<compile_context>
chip_gen: v6e
topology: v6e:2x2x1
jax: 0.10.0
libtpu: 0.0.40
codegen_flags: <defaults>
</compile_context>

<pallas_src>
import numpy as np
import jax
import jax.numpy as jnp
from jax.experimental import pallas as pl
from jax.experimental.pallas import tpu as pltpu

C_MID = 64                 # hidden width of the block
C_OUT_PAD = 128            # last conv Cout padded 3 -> 128 (lane-dense output store)
N_UNIFORM = 16             # number of Conv+ReLU+BN layers
PADL = 8                   # left halo pad (sublanes) -> interior writes are 8-aligned
MXU_DTYPE = jnp.float32    # set to jnp.bfloat16 on v6e/v7x for ~2x MXU rate (looser tolerance)


# ------------------------------- fused kernel ------------------------------- #

def _beps_fused_kernel(x_ref, w_ref, b_ref, s_ref, t_ref, wl_ref, bl_ref,
                       out_ref, buf_ref, slab_ref):
    """Whole BEPS forward for one image.

    x_ref   : (H, W, 64)           input image, channels zero-padded 3 -> 64
    w_ref   : (16, 576, 64)        stacked conv weights, im2col (ky,kx,cin) order
    b_ref   : (16, 1, 64)          conv biases
    s_ref   : (16, 1, 64)          folded BatchNorm scale   (gamma / sqrt(var+eps))
    t_ref   : (16, 1, 64)          folded BatchNorm shift   (beta - mean*scale)
    wl_ref  : (576, 128)           last conv weight, Cout padded 3 -> 128
    bl_ref  : (1, 128)             last conv bias, padded
    out_ref : (H*W, 128)           sigmoid(x + block(x)), channels padded (lane-dense)
    buf_ref : (H+2, PADL+W+1, 64)  VMEM scratch: activation with zero halo, interior at
                                   [1:H+1, PADL:PADL+W] so write-backs are sublane-aligned
    slab_ref: (H*W, 576)           VMEM scratch: im2col slab (MXU operand dtype)
    """
    H, W, C = x_ref.shape
    HW = H * W

    # In-kernel halo padding: zero the buffer once (per image); the halo columns/rows are
    # never written again, so they stay zero while the interior is rewritten every layer.
    buf_ref[...] = jnp.zeros_like(buf_ref)
    buf_ref[1:H + 1, PADL:PADL + W, :] = x_ref[...]

    def build_im2col():
        # Write the 9 shifted taps into the (H*W, 9*C) slab; (ky, kx, cin) ordering
        # matches the reshape of the (3,3,Cin,Cout) weights to (576, Cout).
        for ky in range(3):
            for kx in range(3):
                tap = buf_ref[ky:ky + H, PADL - 1 + kx:PADL - 1 + kx + W, :]
                off = (ky * 3 + kx) * C
                slab_ref[:, off:off + C] = tap.reshape(HW, C).astype(slab_ref.dtype)

    # 16 uniform layers: conv(3x3) + bias -> ReLU -> BatchNorm (folded, inference).
    # TODO(synk): BatchNorm2d training-mode batch statistics are not implemented;
    # running stats are folded into a per-channel affine (inference semantics).
    @pl.loop(0, N_UNIFORM)
    def _(l):
        build_im2col()
        acc = jnp.dot(slab_ref[...], w_ref[l],
                      preferred_element_type=jnp.float32)      # (H*W, 64)
        acc = jnp.maximum(acc + b_ref[l], 0.0)                 # conv bias + ReLU
        acc = acc * s_ref[l] + t_ref[l]                        # BatchNorm (folded)
        buf_ref[1:H + 1, PADL:PADL + W, :] = acc.reshape(H, W, C)   # aligned write-back

    # Final conv(3x3) + bias, residual add, sigmoid (output padded to 128 lanes).
    build_im2col()
    acc = jnp.dot(slab_ref[...], wl_ref[...],
                  preferred_element_type=jnp.float32)          # (H*W, 128)
    acc = acc + bl_ref[...]
    res = x_ref[...].reshape(HW, C)
    res = jnp.concatenate(
        [res, jnp.zeros((HW, C_OUT_PAD - C), jnp.float32)], axis=-1)
    out_ref[...] = jax.nn.sigmoid(res + acc)


# ------------------------------ params & packing ----------------------------- #

def init_params(key):
    """17 convs: 3->64, 15 x (64->64), 64->3; BatchNorm2d(64) after the first 16."""
    chans = [(3, 64)] + [(64, 64)] * 15 + [(64, 3)]
    eps = 1e-5
    params = []
    for i, (cin, cout) in enumerate(chans):
        key, kw, kb, kg, kbe, km, kv = jax.random.split(key, 7)
        bound = 1.0 / float(np.sqrt(9 * cin))
        w = jax.random.uniform(kw, (3, 3, cin, cout), jnp.float32, -bound, bound)
        b = jax.random.uniform(kb, (cout,), jnp.float32, -bound, bound)
        layer = {"w": w, "b": b}
        if i < N_UNIFORM:
            gamma = 1.0 + 0.1 * jax.random.normal(kg, (cout,), jnp.float32)
            beta = 0.1 * jax.random.normal(kbe, (cout,), jnp.float32)
            mean = 0.1 * jax.random.normal(km, (cout,), jnp.float32)
            var = 1.0 + 0.5 * jax.random.uniform(kv, (cout,), jnp.float32)
            scale = gamma / jnp.sqrt(var + eps)
            layer["bn_scale"] = scale
            layer["bn_bias"] = beta - mean * scale
        params.append(layer)
    return params


def pack_params(params):
    """Stack & pad the 17 conv layers into MXU-friendly VMEM-resident tensors."""
    w0 = params[0]["w"]                                           # (3,3,3,64)
    w0 = jnp.pad(w0, ((0, 0), (0, 0), (0, C_MID - w0.shape[2]), (0, 0)))   # Cin 3 -> 64
    ws = [w0] + [p["w"] for p in params[1:N_UNIFORM]]             # 16 x (3,3,64,64)
    w_stack = jnp.stack(ws).reshape(N_UNIFORM, 9 * C_MID, C_MID).astype(MXU_DTYPE)
    b_stack = jnp.stack([p["b"] for p in params[:N_UNIFORM]]).reshape(N_UNIFORM, 1, C_MID)
    s_stack = jnp.stack([p["bn_scale"] for p in params[:N_UNIFORM]]).reshape(N_UNIFORM, 1, C_MID)
    t_stack = jnp.stack([p["bn_bias"] for p in params[:N_UNIFORM]]).reshape(N_UNIFORM, 1, C_MID)

    wl = params[-1]["w"]                                          # (3,3,64,3)
    wl = jnp.pad(wl, ((0, 0), (0, 0), (0, 0), (0, C_OUT_PAD - wl.shape[3])))
    wl = wl.reshape(9 * C_MID, C_OUT_PAD).astype(MXU_DTYPE)
    bl = jnp.pad(params[-1]["b"], (0, C_OUT_PAD - params[-1]["b"].shape[0]))
    bl = bl.reshape(1, C_OUT_PAD)
    return {"w": w_stack, "b": b_stack, "s": s_stack, "t": t_stack, "wl": wl, "bl": bl}


# --------------------------------- forward ---------------------------------- #

@jax.jit
def beps_forward_nchw(x_nchw, packed):
    """sigmoid(x + block(x)); accepts PyTorch NCHW layout."""
    N, Cin, H, W = x_nchw.shape
    x = jnp.transpose(x_nchw, (0, 2, 3, 1)).astype(jnp.float32)   # NCHW -> NHWC
    x = jnp.pad(x, ((0, 0), (0, 0), (0, 0), (0, C_MID - Cin)))    # channels 3 -> 64 (once)

    out = pl.pallas_call(
        _beps_fused_kernel,
        out_shape=jax.ShapeDtypeStruct((N, H * W, C_OUT_PAD), jnp.float32),
        grid=(N,),
        in_specs=[
            pl.BlockSpec((pl.Squeezed(), H, W, C_MID), lambda n: (n, 0, 0, 0)),
            pl.BlockSpec((N_UNIFORM, 9 * C_MID, C_MID), lambda n: (0, 0, 0)),
            pl.BlockSpec((N_UNIFORM, 1, C_MID), lambda n: (0, 0, 0)),
            pl.BlockSpec((N_UNIFORM, 1, C_MID), lambda n: (0, 0, 0)),
            pl.BlockSpec((N_UNIFORM, 1, C_MID), lambda n: (0, 0, 0)),
            pl.BlockSpec((9 * C_MID, C_OUT_PAD), lambda n: (0, 0)),
            pl.BlockSpec((1, C_OUT_PAD), lambda n: (0, 0)),
        ],
        out_specs=pl.BlockSpec((pl.Squeezed(), H * W, C_OUT_PAD), lambda n: (n, 0, 0)),
        scratch_shapes=[
            pltpu.VMEM((H + 2, PADL + W + 1, C_MID), jnp.float32),   # halo activation buffer
            pltpu.VMEM((H * W, 9 * C_MID), MXU_DTYPE),               # im2col slab
        ],
        compiler_params=pltpu.CompilerParams(dimension_semantics=("parallel",)),
    )(x, packed["w"], packed["b"], packed["s"], packed["t"], packed["wl"], packed["bl"])

    out = out.reshape(N, H, W, C_OUT_PAD)[..., :Cin]
    return jnp.transpose(out, (0, 3, 1, 2))                       # NHWC -> NCHW


def beps_reference_nchw(x_nchw, params):
    """Pure-JAX (XLA) reference for validation."""
    x = x_nchw.astype(jnp.float32)
    h = x
    for i, p in enumerate(params):
        w_oihw = jnp.transpose(p["w"], (3, 2, 0, 1))  # HWIO -> OIHW
        h = jax.lax.conv_general_dilated(
            h, w_oihw, window_strides=(1, 1), padding=((1, 1), (1, 1)),
            dimension_numbers=("NCHW", "OIHW", "NCHW"))
        h = h + p["b"][None, :, None, None]
        if i < len(params) - 1:
            h = jnp.maximum(h, 0.0)
            h = h * p["bn_scale"][None, :, None, None] + p["bn_bias"][None, :, None, None]
    return jax.nn.sigmoid(x + h)


if __name__ == "__main__":
    key = jax.random.PRNGKey(0)
    kx, kp = jax.random.split(key)
    x = jax.random.normal(kx, (2, 3, 16, 16), jnp.float32)   # NCHW, like the PyTorch module
    params = init_params(kp)
    packed = pack_params(params)

    out = beps_forward_nchw(x, packed)
    out = jax.block_until_ready(out)
    assert out.shape == (2, 3, 16, 16)

    ref = beps_reference_nchw(x, params)
    np.testing.assert_allclose(np.asarray(out), np.asarray(ref), rtol=2e-4, atol=2e-4)
    print("KERNEL_OK")
</pallas_src>

<mosaic_0001>
module attributes {stable_mosaic.version = 11 : i64} {
  func.func @_beps_fused_kernel(%arg0: i32, %arg1: memref<1x16x16x64xf32, #tpu.memory_space<vmem>>, %arg2: memref<16x576x64xf32, #tpu.memory_space<vmem>>, %arg3: memref<16x1x64xf32, #tpu.memory_space<vmem>>, %arg4: memref<16x1x64xf32, #tpu.memory_space<vmem>>, %arg5: memref<16x1x64xf32, #tpu.memory_space<vmem>>, %arg6: memref<576x128xf32, #tpu.memory_space<vmem>>, %arg7: memref<1x128xf32, #tpu.memory_space<vmem>>, %arg8: memref<1x256x128xf32, #tpu.memory_space<vmem>>, %arg9: memref<18x25x64xf32, #tpu.memory_space<vmem>>, %arg10: memref<256x576xf32, #tpu.memory_space<vmem>>) attributes {dimension_semantics = [#tpu.dimension_semantics<parallel>], iteration_bounds = array<i64: 2>, scalar_prefetch = 0 : i64, scratch_operands = 2 : i64, tpu.core_type = #tpu.core_type<tc>, window_params = [{transform_indices = @transform_0, window_bounds = array<i64: 1, 16, 16, 64>}, {pipeline_mode = #tpu.pipeline_mode<synchronous>, transform_indices = @transform_1, window_bounds = array<i64: 16, 576, 64>}, {pipeline_mode = #tpu.pipeline_mode<synchronous>, transform_indices = @transform_2, window_bounds = array<i64: 16, 1, 64>}, {pipeline_mode = #tpu.pipeline_mode<synchronous>, transform_indices = @transform_3, window_bounds = array<i64: 16, 1, 64>}, {pipeline_mode = #tpu.pipeline_mode<synchronous>, transform_indices = @transform_4, window_bounds = array<i64: 16, 1, 64>}, {pipeline_mode = #tpu.pipeline_mode<synchronous>, transform_indices = @transform_5, window_bounds = array<i64: 576, 128>}, {pipeline_mode = #tpu.pipeline_mode<synchronous>, transform_indices = @transform_6, window_bounds = array<i64: 1, 128>}, {transform_indices = @transform_7, window_bounds = array<i64: 1, 256, 128>}]} {
    %cst = arith.constant 0.000000e+00 : f32
    %0 = vector.broadcast %cst : f32 to vector<18x25x64xf32>
    %c0 = arith.constant 0 : index
    %c0_0 = arith.constant 0 : index
    %c0_1 = arith.constant 0 : index
    %1 = vector.load %arg9[%c0, %c0_0, %c0_1] : memref<18x25x64xf32, #tpu.memory_space<vmem>>, vector<18x25x64xf32>
    tpu.vector_store %arg9[%c0, %c0_0, %c0_1], %0 {strides = array<i32>} : memref<18x25x64xf32, #tpu.memory_space<vmem>>, vector<18x25x64xf32>,
    %c0_2 = arith.constant 0 : index
    %c0_3 = arith.constant 0 : index
    %c0_4 = arith.constant 0 : index
    %c0_5 = arith.constant 0 : index
    %2 = vector.load %arg1[%c0_2, %c0_3, %c0_4, %c0_5] : memref<1x16x16x64xf32, #tpu.memory_space<vmem>>, vector<1x16x16x64xf32>
    %3 = vector.shape_cast %2 : vector<1x16x16x64xf32> to vector<16x16x64xf32>
    %c1 = arith.constant 1 : index
    %c8 = arith.constant 8 : index
    %c0_6 = arith.constant 0 : index
    %4 = vector.load %arg9[%c1, %c8, %c0_6] : memref<18x25x64xf32, #tpu.memory_space<vmem>>, vector<16x16x64xf32>
    tpu.vector_store %arg9[%c1, %c8, %c0_6], %3 {strides = array<i32>} : memref<18x25x64xf32, #tpu.memory_space<vmem>>, vector<16x16x64xf32>,
    %c0_i32 = arith.constant 0 : i32
    %c16_i32 = arith.constant 16 : i32
    %5 = arith.addi %c0_i32, %c16_i32 : i32
    %c1_i32 = arith.constant 1 : i32
    scf.for %arg11 = %c0_i32 to %5 step %c1_i32  : i32 {
      %c1_i32_58 = arith.constant 1 : i32
      %53 = arith.muli %arg11, %c1_i32_58 : i32
      %c0_i32_59 = arith.constant 0 : i32
      %54 = arith.addi %c0_i32_59, %53 : i32
      %c0_60 = arith.constant 0 : index
      %c7_61 = arith.constant 7 : index
      %c0_62 = arith.constant 0 : index
      %55 = vector.load %arg9[%c0_60, %c7_61, %c0_62] : memref<18x25x64xf32, #tpu.memory_space<vmem>>, vector<16x16x64xf32>
      %56 = vector.shape_cast %55 : vector<16x16x64xf32> to vector<256x64xf32>
      %c0_63 = arith.constant 0 : index
      %c0_64 = arith.constant 0 : index
      %57 = vector.load %arg10[%c0_63, %c0_64] : memref<256x576xf32, #tpu.memory_space<vmem>>, vector<256x64xf32>
      tpu.vector_store %arg10[%c0_63, %c0_64], %56 {strides = array<i32>} : memref<256x576xf32, #tpu.memory_space<vmem>>, vector<256x64xf32>,
      %c0_65 = arith.constant 0 : index
      %c8_66 = arith.constant 8 : index
      %c0_67 = arith.constant 0 : index
      %58 = vector.load %arg9[%c0_65, %c8_66, %c0_67] : memref<18x25x64xf32, #tpu.memory_space<vmem>>, vector<16x16x64xf32>
      %59 = vector.shape_cast %58 : vector<16x16x64xf32> to vector<256x64xf32>
      %c0_68 = arith.constant 0 : index
      %c64_69 = arith.constant 64 : index
      %60 = vector.load %arg10[%c0_68, %c64_69] : memref<256x576xf32, #tpu.memory_space<vmem>>, vector<256x64xf32>
      tpu.vector_store %arg10[%c0_68, %c64_69], %59 {strides = array<i32>} : memref<256x576xf32, #tpu.memory_space<vmem>>, vector<256x64xf32>,
      %c0_70 = arith.constant 0 : index
      %c9_71 = arith.constant 9 : index
      %c0_72 = arith.constant 0 : index
      %61 = vector.load %arg9[%c0_70, %c9_71, %c0_72] : memref<18x25x64xf32, #tpu.memory_space<vmem>>, vector<16x16x64xf32>
      %62 = vector.shape_cast %61 : vector<16x16x64xf32> to vector<256x64xf32>
      %c0_73 = arith.constant 0 : index
      %c128_74 = arith.constant 128 : index
      %63 = vector.load %arg10[%c0_73, %c128_74] : memref<256x576xf32, #tpu.memory_space<vmem>>, vector<256x64xf32>
      tpu.vector_store %arg10[%c0_73, %c128_74], %62 {strides = array<i32>} : memref<256x576xf32, #tpu.memory_space<vmem>>, vector<256x64xf32>,
      %c1_75 = arith.constant 1 : index
      %c7_76 = arith.constant 7 : index
      %c0_77 = arith.constant 0 : index
      %64 = vector.load %arg9[%c1_75, %c7_76, %c0_77] : memref<18x25x64xf32, #tpu.memory_space<vmem>>, vector<16x16x64xf32>
      %65 = vector.shape_cast %64 : vector<16x16x64xf32> to vector<256x64xf32>
      %c0_78 = arith.constant 0 : index
      %c192_79 = arith.constant 192 : index
      %66 = vector.load %arg10[%c0_78, %c192_79] : memref<256x576xf32, #tpu.memory_space<vmem>>, vector<256x64xf32>
      tpu.vector_store %arg10[%c0_78, %c192_79], %65 {strides = array<i32>} : memref<256x576xf32, #tpu.memory_space<vmem>>, vector<256x64xf32>,
      %c1_80 = arith.constant 1 : index
      %c8_81 = arith.constant 8 : index
      %c0_82 = arith.constant 0 : index
      %67 = vector.load %arg9[%c1_80, %c8_81, %c0_82] : memref<18x25x64xf32, #tpu.memory_space<vmem>>, vector<16x16x64xf32>
      %68 = vector.shape_cast %67 : vector<16x16x64xf32> to vector<256x64xf32>
      %c0_83 = arith.constant 0 : index
      %c256_84 = arith.constant 256 : index
      %69 = vector.load %arg10[%c0_83, %c256_84] : memref<256x576xf32, #tpu.memory_space<vmem>>, vector<256x64xf32>
      tpu.vector_store %arg10[%c0_83, %c256_84], %68 {strides = array<i32>} : memref<256x576xf32, #tpu.memory_space<vmem>>, vector<256x64xf32>,
      %c1_85 = arith.constant 1 : index
      %c9_86 = arith.constant 9 : index
      %c0_87 = arith.constant 0 : index
      %70 = vector.load %arg9[%c1_85, %c9_86, %c0_87] : memref<18x25x64xf32, #tpu.memory_space<vmem>>, vector<16x16x64xf32>
      %71 = vector.shape_cast %70 : vector<16x16x64xf32> to vector<256x64xf32>
      %c0_88 = arith.constant 0 : index
      %c320_89 = arith.constant 320 : index
      %72 = vector.load %arg10[%c0_88, %c320_89] : memref<256x576xf32, #tpu.memory_space<vmem>>, vector<256x64xf32>
      tpu.vector_store %arg10[%c0_88, %c320_89], %71 {strides = array<i32>} : memref<256x576xf32, #tpu.memory_space<vmem>>, vector<256x64xf32>,
      %c2_90 = arith.constant 2 : index
      %c7_91 = arith.constant 7 : index
      %c0_92 = arith.constant 0 : index
      %73 = vector.load %arg9[%c2_90, %c7_91, %c0_92] : memref<18x25x64xf32, #tpu.memory_space<vmem>>, vector<16x16x64xf32>
      %74 = vector.shape_cast %73 : vector<16x16x64xf32> to vector<256x64xf32>
      %c0_93 = arith.constant 0 : index
      %c384_94 = arith.constant 384 : index
      %75 = vector.load %arg10[%c0_93, %c384_94] : memref<256x576xf32, #tpu.memory_space<vmem>>, vector<256x64xf32>
      tpu.vector_store %arg10[%c0_93, %c384_94], %74 {strides = array<i32>} : memref<256x576xf32, #tpu.memory_space<vmem>>, vector<256x64xf32>,
      %c2_95 = arith.constant 2 : index
      %c8_96 = arith.constant 8 : index
      %c0_97 = arith.constant 0 : index
      %76 = vector.load %arg9[%c2_95, %c8_96, %c0_97] : memref<18x25x64xf32, #tpu.memory_space<vmem>>, vector<16x16x64xf32>
      %77 = vector.shape_cast %76 : vector<16x16x64xf32> to vector<256x64xf32>
      %c0_98 = arith.constant 0 : index
      %c448_99 = arith.constant 448 : index
      %78 = vector.load %arg10[%c0_98, %c448_99] : memref<256x576xf32, #tpu.memory_space<vmem>>, vector<256x64xf32>
      tpu.vector_store %arg10[%c0_98, %c448_99], %77 {strides = array<i32>} : memref<256x576xf32, #tpu.memory_space<vmem>>, vector<256x64xf32>,
      %c2_100 = arith.constant 2 : index
      %c9_101 = arith.constant 9 : index
      %c0_102 = arith.constant 0 : index
      %79 = vector.load %arg9[%c2_100, %c9_101, %c0_102] : memref<18x25x64xf32, #tpu.memory_space<vmem>>, vector<16x16x64xf32>
      %80 = vector.shape_cast %79 : vector<16x16x64xf32> to vector<256x64xf32>
      %c0_103 = arith.constant 0 : index
      %c512_104 = arith.constant 512 : index
      %81 = vector.load %arg10[%c0_103, %c512_104] : memref<256x576xf32, #tpu.memory_space<vmem>>, vector<256x64xf32>
      tpu.vector_store %arg10[%c0_103, %c512_104], %80 {strides = array<i32>} : memref<256x576xf32, #tpu.memory_space<vmem>>, vector<256x64xf32>,
      %c0_105 = arith.constant 0 : index
      %c0_106 = arith.constant 0 : index
      %82 = vector.load %arg10[%c0_105, %c0_106] : memref<256x576xf32, #tpu.memory_space<vmem>>, vector<256x576xf32>
      %83 = arith.index_cast %54 : i32 to index
      %c0_107 = arith.constant 0 : index
      %c0_108 = arith.constant 0 : index
      %84 = vector.load %arg2[%83, %c0_107, %c0_108] : memref<16x576x64xf32, #tpu.memory_space<vmem>>, vector<1x576x64xf32>
      %85 = vector.shape_cast %84 : vector<1x576x64xf32> to vector<576x64xf32>
      %cst_109 = arith.constant dense<0.000000e+00> : vector<256x64xf32>
      %86 = tpu.matmul %82, %85, %cst_109 {dimension_numbers = #tpu.dot_dimension_numbers<[1], [0], [0], [1], [0, 0, 1, 1], [], []>} : vector<256x576xf32>, vector<576x64xf32>, vector<256x64xf32> -> vector<256x64xf32>
      %87 = arith.index_cast %54 : i32 to index
      %c0_110 = arith.constant 0 : index
      %c0_111 = arith.constant 0 : index
      %88 = vector.load %arg3[%87, %c0_110, %c0_111] : memref<16x1x64xf32, #tpu.memory_space<vmem>>, vector<1x1x64xf32>
      %89 = vector.shape_cast %88 : vector<1x1x64xf32> to vector<1x64xf32>
      %90 = vector.broadcast %89 : vector<1x64xf32> to vector<256x64xf32>
      %91 = arith.addf %86, %90 : vector<256x64xf32>
      %cst_112 = arith.constant 0.000000e+00 : f32
      %92 = vector.broadcast %cst_112 : f32 to vector<256x64xf32>
      %93 = arith.maximumf %91, %92 : vector<256x64xf32>
      %94 = arith.index_cast %54 : i32 to index
      %c0_113 = arith.constant 0 : index
      %c0_114 = arith.constant 0 : index
      %95 = vector.load %arg4[%94, %c0_113, %c0_114] : memref<16x1x64xf32, #tpu.memory_space<vmem>>, vector<1x1x64xf32>
      %96 = vector.shape_cast %95 : vector<1x1x64xf32> to vector<1x64xf32>
      %97 = vector.broadcast %96 : vector<1x64xf32> to vector<256x64xf32>
      %98 = arith.mulf %93, %97 : vector<256x64xf32>
      %99 = arith.index_cast %54 : i32 to index
      %c0_115 = arith.constant 0 : index
      %c0_116 = arith.constant 0 : index
      %100 = vector.load %arg5[%99, %c0_115, %c0_116] : memref<16x1x64xf32, #tpu.memory_space<vmem>>, vector<1x1x64xf32>
      %101 = vector.shape_cast %100 : vector<1x1x64xf32> to vector<1x64xf32>
      %102 = vector.broadcast %101 : vector<1x64xf32> to vector<256x64xf32>
      %103 = arith.addf %98, %102 : vector<256x64xf32>
      %104 = vector.shape_cast %103 : vector<256x64xf32> to vector<16x16x64xf32>
      %c1_117 = arith.constant 1 : index
      %c8_118 = arith.constant 8 : index
      %c0_119 = arith.constant 0 : index
      %105 = vector.load %arg9[%c1_117, %c8_118, %c0_119] : memref<18x25x64xf32, #tpu.memory_space<vmem>>, vector<16x16x64xf32>
      tpu.vector_store %arg9[%c1_117, %c8_118, %c0_119], %104 {strides = array<i32>} : memref<18x25x64xf32, #tpu.memory_space<vmem>>, vector<16x16x64xf32>,
    }
    %c16_i32_7 = arith.constant 16 : i32
    %c0_8 = arith.constant 0 : index
    %c7 = arith.constant 7 : index
    %c0_9 = arith.constant 0 : index
    %6 = vector.load %arg9[%c0_8, %c7, %c0_9] : memref<18x25x64xf32, #tpu.memory_space<vmem>>, vector<16x16x64xf32>
    %7 = vector.shape_cast %6 : vector<16x16x64xf32> to vector<256x64xf32>
    %c0_10 = arith.constant 0 : index
    %c0_11 = arith.constant 0 : index
    %8 = vector.load %arg10[%c0_10, %c0_11] : memref<256x576xf32, #tpu.memory_space<vmem>>, vector<256x64xf32>
    tpu.vector_store %arg10[%c0_10, %c0_11], %7 {strides = array<i32>} : memref<256x576xf32, #tpu.memory_space<vmem>>, vector<256x64xf32>,
    %c0_12 = arith.constant 0 : index
    %c8_13 = arith.constant 8 : index
    %c0_14 = arith.constant 0 : index
    %9 = vector.load %arg9[%c0_12, %c8_13, %c0_14] : memref<18x25x64xf32, #tpu.memory_space<vmem>>, vector<16x16x64xf32>
    %10 = vector.shape_cast %9 : vector<16x16x64xf32> to vector<256x64xf32>
    %c0_15 = arith.constant 0 : index
    %c64 = arith.constant 64 : index
    %11 = vector.load %arg10[%c0_15, %c64] : memref<256x576xf32, #tpu.memory_space<vmem>>, vector<256x64xf32>
    tpu.vector_store %arg10[%c0_15, %c64], %10 {strides = array<i32>} : memref<256x576xf32, #tpu.memory_space<vmem>>, vector<256x64xf32>,
    %c0_16 = arith.constant 0 : index
    %c9 = arith.constant 9 : index
    %c0_17 = arith.constant 0 : index
    %12 = vector.load %arg9[%c0_16, %c9, %c0_17] : memref<18x25x64xf32, #tpu.memory_space<vmem>>, vector<16x16x64xf32>
    %13 = vector.shape_cast %12 : vector<16x16x64xf32> to vector<256x64xf32>
    %c0_18 = arith.constant 0 : index
    %c128 = arith.constant 128 : index
    %14 = vector.load %arg10[%c0_18, %c128] : memref<256x576xf32, #tpu.memory_space<vmem>>, vector<256x64xf32>
    tpu.vector_store %arg10[%c0_18, %c128], %13 {strides = array<i32>} : memref<256x576xf32, #tpu.memory_space<vmem>>, vector<256x64xf32>,
    %c1_19 = arith.constant 1 : index
    %c7_20 = arith.constant 7 : index
    %c0_21 = arith.constant 0 : index
    %15 = vector.load %arg9[%c1_19, %c7_20, %c0_21] : memref<18x25x64xf32, #tpu.memory_space<vmem>>, vector<16x16x64xf32>
    %16 = vector.shape_cast %15 : vector<16x16x64xf32> to vector<256x64xf32>
    %c0_22 = arith.constant 0 : index
    %c192 = arith.constant 192 : index
    %17 = vector.load %arg10[%c0_22, %c192] : memref<256x576xf32, #tpu.memory_space<vmem>>, vector<256x64xf32>
    tpu.vector_store %arg10[%c0_22, %c192], %16 {strides = array<i32>} : memref<256x576xf32, #tpu.memory_space<vmem>>, vector<256x64xf32>,
    %c1_23 = arith.constant 1 : index
    %c8_24 = arith.constant 8 : index
    %c0_25 = arith.constant 0 : index
    %18 = vector.load %arg9[%c1_23, %c8_24, %c0_25] : memref<18x25x64xf32, #tpu.memory_space<vmem>>, vector<16x16x64xf32>
    %19 = vector.shape_cast %18 : vector<16x16x64xf32> to vector<256x64xf32>
    %c0_26 = arith.constant 0 : index
    %c256 = arith.constant 256 : index
    %20 = vector.load %arg10[%c0_26, %c256] : memref<256x576xf32, #tpu.memory_space<vmem>>, vector<256x64xf32>
    tpu.vector_store %arg10[%c0_26, %c256], %19 {strides = array<i32>} : memref<256x576xf32, #tpu.memory_space<vmem>>, vector<256x64xf32>,
    %c1_27 = arith.constant 1 : index
    %c9_28 = arith.constant 9 : index
    %c0_29 = arith.constant 0 : index
    %21 = vector.load %arg9[%c1_27, %c9_28, %c0_29] : memref<18x25x64xf32, #tpu.memory_space<vmem>>, vector<16x16x64xf32>
    %22 = vector.shape_cast %21 : vector<16x16x64xf32> to vector<256x64xf32>
    %c0_30 = arith.constant 0 : index
    %c320 = arith.constant 320 : index
    %23 = vector.load %arg10[%c0_30, %c320] : memref<256x576xf32, #tpu.memory_space<vmem>>, vector<256x64xf32>
    tpu.vector_store %arg10[%c0_30, %c320], %22 {strides = array<i32>} : memref<256x576xf32, #tpu.memory_space<vmem>>, vector<256x64xf32>,
    %c2 = arith.constant 2 : index
    %c7_31 = arith.constant 7 : index
    %c0_32 = arith.constant 0 : index
    %24 = vector.load %arg9[%c2, %c7_31, %c0_32] : memref<18x25x64xf32, #tpu.memory_space<vmem>>, vector<16x16x64xf32>
    %25 = vector.shape_cast %24 : vector<16x16x64xf32> to vector<256x64xf32>
    %c0_33 = arith.constant 0 : index
    %c384 = arith.constant 384 : index
    %26 = vector.load %arg10[%c0_33, %c384] : memref<256x576xf32, #tpu.memory_space<vmem>>, vector<256x64xf32>
    tpu.vector_store %arg10[%c0_33, %c384], %25 {strides = array<i32>} : memref<256x576xf32, #tpu.memory_space<vmem>>, vector<256x64xf32>,
    %c2_34 = arith.constant 2 : index
    %c8_35 = arith.constant 8 : index
    %c0_36 = arith.constant 0 : index
    %27 = vector.load %arg9[%c2_34, %c8_35, %c0_36] : memref<18x25x64xf32, #tpu.memory_space<vmem>>, vector<16x16x64xf32>
    %28 = vector.shape_cast %27 : vector<16x16x64xf32> to vector<256x64xf32>
    %c0_37 = arith.constant 0 : index
    %c448 = arith.constant 448 : index
    %29 = vector.load %arg10[%c0_37, %c448] : memref<256x576xf32, #tpu.memory_space<vmem>>, vector<256x64xf32>
    tpu.vector_store %arg10[%c0_37, %c448], %28 {strides = array<i32>} : memref<256x576xf32, #tpu.memory_space<vmem>>, vector<256x64xf32>,
    %c2_38 = arith.constant 2 : index
    %c9_39 = arith.constant 9 : index
    %c0_40 = arith.constant 0 : index
    %30 = vector.load %arg9[%c2_38, %c9_39, %c0_40] : memref<18x25x64xf32, #tpu.memory_space<vmem>>, vector<16x16x64xf32>
    %31 = vector.shape_cast %30 : vector<16x16x64xf32> to vector<256x64xf32>
    %c0_41 = arith.constant 0 : index
    %c512 = arith.constant 512 : index
    %32 = vector.load %arg10[%c0_41, %c512] : memref<256x576xf32, #tpu.memory_space<vmem>>, vector<256x64xf32>
    tpu.vector_store %arg10[%c0_41, %c512], %31 {strides = array<i32>} : memref<256x576xf32, #tpu.memory_space<vmem>>, vector<256x64xf32>,
    %c0_42 = arith.constant 0 : index
    %c0_43 = arith.constant 0 : index
    %33 = vector.load %arg10[%c0_42, %c0_43] : memref<256x576xf32, #tpu.memory_space<vmem>>, vector<256x576xf32>
    %c0_44 = arith.constant 0 : index
    %c0_45 = arith.constant 0 : index
    %34 = vector.load %arg6[%c0_44, %c0_45] : memref<576x128xf32, #tpu.memory_space<vmem>>, vector<576x128xf32>
    %cst_46 = arith.constant dense<0.000000e+00> : vector<256x128xf32>
    %35 = tpu.matmul %33, %34, %cst_46 {dimension_numbers = #tpu.dot_dimension_numbers<[1], [0], [0], [1], [0, 0, 1, 1], [], []>} : vector<256x576xf32>, vector<576x128xf32>, vector<256x128xf32> -> vector<256x128xf32>
    %c0_47 = arith.constant 0 : index
    %c0_48 = arith.constant 0 : index
    %36 = vector.load %arg7[%c0_47, %c0_48] : memref<1x128xf32, #tpu.memory_space<vmem>>, vector<1x128xf32>
    %37 = vector.broadcast %36 : vector<1x128xf32> to vector<256x128xf32>
    %38 = arith.addf %35, %37 : vector<256x128xf32>
    %c0_49 = arith.constant 0 : index
    %c0_50 = arith.constant 0 : index
    %c0_51 = arith.constant 0 : index
    %c0_52 = arith.constant 0 : index
    %39 = vector.load %arg1[%c0_49, %c0_50, %c0_51, %c0_52] : memref<1x16x16x64xf32, #tpu.memory_space<vmem>>, vector<1x16x16x64xf32>
    %40 = vector.shape_cast %39 : vector<1x16x16x64xf32> to vector<16x16x64xf32>
    %41 = vector.shape_cast %40 : vector<16x16x64xf32> to vector<256x64xf32>
    %cst_53 = arith.constant 0.000000e+00 : f32
    %42 = vector.broadcast %cst_53 : f32 to vector<256x64xf32>
    %43 = tpu.concatenate %41, %42 in 1 : vector<256x64xf32>, vector<256x64xf32> -> vector<256x128xf32>
    %44 = arith.addf %43, %38 : vector<256x128xf32>
    %45 = arith.negf %44 : vector<256x128xf32>
    %46 = math.exp %45 : vector<256x128xf32>
    %cst_54 = arith.constant 1.000000e+00 : f32
    %47 = vector.broadcast %cst_54 : f32 to vector<256x128xf32>
    %48 = arith.addf %47, %46 : vector<256x128xf32>
    %49 = arith.divf %47, %48 : vector<256x128xf32>
    %c0_55 = arith.constant 0 : index
    %c0_56 = arith.constant 0 : index
    %c0_57 = arith.constant 0 : index
    %50 = vector.load %arg8[%c0_55, %c0_56, %c0_57] : memref<1x256x128xf32, #tpu.memory_space<vmem>>, vector<1x256x128xf32>
    %51 = vector.shape_cast %50 : vector<1x256x128xf32> to vector<256x128xf32>
    %52 = vector.shape_cast %49 : vector<256x128xf32> to vector<1x256x128xf32>
    tpu.vector_store %arg8[%c0_55, %c0_56, %c0_57], %52 {strides = array<i32>} : memref<1x256x128xf32, #tpu.memory_space<vmem>>, vector<1x256x128xf32>,
    return
  }
  func.func @transform_0(%arg0: i32) -> (i32, i32, i32, i32) {
    %c0_i32 = arith.constant 0 : i32
    %c0_i32_0 = arith.constant 0 : i32
    %c0_i32_1 = arith.constant 0 : i32
    %c0_i32_2 = arith.constant 0 : i32
    return %arg0, %c0_i32, %c0_i32_0, %c0_i32_1 : i32, i32, i32, i32
  }
  func.func @transform_1(%arg0: i32) -> (i32, i32, i32) {
    %c0_i32 = arith.constant 0 : i32
    %c0_i32_0 = arith.constant 0 : i32
    %c0_i32_1 = arith.constant 0 : i32
    %c0_i32_2 = arith.constant 0 : i32
    return %c0_i32, %c0_i32_0, %c0_i32_1 : i32, i32, i32
  }
  func.func @transform_2(%arg0: i32) -> (i32, i32, i32) {
    %c0_i32 = arith.constant 0 : i32
    %c0_i32_0 = arith.constant 0 : i32
    %c0_i32_1 = arith.constant 0 : i32
    %c0_i32_2 = arith.constant 0 : i32
    return %c0_i32, %c0_i32_0, %c0_i32_1 : i32, i32, i32
  }
  func.func @transform_3(%arg0: i32) -> (i32, i32, i32) {
    %c0_i32 = arith.constant 0 : i32
    %c0_i32_0 = arith.constant 0 : i32
    %c0_i32_1 = arith.constant 0 : i32
    %c0_i32_2 = arith.constant 0 : i32
    return %c0_i32, %c0_i32_0, %c0_i32_1 : i32, i32, i32
  }
  func.func @transform_4(%arg0: i32) -> (i32, i32, i32) {
    %c0_i32 = arith.constant 0 : i32
    %c0_i32_0 = arith.constant 0 : i32
    %c0_i32_1 = arith.constant 0 : i32
    %c0_i32_2 = arith.constant 0 : i32
    return %c0_i32, %c0_i32_0, %c0_i32_1 : i32, i32, i32
  }
  func.func @transform_5(%arg0: i32) -> (i32, i32) {
    %c0_i32 = arith.constant 0 : i32
    %c0_i32_0 = arith.constant 0 : i32
    %c0_i32_1 = arith.constant 0 : i32
    return %c0_i32, %c0_i32_0 : i32, i32
  }
  func.func @transform_6(%arg0: i32) -> (i32, i32) {
    %c0_i32 = arith.constant 0 : i32
    %c0_i32_0 = arith.constant 0 : i32
    %c0_i32_1 = arith.constant 0 : i32
    return %c0_i32, %c0_i32_0 : i32, i32
  }
  func.func @transform_7(%arg0: i32) -> (i32, i32, i32) {
    %c0_i32 = arith.constant 0 : i32
    %c0_i32_0 = arith.constant 0 : i32
    %c0_i32_1 = arith.constant 0 : i32
    return %arg0, %c0_i32, %c0_i32_0 : i32, i32, i32
  }
}

</mosaic_0001>

<bundles_post_ra>
// kernel: beps_forward_nchw.1
= control target key start
LH: loop header
LB: loop body
LE: loop exit
PB: predicated region body
PF: predicated region fallthrough
CT: control target
= control target key end

     0   :  { %s5718_s24 = smov 0   ;;  %s8536_s0 = inlined_call_operand.vmem [shape: f32[2,16,16,64], index: 0, kind: input, shape index: {}]   ;;  %s8537_s1 = inlined_call_operand.vmem [shape: f32[16,576,64], index: 1, kind: input, shape index: {}]   ;;  %s8538_s2 = inlined_call_operand.vmem [shape: f32[16,1,64], index: 2, kind: input, shape index: {}]   ;;  %s8539_s3 = inlined_call_operand.vmem [shape: f32[16,1,64], index: 3, kind: input, shape index: {}]   ;;  %s8540_s4 = inlined_call_operand.vmem [shape: f32[16,1,64], index: 4, kind: input, shape index: {}]   ;;  %s8541_s5 = inlined_call_operand.vmem [shape: f32[576,128], index: 5, kind: input, shape index: {}]   ;;  %s8542_s6 = inlined_call_operand.vmem [shape: f32[1,128], index: 6, kind: input, shape index: {}]   ;;  %s8543_s7 = inlined_call_operand.vmem [shape: f32[2,256,128], index: 7, kind: output, shape index: {}]  }
   0x1 LB: > { %s5156_s25 = sadd.s32 4294967295, %s5668_s24   ;;  %p5160_p0 = scmp.ge.s32.totalorder %s5668_s24, 1  ;;  %s5668_s24 = sphi %s5718_s24, %s17_s24  }
   0x2   : > { %p237_p1 = scmp.lt.s32.totalorder %s5668_s24, 3 }
   0x4   : > { %p238_p2 = pnand %p5160_p0, %p237_p1 }
   0x6   : > { %241 = sbr.rel (%p238_p2) target bundleno = 1334 (0x536), region = 48 }
   0xb   : > { %vm279_vm0 = vcmask 523264   ;;  %vm283_vm1 = vcmask 516096   ;;  %p5728_p3 = scmp.lt.s32.totalorder %s5156_s25, 1  ;;  %v5674_v0 = vmov 0.0   ;;  %s5954_s11 = smov 0  }
   0xc   : > { %286 = vst.msk [vmem:[#allocation2 + $0x28] sm:$0xff] %vm279_vm0, %v5674_v0  ;;  %280 = vst.msk [vmem:[#allocation2] sm:$0xff] %vm279_vm0, %v5674_v0 }
   0xd   : > { %281 = vst.msk [vmem:[#allocation2 + $0x8] sm:$0xff] %vm279_vm0, %v5674_v0  ;;  %282 = vst.msk [vmem:[#allocation2 + $0x10] sm:$0xff] %vm279_vm0, %v5674_v0  ;;  %s8548_s25 = smov (!%p5728_p3, %s5156_s25), 1 }
   0xe   : > { %285 = vst.msk [vmem:[#allocation2 + $0x20] sm:$0xff] %vm279_vm0, %v5674_v0  ;;  %287 = vst.msk [vmem:[#allocation2 + $0x30] sm:$0xff] %vm279_vm0, %v5674_v0  ;;  %s5267_s27 = sshll.u32 %s8548_s25, 8 }
   0xf   : > { %289 = vst.msk [vmem:[#allocation2 + $0x40] sm:$0xff] %vm279_vm0, %v5674_v0  ;;  %290 = vst.msk [vmem:[#allocation2 + $0x48] sm:$0xff] %vm279_vm0, %v5674_v0  ;;  %s5883_s30 = scalar_lea.vmem %s8536_s0, %s5267_s27  ;;  %s5888_s10 = scalar_lea.vmem %s8543_s7, %s5267_s27 }
  0x10   : > { %291 = vst.msk [vmem:[#allocation2 + $0x50] sm:$0xff] %vm279_vm0, %v5674_v0  ;;  %293 = vst.msk [vmem:[#allocation2 + $0x60] sm:$0xff] %vm279_vm0, %v5674_v0  ;;  %v353_v1 = vld [vmem:[%s5883_s30] sm:$0xff]  ;;  %v354_v2 = vld [vmem:[%s5883_s30 + $0x8] sm:$0xff] }
  0x11   : > { %294 = vst.msk [vmem:[#allocation2 + $0x68] sm:$0xff] %vm279_vm0, %v5674_v0  ;;  %295 = vst.msk [vmem:[#allocation2 + $0x70] sm:$0xff] %vm279_vm0, %v5674_v0  ;;  %v355_v3 = vld [vmem:[%s5883_s30 + $0x10] sm:$0xff]  ;;  %v356_v4 = vld [vmem:[%s5883_s30 + $0x18] sm:$0xff] }
  0x12   : > { %297 = vst.msk [vmem:[#allocation2 + $0x80] sm:$0xff] %vm279_vm0, %v5674_v0  ;;  %298 = vst.msk [vmem:[#allocation2 + $0x88] sm:$0xff] %vm279_vm0, %v5674_v0  ;;  %v357_v5 = vld [vmem:[%s5883_s30 + $0x20] sm:$0xff]  ;;  %v358_v6 = vld [vmem:[%s5883_s30 + $0x28] sm:$0xff] }
  0x13   : > { %299 = vst.msk [vmem:[#allocation2 + $0x90] sm:$0xff] %vm279_vm0, %v5674_v0  ;;  %301 = vst.msk [vmem:[#allocation2 + $0xa0] sm:$0xff] %vm279_vm0, %v5674_v0  ;;  %v359_v7 = vld [vmem:[%s5883_s30 + $0x30] sm:$0xff]  ;;  %v360_v8 = vld [vmem:[%s5883_s30 + $0x38] sm:$0xff] }
  0x14   : > { %302 = vst.msk [vmem:[#allocation2 + $0xa8] sm:$0xff] %vm279_vm0, %v5674_v0  ;;  %303 = vst.msk [vmem:[#allocation2 + $0xb0] sm:$0xff] %vm279_vm0, %v5674_v0  ;;  %v361_v9 = vld [vmem:[%s5883_s30 + $0x40] sm:$0xff]  ;;  %v362_v10 = vld [vmem:[%s5883_s30 + $0x48] sm:$0xff] }
  0x15   : > { %305 = vst.msk [vmem:[#allocation2 + $0xc0] sm:$0xff] %vm279_vm0, %v5674_v0  ;;  %306 = vst.msk [vmem:[#allocation2 + $0xc8] sm:$0xff] %vm279_vm0, %v5674_v0  ;;  %v363_v11 = vld [vmem:[%s5883_s30 + $0x50] sm:$0xff]  ;;  %v364_v12 = vld [vmem:[%s5883_s30 + $0x58] sm:$0xff] }
  0x16   : > { %307 = vst.msk [vmem:[#allocation2 + $0xd0] sm:$0xff] %vm279_vm0, %v5674_v0  ;;  %309 = vst.msk [vmem:[#allocation2 + $0xe0] sm:$0xff] %vm279_vm0, %v5674_v0  ;;  %v365_v13 = vld [vmem:[%s5883_s30 + $0x60] sm:$0xff]  ;;  %v366_v14 = vld [vmem:[%s5883_s30 + $0x68] sm:$0xff] }
  0x17   : > { %310 = vst.msk [vmem:[#allocation2 + $0xe8] sm:$0xff] %vm279_vm0, %v5674_v0  ;;  %311 = vst.msk [vmem:[#allocation2 + $0xf0] sm:$0xff] %vm279_vm0, %v5674_v0  ;;  %v367_v15 = vld [vmem:[%s5883_s30 + $0x70] sm:$0xff]  ;;  %v368_v16 = vld [vmem:[%s5883_s30 + $0x78] sm:$0xff] }
  0x18   : > { %313 = vst.msk [vmem:[#allocation2 + $0x100] sm:$0xff] %vm279_vm0, %v5674_v0  ;;  %314 = vst.msk [vmem:[#allocation2 + $0x108] sm:$0xff] %vm279_vm0, %v5674_v0  ;;  %v369_v17 = vld [vmem:[%s5883_s30 + $0x80] sm:$0xff]  ;;  %v370_v18 = vld [vmem:[%s5883_s30 + $0x88] sm:$0xff] }
  0x19   : > { %315 = vst.msk [vmem:[#allocation2 + $0x110] sm:$0xff] %vm279_vm0, %v5674_v0  ;;  %317 = vst.msk [vmem:[#allocation2 + $0x120] sm:$0xff] %vm279_vm0, %v5674_v0  ;;  %v371_v19 = vld [vmem:[%s5883_s30 + $0x90] sm:$0xff]  ;;  %v372_v20 = vld [vmem:[%s5883_s30 + $0x98] sm:$0xff] }
  0x1a   : > { %318 = vst.msk [vmem:[#allocation2 + $0x128] sm:$0xff] %vm279_vm0, %v5674_v0  ;;  %319 = vst.msk [vmem:[#allocation2 + $0x130] sm:$0xff] %vm279_vm0, %v5674_v0  ;;  %v373_v21 = vld [vmem:[%s5883_s30 + $0xa0] sm:$0xff]  ;;  %v374_v22 = vld [vmem:[%s5883_s30 + $0xa8] sm:$0xff] }
  0x1b   : > { %321 = vst.msk [vmem:[#allocation2 + $0x140] sm:$0xff] %vm279_vm0, %v5674_v0  ;;  %322 = vst.msk [vmem:[#allocation2 + $0x148] sm:$0xff] %vm279_vm0, %v5674_v0  ;;  %v375_v23 = vld [vmem:[%s5883_s30 + $0xb0] sm:$0xff]  ;;  %v376_v24 = vld [vmem:[%s5883_s30 + $0xb8] sm:$0xff] }
  0x1c   : > { %323 = vst.msk [vmem:[#allocation2 + $0x150] sm:$0xff] %vm279_vm0, %v5674_v0  ;;  %325 = vst.msk [vmem:[#allocation2 + $0x160] sm:$0xff] %vm279_vm0, %v5674_v0  ;;  %v377_v25 = vld [vmem:[%s5883_s30 + $0xc0] sm:$0xff]  ;;  %v378_v26 = vld [vmem:[%s5883_s30 + $0xc8] sm:$0xff] }
  0x1d   : > { %326 = vst.msk [vmem:[#allocation2 + $0x168] sm:$0xff] %vm279_vm0, %v5674_v0  ;;  %327 = vst.msk [vmem:[#allocation2 + $0x170] sm:$0xff] %vm279_vm0, %v5674_v0  ;;  %v379_v27 = vld [vmem:[%s5883_s30 + $0xd0] sm:$0xff]  ;;  %v380_v28 = vld [vmem:[%s5883_s30 + $0xd8] sm:$0xff] }
  0x1e   : > { %329 = vst.msk [vmem:[#allocation2 + $0x180] sm:$0xff] %vm279_vm0, %v5674_v0  ;;  %330 = vst.msk [vmem:[#allocation2 + $0x188] sm:$0xff] %vm279_vm0, %v5674_v0  ;;  %v381_v29 = vld [vmem:[%s5883_s30 + $0xe0] sm:$0xff]  ;;  %v382_v30 = vld [vmem:[%s5883_s30 + $0xe8] sm:$0xff] }
  0x1f   : > { %331 = vst.msk [vmem:[#allocation2 + $0x190] sm:$0xff] %vm279_vm0, %v5674_v0  ;;  %333 = vst.msk [vmem:[#allocation2 + $0x1a0] sm:$0xff] %vm279_vm0, %v5674_v0  ;;  %v383_v31 = vld [vmem:[%s5883_s30 + $0xf0] sm:$0xff]  ;;  %v384_v32 = vld [vmem:[%s5883_s30 + $0xf8] sm:$0xff] }
  0x20   : > { %334 = vst.msk [vmem:[#allocation2 + $0x1a8] sm:$0xff] %vm279_vm0, %v5674_v0  ;;  %335 = vst.msk [vmem:[#allocation2 + $0x1b0] sm:$0xff] %vm279_vm0, %v5674_v0 }
  0x21   : > { %337 = vst.msk [vmem:[#allocation2 + $0x1c0] sm:$0xff] %vm279_vm0, %v5674_v0  ;;  %338 = vst.msk [vmem:[#allocation2 + $0x1c8] sm:$0xff] %vm279_vm0, %v5674_v0 }
  0x22   : > { %339 = vst.msk [vmem:[#allocation2 + $0x1d0] sm:$0xff] %vm279_vm0, %v5674_v0  ;;  %341 = vst.msk [vmem:[#allocation2 + $0x1e0] sm:$0xff] %vm279_vm0, %v5674_v0 }
  0x23   : > { %342 = vst.msk [vmem:[#allocation2 + $0x1e8] sm:$0xff] %vm279_vm0, %v5674_v0  ;;  %343 = vst.msk [vmem:[#allocation2 + $0x1f0] sm:$0xff] %vm279_vm0, %v5674_v0 }
  0x24   : > { %345 = vst.msk [vmem:[#allocation2 + $0x200] sm:$0xff] %vm279_vm0, %v5674_v0  ;;  %346 = vst.msk [vmem:[#allocation2 + $0x208] sm:$0xff] %vm279_vm0, %v5674_v0 }
  0x25   : > { %347 = vst.msk [vmem:[#allocation2 + $0x210] sm:$0xff] %vm279_vm0, %v5674_v0  ;;  %349 = vst.msk [vmem:[#allocation2 + $0x220] sm:$0xff] %vm279_vm0, %v5674_v0 }
  0x26   : > { %350 = vst.msk [vmem:[#allocation2 + $0x228] sm:$0xff] %vm279_vm0, %v5674_v0  ;;  %351 = vst.msk [vmem:[#allocation2 + $0x230] sm:$0xff] %vm279_vm0, %v5674_v0 }
  0x27   : > { %284 = vst.msk [vmem:[#allocation2 + $0x18] sm:$0x1] %vm283_vm1, %v5674_v0  ;;  %288 = vst.msk [vmem:[#allocation2 + $0x38] sm:$0x1] %vm283_vm1, %v5674_v0 }
  0x28   : > { %292 = vst.msk [vmem:[#allocation2 + $0x58] sm:$0x1] %vm283_vm1, %v5674_v0  ;;  %296 = vst.msk [vmem:[#allocation2 + $0x78] sm:$0x1] %vm283_vm1, %v5674_v0 }
  0x29   : > { %300 = vst.msk [vmem:[#allocation2 + $0x98] sm:$0x1] %vm283_vm1, %v5674_v0  ;;  %304 = vst.msk [vmem:[#allocation2 + $0xb8] sm:$0x1] %vm283_vm1, %v5674_v0 }
  0x2a   : > { %308 = vst.msk [vmem:[#allocation2 + $0xd8] sm:$0x1] %vm283_vm1, %v5674_v0  ;;  %312 = vst.msk [vmem:[#allocation2 + $0xf8] sm:$0x1] %vm283_vm1, %v5674_v0 }
  0x2b   : > { %316 = vst.msk [vmem:[#allocation2 + $0x118] sm:$0x1] %vm283_vm1, %v5674_v0  ;;  %320 = vst.msk [vmem:[#allocation2 + $0x138] sm:$0x1] %vm283_vm1, %v5674_v0 }
  0x2c   : > { %324 = vst.msk [vmem:[#allocation2 + $0x158] sm:$0x1] %vm283_vm1, %v5674_v0  ;;  %328 = vst.msk [vmem:[#allocation2 + $0x178] sm:$0x1] %vm283_vm1, %v5674_v0 }
  0x2d   : > { %332 = vst.msk [vmem:[#allocation2 + $0x198] sm:$0x1] %vm283_vm1, %v5674_v0  ;;  %336 = vst.msk [vmem:[#allocation2 + $0x1b8] sm:$0x1] %vm283_vm1, %v5674_v0 }
  0x2e   : > { %340 = vst.msk [vmem:[#allocation2 + $0x1d8] sm:$0x1] %vm283_vm1, %v5674_v0  ;;  %344 = vst.msk [vmem:[#allocation2 + $0x1f8] sm:$0x1] %vm283_vm1, %v5674_v0 }
  0x2f   : > { %348 = vst.msk [vmem:[#allocation2 + $0x218] sm:$0x1] %vm283_vm1, %v5674_v0  ;;  %352 = vst.msk [vmem:[#allocation2 + $0x238] sm:$0x1] %vm283_vm1, %v5674_v0 }
  0x30   : > { %386 = vst.msk [vmem:[#allocation2 + $0x28] sm:$0xff] %vm279_vm0, %v353_v1  ;;  %387 = vst.msk [vmem:[#allocation2 + $0x30] sm:$0xff] %vm279_vm0, %v354_v2 }
  0x31   : > { %388 = vst.msk [vmem:[#allocation2 + $0x48] sm:$0xff] %vm279_vm0, %v355_v3  ;;  %389 = vst.msk [vmem:[#allocation2 + $0x50] sm:$0xff] %vm279_vm0, %v356_v4 }
  0x32   : > { %390 = vst.msk [vmem:[#allocation2 + $0x68] sm:$0xff] %vm279_vm0, %v357_v5  ;;  %391 = vst.msk [vmem:[#allocation2 + $0x70] sm:$0xff] %vm279_vm0, %v358_v6 }
  0x33   : > { %392 = vst.msk [vmem:[#allocation2 + $0x88] sm:$0xff] %vm279_vm0, %v359_v7  ;;  %393 = vst.msk [vmem:[#allocation2 + $0x90] sm:$0xff] %vm279_vm0, %v360_v8 }
  0x34   : > { %394 = vst.msk [vmem:[#allocation2 + $0xa8] sm:$0xff] %vm279_vm0, %v361_v9  ;;  %395 = vst.msk [vmem:[#allocation2 + $0xb0] sm:$0xff] %vm279_vm0, %v362_v10 }
  0x35   : > { %396 = vst.msk [vmem:[#allocation2 + $0xc8] sm:$0xff] %vm279_vm0, %v363_v11  ;;  %397 = vst.msk [vmem:[#allocation2 + $0xd0] sm:$0xff] %vm279_vm0, %v364_v12 }
  0x36   : > { %398 = vst.msk [vmem:[#allocation2 + $0xe8] sm:$0xff] %vm279_vm0, %v365_v13  ;;  %399 = vst.msk [vmem:[#allocation2 + $0xf0] sm:$0xff] %vm279_vm0, %v366_v14 }
  0x37   : > { %400 = vst.msk [vmem:[#allocation2 + $0x108] sm:$0xff] %vm279_vm0, %v367_v15  ;;  %401 = vst.msk [vmem:[#allocation2 + $0x110] sm:$0xff] %vm279_vm0, %v368_v16 }
  0x38   : > { %402 = vst.msk [vmem:[#allocation2 + $0x128] sm:$0xff] %vm279_vm0, %v369_v17  ;;  %403 = vst.msk [vmem:[#allocation2 + $0x130] sm:$0xff] %vm279_vm0, %v370_v18 }
  0x39   : > { %404 = vst.msk [vmem:[#allocation2 + $0x148] sm:$0xff] %vm279_vm0, %v371_v19  ;;  %405 = vst.msk [vmem:[#allocation2 + $0x150] sm:$0xff] %vm279_vm0, %v372_v20 }
  0x3a   : > { %406 = vst.msk [vmem:[#allocation2 + $0x168] sm:$0xff] %vm279_vm0, %v373_v21  ;;  %407 = vst.msk [vmem:[#allocation2 + $0x170] sm:$0xff] %vm279_vm0, %v374_v22 }
  0x3b   : > { %408 = vst.msk [vmem:[#allocation2 + $0x188] sm:$0xff] %vm279_vm0, %v375_v23  ;;  %409 = vst.msk [vmem:[#allocation2 + $0x190] sm:$0xff] %vm279_vm0, %v376_v24 }
  0x3c   : > { %410 = vst.msk [vmem:[#allocation2 + $0x1a8] sm:$0xff] %vm279_vm0, %v377_v25  ;;  %411 = vst.msk [vmem:[#allocation2 + $0x1b0] sm:$0xff] %vm279_vm0, %v378_v26 }
  0x3d   : > { %412 = vst.msk [vmem:[#allocation2 + $0x1c8] sm:$0xff] %vm279_vm0, %v379_v27  ;;  %413 = vst.msk [vmem:[#allocation2 + $0x1d0] sm:$0xff] %vm279_vm0, %v380_v28 }
  0x3e   : > { %414 = vst.msk [vmem:[#allocation2 + $0x1e8] sm:$0xff] %vm279_vm0, %v381_v29  ;;  %415 = vst.msk [vmem:[#allocation2 + $0x1f0] sm:$0xff] %vm279_vm0, %v382_v30 }
  0x3f   : > { %416 = vst.msk [vmem:[#allocation2 + $0x208] sm:$0xff] %vm279_vm0, %v383_v31  ;;  %417 = vst.msk [vmem:[#allocation2 + $0x210] sm:$0xff] %vm279_vm0, %v384_v32 }
  0x40 LB: >> { %v745_v33 = vld [vmem:[#allocation2 + $0x27] sm:$0xff]  ;;  %s5675_s12 = smov 64   ;;  %v746_v37 = vld [vmem:[#allocation2 + $0x2f] sm:$0xff]  ;;  %v5676_v41 = vmov 0.0   ;;  %s1674_s13 = smul.u32 576, %s5672_s11  ;;  %vm648_vm2 = vcmask 1048064   ;;  %s5672_s11 = sphi %s5954_s11, %s423_s11  }
  0x41   : >> { %v488_v34 = vld [vmem:[#allocation2 + $0x8] sm:$0xff]  ;;  %809 = vrot.lane.b32.xlu0 %v745_v33, %s5675_s12  ;;  %v5963_v38 = vld [vmem:[#allocation2 + $0x50] sm:$0xff]  ;;  %458 = vst.msk [vmem:[#allocation3 + $0x50] sm:$0xff] %vm279_vm0, %v745_v33  ;;  %1852 = vmatprep.subr.mxu0 %v5676_v41  ;;  %459 = vst.msk [vmem:[#allocation3 + $0x78] sm:$0xff] %vm279_vm0, %v746_v37  ;;  %s1748_s19 = scalar_lea.vmem %s8538_s2, %s5672_s11  ;;  %s2559_s22 = scalar_lea.vmem %s8539_s3, %s5672_s11 }
  0x42   : >> { %v5959_v35 = vld [vmem:[#allocation2 + $0x48] sm:$0xff]  ;;  %552 = vrot.lane.b32.xlu1 %v488_v34, %s5675_s12  ;;  %v5968_v39 = vld [vmem:[#allocation2 + $0x31] sm:$0xff]  ;;  %2077 = vmatprep.subr.mxu1 %v5676_v41  ;;  %972 = vst.msk [vmem:[#allocation3 + $0x88] sm:$0xff] %vm279_vm0, %v5963_v38  ;;  %s6031_s16 = scalar_lea.vmem %s8537_s1, %s1674_s13  ;;  %s2599_s26 = scalar_lea.vmem %s8540_s4, %s5672_s11 }
  0x43   : >> { %v1001_v36 = vld [vmem:[#allocation2 + $0x29] sm:$0xff]  ;;  %971 = vst.msk [vmem:[#allocation3 + $0x60] sm:$0xff] %vm279_vm0, %v5959_v35  ;;  %716 = vst.msk [vmem:[#allocation3 + $0x80] sm:$0xff] %vm279_vm0, %v5968_v39  ;;  %v6006_v48 = vld [vmem:[#allocation2 + $0x51] sm:$0xff]  ;;  %s423_s11 = sadd.s32 1, %s5672_s11  }
  0x44   : >> { %v5970_v40 = vld [vmem:[#allocation2 + $0x47] sm:$0xff]  ;;  %715 = vst.msk [vmem:[#allocation3 + $0x58] sm:$0xff] %vm279_vm0, %v1001_v36  ;;  %v5991_v45 = vld [vmem:[#allocation2 + $0x4f] sm:$0xff]  ;;  %718 = vst.msk [vmem:[#allocation3 + $0xd0] sm:$0xff] %vm279_vm0, %v6006_v48  ;;  %p420_p4 = scmp.ge.s32.totalorder %s423_s11, 16  }
  0x45   : >> { %v5979_v42 = vld [vmem:[#allocation2 + $0x68] sm:$0xff]  ;;  %1226 = vst.msk [vmem:[#allocation3 + $0x18] sm:$0xff] %vm279_vm0, %v5970_v40  ;;  %460 = vst.msk [vmem:[#allocation3 + $0xa0] sm:$0xff] %vm279_vm0, %v5970_v40  ;;  %v5993_v46 = vld [vmem:[#allocation2 + $0x70] sm:$0xff]  ;;  %1322 = vrot.lane.b32.xlu0 %v5959_v35, %s5675_s12  ;;  %s5677_s27 = smov (%p420_p4), 64  }
  0x46   : >> { %v5981_v43 = vld [vmem:[#allocation2 + $0x28] sm:$0xff]  ;;  %v5995_v47 = vld [vmem:[#allocation2 + $0x30] sm:$0xff]  ;;  %973 = vst.msk [vmem:[#allocation3 + $0xb0] sm:$0xff] %vm279_vm0, %v5979_v42  ;;  %1065 = vrot.lane.b32.xlu1 %v1001_v36, %s5675_s12  ;;  %1227 = vst.msk [vmem:[#allocation3 + $0x40] sm:$0xff] %vm279_vm0, %v5991_v45 }
  0x47   : >> { %v5983_v44 = vld [vmem:[#allocation2 + $0x49] sm:$0xff]  ;;  %969 = vst.msk [vmem:[#allocation3 + $0x10] sm:$0xff] %vm279_vm0, %v5981_v43  ;;  %970 = vst.msk [vmem:[#allocation3 + $0x38] sm:$0xff] %vm279_vm0, %v5995_v47  ;;  %v6041_v54 = vld [vmem:[#allocation2 + $0x71] sm:$0xff] }
  0x48   : >> { %717 = vst.msk [vmem:[#allocation3 + $0xa8] sm:$0xff] %vm279_vm0, %v5983_v44  ;;  %v6008_v49 = vld [vmem:[#allocation2 + $0x67] sm:$0xff]  ;;  %461 = vst.msk [vmem:[#allocation3 + $0xc8] sm:$0xff] %vm279_vm0, %v5991_v45  ;;  %v6022_v52 = vld [vmem:[#allocation2 + $0x6f] sm:$0xff] }
  0x49   : >> { %v6010_v50 = vld [vmem:[#allocation2 + $0x88] sm:$0xff]  ;;  %974 = vst.msk [vmem:[#allocation3 + $0xd8] sm:$0xff] %vm279_vm0, %v5993_v46  ;;  %v6024_v53 = vld [vmem:[#allocation2 + $0x90] sm:$0xff]  ;;  %1228 = vst.msk [vmem:[#allocation3 + $0x68] sm:$0xff] %vm279_vm0, %v6008_v49  ;;  %811 = vrot.lane.b32.xlu0 %v746_v37, %s5675_s12 }
  0x4a   : >> { %v6020_v51 = vld [vmem:[#allocation2 + $0x69] sm:$0xff]  ;;  %462 = vst.msk [vmem:[#allocation3 + $0xf0] sm:$0xff] %vm279_vm0, %v6008_v49  ;;  %975 = vst.msk [vmem:[#allocation3 + $0x100] sm:$0xff] %vm279_vm0, %v6010_v50  ;;  %1324 = vrot.lane.b32.xlu1 %v5963_v38, %s5675_s12  ;;  %v1691_v58 = vld [vmem:[%s6031_s16 + $0x78] sm:$0xff] }
  0x4b   : >> { %v6043_v55 = vld [vmem:[#allocation2 + $0x87] sm:$0xff]  ;;  %1229 = vst.msk [vmem:[#allocation3 + $0x90] sm:$0xff] %vm279_vm0, %v6022_v52  ;;  %719 = vst.msk [vmem:[#allocation3 + $0xf8] sm:$0xff] %vm279_vm0, %v6020_v51  ;;  %v6055_v57 = vld [vmem:[#allocation2 + $0x8f] sm:$0xff]  ;;  %1853 = vmatpush1.msra.mxu0 %v1691_v58 }
  0x4c   : >> { %463 = vst.msk [vmem:[#allocation3 + $0x118] sm:$0xff] %vm279_vm0, %v6022_v52  ;;  %976 = vst.msk [vmem:[#allocation3 + $0x128] sm:$0xff] %vm279_vm0, %v6024_v53  ;;  %v6053_v56 = vld [vmem:[#allocation2 + $0x89] sm:$0xff]  ;;  %1854 = vmatprep.subr.mxu0 %v5676_v41  ;;  %v1723_v62 = vld [vmem:[%s6031_s16 + $0x178] sm:$0xff] }
  0x4d   : >> { %1230 = vst.msk [vmem:[#allocation3 + $0xb8] sm:$0xff] %vm279_vm0, %v6043_v55  ;;  %720 = vst.msk [vmem:[#allocation3 + $0x120] sm:$0xff] %vm279_vm0, %v6041_v54  ;;  %v1690_v59 = vld [vmem:[%s6031_s16 + $0x70] sm:$0xff]  ;;  %v6070_v61 = vld [vmem:[#allocation2 + $0xa7] sm:$0xff]  ;;  %2078 = vmatpush1.msra.mxu1 %v1723_v62 }
  0x4e   : >> { %1231 = vst.msk [vmem:[#allocation3 + $0xe0] sm:$0xff] %vm279_vm0, %v6055_v57  ;;  %721 = vst.msk [vmem:[#allocation3 + $0x148] sm:$0xff] %vm279_vm0, %v6053_v56  ;;  %v489_v60 = vld [vmem:[#allocation2 + $0x10] sm:$0xff]  ;;  %1855 = vmatpush1.msra.mxu0 %v1690_v59  ;;  %v1689_v63 = vld [vmem:[%s6031_s16 + $0x68] sm:$0xff]  ;;  %1067 = vrot.lane.b32.xlu1 %v5968_v39, %s5675_s12 }
  0x4f   : >> { %1232 = vst.msk [vmem:[#allocation3 + $0x108] sm:$0xff] %vm279_vm0, %v6070_v61  ;;  %v1722_v1 = vld [vmem:[%s6031_s16 + $0x170] sm:$0xff]  ;;  %554 = vrot.lane.b32.xlu0 %v489_v60, %s5675_s12  ;;  %1856 = vmatprep.subr.mxu0 %v5676_v41  ;;  %v1688_v3 = vld [vmem:[%s6031_s16 + $0x60] sm:$0xff]  ;;  %v1721_v4 = vld [vmem:[%s6031_s16 + $0x168] sm:$0xff] }
  0x50   : >> { %v6081_v2 = vld [vmem:[#allocation2 + $0xaf] sm:$0xff]  ;;  %2079 = vmatprep.subr.mxu1 %v5676_v41  ;;  %1857 = vmatpush1.msra.mxu0 %v1689_v63  ;;  %v1687_v5 = vld [vmem:[%s6031_s16 + $0x58] sm:$0xff]  ;;  %v1720_v6 = vld [vmem:[%s6031_s16 + $0x160] sm:$0xff] }
  0x51   : >> { %1233 = vst.msk [vmem:[#allocation3 + $0x130] sm:$0xff] %vm279_vm0, %v6081_v2  ;;  %2080 = vmatpush1.msra.mxu1 %v1722_v1  ;;  %1858 = vmatprep.subr.mxu0 %v5676_v41  ;;  %v6097_v7 = vld [vmem:[#allocation2 + $0xc7] sm:$0xff]  ;;  %v1686_v8 = vld [vmem:[%s6031_s16 + $0x50] sm:$0xff]  ;;  %v1719_v9 = vld [vmem:[%s6031_s16 + $0x158] sm:$0xff] }
  0x52   : >> { %2081 = vmatprep.subr.mxu1 %v5676_v41  ;;  %1326 = vrot.lane.b32.xlu1 %v5979_v42, %s5675_s12  ;;  %1234 = vst.msk [vmem:[#allocation3 + $0x158] sm:$0xff] %vm279_vm0, %v6097_v7  ;;  %v6109_v10 = vld [vmem:[#allocation2 + $0xcf] sm:$0xff]  ;;  %v6119_v13 = vld [vmem:[#allocation2 + $0xe7] sm:$0xff]  ;;  %v1683_v16 = vld [vmem:[%s6031_s16 + $0x38] sm:$0xff] }
  0x53   : >> { %813 = vrot.lane.b32.xlu0 %v5970_v40, %s5675_s12  ;;  %1859 = vmatpush1.msra.mxu0 %v1688_v3  ;;  %1235 = vst.msk [vmem:[#allocation3 + $0x180] sm:$0xff] %vm279_vm0, %v6109_v10  ;;  %v1685_v11 = vld [vmem:[%s6031_s16 + $0x48] sm:$0xff]  ;;  %v1718_v12 = vld [vmem:[%s6031_s16 + $0x150] sm:$0xff]  ;;  %v1684_v14 = vld [vmem:[%s6031_s16 + $0x40] sm:$0xff] }
  0x54   : >> { %2082 = vmatpush1.msra.mxu1 %v1721_v4  ;;  %1860 = vmatprep.subr.mxu0 %v5676_v41  ;;  %v1717_v15 = vld [vmem:[%s6031_s16 + $0x148] sm:$0xff]  ;;  %1236 = vst.msk [vmem:[#allocation3 + $0x1a8] sm:$0xff] %vm279_vm0, %v6119_v13  ;;  %v1716_v17 = vld [vmem:[%s6031_s16 + $0x140] sm:$0xff]  ;;  %v1682_v19 = vld [vmem:[%s6031_s16 + $0x30] sm:$0xff] }
  0x55   : >> { %2083 = vmatprep.subr.mxu1 %v5676_v41  ;;  %1861 = vmatpush1.msra.mxu0 %v1687_v5  ;;  %v6133_v18 = vld [vmem:[#allocation2 + $0xef] sm:$0xff]  ;;  %v1715_v20 = vld [vmem:[%s6031_s16 + $0x138] sm:$0xff]  ;;  %v6148_v22 = vld [vmem:[#allocation2 + $0x107] sm:$0xff] }
  0x56   : >> { %2084 = vmatpush1.msra.mxu1 %v1720_v6  ;;  %1069 = vrot.lane.b32.xlu1 %v5983_v44, %s5675_s12  ;;  %1237 = vst.msk [vmem:[#allocation3 + $0x1d0] sm:$0xff] %vm279_vm0, %v6133_v18  ;;  %v1681_v21 = vld [vmem:[%s6031_s16 + $0x28] sm:$0xff]  ;;  %v1714_v23 = vld [vmem:[%s6031_s16 + $0x130] sm:$0xff]  ;;  %1238 = vst.msk [vmem:[#allocation3 + $0x1f8] sm:$0xff] %vm279_vm0, %v6148_v22 }
  0x57   : >> { %556 = vrot.lane.b32.xlu0 %v5981_v43, %s5675_s12  ;;  %1862 = vmatprep.subr.mxu0 %v5676_v41  ;;  %v681_v24 = vld [vmem:[#allocation2 + $0x9] sm:$0xff]  ;;  %v1680_v26 = vld [vmem:[%s6031_s16 + $0x20] sm:$0xff]  ;;  %v682_v29 = vld [vmem:[#allocation2 + $0x11] sm:$0xff] }
  0x58   : >> { %2085 = vmatprep.subr.mxu1 %v5676_v41  ;;  %1863 = vmatpush1.msra.mxu0 %v1686_v8  ;;  %v424_v25 = vld [vmem:[#allocation2 + $0x7] sm:$0xff]  ;;  %713 = vst.msk [vmem:[#allocation3 + $0x8] sm:$0xff] %vm279_vm0, %v681_v24  ;;  %v6163_v28 = vld [vmem:[#allocation2 + $0x10f] sm:$0xff]  ;;  %714 = vst.msk [vmem:[#allocation3 + $0x30] sm:$0xff] %vm279_vm0, %v682_v29 }
  0x59   : >> { %2086 = vmatpush1.msra.mxu1 %v1719_v9  ;;  %1864 = vmatprep.subr.mxu0 %v5676_v41  ;;  %456 = vst.msk [vmem:[#allocation3] sm:$0xff] %vm279_vm0, %v424_v25  ;;  %v1713_v27 = vld [vmem:[%s6031_s16 + $0x128] sm:$0xff]  ;;  %1239 = vst.msk [vmem:[#allocation3 + $0x220] sm:$0xff] %vm279_vm0, %v6163_v28  ;;  %v6174_v30 = vld [vmem:[#allocation2 + $0x111] sm:$0xff] }
  0x5a   : >> { %2087 = vmatprep.subr.mxu1 %v5676_v41  ;;  %1328 = vrot.lane.b32.xlu1 %v5993_v46, %s5675_s12  ;;  %v1679_v31 = vld [vmem:[%s6031_s16 + $0x18] sm:$0xff]  ;;  %v1712_v32 = vld [vmem:[%s6031_s16 + $0x120] sm:$0xff]  ;;  %v425_v33 = vld [vmem:[#allocation2 + $0xf] sm:$0xff]  ;;  %730 = vst.msk [vmem:[#allocation3 + $0x2b0] sm:$0xff] %vm279_vm0, %v6174_v30 }
  0x5b   : >> { %815 = vrot.lane.b32.xlu0 %v5991_v45, %s5675_s12  ;;  %1865 = vmatpush1.msra.mxu0 %v1685_v11  ;;  %v1678_v34 = vld [vmem:[%s6031_s16 + $0x10] sm:$0xff]  ;;  %457 = vst.msk [vmem:[#allocation3 + $0x28] sm:$0xff] %vm279_vm0, %v425_v33  ;;  %v1711_v37 = vld [vmem:[%s6031_s16 + $0x118] sm:$0xff]  ;;  %v1677_v43 = vld [vmem:[%s6031_s16 + $0x8] sm:$0xff] }
  0x5c   : >> { %2088 = vmatpush1.msra.mxu1 %v1718_v12  ;;  %1866 = vmatprep.subr.mxu0 %v5676_v41  ;;  %v6186_v36 = vld [vmem:[#allocation2 + $0x129] sm:$0xff]  ;;  %v6195_v40 = vld [vmem:[#allocation2 + $0x131] sm:$0xff]  ;;  %v1708_v4 = vld [vmem:[%s6031_s16 + $0x100] sm:$0xff] }
  0x5d   : >> { %2089 = vmatprep.subr.mxu1 %v5676_v41  ;;  %1867 = vmatpush1.msra.mxu0 %v1684_v14  ;;  %v6193_v39 = vld [vmem:[#allocation2 + $0x12f] sm:$0xff]  ;;  %731 = vst.msk [vmem:[#allocation3 + $0x2d8] sm:$0xff] %vm279_vm0, %v6186_v36  ;;  %v6202_v44 = vld [vmem:[#allocation2 + $0x147] sm:$0xff]  ;;  %732 = vst.msk [vmem:[#allocation3 + $0x300] sm:$0xff] %vm279_vm0, %v6195_v40 }
  0x5e   : >> { %2090 = vmatpush1.msra.mxu1 %v1717_v15  ;;  %1071 = vrot.lane.b32.xlu1 %v6006_v48, %s5675_s12  ;;  %v6204_v45 = vld [vmem:[#allocation2 + $0x149] sm:$0xff]  ;;  %1241 = vst.msk [vmem:[#allocation3 + $0x270] sm:$0xff] %vm279_vm0, %v6193_v39  ;;  %1242 = vst.msk [vmem:[#allocation3 + $0x298] sm:$0xff] %vm279_vm0, %v6202_v44  ;;  %v6239_v62 = vld [vmem:[#allocation2 + $0x171] sm:$0xff] }
  0x5f   : >> { %558 = vrot.lane.b32.xlu0 %v5995_v47, %s5675_s12  ;;  %1868 = vmatprep.subr.mxu0 %v5676_v41  ;;  %v1710_v47 = vld [vmem:[%s6031_s16 + $0x110] sm:$0xff]  ;;  %733 = vst.msk [vmem:[#allocation3 + $0x328] sm:$0xff] %vm279_vm0, %v6204_v45  ;;  %736 = vst.msk [vmem:[#allocation3 + $0x3a0] sm:$0xff] %vm279_vm0, %v6239_v62  ;;  %v1709_v63 = vld [vmem:[%s6031_s16 + $0x108] sm:$0xff] }
  0x60   : >> { %2091 = vmatprep.subr.mxu1 %v5676_v41  ;;  %1869 = vmatpush1.msra.mxu0 %v1683_v16  ;;  %v6213_v48 = vld [vmem:[#allocation2 + $0x14f] sm:$0xff]  ;;  %v6265_v1 = vld [vmem:[#allocation2 + $0x187] sm:$0xff]  ;;  %v1707_v3 = vld [vmem:[%s6031_s16 + $0xf8] sm:$0xff] }
  0x61   : >> { %2092 = vmatpush1.msra.mxu1 %v1716_v17  ;;  %1870 = vmatprep.subr.mxu0 %v5676_v41  ;;  %v6225_v58 = vld [vmem:[#allocation2 + $0x169] sm:$0xff]  ;;  %1243 = vst.msk [vmem:[#allocation3 + $0x2c0] sm:$0xff] %vm279_vm0, %v6213_v48  ;;  %1246 = vst.msk [vmem:[#allocation3 + $0x338] sm:$0xff] %vm279_vm0, %v6265_v1  ;;  %v1739_v6 = vld [vmem:[%s6031_s16 + $0x1f8] sm:$0xff] }
  0x62   : >> { %2093 = vmatprep.subr.mxu1 %v5676_v41  ;;  %1330 = vrot.lane.b32.xlu1 %v6010_v50, %s5675_s12  ;;  %v6235_v59 = vld [vmem:[#allocation2 + $0x16f] sm:$0xff]  ;;  %735 = vst.msk [vmem:[#allocation3 + $0x378] sm:$0xff] %vm279_vm0, %v6225_v58  ;;  %480 = vst.msk [vmem:[#allocation3 + $0x3c0] sm:$0xff] %vm279_vm0, %v6265_v1 }
  0x63   : >> { %817 = vrot.lane.b32.xlu0 %v6008_v49, %s5675_s12  ;;  %1871 = vmatpush1.msra.mxu0 %v1682_v19  ;;  %v6215_v49 = vld [vmem:[#allocation2 + $0x151] sm:$0xff]  ;;  %1245 = vst.msk [vmem:[#allocation3 + $0x310] sm:$0xff] %vm279_vm0, %v6235_v59  ;;  %479 = vst.msk [vmem:[#allocation3 + $0x398] sm:$0xff] %vm279_vm0, %v6235_v59  ;;  %v6273_v5 = vld [vmem:[#allocation2 + $0x1a8] sm:$0xff] }
  0x64   : >> { %2094 = vmatpush1.msra.mxu1 %v1715_v20  ;;  %1872 = vmatprep.subr.mxu0 %v5676_v41  ;;  %734 = vst.msk [vmem:[#allocation3 + $0x350] sm:$0xff] %vm279_vm0, %v6215_v49  ;;  %v6237_v60 = vld [vmem:[#allocation2 + $0x190] sm:$0xff]  ;;  %993 = vst.msk [vmem:[#allocation3 + $0x3d0] sm:$0xff] %vm279_vm0, %v6273_v5  ;;  %v1705_v11 = vld [vmem:[%s6031_s16 + $0xe8] sm:$0xff] }
  0x65   : >> { %2095 = vmatprep.subr.mxu1 %v5676_v41  ;;  %1873 = vmatpush1.msra.mxu0 %v1681_v21  ;;  %992 = vst.msk [vmem:[#allocation3 + $0x3a8] sm:$0xff] %vm279_vm0, %v6237_v60  ;;  %v6289_v8 = vld [vmem:[#allocation2 + $0x189] sm:$0xff]  ;;  %v690_v19 = vld [vmem:[#allocation2 + $0x91] sm:$0xff]  ;;  %v1736_v21 = vld [vmem:[%s6031_s16 + $0x1e0] sm:$0xff] }
  0x66   : >> { %2096 = vmatpush1.msra.mxu1 %v1714_v23  ;;  %1073 = vrot.lane.b32.xlu1 %v6020_v51, %s5675_s12  ;;  %v6221_v51 = vld [vmem:[#allocation2 + $0x167] sm:$0xff]  ;;  %v6291_v9 = vld [vmem:[#allocation2 + $0xb0] sm:$0xff]  ;;  %737 = vst.msk [vmem:[#allocation3 + $0x3c8] sm:$0xff] %vm279_vm0, %v6289_v8  ;;  %722 = vst.msk [vmem:[#allocation3 + $0x170] sm:$0xff] %vm279_vm0, %v690_v19 }
  0x67   : >> { %560 = vrot.lane.b32.xlu0 %v5959_v35, %s5675_s12  ;;  %1874 = vmatprep.subr.mxu0 %v5676_v41  ;;  %v6184_v35 = vld [vmem:[#allocation2 + $0x127] sm:$0xff]  ;;  %1244 = vst.msk [vmem:[#allocation3 + $0x2e8] sm:$0xff] %vm279_vm0, %v6221_v51  ;;  %478 = vst.msk [vmem:[#allocation3 + $0x370] sm:$0xff] %vm279_vm0, %v6221_v51  ;;  %v1738_v12 = vld [vmem:[%s6031_s16 + $0x1f0] sm:$0xff] }
  0x68   : >> { %2097 = vmatprep.subr.mxu1 %v5676_v41  ;;  %1875 = vmatpush1.msra.mxu0 %v1680_v26  ;;  %1240 = vst.msk [vmem:[#allocation3 + $0x248] sm:$0xff] %vm279_vm0, %v6184_v35  ;;  %v945_v14 = vld [vmem:[#allocation2 + $0xa8] sm:$0xff]  ;;  %v6311_v17 = vld [vmem:[#allocation2 + $0x1b0] sm:$0xff]  ;;  %v1735_v26 = vld [vmem:[%s6031_s16 + $0x1d8] sm:$0xff] }
  0x69   : >> { %2098 = vmatpush1.msra.mxu1 %v1713_v27  ;;  %1876 = vmatprep.subr.mxu0 %v5676_v41  ;;  %977 = vst.msk [vmem:[#allocation3 + $0x150] sm:$0xff] %vm279_vm0, %v945_v14  ;;  %v6304_v15 = vld [vmem:[#allocation2 + $0x18f] sm:$0xff]  ;;  %994 = vst.msk [vmem:[#allocation3 + $0x3f8] sm:$0xff] %vm279_vm0, %v6311_v17 }
  0x6a   : >> { %2099 = vmatprep.subr.mxu1 %v5676_v41  ;;  %1332 = vrot.lane.b32.xlu1 %v6024_v53, %s5675_s12  ;;  %v1737_v16 = vld [vmem:[%s6031_s16 + $0x1e8] sm:$0xff]  ;;  %1247 = vst.msk [vmem:[#allocation3 + $0x360] sm:$0xff] %vm279_vm0, %v6304_v15  ;;  %481 = vst.msk [vmem:[#allocation3 + $0x3e8] sm:$0xff] %vm279_vm0, %v6304_v15  ;;  %v1008_v20 = vld [vmem:[#allocation2 + $0x91] sm:$0xff] }
  0x6b   : >> { %819 = vrot.lane.b32.xlu0 %v6022_v52, %s5675_s12  ;;  %1877 = vmatpush1.msra.mxu0 %v1679_v31  ;;  %v6223_v52 = vld [vmem:[#allocation2 + $0x188] sm:$0xff]  ;;  %v6327_v23 = vld [vmem:[#allocation2 + $0x191] sm:$0xff] }
  0x6c   : >> { %2100 = vmatpush1.msra.mxu1 %v1712_v32  ;;  %1878 = vmatprep.subr.mxu0 %v5676_v41  ;;  %991 = vst.msk [vmem:[#allocation3 + $0x380] sm:$0xff] %vm279_vm0, %v6223_v52  ;;  %v6329_v24 = vld [vmem:[#allocation2 + $0xc8] sm:$0xff]  ;;  %v1702_v25 = vld [vmem:[%s6031_s16 + $0xd0] sm:$0xff]  ;;  %738 = vst.msk [vmem:[#allocation3 + $0x3f0] sm:$0xff] %vm279_vm0, %v6327_v23 }
  0x6d   : >> { %2101 = vmatprep.subr.mxu1 %v5676_v41  ;;  %1879 = vmatpush1.msra.mxu0 %v1678_v34  ;;  %v433_v27 = vld [vmem:[#allocation2 + $0x8f] sm:$0xff]  ;;  %v6342_v31 = vld [vmem:[#allocation2 + $0x1a7] sm:$0xff] }
  0x6e   : >> { %2102 = vmatpush1.msra.mxu1 %v1711_v37  ;;  %1075 = vrot.lane.b32.xlu1 %v6041_v54, %s5675_s12  ;;  %v1676_v54 = vld [vmem:[%s6031_s16] sm:$0xff]  ;;  %v1701_v29 = vld [vmem:[%s6031_s16 + $0xc8] sm:$0xff]  ;;  %465 = vst.msk [vmem:[#allocation3 + $0x168] sm:$0xff] %vm279_vm0, %v433_v27  ;;  %v1734_v32 = vld [vmem:[%s6031_s16 + $0x1d0] sm:$0xff] }
  0x6f   : >> { %562 = vrot.lane.b32.xlu0 %v5963_v38, %s5675_s12  ;;  %v6249_v38 = vld [vmem:[#allocation2 + $0xa8] sm:$0xff]  ;;  %1880 = vmatprep.subr.mxu0 %v5676_v41  ;;  %1248 = vst.msk [vmem:[#allocation3 + $0x388] sm:$0xff] %vm279_vm0, %v6342_v31  ;;  %482 = vst.msk [vmem:[#allocation3 + $0x410] sm:$0xff] %vm279_vm0, %v6342_v31  ;;  %v1010_v14 = vld [vmem:[#allocation2 + $0xb1] sm:$0xff] }
  0x70   : >> { %2103 = vmatprep.subr.mxu1 %v5676_v41  ;;  %1881 = vmatpush1.msra.mxu0 %v1677_v43  ;;  %v6349_v33 = vld [vmem:[#allocation2 + $0x1c8] sm:$0xff]  ;;  %v1728_v27 = vld [vmem:[%s6031_s16 + $0x1a0] sm:$0xff] }
  0x71   : >> { %2104 = vmatpush1.msra.mxu1 %v1710_v47  ;;  %1882 = vmatprep.subr.mxu0 %v5676_v41  ;;  %v691_v34 = vld [vmem:[#allocation2 + $0xa9] sm:$0xff]  ;;  %995 = vst.msk [vmem:[#allocation3 + $0x420] sm:$0xff] %vm279_vm0, %v6349_v33 }
  0x72   : >> { %2105 = vmatprep.subr.mxu1 %v5676_v41  ;;  %1334 = vrot.lane.b32.xlu1 %v6249_v38, %s5675_s12  ;;  %v1009_v37 = vld [vmem:[#allocation2 + $0xa9] sm:$0xff]  ;;  %723 = vst.msk [vmem:[#allocation3 + $0x198] sm:$0xff] %vm279_vm0, %v691_v34  ;;  %v1727_v34 = vld [vmem:[%s6031_s16 + $0x198] sm:$0xff] }
  0x73   : >> { %821 = vrot.lane.b32.xlu0 %v6043_v55, %s5675_s12  ;;  %1883 = vmatpush1.msra.mxu0 %v1676_v54  ;;  %v1706_v55 = vld [vmem:[%s6031_s16 + $0xf0] sm:$0xff]  ;;  %v1733_v43 = vld [vmem:[%s6031_s16 + $0x1c8] sm:$0xff] }
  0x74   : >> { %2106 = vmatpush1.msra.mxu1 %v1709_v63  ;;  %1884 = vmatprep.subr.mxu0 %v5676_v41  ;;  %v6365_v47 = vld [vmem:[#allocation2 + $0x1a9] sm:$0xff]  ;;  %v1699_v63 = vld [vmem:[%s6031_s16 + $0xb8] sm:$0xff] }
  0x75   : >> { %2107 = vmatprep.subr.mxu1 %v5676_v41  ;;  %1885 = vmatpush2.msra.mxu0 %v1707_v3  ;;  %v6367_v54 = vld [vmem:[#allocation2 + $0xd0] sm:$0xff]  ;;  %739 = vst.msk [vmem:[#allocation3 + $0x418] sm:$0xff] %vm279_vm0, %v6365_v47  ;;  %v1732_v3 = vld [vmem:[%s6031_s16 + $0x1c0] sm:$0xff]  ;;  %v6405_v19 = vld [vmem:[#allocation2 + $0xe8] sm:$0xff] }
  0x76   : >> { %2108 = vmatpush1.msra.mxu1 %v1708_v4  ;;  %1077 = vrot.lane.b32.xlu1 %v6053_v56, %s5675_s12  ;;  %v1704_v56 = vld [vmem:[%s6031_s16 + $0xe0] sm:$0xff] }
  0x77   : >> { %564 = vrot.lane.b32.xlu0 %v5979_v42, %s5675_s12  ;;  %1886 = vmatprep.subr.mxu0 %v5676_v41  ;;  %v432_v42 = vld [vmem:[#allocation2 + $0x87] sm:$0xff] }
  0x78   : >> { %2109 = vmatprep.subr.mxu1 %v5676_v41  ;;  %1887 = vmatpush2.msra.mxu0 %v1706_v55  ;;  %464 = vst.msk [vmem:[#allocation3 + $0x140] sm:$0xff] %vm279_vm0, %v432_v42  ;;  %v434_v4 = vld [vmem:[#allocation2 + $0xa7] sm:$0xff]  ;;  %v1698_v55 = vld [vmem:[%s6031_s16 + $0xb0] sm:$0xff] }
  0x79   : >> { %2110 = vmatpush2.msra.mxu1 %v1739_v6  ;;  %1888 = vmatprep.subr.mxu0 %v5676_v41  ;;  %466 = vst.msk [vmem:[#allocation3 + $0x190] sm:$0xff] %vm279_vm0, %v434_v4  ;;  %v6380_v6 = vld [vmem:[#allocation2 + $0x1af] sm:$0xff]  ;;  %v1692_v4 = vld [vmem:[%s6031_s16 + $0x80] sm:$0xff] }
  0x7a   : >> { %2111 = vmatprep.subr.mxu1 %v5676_v41  ;;  %1336 = vrot.lane.b32.xlu1 %v6291_v9, %s5675_s12  ;;  %v692_v42 = vld [vmem:[#allocation2 + $0xb1] sm:$0xff]  ;;  %1249 = vst.msk [vmem:[#allocation3 + $0x3b0] sm:$0xff] %vm279_vm0, %v6380_v6  ;;  %483 = vst.msk [vmem:[#allocation3 + $0x438] sm:$0xff] %vm279_vm0, %v6380_v6 }
  0x7b   : >> { %823 = vrot.lane.b32.xlu0 %v6055_v57, %s5675_s12  ;;  %1889 = vmatpush2.msra.mxu0 %v1705_v11  ;;  %v1703_v57 = vld [vmem:[%s6031_s16 + $0xd8] sm:$0xff]  ;;  %724 = vst.msk [vmem:[#allocation3 + $0x1c0] sm:$0xff] %vm279_vm0, %v692_v42 }
  0x7c   : >> { %2112 = vmatpush2.msra.mxu1 %v1738_v12  ;;  %1890 = vmatprep.subr.mxu0 %v5676_v41  ;;  %v1731_v11 = vld [vmem:[%s6031_s16 + $0x1b8] sm:$0xff]  ;;  %v6387_v12 = vld [vmem:[#allocation2 + $0x1d0] sm:$0xff] }
  0x7d   : >> { %2113 = vmatprep.subr.mxu1 %v5676_v41  ;;  %1891 = vmatpush2.msra.mxu0 %v1704_v56  ;;  %996 = vst.msk [vmem:[#allocation3 + $0x448] sm:$0xff] %vm279_vm0, %v6387_v12  ;;  %v1730_v56 = vld [vmem:[%s6031_s16 + $0x1b0] sm:$0xff] }
  0x7e   : >> { %2114 = vmatpush2.msra.mxu1 %v1737_v16  ;;  %1079 = vrot.lane.b32.xlu1 %v1008_v20, %s5675_s12  ;;  %v6403_v16 = vld [vmem:[#allocation2 + $0x1b1] sm:$0xff]  ;;  %v1696_v20 = vld [vmem:[%s6031_s16 + $0xa0] sm:$0xff] }
  0x7f   : >> { %566 = vrot.lane.b32.xlu0 %v5993_v46, %s5675_s12  ;;  %1892 = vmatprep.subr.mxu0 %v5676_v41  ;;  %v946_v46 = vld [vmem:[#allocation2 + $0xb0] sm:$0xff]  ;;  %740 = vst.msk [vmem:[#allocation3 + $0x440] sm:$0xff] %vm279_vm0, %v6403_v16 }
  0x80   : >> { %2115 = vmatprep.subr.mxu1 %v5676_v41  ;;  %1893 = vmatpush2.msra.mxu0 %v1703_v57  ;;  %978 = vst.msk [vmem:[#allocation3 + $0x178] sm:$0xff] %vm279_vm0, %v946_v46  ;;  %v1729_v57 = vld [vmem:[%s6031_s16 + $0x1a8] sm:$0xff]  ;;  %v694_v42 = vld [vmem:[#allocation2 + $0xd1] sm:$0xff] }
  0x81   : >> { %2116 = vmatpush2.msra.mxu1 %v1736_v21  ;;  %1894 = vmatprep.subr.mxu0 %v5676_v41  ;;  %v435_v21 = vld [vmem:[#allocation2 + $0xaf] sm:$0xff]  ;;  %726 = vst.msk [vmem:[#allocation3 + $0x210] sm:$0xff] %vm279_vm0, %v694_v42 }
  0x82   : >> { %2117 = vmatprep.subr.mxu1 %v5676_v41  ;;  %1338 = vrot.lane.b32.xlu1 %v6329_v24, %s5675_s12  ;;  %467 = vst.msk [vmem:[#allocation3 + $0x1b8] sm:$0xff] %vm279_vm0, %v435_v21  ;;  %v6425_v46 = vld [vmem:[#allocation2 + $0x1e8] sm:$0xff] }
  0x83   : >> { %825 = vrot.lane.b32.xlu0 %v6070_v61, %s5675_s12  ;;  %1895 = vmatpush2.msra.mxu0 %v1702_v25  ;;  %v1700_v61 = vld [vmem:[%s6031_s16 + $0xc0] sm:$0xff]  ;;  %v1695_v25 = vld [vmem:[%s6031_s16 + $0x98] sm:$0xff]  ;;  %997 = vst.msk [vmem:[#allocation3 + $0x470] sm:$0xff] %vm279_vm0, %v6425_v46 }
  0x84   : >> { %2118 = vmatpush2.msra.mxu1 %v1735_v26  ;;  %1896 = vmatprep.subr.mxu0 %v5676_v41  ;;  %v6418_v26 = vld [vmem:[#allocation2 + $0x1c7] sm:$0xff] }
  0x85   : >> { %2119 = vmatprep.subr.mxu1 %v5676_v41  ;;  %1897 = vmatpush2.msra.mxu0 %v1701_v29  ;;  %v693_v29 = vld [vmem:[#allocation2 + $0xc9] sm:$0xff]  ;;  %1250 = vst.msk [vmem:[#allocation3 + $0x3d8] sm:$0xff] %vm279_vm0, %v6418_v26  ;;  %484 = vst.msk [vmem:[#allocation3 + $0x460] sm:$0xff] %vm279_vm0, %v6418_v26 }
  0x86   : >> { %2120 = vmatpush2.msra.mxu1 %v1734_v32  ;;  %1081 = vrot.lane.b32.xlu1 %v1009_v37, %s5675_s12  ;;  %v1011_v32 = vld [vmem:[#allocation2 + $0xc9] sm:$0xff]  ;;  %725 = vst.msk [vmem:[#allocation3 + $0x1e8] sm:$0xff] %vm279_vm0, %v693_v29 }
  0x87   : >> { %568 = vrot.lane.b32.xlu0 %v6010_v50, %s5675_s12  ;;  %1898 = vmatprep.subr.mxu0 %v5676_v41  ;;  %v947_v50 = vld [vmem:[#allocation2 + $0xc8] sm:$0xff] }
  0x88   : >> { %2121 = vmatprep.subr.mxu1 %v5676_v41  ;;  %1899 = vmatpush2.msra.mxu0 %v1700_v61  ;;  %979 = vst.msk [vmem:[#allocation3 + $0x1a0] sm:$0xff] %vm279_vm0, %v947_v50  ;;  %v6441_v37 = vld [vmem:[#allocation2 + $0x1c9] sm:$0xff] }
  0x89   : >> { %2122 = vmatpush2.msra.mxu1 %v1733_v43  ;;  %1900 = vmatprep.subr.mxu0 %v5676_v41  ;;  %v6443_v61 = vld [vmem:[#allocation2 + $0xf0] sm:$0xff]  ;;  %v1693_v43 = vld [vmem:[%s6031_s16 + $0x88] sm:$0xff]  ;;  %741 = vst.msk [vmem:[#allocation3 + $0x468] sm:$0xff] %vm279_vm0, %v6441_v37 }
  0x8a   : >> { %2123 = vmatprep.subr.mxu1 %v5676_v41  ;;  %1340 = vrot.lane.b32.xlu1 %v6367_v54, %s5675_s12  ;;  %v6456_v50 = vld [vmem:[#allocation2 + $0x1cf] sm:$0xff]  ;;  %v6487_v21 = vld [vmem:[#allocation2 + $0x1e7] sm:$0xff] }
  0x8b   : >> { %827 = vrot.lane.b32.xlu0 %v6081_v2, %s5675_s12  ;;  %1901 = vmatpush2.msra.mxu0 %v1699_v63  ;;  %v1697_v2 = vld [vmem:[%s6031_s16 + $0xa8] sm:$0xff]  ;;  %v1726_v63 = vld [vmem:[%s6031_s16 + $0x190] sm:$0xff]  ;;  %1251 = vst.msk [vmem:[#allocation3 + $0x400] sm:$0xff] %vm279_vm0, %v6456_v50  ;;  %485 = vst.msk [vmem:[#allocation3 + $0x488] sm:$0xff] %vm279_vm0, %v6456_v50 }
  0x8c   : >> { %2124 = vmatpush2.msra.mxu1 %v1732_v3  ;;  %1902 = vmatprep.subr.mxu0 %v5676_v41  ;;  %v436_v3 = vld [vmem:[#allocation2 + $0xc7] sm:$0xff]  ;;  %1252 = vst.msk [vmem:[#allocation3 + $0x428] sm:$0xff] %vm279_vm0, %v6487_v21  ;;  %486 = vst.msk [vmem:[#allocation3 + $0x4b0] sm:$0xff] %vm279_vm0, %v6487_v21 }
  0x8d   : >> { %2125 = vmatprep.subr.mxu1 %v5676_v41  ;;  %1903 = vmatpush2.msra.mxu0 %v1698_v55  ;;  %468 = vst.msk [vmem:[#allocation3 + $0x1e0] sm:$0xff] %vm279_vm0, %v436_v3  ;;  %v1725_v55 = vld [vmem:[%s6031_s16 + $0x188] sm:$0xff]  ;;  %v952_v3 = vld [vmem:[#allocation2 + $0x110] sm:$0xff] }
  0x8e   : >> { %2126 = vmatpush2.msra.mxu1 %v1731_v11  ;;  %1083 = vrot.lane.b32.xlu1 %v1010_v14, %s5675_s12  ;;  %v6463_v11 = vld [vmem:[#allocation2 + $0x1f0] sm:$0xff]  ;;  %v951_v29 = vld [vmem:[#allocation2 + $0x108] sm:$0xff]  ;;  %984 = vst.msk [vmem:[#allocation3 + $0x268] sm:$0xff] %vm279_vm0, %v952_v3 }
  0x8f   : >> { %570 = vrot.lane.b32.xlu0 %v6024_v53, %s5675_s12  ;;  %1904 = vmatprep.subr.mxu0 %v5676_v41  ;;  %v948_v53 = vld [vmem:[#allocation2 + $0xd0] sm:$0xff]  ;;  %998 = vst.msk [vmem:[#allocation3 + $0x498] sm:$0xff] %vm279_vm0, %v6463_v11  ;;  %983 = vst.msk [vmem:[#allocation3 + $0x240] sm:$0xff] %vm279_vm0, %v951_v29 }
  0x90   : >> { %2127 = vmatprep.subr.mxu1 %v5676_v41  ;;  %1905 = vmatpush2.msra.mxu0 %v1697_v2  ;;  %980 = vst.msk [vmem:[#allocation3 + $0x1c8] sm:$0xff] %vm279_vm0, %v948_v53  ;;  %v1012_v14 = vld [vmem:[#allocation2 + $0xd1] sm:$0xff]  ;;  %v1013_v53 = vld [vmem:[#allocation2 + $0xe9] sm:$0xff] }
  0x91   : >> { %2128 = vmatpush2.msra.mxu1 %v1730_v56  ;;  %1906 = vmatprep.subr.mxu0 %v5676_v41  ;;  %v6478_v2 = vld [vmem:[#allocation2 + $0x1d1] sm:$0xff]  ;;  %v6480_v56 = vld [vmem:[#allocation2 + $0x108] sm:$0xff] }
  0x92   : >> { %2129 = vmatprep.subr.mxu1 %v5676_v41  ;;  %1342 = vrot.lane.b32.xlu1 %v6405_v19, %s5675_s12  ;;  %742 = vst.msk [vmem:[#allocation3 + $0x490] sm:$0xff] %vm279_vm0, %v6478_v2 }
  0x93   : >> { %829 = vrot.lane.b32.xlu0 %v6097_v7, %s5675_s12  ;;  %1907 = vmatpush2.msra.mxu0 %v1696_v20  ;;  %v1694_v7 = vld [vmem:[%s6031_s16 + $0x90] sm:$0xff] }
  0x94   : >> { %2130 = vmatpush2.msra.mxu1 %v1729_v57  ;;  %1908 = vmatprep.subr.mxu0 %v5676_v41  ;;  %v437_v20 = vld [vmem:[#allocation2 + $0xcf] sm:$0xff] }
  0x95   : >> { %2131 = vmatprep.subr.mxu1 %v5676_v41  ;;  %1909 = vmatpush2.msra.mxu0 %v1695_v25  ;;  %v950_v57 = vld [vmem:[#allocation2 + $0xf0] sm:$0xff]  ;;  %469 = vst.msk [vmem:[#allocation3 + $0x208] sm:$0xff] %vm279_vm0, %v437_v20  ;;  %v440_v20 = vld [vmem:[#allocation2 + $0x107] sm:$0xff] }
  0x96   : >> { %2132 = vmatpush2.msra.mxu1 %v1728_v27  ;;  %1085 = vrot.lane.b32.xlu1 %v1011_v32, %s5675_s12  ;;  %982 = vst.msk [vmem:[#allocation3 + $0x218] sm:$0xff] %vm279_vm0, %v950_v57  ;;  %v6507_v25 = vld [vmem:[#allocation2 + $0x110] sm:$0xff]  ;;  %v438_v27 = vld [vmem:[#allocation2 + $0xe7] sm:$0xff]  ;;  %472 = vst.msk [vmem:[#allocation3 + $0x280] sm:$0xff] %vm279_vm0, %v440_v20 }
  0x97   : >> { %572 = vrot.lane.b32.xlu0 %v6249_v38, %s5675_s12  ;;  %1910 = vmatprep.subr.mxu0 %v5676_v41  ;;  %v949_v38 = vld [vmem:[#allocation2 + $0xe8] sm:$0xff]  ;;  %470 = vst.msk [vmem:[#allocation3 + $0x230] sm:$0xff] %vm279_vm0, %v438_v27 }
  0x98   : >> { %2133 = vmatprep.subr.mxu1 %v5676_v41  ;;  %1911 = vmatpush2.msra.mxu0 %v1694_v7  ;;  %981 = vst.msk [vmem:[#allocation3 + $0x1f0] sm:$0xff] %vm279_vm0, %v949_v38  ;;  %v6513_v32 = vld [vmem:[#allocation2 + $0x1ef] sm:$0xff]  ;;  %v6539_v38 = vld [vmem:[#allocation2 + $0x207] sm:$0xff] }
  0x99   : >> { %2134 = vmatpush2.msra.mxu1 %v1727_v34  ;;  %1912 = vmatprep.subr.mxu0 %v5676_v41  ;;  %v696_v7 = vld [vmem:[#allocation2 + $0xf1] sm:$0xff]  ;;  %1253 = vst.msk [vmem:[#allocation3 + $0x450] sm:$0xff] %vm279_vm0, %v6513_v32  ;;  %487 = vst.msk [vmem:[#allocation3 + $0x4d8] sm:$0xff] %vm279_vm0, %v6513_v32  ;;  %v953_v57 = vld [vmem:[#allocation2 + $0x128] sm:$0xff] }
  0x9a   : >> { %2135 = vmatprep.subr.mxu1 %v5676_v41  ;;  %1344 = vrot.lane.b32.xlu1 %v6443_v61, %s5675_s12  ;;  %v1014_v34 = vld [vmem:[#allocation2 + $0xf1] sm:$0xff]  ;;  %728 = vst.msk [vmem:[#allocation3 + $0x260] sm:$0xff] %vm279_vm0, %v696_v7  ;;  %1254 = vst.msk [vmem:[#allocation3 + $0x478] sm:$0xff] %vm279_vm0, %v6539_v38 }
  0x9b   : >> { %831 = vrot.lane.b32.xlu0 %v6109_v10, %s5675_s12  ;;  %1913 = vmatpush2.msra.mxu0 %v1693_v43  ;;  %v1724_v10 = vld [vmem:[%s6031_s16 + $0x180] sm:$0xff]  ;;  %v6533_v43 = vld [vmem:[#allocation2 + $0x128] sm:$0xff]  ;;  %985 = vst.msk [vmem:[#allocation3 + $0x290] sm:$0xff] %vm279_vm0, %v953_v57  ;;  %v1747_v7 = vld [vmem:[%s6031_s16 + $0x238] sm:$0xff] }
  0x9c   : >> { %2136 = vmatpush2.msra.mxu1 %v1726_v63  ;;  %1914 = vmatprep.subr.mxu0 %v5676_v41  ;;  %v439_v63 = vld [vmem:[#allocation2 + $0xef] sm:$0xff] }
  0x9d   : >> { %2137 = vmatprep.subr.mxu1 %v5676_v41  ;;  %1915 = vmatpush2.msra.mxu0 %v1692_v4  ;;  %471 = vst.msk [vmem:[#allocation3 + $0x258] sm:$0xff] %vm279_vm0, %v439_v63  ;;  %v1015_v4 = vld [vmem:[#allocation2 + $0x109] sm:$0xff] }
  0x9e   : >> { %2138 = vmatpush2.msra.mxu1 %v1725_v55  ;;  %1087 = vrot.lane.b32.xlu1 %v1012_v14, %s5675_s12 }
  0x9f   : >> { %574 = vrot.lane.b32.xlu0 %v6291_v9, %s5675_s12  ;;  %2139 = vmatprep.subr.mxu1 %v5676_v41  ;;  %v6493_v9 = vld [vmem:[#allocation2 + $0x208] sm:$0xff] }
  0xa0   : >> { %2140 = vmatpush2.msra.mxu1 %v1724_v10  ;;  %v695_v41 = vld [vmem:[#allocation2 + $0xe9] sm:$0xff]  ;;  %999 = vst.msk [vmem:[#allocation3 + $0x4c0] sm:$0xff] %vm279_vm0, %v6493_v9  ;;  %5349 = vmatprep.subr.mxu0 %v1747_v7 }
  0xa1   : >> { %727 = vst.msk [vmem:[#allocation3 + $0x238] sm:$0xff] %vm279_vm0, %v695_v41  ;;  %v6559_v41 = vld [vmem:[#allocation2 + $0x20f] sm:$0xff]  ;;  %5477 = vmatprep.subr.mxu1 %v1747_v7 }
  0xa2   : >> { %1346 = vrot.lane.b32.xlu1 %v6480_v56, %s5675_s12  ;;  %1255 = vst.msk [vmem:[#allocation3 + $0x4a0] sm:$0xff] %vm279_vm0, %v6559_v41 }
  0xa3   : >> { %833 = vrot.lane.b32.xlu0 %v6119_v13, %s5675_s12  ;;  %v6505_v13 = vld [vmem:[#allocation2 + $0x1e9] sm:$0xff] }
  0xa4   : >> { %743 = vst.msk [vmem:[#allocation3 + $0x4b8] sm:$0xff] %vm279_vm0, %v6505_v13 }
  0xa6   : >> { %1089 = vrot.lane.b32.xlu1 %v1013_v53, %s5675_s12 }
  0xa7   : >> { %576 = vrot.lane.b32.xlu0 %v6329_v24, %s5675_s12  ;;  %v6519_v24 = vld [vmem:[#allocation2 + $0x210] sm:$0xff] }
  0xa8   : >> { %1000 = vst.msk [vmem:[#allocation3 + $0x4e8] sm:$0xff] %vm279_vm0, %v6519_v24 }
  0xaa   : >> { %1348 = vrot.lane.b32.xlu1 %v6507_v25, %s5675_s12 }
  0xab   : >> { %835 = vrot.lane.b32.xlu0 %v6133_v18, %s5675_s12  ;;  %v6531_v18 = vld [vmem:[#allocation2 + $0x1f1] sm:$0xff] }
  0xac   : >> { %744 = vst.msk [vmem:[#allocation3 + $0x4e0] sm:$0xff] %vm279_vm0, %v6531_v18 }
  0xae   : >> { %1091 = vrot.lane.b32.xlu1 %v1014_v34, %s5675_s12 }
  0xaf   : >> { %578 = vrot.lane.b32.xlu0 %v6367_v54, %s5675_s12  ;;  %v697_v54 = vld [vmem:[#allocation2 + $0x109] sm:$0xff] }
  0xb0   : >> { %729 = vst.msk [vmem:[#allocation3 + $0x288] sm:$0xff] %vm279_vm0, %v697_v54 }
  0xb2   : >> { %1350 = vrot.lane.b32.xlu1 %v6533_v43, %s5675_s12 }
  0xb3   : >> { %837 = vrot.lane.b32.xlu0 %v6148_v22, %s5675_s12  ;;  %v810_v55 = vpop.permute.xlu0 %809  ;;  %v6553_v22 = vld [vmem:[#allocation2 + $0x130] sm:$0xff] }
  0xb4   : >> { %v553_v42 = vpop.permute.xlu1 %552  ;;  %905 = vst.msk [vmem:[#allocation3 + $0x8] sm:$0xff] %vm648_vm2, %v810_v55 }
  0xb5   : >> { %649 = vst.msk [vmem:[#allocation3] sm:$0xff] %vm648_vm2, %v553_v42 }
  0xb6   : >> { %1093 = vrot.lane.b32.xlu1 %v1015_v4, %s5675_s12  ;;  %v441_v4 = vld [vmem:[#allocation2 + $0x10f] sm:$0xff] }
  0xb7   : >> { %580 = vrot.lane.b32.xlu0 %v6405_v19, %s5675_s12  ;;  %v1323_v14 = vpop.permute.xlu0 %1322  ;;  %473 = vst.msk [vmem:[#allocation3 + $0x2a8] sm:$0xff] %vm279_vm0, %v441_v4 }
  0xb8   : >> { %v1066_v10 = vpop.permute.xlu1 %1065  ;;  %1418 = vst.msk [vmem:[#allocation3 + $0x18] sm:$0xff] %vm648_vm2, %v1323_v14 }
  0xb9   : >> { %1161 = vst.msk [vmem:[#allocation3 + $0x10] sm:$0xff] %vm648_vm2, %v1066_v10 }
  0xba   : >> { %1352 = vrot.lane.b32.xlu1 %v6553_v22, %s5675_s12 }
  0xbb   : >> { %839 = vrot.lane.b32.xlu0 %v6163_v28, %s5675_s12  ;;  %v812_v19 = vpop.permute.xlu0 %811  ;;  %v1515_v27 = vld [vmem:[#allocation3 + $0x8] sm:$0xff] }
  0xbc   : >> { %v1325_v53 = vpop.permute.xlu1 %1324  ;;  %v1514_v29 = vld [vmem:[#allocation3] sm:$0xff]  ;;  %906 = vst.msk [vmem:[#allocation3 + $0x30] sm:$0xff] %vm648_vm2, %v812_v19  ;;  %1916 = vmatprep.mubr.f32.mxu0 %v1515_v27  ;;  %v6574_v28 = vld [vmem:[#allocation2 + $0x148] sm:$0xff] }
  0xbd   : >> { %1419 = vst.msk [vmem:[#allocation3 + $0x40] sm:$0xff] %vm648_vm2, %v1325_v53  ;;  %1917 = vmatmul.mubr.f32.vlgmr.msra.gmra.mxu0 %v1514_v29  ;;  %v442_v53 = vld [vmem:[#allocation2 + $0x127] sm:$0xff] }
  0xbe   : >> { %1095 = vrot.lane.b32.xlu1 %v6174_v30, %s5675_s12  ;;  %5350 = vmatpush3.msra.mxu0 %v1747_v7  ;;  %474 = vst.msk [vmem:[#allocation3 + $0x2d0] sm:$0xff] %vm279_vm0, %v442_v53 }
  0xbf   : >> { %582 = vrot.lane.b32.xlu0 %v6443_v61, %s5675_s12  ;;  %v1517_v3 = vld [vmem:[#allocation3 + $0x18] sm:$0xff]  ;;  %v954_v61 = vld [vmem:[#allocation2 + $0x130] sm:$0xff] }
  0xc0   : >> { %v1068_v63 = vpop.permute.xlu1 %1067  ;;  %v1516_v54 = vld [vmem:[#allocation3 + $0x10] sm:$0xff]  ;;  %2141 = vmatprep.mubr.f32.mxu1 %v1517_v3  ;;  %986 = vst.msk [vmem:[#allocation3 + $0x2b8] sm:$0xff] %vm279_vm0, %v954_v61 }
  0xc1   : >> { %v555_v34 = vpop.permute.xlu0 %554  ;;  %1162 = vst.msk [vmem:[#allocation3 + $0x38] sm:$0xff] %vm648_vm2, %v1068_v63  ;;  %2142 = vmatmul.mubr.f32.vlgmr.msra.gmra.mxu1 %v1516_v54  ;;  %v443_v61 = vld [vmem:[#allocation2 + $0x12f] sm:$0xff] }
  0xc2   : >> { %650 = vst.msk [vmem:[#allocation3 + $0x28] sm:$0xff] %vm648_vm2, %v555_v34  ;;  %1354 = vrot.lane.b32.xlu1 %v6574_v28, %s5675_s12  ;;  %5485 = vmatpush3.msra.mxu1 %v1747_v7  ;;  %v1746_v34 = vld [vmem:[%s6031_s16 + $0x230] sm:$0xff] }
  0xc3   : >> { %841 = vrot.lane.b32.xlu0 %v6184_v35, %s5675_s12  ;;  %v1520_v42 = vld [vmem:[#allocation3 + $0x30] sm:$0xff]  ;;  %5351 = vmatprep.subr.mxu0 %v1746_v34  ;;  %475 = vst.msk [vmem:[#allocation3 + $0x2f8] sm:$0xff] %vm279_vm0, %v443_v61 }
  0xc4   : >> { %v1327_v55 = vpop.permute.xlu1 %1326  ;;  %v1522_v14 = vld [vmem:[#allocation3 + $0x40] sm:$0xff]  ;;  %1921 = vmatprep.mubr.f32.mxu0 %v1520_v42  ;;  %v6590_v35 = vld [vmem:[#allocation2 + $0x150] sm:$0xff]  ;;  %5478 = vmatprep.subr.mxu1 %v1746_v34 }
  0xc5   : >> { %v814_v30 = vpop.permute.xlu0 %813  ;;  %1420 = vst.msk [vmem:[#allocation3 + $0x68] sm:$0xff] %vm648_vm2, %v1327_v55  ;;  %2146 = vmatprep.mubr.f32.mxu1 %v1522_v14  ;;  %5352 = vmatpush3.msra.mxu0 %v1746_v34 }
  0xc6   : >> { %907 = vst.msk [vmem:[#allocation3 + $0x58] sm:$0xff] %vm648_vm2, %v814_v30  ;;  %1097 = vrot.lane.b32.xlu1 %v6186_v36, %s5675_s12  ;;  %5486 = vmatpush3.msra.mxu1 %v1746_v34 }
  0xc7   : >> { %584 = vrot.lane.b32.xlu0 %v6480_v56, %s5675_s12  ;;  %v955_v56 = vld [vmem:[#allocation2 + $0x148] sm:$0xff] }
  0xc8   : >> { %v1070_v20 = vpop.permute.xlu1 %1069  ;;  %v1521_v19 = vld [vmem:[#allocation3 + $0x38] sm:$0xff]  ;;  %987 = vst.msk [vmem:[#allocation3 + $0x2e0] sm:$0xff] %vm279_vm0, %v955_v56 }
  0xc9   : >> { %v557_v10 = vpop.permute.xlu0 %556  ;;  %v1519_v57 = vld [vmem:[#allocation3 + $0x28] sm:$0xff]  ;;  %1163 = vst.msk [vmem:[#allocation3 + $0x60] sm:$0xff] %vm648_vm2, %v1070_v20  ;;  %2147 = vmatmul.mubr.f32.gmra.mxu1 %v1521_v19 }
  0xca   : >> { %651 = vst.msk [vmem:[#allocation3 + $0x50] sm:$0xff] %vm648_vm2, %v557_v10  ;;  %1922 = vmatmul.mubr.f32.gmra.mxu0 %v1519_v57  ;;  %1356 = vrot.lane.b32.xlu1 %v6590_v35, %s5675_s12  ;;  %v444_v19 = vld [vmem:[#allocation2 + $0x147] sm:$0xff] }
  0xcb   : >> { %843 = vrot.lane.b32.xlu0 %v6193_v39, %s5675_s12  ;;  %v6607_v39 = vld [vmem:[#allocation2 + $0x168] sm:$0xff]  ;;  %476 = vst.msk [vmem:[#allocation3 + $0x320] sm:$0xff] %vm279_vm0, %v444_v19 }
  0xcc   : >> { %v1329_v27 = vpop.permute.xlu1 %1328  ;;  %v1527_v7 = vld [vmem:[#allocation3 + $0x68] sm:$0xff] }
  0xcd   : >> { %v816_v36 = vpop.permute.xlu0 %815  ;;  %v1525_v29 = vld [vmem:[#allocation3 + $0x58] sm:$0xff]  ;;  %1421 = vst.msk [vmem:[#allocation3 + $0x90] sm:$0xff] %vm648_vm2, %v1329_v27  ;;  %2151 = vmatprep.mubr.f32.mxu1 %v1527_v7  ;;  %v1745_v27 = vld [vmem:[%s6031_s16 + $0x228] sm:$0xff] }
  0xce   : >> { %908 = vst.msk [vmem:[#allocation3 + $0x80] sm:$0xff] %vm648_vm2, %v816_v36  ;;  %1926 = vmatprep.mubr.f32.mxu0 %v1525_v29  ;;  %1099 = vrot.lane.b32.xlu1 %v6195_v40, %s5675_s12  ;;  %v956_v40 = vld [vmem:[#allocation2 + $0x150] sm:$0xff] }
  0xcf   : >> { %586 = vrot.lane.b32.xlu0 %v6507_v25, %s5675_s12  ;;  %988 = vst.msk [vmem:[#allocation3 + $0x308] sm:$0xff] %vm279_vm0, %v956_v40  ;;  %5353 = vmatprep.subr.mxu0 %v1745_v27 }
  0xd0   : >> { %v1072_v3 = vpop.permute.xlu1 %1071  ;;  %v1526_v4 = vld [vmem:[#allocation3 + $0x60] sm:$0xff]  ;;  %5479 = vmatprep.subr.mxu1 %v1745_v27  ;;  %5354 = vmatpush3.msra.mxu0 %v1745_v27 }
  0xd1   : >> { %v559_v63 = vpop.permute.xlu0 %558  ;;  %v1524_v54 = vld [vmem:[#allocation3 + $0x50] sm:$0xff]  ;;  %1164 = vst.msk [vmem:[#allocation3 + $0x88] sm:$0xff] %vm648_vm2, %v1072_v3  ;;  %2152 = vmatmul.mubr.f32.gmra.mxu1 %v1526_v4 }
  0xd2   : >> { %652 = vst.msk [vmem:[#allocation3 + $0x78] sm:$0xff] %vm648_vm2, %v559_v63  ;;  %1927 = vmatmul.mubr.f32.gmra.mxu0 %v1524_v54  ;;  %1358 = vrot.lane.b32.xlu1 %v6607_v39, %s5675_s12  ;;  %v445_v63 = vld [vmem:[#allocation2 + $0x14f] sm:$0xff] }
  0xd3   : >> { %845 = vrot.lane.b32.xlu0 %v6202_v44, %s5675_s12  ;;  %v6623_v44 = vld [vmem:[#allocation2 + $0x170] sm:$0xff]  ;;  %5487 = vmatpush3.msra.mxu1 %v1745_v27  ;;  %477 = vst.msk [vmem:[#allocation3 + $0x348] sm:$0xff] %vm279_vm0, %v445_v63  ;;  %v1743_v27 = vld [vmem:[%s6031_s16 + $0x218] sm:$0xff] }
  0xd4   : >> { %v1331_v30 = vpop.permute.xlu1 %1330  ;;  %v1532_v42 = vld [vmem:[#allocation3 + $0x90] sm:$0xff] }
  0xd5   : >> { %v818_v25 = vpop.permute.xlu0 %817  ;;  %v1530_v55 = vld [vmem:[#allocation3 + $0x80] sm:$0xff]  ;;  %1422 = vst.msk [vmem:[#allocation3 + $0xb8] sm:$0xff] %vm648_vm2, %v1331_v30  ;;  %2156 = vmatprep.mubr.f32.mxu1 %v1532_v42 }
  0xd6   : >> { %909 = vst.msk [vmem:[#allocation3 + $0xa8] sm:$0xff] %vm648_vm2, %v818_v25  ;;  %1931 = vmatprep.mubr.f32.mxu0 %v1530_v55  ;;  %1101 = vrot.lane.b32.xlu1 %v6204_v45, %s5675_s12  ;;  %v1744_v42 = vld [vmem:[%s6031_s16 + $0x220] sm:$0xff] }
  0xd7   : >> { %588 = vrot.lane.b32.xlu0 %v6533_v43, %s5675_s12  ;;  %v957_v43 = vld [vmem:[#allocation2 + $0x168] sm:$0xff]  ;;  %5355 = vmatprep.subr.mxu0 %v1744_v42 }
  0xd8   : >> { %v1074_v10 = vpop.permute.xlu1 %1073  ;;  %v1531_v57 = vld [vmem:[#allocation3 + $0x88] sm:$0xff]  ;;  %989 = vst.msk [vmem:[#allocation3 + $0x330] sm:$0xff] %vm279_vm0, %v957_v43  ;;  %5480 = vmatprep.subr.mxu1 %v1744_v42  ;;  %5356 = vmatpush3.msra.mxu0 %v1744_v42 }
  0xd9   : >> { %v561_v14 = vpop.permute.xlu0 %560  ;;  %v1529_v20 = vld [vmem:[#allocation3 + $0x78] sm:$0xff]  ;;  %1165 = vst.msk [vmem:[#allocation3 + $0xb0] sm:$0xff] %vm648_vm2, %v1074_v10  ;;  %2157 = vmatmul.mubr.f32.gmra.mxu1 %v1531_v57  ;;  %5357 = vmatprep.subr.mxu0 %v1743_v27 }
  0xda   : >> { %653 = vst.msk [vmem:[#allocation3 + $0xa0] sm:$0xff] %vm648_vm2, %v561_v14  ;;  %1932 = vmatmul.mubr.f32.gmra.mxu0 %v1529_v20  ;;  %1360 = vrot.lane.b32.xlu1 %v6623_v44, %s5675_s12 }
  0xdb   : >> { %847 = vrot.lane.b32.xlu0 %v6213_v48, %s5675_s12  ;;  %5488 = vmatpush3.msra.mxu1 %v1744_v42 }
  0xdc   : >> { %v1333_v53 = vpop.permute.xlu1 %1332  ;;  %v1537_v36 = vld [vmem:[#allocation3 + $0xb8] sm:$0xff]  ;;  %5481 = vmatprep.subr.mxu1 %v1743_v27  ;;  %5358 = vmatpush3.msra.mxu0 %v1743_v27 }
  0xdd   : >> { %v820_v45 = vpop.permute.xlu0 %819  ;;  %v1535_v56 = vld [vmem:[#allocation3 + $0xa8] sm:$0xff]  ;;  %1423 = vst.msk [vmem:[#allocation3 + $0xe0] sm:$0xff] %vm648_vm2, %v1333_v53  ;;  %2161 = vmatprep.mubr.f32.mxu1 %v1537_v36  ;;  %5489 = vmatpush3.msra.mxu1 %v1743_v27 }
  0xde   : >> { %910 = vst.msk [vmem:[#allocation3 + $0xd0] sm:$0xff] %vm648_vm2, %v820_v45  ;;  %1936 = vmatprep.mubr.f32.mxu0 %v1535_v56  ;;  %1103 = vrot.lane.b32.xlu1 %v6215_v49, %s5675_s12 }
  0xdf   : >> { %590 = vrot.lane.b32.xlu0 %v6553_v22, %s5675_s12  ;;  %v958_v22 = vld [vmem:[#allocation2 + $0x170] sm:$0xff] }
  0xe0   : >> { %v1076_v29 = vpop.permute.xlu1 %1075  ;;  %v1536_v34 = vld [vmem:[#allocation3 + $0xb0] sm:$0xff]  ;;  %990 = vst.msk [vmem:[#allocation3 + $0x358] sm:$0xff] %vm279_vm0, %v958_v22 }
  0xe1   : >> { %v563_v48 = vpop.permute.xlu0 %562  ;;  %v1534_v7 = vld [vmem:[#allocation3 + $0xa0] sm:$0xff]  ;;  %1166 = vst.msk [vmem:[#allocation3 + $0xd8] sm:$0xff] %vm648_vm2, %v1076_v29  ;;  %2162 = vmatmul.mubr.f32.gmra.mxu1 %v1536_v34 }
  0xe2   : >> { %654 = vst.msk [vmem:[#allocation3 + $0xc8] sm:$0xff] %vm648_vm2, %v563_v48  ;;  %1937 = vmatmul.mubr.f32.gmra.mxu0 %v1534_v7  ;;  %1362 = vrot.lane.b32.xlu1 %v6223_v52, %s5675_s12 }
  0xe3   : >> { %849 = vrot.lane.b32.xlu0 %v6221_v51, %s5675_s12 }
  0xe4   : >> { %v1335_v3 = vpop.permute.xlu1 %1334  ;;  %v1542_v4 = vld [vmem:[#allocation3 + $0xe0] sm:$0xff] }
  0xe5   : >> { %v822_v49 = vpop.permute.xlu0 %821  ;;  %v1540_v54 = vld [vmem:[#allocation3 + $0xd0] sm:$0xff]  ;;  %1424 = vst.msk [vmem:[#allocation3 + $0x108] sm:$0xff] %vm648_vm2, %v1335_v3  ;;  %2166 = vmatprep.mubr.f32.mxu1 %v1542_v4 }
  0xe6   : >> { %911 = vst.msk [vmem:[#allocation3 + $0xf8] sm:$0xff] %vm648_vm2, %v822_v49  ;;  %1941 = vmatprep.mubr.f32.mxu0 %v1540_v54  ;;  %1105 = vrot.lane.b32.xlu1 %v6225_v58, %s5675_s12 }
  0xe7   : >> { %592 = vrot.lane.b32.xlu0 %v6574_v28, %s5675_s12 }
  0xe8   : >> { %v1078_v61 = vpop.permute.xlu1 %1077  ;;  %v1541_v25 = vld [vmem:[#allocation3 + $0xd8] sm:$0xff] }
  0xe9   : >> { %v565_v51 = vpop.permute.xlu0 %564  ;;  %v1539_v40 = vld [vmem:[#allocation3 + $0xc8] sm:$0xff]  ;;  %1167 = vst.msk [vmem:[#allocation3 + $0x100] sm:$0xff] %vm648_vm2, %v1078_v61  ;;  %2167 = vmatmul.mubr.f32.gmra.mxu1 %v1541_v25 }
  0xea   : >> { %655 = vst.msk [vmem:[#allocation3 + $0xf0] sm:$0xff] %vm648_vm2, %v565_v51  ;;  %1942 = vmatmul.mubr.f32.gmra.mxu0 %v1539_v40  ;;  %1364 = vrot.lane.b32.xlu1 %v6237_v60, %s5675_s12  ;;  %v1742_v51 = vld [vmem:[%s6031_s16 + $0x210] sm:$0xff] }
  0xeb   : >> { %851 = vrot.lane.b32.xlu0 %v6235_v59, %s5675_s12  ;;  %5359 = vmatprep.subr.mxu0 %v1742_v51 }
  0xec   : >> { %v1337_v30 = vpop.permute.xlu1 %1336  ;;  %v1547_v55 = vld [vmem:[#allocation3 + $0x108] sm:$0xff]  ;;  %5482 = vmatprep.subr.mxu1 %v1742_v51  ;;  %5360 = vmatpush3.msra.mxu0 %v1742_v51 }
  0xed   : >> { %v824_v28 = vpop.permute.xlu0 %823  ;;  %v1545_v58 = vld [vmem:[#allocation3 + $0xf8] sm:$0xff]  ;;  %1425 = vst.msk [vmem:[#allocation3 + $0x130] sm:$0xff] %vm648_vm2, %v1337_v30  ;;  %2171 = vmatprep.mubr.f32.mxu1 %v1547_v55  ;;  %5490 = vmatpush3.msra.mxu1 %v1742_v51 }
  0xee   : >> { %912 = vst.msk [vmem:[#allocation3 + $0x120] sm:$0xff] %vm648_vm2, %v824_v28  ;;  %1946 = vmatprep.mubr.f32.mxu0 %v1545_v58  ;;  %1107 = vrot.lane.b32.xlu1 %v6239_v62, %s5675_s12 }
  0xef   : >> { %594 = vrot.lane.b32.xlu0 %v6590_v35, %s5675_s12 }
  0xf0   : >> { %v1080_v14 = vpop.permute.xlu1 %1079  ;;  %v1546_v20 = vld [vmem:[#allocation3 + $0x100] sm:$0xff] }
  0xf1   : >> { %v567_v59 = vpop.permute.xlu0 %566  ;;  %v1544_v10 = vld [vmem:[#allocation3 + $0xf0] sm:$0xff]  ;;  %1168 = vst.msk [vmem:[#allocation3 + $0x128] sm:$0xff] %vm648_vm2, %v1080_v14  ;;  %2172 = vmatmul.mubr.f32.gmra.mxu1 %v1546_v20 }
  0xf2   : >> { %656 = vst.msk [vmem:[#allocation3 + $0x118] sm:$0xff] %vm648_vm2, %v567_v59  ;;  %1947 = vmatmul.mubr.f32.gmra.mxu0 %v1544_v10  ;;  %1366 = vrot.lane.b32.xlu1 %v6273_v5, %s5675_s12  ;;  %v1741_v10 = vld [vmem:[%s6031_s16 + $0x208] sm:$0xff] }
  0xf3   : >> { %853 = vrot.lane.b32.xlu0 %v6265_v1, %s5675_s12  ;;  %5361 = vmatprep.subr.mxu0 %v1741_v10 }
  0xf4   : >> { %v1339_v35 = vpop.permute.xlu1 %1338  ;;  %v1552_v19 = vld [vmem:[#allocation3 + $0x130] sm:$0xff]  ;;  %5483 = vmatprep.subr.mxu1 %v1741_v10  ;;  %5362 = vmatpush3.msra.mxu0 %v1741_v10 }
  0xf5   : >> { %v826_v62 = vpop.permute.xlu0 %825  ;;  %v1550_v57 = vld [vmem:[#allocation3 + $0x120] sm:$0xff]  ;;  %1426 = vst.msk [vmem:[#allocation3 + $0x158] sm:$0xff] %vm648_vm2, %v1339_v35  ;;  %2176 = vmatprep.mubr.f32.mxu1 %v1552_v19  ;;  %5491 = vmatpush3.msra.mxu1 %v1741_v10 }
  0xf6   : >> { %913 = vst.msk [vmem:[#allocation3 + $0x148] sm:$0xff] %vm648_vm2, %v826_v62  ;;  %1951 = vmatprep.mubr.f32.mxu0 %v1550_v57  ;;  %1109 = vrot.lane.b32.xlu1 %v6289_v8, %s5675_s12 }
  0xf7   : >> { %596 = vrot.lane.b32.xlu0 %v6607_v39, %s5675_s12 }
  0xf8   : >> { %v1082_v43 = vpop.permute.xlu1 %1081  ;;  %v1551_v53 = vld [vmem:[#allocation3 + $0x128] sm:$0xff] }
  0xf9   : >> { %v569_v1 = vpop.permute.xlu0 %568  ;;  %v1549_v45 = vld [vmem:[#allocation3 + $0x118] sm:$0xff]  ;;  %1169 = vst.msk [vmem:[#allocation3 + $0x150] sm:$0xff] %vm648_vm2, %v1082_v43  ;;  %2177 = vmatmul.mubr.f32.gmra.mxu1 %v1551_v53 }
  0xfa   : >> { %657 = vst.msk [vmem:[#allocation3 + $0x140] sm:$0xff] %vm648_vm2, %v569_v1  ;;  %1952 = vmatmul.mubr.f32.gmra.mxu0 %v1549_v45  ;;  %1368 = vrot.lane.b32.xlu1 %v6311_v17, %s5675_s12  ;;  %v1224_v1 = vld [vmem:[#allocation2 + $0x227] sm:$0xff] }
  0xfb   : >> { %855 = vrot.lane.b32.xlu0 %v6304_v15, %s5675_s12  ;;  %1256 = vst.msk [vmem:[#allocation3 + $0x4c8] sm:$0xff] %vm279_vm0, %v1224_v1  ;;  %v1460_v1 = vld [vmem:[#allocation2 + $0xe9] sm:$0xff] }
  0xfc   : >> { %v1341_v56 = vpop.permute.xlu1 %1340  ;;  %v1557_v36 = vld [vmem:[#allocation3 + $0x158] sm:$0xff]  ;;  %1492 = vst.msk [vmem:[#allocation3 + $0x1b0] sm:$0xff] %vm279_vm0, %v1460_v1 }
  0xfd   : >> { %v828_v39 = vpop.permute.xlu0 %827  ;;  %v1555_v8 = vld [vmem:[#allocation3 + $0x148] sm:$0xff]  ;;  %1427 = vst.msk [vmem:[#allocation3 + $0x180] sm:$0xff] %vm648_vm2, %v1341_v56  ;;  %2181 = vmatprep.mubr.f32.mxu1 %v1557_v36 }
  0xfe   : >> { %914 = vst.msk [vmem:[#allocation3 + $0x170] sm:$0xff] %vm648_vm2, %v828_v39  ;;  %1956 = vmatprep.mubr.f32.mxu0 %v1555_v8  ;;  %1111 = vrot.lane.b32.xlu1 %v6327_v23, %s5675_s12  ;;  %v1225_v56 = vld [vmem:[#allocation2 + $0x22f] sm:$0xff]  ;;  %v1740_v8 = vld [vmem:[%s6031_s16 + $0x200] sm:$0xff] }
  0xff   : >> { %598 = vrot.lane.b32.xlu0 %v6623_v44, %s5675_s12  ;;  %1257 = vst.msk [vmem:[#allocation3 + $0x4f0] sm:$0xff] %vm279_vm0, %v1225_v56  ;;  %5363 = vmatprep.subr.mxu0 %v1740_v8  ;;  %v1478_v56 = vld [vmem:[#allocation2 + $0x209] sm:$0xff] }
 0x100   : >> { %v1084_v48 = vpop.permute.xlu1 %1083  ;;  %v1556_v7 = vld [vmem:[#allocation3 + $0x150] sm:$0xff]  ;;  %5484 = vmatprep.subr.mxu1 %v1740_v8  ;;  %5364 = vmatpush3.msra.mxu0 %v1740_v8  ;;  %1510 = vst.msk [vmem:[#allocation3 + $0x480] sm:$0xff] %vm279_vm0, %v1478_v56 }
 0x101   : >> { %v571_v15 = vpop.permute.xlu0 %570  ;;  %v1554_v29 = vld [vmem:[#allocation3 + $0x140] sm:$0xff]  ;;  %1170 = vst.msk [vmem:[#allocation3 + $0x178] sm:$0xff] %vm648_vm2, %v1084_v48  ;;  %2182 = vmatmul.mubr.f32.gmra.mxu1 %v1556_v7  ;;  %4096 = vmatprep.subr.mxu0 (%p420_p4), %v5674_v0 }
 0x102   : >> { %658 = vst.msk [vmem:[#allocation3 + $0x168] sm:$0xff] %vm648_vm2, %v571_v15  ;;  %1957 = vmatmul.mubr.f32.gmra.mxu0 %v1554_v29  ;;  %1370 = vrot.lane.b32.xlu1 %v6349_v33, %s5675_s12 }
 0x103   : >> { %857 = vrot.lane.b32.xlu0 %v6342_v31, %s5675_s12  ;;  %5492 = vmatpush3.msra.mxu1 %v1740_v8  ;;  %v1463_v8 = vld [vmem:[#allocation2 + $0x111] sm:$0xff] }
 0x104   : >> { %v1343_v44 = vpop.permute.xlu1 %1342  ;;  %v1562_v63 = vld [vmem:[#allocation3 + $0x180] sm:$0xff]  ;;  %1495 = vst.msk [vmem:[#allocation3 + $0x228] sm:$0xff] %vm279_vm0, %v1463_v8  ;;  %4321 = vmatprep.subr.mxu1 (%p420_p4), %v5674_v0 }
 0x105   : >> { %v830_v23 = vpop.permute.xlu0 %829  ;;  %v1560_v34 = vld [vmem:[#allocation3 + $0x170] sm:$0xff]  ;;  %1428 = vst.msk [vmem:[#allocation3 + $0x1a8] sm:$0xff] %vm648_vm2, %v1343_v44  ;;  %2186 = vmatprep.mubr.f32.mxu1 %v1562_v63 }
 0x106   : >> { %915 = vst.msk [vmem:[#allocation3 + $0x198] sm:$0xff] %vm648_vm2, %v830_v23  ;;  %1961 = vmatprep.mubr.f32.mxu0 %v1560_v34  ;;  %1113 = vrot.lane.b32.xlu1 %v6365_v47, %s5675_s12  ;;  %v1450_v23 = vld [vmem:[#allocation2 + $0x49] sm:$0xff]  ;;  %v1451_v34 = vld [vmem:[#allocation2 + $0x51] sm:$0xff] }
 0x107   : >> { %600 = vrot.lane.b32.xlu0 %v6223_v52, %s5675_s12  ;;  %1482 = vst.msk [vmem:[#allocation3 + $0x20] sm:$0xff] %vm279_vm0, %v1450_v23  ;;  %v1466_v44 = vld [vmem:[#allocation2 + $0x149] sm:$0xff]  ;;  %v1467_v63 = vld [vmem:[#allocation2 + $0x151] sm:$0xff]  ;;  %1483 = vst.msk [vmem:[#allocation3 + $0x48] sm:$0xff] %vm279_vm0, %v1451_v34 }
 0x108   : >> { %v1086_v22 = vpop.permute.xlu1 %1085  ;;  %v1561_v3 = vld [vmem:[#allocation3 + $0x178] sm:$0xff]  ;;  %1498 = vst.msk [vmem:[#allocation3 + $0x2a0] sm:$0xff] %vm279_vm0, %v1466_v44  ;;  %1499 = vst.msk [vmem:[#allocation3 + $0x2c8] sm:$0xff] %vm279_vm0, %v1467_v63 }
 0x109   : >> { %v573_v31 = vpop.permute.xlu0 %572  ;;  %v1559_v49 = vld [vmem:[#allocation3 + $0x168] sm:$0xff]  ;;  %1171 = vst.msk [vmem:[#allocation3 + $0x1a0] sm:$0xff] %vm648_vm2, %v1086_v22  ;;  %2187 = vmatmul.mubr.f32.gmra.mxu1 %v1561_v3 }
 0x10a   : >> { %659 = vst.msk [vmem:[#allocation3 + $0x190] sm:$0xff] %vm648_vm2, %v573_v31  ;;  %1962 = vmatmul.mubr.f32.gmra.mxu0 %v1559_v49  ;;  %1372 = vrot.lane.b32.xlu1 %v6387_v12, %s5675_s12 }
 0x10b   : >> { %859 = vrot.lane.b32.xlu0 %v6380_v6, %s5675_s12 }
 0x10c   : >> { %v1345_v54 = vpop.permute.xlu1 %1344  ;;  %v1567_v4 = vld [vmem:[#allocation3 + $0x1a8] sm:$0xff] }
 0x10d   : >> { %v832_v52 = vpop.permute.xlu0 %831  ;;  %v1565_v47 = vld [vmem:[#allocation3 + $0x198] sm:$0xff]  ;;  %1429 = vst.msk [vmem:[#allocation3 + $0x1d0] sm:$0xff] %vm648_vm2, %v1345_v54  ;;  %2191 = vmatprep.mubr.f32.mxu1 %v1567_v4 }
 0x10e   : >> { %916 = vst.msk [vmem:[#allocation3 + $0x1c0] sm:$0xff] %vm648_vm2, %v832_v52  ;;  %1966 = vmatprep.mubr.f32.mxu0 %v1565_v47  ;;  %1115 = vrot.lane.b32.xlu1 %v6403_v16, %s5675_s12  ;;  %v1452_v52 = vld [vmem:[#allocation2 + $0x69] sm:$0xff]  ;;  %v1453_v54 = vld [vmem:[#allocation2 + $0x71] sm:$0xff] }
 0x10f   : >> { %602 = vrot.lane.b32.xlu0 %v6237_v60, %s5675_s12  ;;  %1484 = vst.msk [vmem:[#allocation3 + $0x70] sm:$0xff] %vm279_vm0, %v1452_v52  ;;  %v1469_v47 = vld [vmem:[#allocation2 + $0x171] sm:$0xff]  ;;  %1485 = vst.msk [vmem:[#allocation3 + $0x98] sm:$0xff] %vm279_vm0, %v1453_v54 }
 0x110   : >> { %v1088_v61 = vpop.permute.xlu1 %1087  ;;  %v1566_v25 = vld [vmem:[#allocation3 + $0x1a0] sm:$0xff]  ;;  %1501 = vst.msk [vmem:[#allocation3 + $0x318] sm:$0xff] %vm279_vm0, %v1469_v47  ;;  %v1032_v4 = vld [vmem:[#allocation2 + $0x211] sm:$0xff] }
 0x111   : >> { %v575_v6 = vpop.permute.xlu0 %574  ;;  %v1564_v40 = vld [vmem:[#allocation3 + $0x190] sm:$0xff]  ;;  %1172 = vst.msk [vmem:[#allocation3 + $0x1c8] sm:$0xff] %vm648_vm2, %v1088_v61  ;;  %2192 = vmatmul.mubr.f32.gmra.mxu1 %v1566_v25 }
 0x112   : >> { %660 = vst.msk [vmem:[#allocation3 + $0x1b8] sm:$0xff] %vm648_vm2, %v575_v6  ;;  %1967 = vmatmul.mubr.f32.gmra.mxu0 %v1564_v40  ;;  %1374 = vrot.lane.b32.xlu1 %v6425_v46, %s5675_s12  ;;  %v1470_v25 = vld [vmem:[#allocation2 + $0x189] sm:$0xff] }
 0x113   : >> { %861 = vrot.lane.b32.xlu0 %v6418_v26, %s5675_s12  ;;  %1502 = vst.msk [vmem:[#allocation3 + $0x340] sm:$0xff] %vm279_vm0, %v1470_v25 }
 0x114   : >> { %v1347_v16 = vpop.permute.xlu1 %1346  ;;  %v1572_v30 = vld [vmem:[#allocation3 + $0x1d0] sm:$0xff] }
 0x115   : >> { %v834_v60 = vpop.permute.xlu0 %833  ;;  %v1570_v28 = vld [vmem:[#allocation3 + $0x1c0] sm:$0xff]  ;;  %1430 = vst.msk [vmem:[#allocation3 + $0x1f8] sm:$0xff] %vm648_vm2, %v1347_v16  ;;  %2196 = vmatprep.mubr.f32.mxu1 %v1572_v30  ;;  %v1471_v16 = vld [vmem:[#allocation2 + $0x191] sm:$0xff] }
 0x116   : >> { %917 = vst.msk [vmem:[#allocation3 + $0x1e8] sm:$0xff] %vm648_vm2, %v834_v60  ;;  %1971 = vmatprep.mubr.f32.mxu0 %v1570_v28  ;;  %1117 = vrot.lane.b32.xlu1 %v6441_v37, %s5675_s12  ;;  %v1455_v60 = vld [vmem:[#allocation2 + $0x91] sm:$0xff] }
 0x117   : >> { %604 = vrot.lane.b32.xlu0 %v6273_v5, %s5675_s12  ;;  %1487 = vst.msk [vmem:[#allocation3 + $0xe8] sm:$0xff] %vm279_vm0, %v1455_v60  ;;  %1503 = vst.msk [vmem:[#allocation3 + $0x368] sm:$0xff] %vm279_vm0, %v1471_v16 }
 0x118   : >> { %v1090_v58 = vpop.permute.xlu1 %1089  ;;  %v1571_v42 = vld [vmem:[#allocation3 + $0x1c8] sm:$0xff] }
 0x119   : >> { %v577_v26 = vpop.permute.xlu0 %576  ;;  %v1569_v55 = vld [vmem:[#allocation3 + $0x1b8] sm:$0xff]  ;;  %1173 = vst.msk [vmem:[#allocation3 + $0x1f0] sm:$0xff] %vm648_vm2, %v1090_v58  ;;  %2197 = vmatmul.mubr.f32.gmra.mxu1 %v1571_v42 }
 0x11a   : >> { %661 = vst.msk [vmem:[#allocation3 + $0x1e0] sm:$0xff] %vm648_vm2, %v577_v26  ;;  %1972 = vmatmul.mubr.f32.gmra.mxu0 %v1569_v55  ;;  %1376 = vrot.lane.b32.xlu1 %v6463_v11, %s5675_s12  ;;  %v1472_v55 = vld [vmem:[#allocation2 + $0x1a9] sm:$0xff]  ;;  %v1457_v42 = vld [vmem:[#allocation2 + $0xb1] sm:$0xff] }
 0x11b   : >> { %863 = vrot.lane.b32.xlu0 %v6456_v50, %s5675_s12  ;;  %1504 = vst.msk [vmem:[#allocation3 + $0x390] sm:$0xff] %vm279_vm0, %v1472_v55  ;;  %1489 = vst.msk [vmem:[#allocation3 + $0x138] sm:$0xff] %vm279_vm0, %v1457_v42 }
 0x11c   : >> { %v1349_v59 = vpop.permute.xlu1 %1348  ;;  %v1577_v14 = vld [vmem:[#allocation3 + $0x1f8] sm:$0xff] }
 0x11d   : >> { %v836_v5 = vpop.permute.xlu0 %835  ;;  %v1575_v37 = vld [vmem:[#allocation3 + $0x1e8] sm:$0xff]  ;;  %1431 = vst.msk [vmem:[#allocation3 + $0x220] sm:$0xff] %vm648_vm2, %v1349_v59  ;;  %2201 = vmatprep.mubr.f32.mxu1 %v1577_v14 }
 0x11e   : >> { %918 = vst.msk [vmem:[#allocation3 + $0x210] sm:$0xff] %vm648_vm2, %v836_v5  ;;  %1976 = vmatprep.mubr.f32.mxu0 %v1575_v37  ;;  %1119 = vrot.lane.b32.xlu1 %v6478_v2, %s5675_s12  ;;  %v1473_v5 = vld [vmem:[#allocation2 + $0x1b1] sm:$0xff] }
 0x11f   : >> { %606 = vrot.lane.b32.xlu0 %v6311_v17, %s5675_s12  ;;  %1505 = vst.msk [vmem:[#allocation3 + $0x3b8] sm:$0xff] %vm279_vm0, %v1473_v5 }
 0x120   : >> { %v1092_v20 = vpop.permute.xlu1 %1091  ;;  %v1576_v35 = vld [vmem:[#allocation3 + $0x1f0] sm:$0xff] }
 0x121   : >> { %v579_v50 = vpop.permute.xlu0 %578  ;;  %v1574_v62 = vld [vmem:[#allocation3 + $0x1e0] sm:$0xff]  ;;  %1174 = vst.msk [vmem:[#allocation3 + $0x218] sm:$0xff] %vm648_vm2, %v1092_v20  ;;  %2202 = vmatmul.mubr.f32.gmra.mxu1 %v1576_v35  ;;  %v1474_v20 = vld [vmem:[#allocation2 + $0x1c9] sm:$0xff]  ;;  %v1475_v35 = vld [vmem:[#allocation2 + $0x1d1] sm:$0xff] }
 0x122   : >> { %662 = vst.msk [vmem:[#allocation3 + $0x208] sm:$0xff] %vm648_vm2, %v579_v50  ;;  %1977 = vmatmul.mubr.f32.gmra.mxu0 %v1574_v62  ;;  %1378 = vrot.lane.b32.xlu1 %v6493_v9, %s5675_s12  ;;  %v1458_v50 = vld [vmem:[#allocation2 + $0xc9] sm:$0xff]  ;;  %v1459_v62 = vld [vmem:[#allocation2 + $0xd1] sm:$0xff] }
 0x123   : >> { %865 = vrot.lane.b32.xlu0 %v6487_v21, %s5675_s12  ;;  %1490 = vst.msk [vmem:[#allocation3 + $0x160] sm:$0xff] %vm279_vm0, %v1458_v50  ;;  %1506 = vst.msk [vmem:[#allocation3 + $0x3e0] sm:$0xff] %vm279_vm0, %v1474_v20 }
 0x124   : >> { %v1351_v2 = vpop.permute.xlu1 %1350  ;;  %v1582_v19 = vld [vmem:[#allocation3 + $0x220] sm:$0xff]  ;;  %1491 = vst.msk [vmem:[#allocation3 + $0x188] sm:$0xff] %vm279_vm0, %v1459_v62  ;;  %1507 = vst.msk [vmem:[#allocation3 + $0x408] sm:$0xff] %vm279_vm0, %v1475_v35 }
 0x125   : >> { %v838_v17 = vpop.permute.xlu0 %837  ;;  %v1580_v57 = vld [vmem:[#allocation3 + $0x210] sm:$0xff]  ;;  %1432 = vst.msk [vmem:[#allocation3 + $0x248] sm:$0xff] %vm648_vm2, %v1351_v2  ;;  %2206 = vmatprep.mubr.f32.mxu1 %v1582_v19 }
 0x126   : >> { %919 = vst.msk [vmem:[#allocation3 + $0x238] sm:$0xff] %vm648_vm2, %v838_v17  ;;  %1981 = vmatprep.mubr.f32.mxu0 %v1580_v57  ;;  %1121 = vrot.lane.b32.xlu1 %v6505_v13, %s5675_s12 }
 0x127   : >> { %608 = vrot.lane.b32.xlu0 %v6349_v33, %s5675_s12 }
 0x128   : >> { %v1094_v9 = vpop.permute.xlu1 %1093  ;;  %v1581_v45 = vld [vmem:[#allocation3 + $0x218] sm:$0xff] }
 0x129   : >> { %v581_v21 = vpop.permute.xlu0 %580  ;;  %v1579_v43 = vld [vmem:[#allocation3 + $0x208] sm:$0xff]  ;;  %1175 = vst.msk [vmem:[#allocation3 + $0x240] sm:$0xff] %vm648_vm2, %v1094_v9  ;;  %2207 = vmatmul.mubr.f32.gmra.mxu1 %v1581_v45  ;;  %v1461_v9 = vld [vmem:[#allocation2 + $0xf1] sm:$0xff] }
 0x12a   : >> { %663 = vst.msk [vmem:[#allocation3 + $0x230] sm:$0xff] %vm648_vm2, %v581_v21  ;;  %1982 = vmatmul.mubr.f32.gmra.mxu0 %v1579_v43  ;;  %1380 = vrot.lane.b32.xlu1 %v6519_v24, %s5675_s12  ;;  %v1476_v21 = vld [vmem:[#allocation2 + $0x1e9] sm:$0xff]  ;;  %v1477_v43 = vld [vmem:[#allocation2 + $0x1f1] sm:$0xff] }
 0x12b   : >> { %867 = vrot.lane.b32.xlu0 %v6513_v32, %s5675_s12  ;;  %v1288_v32 = vld [vmem:[#allocation2 + $0x228] sm:$0xff]  ;;  %1508 = vst.msk [vmem:[#allocation3 + $0x430] sm:$0xff] %vm279_vm0, %v1476_v21  ;;  %1493 = vst.msk [vmem:[#allocation3 + $0x1d8] sm:$0xff] %vm279_vm0, %v1461_v9  ;;  %v6857_v21 = vld [vmem:[%s1748_s19] ss:$0 sm:$0xff] }
 0x12c   : >> { %v1353_v53 = vpop.permute.xlu1 %1352  ;;  %v1587_v39 = vld [vmem:[#allocation3 + $0x248] sm:$0xff]  ;;  %1509 = vst.msk [vmem:[#allocation3 + $0x458] sm:$0xff] %vm279_vm0, %v1477_v43 }
 0x12d   : >> { %v840_v33 = vpop.permute.xlu0 %839  ;;  %v1585_v13 = vld [vmem:[#allocation3 + $0x238] sm:$0xff]  ;;  %1433 = vst.msk [vmem:[#allocation3 + $0x270] sm:$0xff] %vm648_vm2, %v1353_v53  ;;  %2211 = vmatprep.mubr.f32.mxu1 %v1587_v39  ;;  %v1462_v39 = vld [vmem:[#allocation2 + $0x109] sm:$0xff] }
 0x12e   : >> { %920 = vst.msk [vmem:[#allocation3 + $0x260] sm:$0xff] %vm648_vm2, %v840_v33  ;;  %1986 = vmatprep.mubr.f32.mxu0 %v1585_v13  ;;  %1123 = vrot.lane.b32.xlu1 %v6531_v18, %s5675_s12 }
 0x12f   : >> { %610 = vrot.lane.b32.xlu0 %v6387_v12, %s5675_s12  ;;  %v1031_v12 = vld [vmem:[#allocation2 + $0x209] sm:$0xff]  ;;  %1494 = vst.msk [vmem:[#allocation3 + $0x200] sm:$0xff] %vm279_vm0, %v1462_v39 }
 0x130   : >> { %v1096_v36 = vpop.permute.xlu1 %1095  ;;  %v1586_v15 = vld [vmem:[#allocation3 + $0x240] sm:$0xff] }
 0x131   : >> { %v583_v24 = vpop.permute.xlu0 %582  ;;  %v1584_v27 = vld [vmem:[#allocation3 + $0x230] sm:$0xff]  ;;  %1176 = vst.msk [vmem:[#allocation3 + $0x268] sm:$0xff] %vm648_vm2, %v1096_v36  ;;  %2212 = vmatmul.mubr.f32.gmra.mxu1 %v1586_v15 }
 0x132   : >> { %664 = vst.msk [vmem:[#allocation3 + $0x258] sm:$0xff] %vm648_vm2, %v583_v24  ;;  %1987 = vmatmul.mubr.f32.gmra.mxu0 %v1584_v27  ;;  %1382 = vrot.lane.b32.xlu1 %v1288_v32, %s5675_s12  ;;  %v1479_v32 = vld [vmem:[#allocation2 + $0x211] sm:$0xff] }
 0x133   : >> { %869 = vrot.lane.b32.xlu0 %v6539_v38, %s5675_s12  ;;  %v1289_v38 = vld [vmem:[#allocation2 + $0x230] sm:$0xff]  ;;  %1511 = vst.msk [vmem:[#allocation3 + $0x4a8] sm:$0xff] %vm279_vm0, %v1479_v32 }
 0x134   : >> { %v1355_v48 = vpop.permute.xlu1 %1354  ;;  %v1592_v7 = vld [vmem:[#allocation3 + $0x270] sm:$0xff] }
 0x135   : >> { %v842_v18 = vpop.permute.xlu0 %841  ;;  %v1590_v29 = vld [vmem:[#allocation3 + $0x260] sm:$0xff]  ;;  %1434 = vst.msk [vmem:[#allocation3 + $0x298] sm:$0xff] %vm648_vm2, %v1355_v48  ;;  %2216 = vmatprep.mubr.f32.mxu1 %v1592_v7  ;;  %v1465_v48 = vld [vmem:[#allocation2 + $0x131] sm:$0xff] }
 0x136   : >> { %921 = vst.msk [vmem:[#allocation3 + $0x288] sm:$0xff] %vm648_vm2, %v842_v18  ;;  %1991 = vmatprep.mubr.f32.mxu0 %v1590_v29  ;;  %1125 = vrot.lane.b32.xlu1 %v1031_v12, %s5675_s12  ;;  %v1464_v12 = vld [vmem:[#allocation2 + $0x129] sm:$0xff]  ;;  %v1481_v29 = vld [vmem:[#allocation2 + $0x231] sm:$0xff] }
 0x137   : >> { %612 = vrot.lane.b32.xlu0 %v6425_v46, %s5675_s12  ;;  %v1468_v46 = vld [vmem:[#allocation2 + $0x169] sm:$0xff]  ;;  %1496 = vst.msk [vmem:[#allocation3 + $0x250] sm:$0xff] %vm279_vm0, %v1464_v12  ;;  %1497 = vst.msk [vmem:[#allocation3 + $0x278] sm:$0xff] %vm279_vm0, %v1465_v48 }
 0x138   : >> { %v1098_v22 = vpop.permute.xlu1 %1097  ;;  %v1591_v3 = vld [vmem:[#allocation3 + $0x268] sm:$0xff]  ;;  %1500 = vst.msk [vmem:[#allocation3 + $0x2f0] sm:$0xff] %vm279_vm0, %v1468_v46  ;;  %1513 = vst.msk [vmem:[#allocation3 + $0x4f8] sm:$0xff] %vm279_vm0, %v1481_v29 }
 0x139   : >> { %v585_v31 = vpop.permute.xlu0 %584  ;;  %v1589_v49 = vld [vmem:[#allocation3 + $0x258] sm:$0xff]  ;;  %1177 = vst.msk [vmem:[#allocation3 + $0x290] sm:$0xff] %vm648_vm2, %v1098_v22  ;;  %2217 = vmatmul.mubr.f32.gmra.mxu1 %v1591_v3  ;;  %v1480_v18 = vld [vmem:[#allocation2 + $0x229] sm:$0xff] }
 0x13a   : >> { %665 = vst.msk [vmem:[#allocation3 + $0x280] sm:$0xff] %vm648_vm2, %v585_v31  ;;  %1992 = vmatmul.mubr.f32.gmra.mxu0 %v1589_v49  ;;  %1384 = vrot.lane.b32.xlu1 %v1289_v38, %s5675_s12 }
 0x13b   : >> { %871 = vrot.lane.b32.xlu0 %v6559_v41, %s5675_s12  ;;  %v1454_v41 = vld [vmem:[#allocation2 + $0x89] sm:$0xff]  ;;  %1512 = vst.msk [vmem:[#allocation3 + $0x4d0] sm:$0xff] %vm279_vm0, %v1480_v18 }
 0x13c   : >> { %v1357_v6 = vpop.permute.xlu1 %1356  ;;  %v1597_v40 = vld [vmem:[#allocation3 + $0x298] sm:$0xff]  ;;  %1486 = vst.msk [vmem:[#allocation3 + $0xc0] sm:$0xff] %vm279_vm0, %v1454_v41 }
 0x13d   : >> { %v844_v51 = vpop.permute.xlu0 %843  ;;  %v1595_v61 = vld [vmem:[#allocation3 + $0x288] sm:$0xff]  ;;  %1435 = vst.msk [vmem:[#allocation3 + $0x2c0] sm:$0xff] %vm648_vm2, %v1357_v6  ;;  %2221 = vmatprep.mubr.f32.mxu1 %v1597_v40 }
 0x13e   : >> { %922 = vst.msk [vmem:[#allocation3 + $0x2b0] sm:$0xff] %vm648_vm2, %v844_v51  ;;  %1996 = vmatprep.mubr.f32.mxu0 %v1595_v61  ;;  %1127 = vrot.lane.b32.xlu1 %v1032_v4, %s5675_s12 }
 0x13f   : >> { %614 = vrot.lane.b32.xlu0 %v6463_v11, %s5675_s12  ;;  %v1456_v11 = vld [vmem:[#allocation2 + $0xa9] sm:$0xff] }
 0x140   : >> { %v1100_v30 = vpop.permute.xlu1 %1099  ;;  %v1596_v58 = vld [vmem:[#allocation3 + $0x290] sm:$0xff]  ;;  %1488 = vst.msk [vmem:[#allocation3 + $0x110] sm:$0xff] %vm279_vm0, %v1456_v11 }
 0x141   : >> { %v587_v28 = vpop.permute.xlu0 %586  ;;  %v1594_v26 = vld [vmem:[#allocation3 + $0x280] sm:$0xff]  ;;  %1178 = vst.msk [vmem:[#allocation3 + $0x2b8] sm:$0xff] %vm648_vm2, %v1100_v30  ;;  %2222 = vmatmul.mubr.f32.gmra.mxu1 %v1596_v58 }
 0x142   : >> { %666 = vst.msk [vmem:[#allocation3 + $0x2a8] sm:$0xff] %vm648_vm2, %v587_v28  ;;  %1997 = vmatmul.mubr.f32.gmra.mxu0 %v1594_v26 }
 0x144   : >> { %v1359_v37 = vpop.permute.xlu1 %1358  ;;  %v1602_v10 = vld [vmem:[#allocation3 + $0x2c0] sm:$0xff] }
 0x145   : >> { %v846_v59 = vpop.permute.xlu0 %845  ;;  %v1600_v14 = vld [vmem:[#allocation3 + $0x2b0] sm:$0xff]  ;;  %1436 = vst.msk [vmem:[#allocation3 + $0x2e8] sm:$0xff] %vm648_vm2, %v1359_v37  ;;  %2226 = vmatprep.mubr.f32.mxu1 %v1602_v10 }
 0x146   : >> { %923 = vst.msk [vmem:[#allocation3 + $0x2d8] sm:$0xff] %vm648_vm2, %v846_v59  ;;  %2001 = vmatprep.mubr.f32.mxu0 %v1600_v14 }
 0x148   : >> { %v1102_v2 = vpop.permute.xlu1 %1101  ;;  %v1601_v19 = vld [vmem:[#allocation3 + $0x2b8] sm:$0xff] }
 0x149   : >> { %v589_v17 = vpop.permute.xlu0 %588  ;;  %v1599_v57 = vld [vmem:[#allocation3 + $0x2a8] sm:$0xff]  ;;  %1179 = vst.msk [vmem:[#allocation3 + $0x2e0] sm:$0xff] %vm648_vm2, %v1102_v2  ;;  %2227 = vmatmul.mubr.f32.gmra.mxu1 %v1601_v19 }
 0x14a   : >> { %667 = vst.msk [vmem:[#allocation3 + $0x2d0] sm:$0xff] %vm648_vm2, %v589_v17  ;;  %2002 = vmatmul.mubr.f32.gmra.mxu0 %v1599_v57 }
 0x14c   : >> { %v1361_v33 = vpop.permute.xlu1 %1360  ;;  %v1607_v13 = vld [vmem:[#allocation3 + $0x2e8] sm:$0xff] }
 0x14d   : >> { %v848_v45 = vpop.permute.xlu0 %847  ;;  %v1605_v53 = vld [vmem:[#allocation3 + $0x2d8] sm:$0xff]  ;;  %1437 = vst.msk [vmem:[#allocation3 + $0x310] sm:$0xff] %vm648_vm2, %v1361_v33  ;;  %2231 = vmatprep.mubr.f32.mxu1 %v1607_v13 }
 0x14e   : >> { %924 = vst.msk [vmem:[#allocation3 + $0x300] sm:$0xff] %vm648_vm2, %v848_v45  ;;  %2006 = vmatprep.mubr.f32.mxu0 %v1605_v53 }
 0x150   : >> { %v1104_v36 = vpop.permute.xlu1 %1103  ;;  %v1606_v15 = vld [vmem:[#allocation3 + $0x2e0] sm:$0xff] }
 0x151   : >> { %v591_v24 = vpop.permute.xlu0 %590  ;;  %v1604_v27 = vld [vmem:[#allocation3 + $0x2d0] sm:$0xff]  ;;  %1180 = vst.msk [vmem:[#allocation3 + $0x308] sm:$0xff] %vm648_vm2, %v1104_v36  ;;  %2232 = vmatmul.mubr.f32.gmra.mxu1 %v1606_v15 }
 0x152   : >> { %668 = vst.msk [vmem:[#allocation3 + $0x2f8] sm:$0xff] %vm648_vm2, %v591_v24  ;;  %2007 = vmatmul.mubr.f32.gmra.mxu0 %v1604_v27 }
 0x154   : >> { %v1363_v23 = vpop.permute.xlu1 %1362  ;;  %v1612_v34 = vld [vmem:[#allocation3 + $0x310] sm:$0xff] }
 0x155   : >> { %v850_v7 = vpop.permute.xlu0 %849  ;;  %v1610_v44 = vld [vmem:[#allocation3 + $0x300] sm:$0xff]  ;;  %1438 = vst.msk [vmem:[#allocation3 + $0x338] sm:$0xff] %vm648_vm2, %v1363_v23  ;;  %2236 = vmatprep.mubr.f32.mxu1 %v1612_v34 }
 0x156   : >> { %925 = vst.msk [vmem:[#allocation3 + $0x328] sm:$0xff] %vm648_vm2, %v850_v7  ;;  %2011 = vmatprep.mubr.f32.mxu0 %v1610_v44 }
 0x158   : >> { %v1106_v38 = vpop.permute.xlu1 %1105  ;;  %v1611_v22 = vld [vmem:[#allocation3 + $0x308] sm:$0xff] }
 0x159   : >> { %v593_v63 = vpop.permute.xlu0 %592  ;;  %v1609_v31 = vld [vmem:[#allocation3 + $0x2f8] sm:$0xff]  ;;  %1181 = vst.msk [vmem:[#allocation3 + $0x330] sm:$0xff] %vm648_vm2, %v1106_v38  ;;  %2237 = vmatmul.mubr.f32.gmra.mxu1 %v1611_v22 }
 0x15a   : >> { %669 = vst.msk [vmem:[#allocation3 + $0x320] sm:$0xff] %vm648_vm2, %v593_v63  ;;  %2012 = vmatmul.mubr.f32.gmra.mxu0 %v1609_v31 }
 0x15c   : >> { %v1365_v3 = vpop.permute.xlu1 %1364  ;;  %v1617_v46 = vld [vmem:[#allocation3 + $0x338] sm:$0xff] }
 0x15d   : >> { %v852_v49 = vpop.permute.xlu0 %851  ;;  %v1615_v52 = vld [vmem:[#allocation3 + $0x328] sm:$0xff]  ;;  %1439 = vst.msk [vmem:[#allocation3 + $0x360] sm:$0xff] %vm648_vm2, %v1365_v3  ;;  %2241 = vmatprep.mubr.f32.mxu1 %v1617_v46 }
 0x15e   : >> { %926 = vst.msk [vmem:[#allocation3 + $0x350] sm:$0xff] %vm648_vm2, %v852_v49  ;;  %2016 = vmatprep.mubr.f32.mxu0 %v1615_v52 }
 0x160   : >> { %v1108_v47 = vpop.permute.xlu1 %1107  ;;  %v1616_v51 = vld [vmem:[#allocation3 + $0x330] sm:$0xff] }
 0x161   : >> { %v595_v54 = vpop.permute.xlu0 %594  ;;  %v1614_v4 = vld [vmem:[#allocation3 + $0x320] sm:$0xff]  ;;  %1182 = vst.msk [vmem:[#allocation3 + $0x358] sm:$0xff] %vm648_vm2, %v1108_v47  ;;  %2242 = vmatmul.mubr.f32.gmra.mxu1 %v1616_v51 }
 0x162   : >> { %670 = vst.msk [vmem:[#allocation3 + $0x348] sm:$0xff] %vm648_vm2, %v595_v54  ;;  %2017 = vmatmul.mubr.f32.gmra.mxu0 %v1614_v4 }
 0x164   : >> { %v1367_v61 = vpop.permute.xlu1 %1366  ;;  %v1622_v41 = vld [vmem:[#allocation3 + $0x360] sm:$0xff] }
 0x165   : >> { %v854_v6 = vpop.permute.xlu0 %853  ;;  %v1620_v40 = vld [vmem:[#allocation3 + $0x350] sm:$0xff]  ;;  %1440 = vst.msk [vmem:[#allocation3 + $0x388] sm:$0xff] %vm648_vm2, %v1367_v61  ;;  %2246 = vmatprep.mubr.f32.mxu1 %v1622_v41 }
 0x166   : >> { %927 = vst.msk [vmem:[#allocation3 + $0x378] sm:$0xff] %vm648_vm2, %v854_v6  ;;  %2021 = vmatprep.mubr.f32.mxu0 %v1620_v40 }
 0x168   : >> { %v1110_v60 = vpop.permute.xlu1 %1109  ;;  %v1621_v28 = vld [vmem:[#allocation3 + $0x358] sm:$0xff] }
 0x169   : >> { %v597_v25 = vpop.permute.xlu0 %596  ;;  %v1619_v16 = vld [vmem:[#allocation3 + $0x348] sm:$0xff]  ;;  %1183 = vst.msk [vmem:[#allocation3 + $0x380] sm:$0xff] %vm648_vm2, %v1110_v60  ;;  %2247 = vmatmul.mubr.f32.gmra.mxu1 %v1621_v28 }
 0x16a   : >> { %671 = vst.msk [vmem:[#allocation3 + $0x370] sm:$0xff] %vm648_vm2, %v597_v25  ;;  %2022 = vmatmul.mubr.f32.gmra.mxu0 %v1619_v16 }
 0x16c   : >> { %v1369_v26 = vpop.permute.xlu1 %1368  ;;  %v1627_v11 = vld [vmem:[#allocation3 + $0x388] sm:$0xff] }
 0x16d   : >> { %v856_v30 = vpop.permute.xlu0 %855  ;;  %v1625_v58 = vld [vmem:[#allocation3 + $0x378] sm:$0xff]  ;;  %1441 = vst.msk [vmem:[#allocation3 + $0x3b0] sm:$0xff] %vm648_vm2, %v1369_v26  ;;  %2251 = vmatprep.mubr.f32.mxu1 %v1627_v11 }
 0x16e   : >> { %928 = vst.msk [vmem:[#allocation3 + $0x3a0] sm:$0xff] %vm648_vm2, %v856_v30  ;;  %2026 = vmatprep.mubr.f32.mxu0 %v1625_v58 }
 0x170   : >> { %v1112_v42 = vpop.permute.xlu1 %1111  ;;  %v1626_v59 = vld [vmem:[#allocation3 + $0x380] sm:$0xff] }
 0x171   : >> { %v599_v55 = vpop.permute.xlu0 %598  ;;  %v1624_v5 = vld [vmem:[#allocation3 + $0x370] sm:$0xff]  ;;  %1184 = vst.msk [vmem:[#allocation3 + $0x3a8] sm:$0xff] %vm648_vm2, %v1112_v42  ;;  %2252 = vmatmul.mubr.f32.gmra.mxu1 %v1626_v59 }
 0x172   : >> { %672 = vst.msk [vmem:[#allocation3 + $0x398] sm:$0xff] %vm648_vm2, %v599_v55  ;;  %2027 = vmatmul.mubr.f32.gmra.mxu0 %v1624_v5 }
 0x174   : >> { %v1371_v14 = vpop.permute.xlu1 %1370  ;;  %v1632_v50 = vld [vmem:[#allocation3 + $0x3b0] sm:$0xff] }
 0x175   : >> { %v858_v37 = vpop.permute.xlu0 %857  ;;  %v1630_v10 = vld [vmem:[#allocation3 + $0x3a0] sm:$0xff]  ;;  %1442 = vst.msk [vmem:[#allocation3 + $0x3d8] sm:$0xff] %vm648_vm2, %v1371_v14  ;;  %2256 = vmatprep.mubr.f32.mxu1 %v1632_v50 }
 0x176   : >> { %929 = vst.msk [vmem:[#allocation3 + $0x3c8] sm:$0xff] %vm648_vm2, %v858_v37  ;;  %2031 = vmatprep.mubr.f32.mxu0 %v1630_v10 }
 0x178   : >> { %v1114_v62 = vpop.permute.xlu1 %1113  ;;  %v1631_v17 = vld [vmem:[#allocation3 + $0x3a8] sm:$0xff] }
 0x179   : >> { %v601_v20 = vpop.permute.xlu0 %600  ;;  %v1629_v35 = vld [vmem:[#allocation3 + $0x398] sm:$0xff]  ;;  %1185 = vst.msk [vmem:[#allocation3 + $0x3d0] sm:$0xff] %vm648_vm2, %v1114_v62  ;;  %2257 = vmatmul.mubr.f32.gmra.mxu1 %v1631_v17 }
 0x17a   : >> { %673 = vst.msk [vmem:[#allocation3 + $0x3c0] sm:$0xff] %vm648_vm2, %v601_v20  ;;  %2032 = vmatmul.mubr.f32.gmra.mxu0 %v1629_v35 }
 0x17c   : >> { %v1373_v57 = vpop.permute.xlu1 %1372  ;;  %v1637_v1 = vld [vmem:[#allocation3 + $0x3d8] sm:$0xff] }
 0x17d   : >> { %v860_v2 = vpop.permute.xlu0 %859  ;;  %v1635_v19 = vld [vmem:[#allocation3 + $0x3c8] sm:$0xff]  ;;  %1443 = vst.msk [vmem:[#allocation3 + $0x400] sm:$0xff] %vm648_vm2, %v1373_v57  ;;  %2261 = vmatprep.mubr.f32.mxu1 %v1637_v1  ;;  %v1918_v9 = vpop.f32.mrf.mxu0 }
 0x17e   : >> { %930 = vst.msk [vmem:[#allocation3 + $0x3f0] sm:$0xff] %vm648_vm2, %v860_v2  ;;  %2036 = vmatprep.mubr.f32.mxu0 %v1635_v19  ;;  %v1919_v39 = vadd.f32 %v6857_v21, %v1918_v9 }
 0x17f   : >> { %v1920_v13 = vpop.f32.mrf.mxu0 }
 0x180   : >> { %v1116_v45 = vpop.permute.xlu1 %1115  ;;  %v1636_v53 = vld [vmem:[#allocation3 + $0x3d0] sm:$0xff] }
 0x181   : >> { %v603_v43 = vpop.permute.xlu0 %602  ;;  %v1634_v33 = vld [vmem:[#allocation3 + $0x3c0] sm:$0xff]  ;;  %1186 = vst.msk [vmem:[#allocation3 + $0x3f8] sm:$0xff] %vm648_vm2, %v1116_v45  ;;  %2262 = vmatmul.mubr.f32.gmra.mxu1 %v1636_v53  ;;  %v2143_v56 = vpop.f32.mrf.mxu1 }
 0x182   : >> { %674 = vst.msk [vmem:[#allocation3 + $0x3e8] sm:$0xff] %vm648_vm2, %v603_v43  ;;  %2037 = vmatmul.mubr.f32.gmra.mxu0 %v1634_v33  ;;  %v6862_v8 = vadd.f32 %v2143_v56, %v1919_v39 }
 0x183   : >> { %v2145_v15 = vpop.f32.mrf.mxu1 }
 0x184   : >> { %v1375_v24 = vpop.permute.xlu1 %1374  ;;  %v1642_v27 = vld [vmem:[#allocation3 + $0x400] sm:$0xff] }
 0x185   : >> { %v862_v32 = vpop.permute.xlu0 %861  ;;  %v1640_v36 = vld [vmem:[#allocation3 + $0x3f0] sm:$0xff]  ;;  %1444 = vst.msk [vmem:[#allocation3 + $0x428] sm:$0xff] %vm648_vm2, %v1375_v24  ;;  %2266 = vmatprep.mubr.f32.mxu1 %v1642_v27 }
 0x186   : >> { %931 = vst.msk [vmem:[#allocation3 + $0x418] sm:$0xff] %vm648_vm2, %v862_v32  ;;  %2041 = vmatprep.mubr.f32.mxu0 %v1640_v36 }
 0x188   : >> { %v1118_v18 = vpop.permute.xlu1 %1117  ;;  %v1641_v29 = vld [vmem:[#allocation3 + $0x3f8] sm:$0xff] }
 0x189   : >> { %v605_v12 = vpop.permute.xlu0 %604  ;;  %v1639_v48 = vld [vmem:[#allocation3 + $0x3e8] sm:$0xff]  ;;  %1187 = vst.msk [vmem:[#allocation3 + $0x420] sm:$0xff] %vm648_vm2, %v1118_v18  ;;  %v2148_v23 = vpop.f32.mrf.mxu1  ;;  %2267 = vmatmul.mubr.f32.gmra.mxu1 %v1641_v29 }
 0x18a   : >> { %675 = vst.msk [vmem:[#allocation3 + $0x410] sm:$0xff] %vm648_vm2, %v605_v12  ;;  %v1923_v7 = vpop.f32.mrf.mxu0  ;;  %2042 = vmatmul.mubr.f32.gmra.mxu0 %v1639_v48 }
 0x18b   : >> { %v1924_v44 = vadd.f32 %v6857_v21, %v1923_v7  ;;  %v2150_v63 = vpop.f32.mrf.mxu1 }
 0x18c   : >> { %v1925_v34 = vpop.f32.mrf.mxu0  ;;  %v1377_v22 = vpop.permute.xlu1 %1376  ;;  %v1647_v3 = vld [vmem:[#allocation3 + $0x428] sm:$0xff] }
 0x18d   : >> { %v6869_v38 = vadd.f32 %v2148_v23, %v1924_v44  ;;  %v864_v31 = vpop.permute.xlu0 %863  ;;  %v1645_v49 = vld [vmem:[#allocation3 + $0x418] sm:$0xff]  ;;  %1445 = vst.msk [vmem:[#allocation3 + $0x450] sm:$0xff] %vm648_vm2, %v1377_v22  ;;  %2271 = vmatprep.mubr.f32.mxu1 %v1647_v3 }
 0x18e   : >> { %932 = vst.msk [vmem:[#allocation3 + $0x440] sm:$0xff] %vm648_vm2, %v864_v31  ;;  %2046 = vmatprep.mubr.f32.mxu0 %v1645_v49 }
 0x190   : >> { %v1120_v46 = vpop.permute.xlu1 %1119  ;;  %v1646_v47 = vld [vmem:[#allocation3 + $0x420] sm:$0xff] }
 0x191   : >> { %v607_v52 = vpop.permute.xlu0 %606  ;;  %v1644_v54 = vld [vmem:[#allocation3 + $0x410] sm:$0xff]  ;;  %1188 = vst.msk [vmem:[#allocation3 + $0x448] sm:$0xff] %vm648_vm2, %v1120_v46  ;;  %v2153_v51 = vpop.f32.mrf.mxu1  ;;  %2272 = vmatmul.mubr.f32.gmra.mxu1 %v1646_v47 }
 0x192   : >> { %676 = vst.msk [vmem:[#allocation3 + $0x438] sm:$0xff] %vm648_vm2, %v607_v52  ;;  %v1928_v4 = vpop.f32.mrf.mxu0  ;;  %2047 = vmatmul.mubr.f32.gmra.mxu0 %v1644_v54 }
 0x193   : >> { %v1929_v6 = vadd.f32 %v6857_v21, %v1928_v4  ;;  %v2155_v40 = vpop.f32.mrf.mxu1 }
 0x194   : >> { %v1930_v61 = vpop.f32.mrf.mxu0  ;;  %v1379_v60 = vpop.permute.xlu1 %1378  ;;  %v1652_v28 = vld [vmem:[#allocation3 + $0x450] sm:$0xff]  ;;  %v1518_v40 = vld [vmem:[#allocation3 + $0x20] sm:$0xff] }
 0x195   : >> { %v6876_v41 = vadd.f32 %v2153_v51, %v1929_v6  ;;  %v866_v25 = vpop.permute.xlu0 %865  ;;  %v1650_v16 = vld [vmem:[#allocation3 + $0x440] sm:$0xff]  ;;  %1446 = vst.msk [vmem:[#allocation3 + $0x478] sm:$0xff] %vm648_vm2, %v1379_v60  ;;  %2276 = vmatprep.mubr.f32.mxu1 %v1652_v28 }
 0x196   : >> { %933 = vst.msk [vmem:[#allocation3 + $0x468] sm:$0xff] %vm648_vm2, %v866_v25  ;;  %2051 = vmatprep.mubr.f32.mxu0 %v1650_v16  ;;  %v1598_v25 = vld [vmem:[#allocation3 + $0x2a0] sm:$0xff] }
 0x198   : >> { %v1122_v26 = vpop.permute.xlu1 %1121  ;;  %v1651_v11 = vld [vmem:[#allocation3 + $0x448] sm:$0xff] }
 0x199   : >> { %v609_v30 = vpop.permute.xlu0 %608  ;;  %v1649_v58 = vld [vmem:[#allocation3 + $0x438] sm:$0xff]  ;;  %1189 = vst.msk [vmem:[#allocation3 + $0x470] sm:$0xff] %vm648_vm2, %v1122_v26  ;;  %v2158_v42 = vpop.f32.mrf.mxu1  ;;  %2277 = vmatmul.mubr.f32.gmra.mxu1 %v1651_v11  ;;  %v1603_v11 = vld [vmem:[#allocation3 + $0x2c8] sm:$0xff] }
 0x19a   : >> { %677 = vst.msk [vmem:[#allocation3 + $0x460] sm:$0xff] %vm648_vm2, %v609_v30  ;;  %v1933_v55 = vpop.f32.mrf.mxu0  ;;  %2052 = vmatmul.mubr.f32.gmra.mxu0 %v1649_v58  ;;  %v1523_v58 = vld [vmem:[#allocation3 + $0x48] sm:$0xff] }
 0x19b   : >> { %v1934_v5 = vadd.f32 %v6857_v21, %v1933_v55  ;;  %v2160_v37 = vpop.f32.mrf.mxu1 }
 0x19c   : >> { %v1935_v59 = vpop.f32.mrf.mxu0  ;;  %v1381_v50 = vpop.permute.xlu1 %1380  ;;  %v1657_v62 = vld [vmem:[#allocation3 + $0x478] sm:$0xff] }
 0x19d   : >> { %v6883_v14 = vadd.f32 %v2158_v42, %v1934_v5  ;;  %v868_v10 = vpop.permute.xlu0 %867  ;;  %v1655_v20 = vld [vmem:[#allocation3 + $0x468] sm:$0xff]  ;;  %1447 = vst.msk [vmem:[#allocation3 + $0x4a0] sm:$0xff] %vm648_vm2, %v1381_v50  ;;  %2281 = vmatprep.mubr.f32.mxu1 %v1657_v62  ;;  %v1528_v5 = vld [vmem:[#allocation3 + $0x70] sm:$0xff]  ;;  %v1613_v50 = vld [vmem:[#allocation3 + $0x318] sm:$0xff] }
 0x19e   : >> { %934 = vst.msk [vmem:[#allocation3 + $0x490] sm:$0xff] %vm648_vm2, %v868_v10  ;;  %2056 = vmatprep.mubr.f32.mxu0 %v1655_v20  ;;  %v1608_v59 = vld [vmem:[#allocation3 + $0x2f0] sm:$0xff]  ;;  %v1533_v10 = vld [vmem:[#allocation3 + $0x98] sm:$0xff]  ;;  %v1538_v20 = vld [vmem:[#allocation3 + $0xc0] sm:$0xff] }
 0x19f   : >> { %v1618_v62 = vld [vmem:[#allocation3 + $0x340] sm:$0xff] }
 0x1a0   : >> { %v1124_v17 = vpop.permute.xlu1 %1123  ;;  %v1656_v57 = vld [vmem:[#allocation3 + $0x470] sm:$0xff] }
 0x1a1   : >> { %v611_v35 = vpop.permute.xlu0 %610  ;;  %v1654_v2 = vld [vmem:[#allocation3 + $0x460] sm:$0xff]  ;;  %1190 = vst.msk [vmem:[#allocation3 + $0x498] sm:$0xff] %vm648_vm2, %v1124_v17  ;;  %v2163_v1 = vpop.f32.mrf.mxu1  ;;  %2282 = vmatmul.mubr.f32.gmra.mxu1 %v1656_v57  ;;  %v1543_v57 = vld [vmem:[#allocation3 + $0xe8] sm:$0xff] }
 0x1a2   : >> { %678 = vst.msk [vmem:[#allocation3 + $0x488] sm:$0xff] %vm648_vm2, %v611_v35  ;;  %v1938_v19 = vpop.f32.mrf.mxu0  ;;  %2057 = vmatmul.mubr.f32.gmra.mxu0 %v1654_v2 }
 0x1a3   : >> { %v1939_v9 = vadd.f32 %v6857_v21, %v1938_v19  ;;  %v2165_v45 = vpop.f32.mrf.mxu1  ;;  %v1623_v19 = vld [vmem:[#allocation3 + $0x368] sm:$0xff] }
 0x1a4   : >> { %v1940_v43 = vpop.f32.mrf.mxu0  ;;  %v1383_v13 = vpop.permute.xlu1 %1382  ;;  %v1662_v56 = vld [vmem:[#allocation3 + $0x4a0] sm:$0xff]  ;;  %v1628_v45 = vld [vmem:[#allocation3 + $0x390] sm:$0xff] }
 0x1a5   : >> { %v6890_v33 = vadd.f32 %v2163_v1, %v1939_v9  ;;  %v870_v53 = vpop.permute.xlu0 %869  ;;  %v1660_v39 = vld [vmem:[#allocation3 + $0x490] sm:$0xff]  ;;  %1448 = vst.msk [vmem:[#allocation3 + $0x4c8] sm:$0xff] %vm648_vm2, %v1383_v13  ;;  %2286 = vmatprep.mubr.f32.mxu1 %v1662_v56  ;;  %v1553_v13 = vld [vmem:[#allocation3 + $0x138] sm:$0xff]  ;;  %v1558_v56 = vld [vmem:[#allocation3 + $0x160] sm:$0xff] }
 0x1a6   : >> { %935 = vst.msk [vmem:[#allocation3 + $0x4b8] sm:$0xff] %vm648_vm2, %v870_v53  ;;  %2061 = vmatprep.mubr.f32.mxu0 %v1660_v39  ;;  %v1548_v43 = vld [vmem:[#allocation3 + $0x110] sm:$0xff]  ;;  %v1633_v39 = vld [vmem:[#allocation3 + $0x3b8] sm:$0xff] }
 0x1a8   : >> { %v1126_v24 = vpop.permute.xlu1 %1125  ;;  %v1661_v27 = vld [vmem:[#allocation3 + $0x498] sm:$0xff] }
 0x1a9   : >> { %v613_v32 = vpop.permute.xlu0 %612  ;;  %v1659_v36 = vld [vmem:[#allocation3 + $0x488] sm:$0xff]  ;;  %1191 = vst.msk [vmem:[#allocation3 + $0x4c0] sm:$0xff] %vm648_vm2, %v1126_v24  ;;  %v2168_v12 = vpop.f32.mrf.mxu1  ;;  %2287 = vmatmul.mubr.f32.gmra.mxu1 %v1661_v27 }
 0x1aa   : >> { %679 = vst.msk [vmem:[#allocation3 + $0x4b0] sm:$0xff] %vm648_vm2, %v613_v32  ;;  %v1943_v15 = vpop.f32.mrf.mxu0  ;;  %2062 = vmatmul.mubr.f32.gmra.mxu0 %v1659_v36  ;;  %v1638_v32 = vld [vmem:[#allocation3 + $0x3e0] sm:$0xff] }
 0x1ab   : >> { %v1944_v18 = vadd.f32 %v6857_v21, %v1943_v15  ;;  %v2170_v29 = vpop.f32.mrf.mxu1  ;;  %v1563_v15 = vld [vmem:[#allocation3 + $0x188] sm:$0xff] }
 0x1ac   : >> { %v1945_v48 = vpop.f32.mrf.mxu0  ;;  %v1385_v44 = vpop.permute.xlu1 %1384  ;;  %v1667_v63 = vld [vmem:[#allocation3 + $0x4c8] sm:$0xff]  ;;  %v1568_v29 = vld [vmem:[#allocation3 + $0x1b0] sm:$0xff] }
 0x1ad   : >> { %v6897_v7 = vadd.f32 %v2168_v12, %v1944_v18  ;;  %v872_v23 = vpop.permute.xlu0 %871  ;;  %v1665_v34 = vld [vmem:[#allocation3 + $0x4b8] sm:$0xff]  ;;  %1449 = vst.msk [vmem:[#allocation3 + $0x4f0] sm:$0xff] %vm648_vm2, %v1385_v44  ;;  %2291 = vmatprep.mubr.f32.mxu1 %v1667_v63  ;;  %v1643_v12 = vld [vmem:[#allocation3 + $0x408] sm:$0xff] }
 0x1ae   : >> { %936 = vst.msk [vmem:[#allocation3 + $0x4e0] sm:$0xff] %vm648_vm2, %v872_v23  ;;  %2066 = vmatprep.mubr.f32.mxu0 %v1665_v34  ;;  %v1648_v23 = vld [vmem:[#allocation3 + $0x430] sm:$0xff]  ;;  %v1573_v34 = vld [vmem:[#allocation3 + $0x1d8] sm:$0xff] }
 0x1af   : >> { %v1653_v63 = vld [vmem:[#allocation3 + $0x458] sm:$0xff] }
 0x1b0   : >> { %v1128_v22 = vpop.permute.xlu1 %1127  ;;  %v1666_v3 = vld [vmem:[#allocation3 + $0x4c0] sm:$0xff] }
 0x1b1   : >> { %v615_v31 = vpop.permute.xlu0 %614  ;;  %v1664_v49 = vld [vmem:[#allocation3 + $0x4b0] sm:$0xff]  ;;  %1192 = vst.msk [vmem:[#allocation3 + $0x4e8] sm:$0xff] %vm648_vm2, %v1128_v22  ;;  %v2173_v46 = vpop.f32.mrf.mxu1  ;;  %2292 = vmatmul.mubr.f32.gmra.mxu1 %v1666_v3  ;;  %v1658_v22 = vld [vmem:[#allocation3 + $0x480] sm:$0xff] }
 0x1b2   : >> { %680 = vst.msk [vmem:[#allocation3 + $0x4d8] sm:$0xff] %vm648_vm2, %v615_v31  ;;  %v1948_v52 = vpop.f32.mrf.mxu0  ;;  %2067 = vmatmul.mubr.f32.gmra.mxu0 %v1664_v49  ;;  %v1578_v31 = vld [vmem:[#allocation3 + $0x200] sm:$0xff] }
 0x1b3   : >> { %v1949_v54 = vadd.f32 %v6857_v21, %v1948_v52  ;;  %v2175_v4 = vpop.f32.mrf.mxu1 }
 0x1b4   : >> { %v1950_v47 = vpop.f32.mrf.mxu0  ;;  %v1672_v61 = vld [vmem:[#allocation3 + $0x4f0] sm:$0xff] }
 0x1b5   : >> { %v6904_v51 = vadd.f32 %v2173_v46, %v1949_v54  ;;  %v1670_v6 = vld [vmem:[#allocation3 + $0x4e0] sm:$0xff]  ;;  %2296 = vmatprep.mubr.f32.mxu1 %v1672_v61  ;;  %v1583_v46 = vld [vmem:[#allocation3 + $0x228] sm:$0xff]  ;;  %v1668_v61 = vld [vmem:[#allocation3 + $0x4d0] sm:$0xff] }
 0x1b6   : >> { %2071 = vmatprep.mubr.f32.mxu0 %v1670_v6  ;;  %v1663_v54 = vld [vmem:[#allocation3 + $0x4a8] sm:$0xff]  ;;  %v1588_v6 = vld [vmem:[#allocation3 + $0x250] sm:$0xff] }
 0x1b8   : >> { %v1671_v16 = vld [vmem:[#allocation3 + $0x4e8] sm:$0xff] }
 0x1b9   : >> { %v1669_v60 = vld [vmem:[#allocation3 + $0x4d8] sm:$0xff]  ;;  %v2178_v30 = vpop.f32.mrf.mxu1  ;;  %2297 = vmatmul.mubr.f32.gmra.mxu1 %v1671_v16 }
 0x1ba   : >> { %v1953_v28 = vpop.f32.mrf.mxu0  ;;  %2072 = vmatmul.mubr.f32.gmra.mxu0 %v1669_v60  ;;  %5389 = vmatprep.mubr.msk.f32.mxu1 %vm279_vm0, %v1598_v25  ;;  %v1593_v25 = vld [vmem:[#allocation3 + $0x278] sm:$0xff] }
 0x1bb   : >> { %v1954_v26 = vadd.f32 %v6857_v21, %v1953_v28  ;;  %5365 = vmatprep.mubr.msk.f32.mxu0 %vm279_vm0, %v1518_v40  ;;  %v2180_v42 = vpop.f32.mrf.mxu1  ;;  %v1673_v60 = vld [vmem:[#allocation3 + $0x4f8] sm:$0xff] }
 0x1bc   : >> { %v1955_v55 = vpop.f32.mrf.mxu0 }
 0x1bd   : >> { %v6909_v37 = vadd.f32 %v2178_v30, %v1954_v26  ;;  %5390 = vmatmul.mubr.msk.f32.vlgmr.msra.gmra.mxu1 %vm279_vm0, %v1603_v11 }
 0x1be   : >> { %5366 = vmatmul.mubr.msk.f32.vlgmr.msra.gmra.mxu0 %vm279_vm0, %v1523_v58  ;;  %5392 = vmatprep.mubr.msk.f32.mxu1 %vm279_vm0, %v1608_v59 }
 0x1bf   : >> { %5368 = vmatprep.mubr.msk.f32.mxu0 %vm279_vm0, %v1528_v5 }
 0x1c1   : >> { %v2183_v17 = vpop.f32.mrf.mxu1  ;;  %5393 = vmatmul.mubr.msk.f32.gmra.mxu1 %vm279_vm0, %v1613_v50 }
 0x1c2   : >> { %v1958_v35 = vpop.f32.mrf.mxu0  ;;  %5369 = vmatmul.mubr.msk.f32.gmra.mxu0 %vm279_vm0, %v1533_v10  ;;  %5395 = vmatprep.mubr.msk.f32.mxu1 %vm279_vm0, %v1618_v62 }
 0x1c3   : >> { %v1959_v2 = vadd.f32 %v6857_v21, %v1958_v35  ;;  %5371 = vmatprep.mubr.msk.f32.mxu0 %vm279_vm0, %v1538_v20  ;;  %v2185_v9 = vpop.f32.mrf.mxu1 }
 0x1c4   : >> { %v1960_v1 = vpop.f32.mrf.mxu0 }
 0x1c5   : >> { %v6920_v53 = vadd.f32 %v2183_v17, %v1959_v2  ;;  %5396 = vmatmul.mubr.msk.f32.gmra.mxu1 %vm279_vm0, %v1623_v19 }
 0x1c6   : >> { %5372 = vmatmul.mubr.msk.f32.gmra.mxu0 %vm279_vm0, %v1543_v57  ;;  %5398 = vmatprep.mubr.msk.f32.mxu1 %vm279_vm0, %v1628_v45 }
 0x1c7   : >> { %5374 = vmatprep.mubr.msk.f32.mxu0 %vm279_vm0, %v1548_v43 }
 0x1c9   : >> { %v2188_v36 = vpop.f32.mrf.mxu1  ;;  %5399 = vmatmul.mubr.msk.f32.gmra.mxu1 %vm279_vm0, %v1633_v39 }
 0x1ca   : >> { %v1963_v24 = vpop.f32.mrf.mxu0  ;;  %5375 = vmatmul.mubr.msk.f32.gmra.mxu0 %vm279_vm0, %v1553_v13  ;;  %5401 = vmatprep.mubr.msk.f32.mxu1 %vm279_vm0, %v1638_v32 }
 0x1cb   : >> { %v1964_v27 = vadd.f32 %v6857_v21, %v1963_v24  ;;  %5377 = vmatprep.mubr.msk.f32.mxu0 %vm279_vm0, %v1558_v56  ;;  %v2190_v48 = vpop.f32.mrf.mxu1 }
 0x1cc   : >> { %v1965_v18 = vpop.f32.mrf.mxu0 }
 0x1cd   : >> { %v6931_v44 = vadd.f32 %v2188_v36, %v1964_v27  ;;  %5402 = vmatmul.mubr.msk.f32.gmra.mxu1 %vm279_vm0, %v1643_v12 }
 0x1ce   : >> { %5378 = vmatmul.mubr.msk.f32.gmra.mxu0 %vm279_vm0, %v1563_v15  ;;  %5404 = vmatprep.mubr.msk.f32.mxu1 %vm279_vm0, %v1648_v23 }
 0x1cf   : >> { %5380 = vmatprep.mubr.msk.f32.mxu0 %vm279_vm0, %v1568_v29 }
 0x1d1   : >> { %v2193_v3 = vpop.f32.mrf.mxu1  ;;  %5405 = vmatmul.mubr.msk.f32.gmra.mxu1 %vm279_vm0, %v1653_v63 }
 0x1d2   : >> { %v1968_v49 = vpop.f32.mrf.mxu0  ;;  %5381 = vmatmul.mubr.msk.f32.gmra.mxu0 %vm279_vm0, %v1573_v34  ;;  %5407 = vmatprep.mubr.msk.f32.mxu1 %vm279_vm0, %v1658_v22 }
 0x1d3   : >> { %v1969_v52 = vadd.f32 %v6857_v21, %v1968_v49  ;;  %5383 = vmatprep.mubr.msk.f32.mxu0 %vm279_vm0, %v1578_v31  ;;  %v2195_v4 = vpop.f32.mrf.mxu1 }
 0x1d4   : >> { %v1970_v47 = vpop.f32.mrf.mxu0 }
 0x1d5   : >> { %v6942_v40 = vadd.f32 %v2193_v3, %v1969_v52  ;;  %5408 = vmatmul.mubr.msk.f32.gmra.mxu1 %vm279_vm0, %v1663_v54 }
 0x1d6   : >> { %5384 = vmatmul.mubr.msk.f32.gmra.mxu0 %vm279_vm0, %v1583_v46  ;;  %5410 = vmatprep.mubr.msk.f32.mxu1 %vm279_vm0, %v1668_v61 }
 0x1d7   : >> { %5386 = vmatprep.mubr.msk.f32.mxu0 %vm279_vm0, %v1588_v6 }
 0x1d9   : >> { %v2198_v28 = vpop.f32.mrf.mxu1  ;;  %5411 = vmatmul.mubr.msk.f32.gmra.mxu1 %vm279_vm0, %v1673_v60 }
 0x1da   : >> { %v1973_v16 = vpop.f32.mrf.mxu0  ;;  %5387 = vmatmul.mubr.msk.f32.gmra.mxu0 %vm279_vm0, %v1593_v25 }
 0x1db   : >> { %v1974_v30 = vadd.f32 %v6857_v21, %v1973_v16  ;;  %v2200_v58 = vpop.f32.mrf.mxu1 }
 0x1dc   : >> { %v1975_v26 = vpop.f32.mrf.mxu0 }
 0x1dd   : >> { %v6951_v11 = vadd.f32 %v2198_v28, %v1974_v30 }
 0x1e1   : >> { %v2203_v42 = vpop.f32.mrf.mxu1 }
 0x1e2   : >> { %v1978_v55 = vpop.f32.mrf.mxu0 }
 0x1e3   : >> { %v1979_v5 = vadd.f32 %v6857_v21, %v1978_v55  ;;  %v2205_v10 = vpop.f32.mrf.mxu1 }
 0x1e4   : >> { %v1980_v59 = vpop.f32.mrf.mxu0 }
 0x1e5   : >> { %v6954_v50 = vadd.f32 %v2203_v42, %v1979_v5 }
 0x1e9   : >> { %v2208_v62 = vpop.f32.mrf.mxu1 }
 0x1ea   : >> { %v1983_v20 = vpop.f32.mrf.mxu0 }
 0x1eb   : >> { %v1984_v35 = vadd.f32 %v6857_v21, %v1983_v20  ;;  %v2210_v2 = vpop.f32.mrf.mxu1 }
 0x1ec   : >> { %v1985_v17 = vpop.f32.mrf.mxu0 }
 0x1ed   : >> { %v6957_v57 = vadd.f32 %v2208_v62, %v1984_v35 }
 0x1f1   : >> { %v2213_v1 = vpop.f32.mrf.mxu1 }
 0x1f2   : >> { %v1988_v19 = vpop.f32.mrf.mxu0 }
 0x1f3   : >> { %v1989_v9 = vadd.f32 %v6857_v21, %v1988_v19  ;;  %v2215_v45 = vpop.f32.mrf.mxu1 }
 0x1f4   : >> { %v1990_v43 = vpop.f32.mrf.mxu0 }
 0x1f5   : >> { %v6960_v13 = vadd.f32 %v2213_v1, %v1989_v9 }
 0x1f9   : >> { %v2218_v56 = vpop.f32.mrf.mxu1 }
 0x1fa   : >> { %v1993_v39 = vpop.f32.mrf.mxu0 }
 0x1fb   : >> { %v1994_v32 = vadd.f32 %v6857_v21, %v1993_v39  ;;  %v2220_v36 = vpop.f32.mrf.mxu1 }
 0x1fc   : >> { %v1995_v24 = vpop.f32.mrf.mxu0 }
 0x1fd   : >> { %v6963_v27 = vadd.f32 %v2218_v56, %v1994_v32 }
 0x201   : >> { %v2223_v12 = vpop.f32.mrf.mxu1 }
 0x202   : >> { %v1998_v15 = vpop.f32.mrf.mxu0 }
 0x203   : >> { %v1999_v18 = vadd.f32 %v6857_v21, %v1998_v15  ;;  %v2225_v29 = vpop.f32.mrf.mxu1 }
 0x204   : >> { %v2000_v48 = vpop.f32.mrf.mxu0 }
 0x205   : >> { %v6966_v23 = vadd.f32 %v2223_v12, %v1999_v18 }
 0x209   : >> { %v2228_v63 = vpop.f32.mrf.mxu1 }
 0x20a   : >> { %v2003_v34 = vpop.f32.mrf.mxu0 }
 0x20b   : >> { %v2004_v31 = vadd.f32 %v6857_v21, %v2003_v34  ;;  %v2230_v49 = vpop.f32.mrf.mxu1 }
 0x20c   : >> { %v2005_v22 = vpop.f32.mrf.mxu0 }
 0x20d   : >> { %v6969_v3 = vadd.f32 %v2228_v63, %v2004_v31 }
 0x211   : >> { %v2233_v46 = vpop.f32.mrf.mxu1 }
 0x212   : >> { %v2008_v52 = vpop.f32.mrf.mxu0 }
 0x213   : >> { %v2009_v54 = vadd.f32 %v6857_v21, %v2008_v52  ;;  %v2235_v4 = vpop.f32.mrf.mxu1 }
 0x214   : >> { %v2010_v47 = vpop.f32.mrf.mxu0 }
 0x215   : >> { %v6972_v6 = vadd.f32 %v2233_v46, %v2009_v54 }
 0x219   : >> { %v2238_v25 = vpop.f32.mrf.mxu1 }
 0x21a   : >> { %v2013_v61 = vpop.f32.mrf.mxu0 }
 0x21b   : >> { %v2014_v60 = vadd.f32 %v6857_v21, %v2013_v61  ;;  %v2240_v28 = vpop.f32.mrf.mxu1 }
 0x21c   : >> { %v2015_v16 = vpop.f32.mrf.mxu0 }
 0x21d   : >> { %v6975_v30 = vadd.f32 %v2238_v25, %v2014_v60 }
 0x221   : >> { %v2243_v58 = vpop.f32.mrf.mxu1 }
 0x222   : >> { %v2018_v26 = vpop.f32.mrf.mxu0 }
 0x223   : >> { %v2019_v55 = vadd.f32 %v6857_v21, %v2018_v26  ;;  %v2245_v5 = vpop.f32.mrf.mxu1 }
 0x224   : >> { %v2020_v42 = vpop.f32.mrf.mxu0 }
 0x225   : >> { %v6978_v59 = vadd.f32 %v2243_v58, %v2019_v55 }
 0x229   : >> { %v2248_v20 = vpop.f32.mrf.mxu1 }
 0x22a   : >> { %v2023_v10 = vpop.f32.mrf.mxu0 }
 0x22b   : >> { %v2024_v62 = vadd.f32 %v6857_v21, %v2023_v10  ;;  %v2250_v17 = vpop.f32.mrf.mxu1 }
 0x22c   : >> { %v2025_v35 = vpop.f32.mrf.mxu0 }
 0x22d   : >> { %v6981_v2 = vadd.f32 %v2248_v20, %v2024_v62 }
 0x231   : >> { %v2253_v1 = vpop.f32.mrf.mxu1 }
 0x232   : >> { %v2028_v19 = vpop.f32.mrf.mxu0 }
 0x233   : >> { %v2029_v9 = vadd.f32 %v6857_v21, %v2028_v19  ;;  %v2255_v45 = vpop.f32.mrf.mxu1 }
 0x234   : >> { %v2030_v43 = vpop.f32.mrf.mxu0 }
 0x235   : >> { %v6984_v39 = vadd.f32 %v2253_v1, %v2029_v9 }
 0x239   : >> { %v2258_v32 = vpop.f32.mrf.mxu1 }
 0x23a   : >> { %v2033_v56 = vpop.f32.mrf.mxu0 }
 0x23b   : >> { %v2034_v24 = vadd.f32 %v6857_v21, %v2033_v56  ;;  %v2260_v15 = vpop.f32.mrf.mxu1 }
 0x23c   : >> { %v2035_v36 = vpop.f32.mrf.mxu0 }
 0x23d   : >> { %v6987_v12 = vadd.f32 %v2258_v32, %v2034_v24 }
 0x241   : >> { %v2263_v48 = vpop.f32.mrf.mxu1 }
 0x242   : >> { %v2038_v18 = vpop.f32.mrf.mxu0 }
 0x243   : >> { %v2039_v29 = vadd.f32 %v6857_v21, %v2038_v18  ;;  %v2265_v63 = vpop.f32.mrf.mxu1 }
 0x244   : >> { %v2040_v34 = vpop.f32.mrf.mxu0 }
 0x245   : >> { %v6990_v31 = vadd.f32 %v2263_v48, %v2039_v29 }
 0x249   : >> { %v2268_v49 = vpop.f32.mrf.mxu1 }
 0x24a   : >> { %v2043_v22 = vpop.f32.mrf.mxu0 }
 0x24b   : >> { %v2044_v52 = vadd.f32 %v6857_v21, %v2043_v22  ;;  %v2270_v54 = vpop.f32.mrf.mxu1 }
 0x24c   : >> { %v2045_v46 = vpop.f32.mrf.mxu0 }
 0x24d   : >> { %v6993_v47 = vadd.f32 %v2268_v49, %v2044_v52  ;;  %v7011_v46 = vld [vmem:[%s2559_s22] ss:$0 sm:$0xff] }
 0x251   : >> { %v2273_v61 = vpop.f32.mrf.mxu1 }
 0x252   : >> { %v2048_v4 = vpop.f32.mrf.mxu0 }
 0x253   : >> { %v2275_v60 = vpop.f32.mrf.mxu1  ;;  %v2049_v36 = vadd.f32 %v6857_v21, %v2048_v4 }
 0x254   : >> { %v2050_v25 = vpop.f32.mrf.mxu0 }
 0x259   : >> { %v2278_v28 = vpop.f32.mrf.mxu1 }
 0x25a   : >> { %v2053_v16 = vpop.f32.mrf.mxu0 }
 0x25b   : >> { %v2280_v58 = vpop.f32.mrf.mxu1  ;;  %v2054_v15 = vadd.f32 %v6857_v21, %v2053_v16 }
 0x25c   : >> { %v2055_v26 = vpop.f32.mrf.mxu0 }
 0x25d   : >> { %v7015_v26 = vadd.f32 %v2273_v61, %v2049_v36  ;;  %v7017_v58 = vadd.f32 %v2278_v28, %v2054_v15 }
 0x261   : >> { %v2283_v42 = vpop.f32.mrf.mxu1 }
 0x262   : >> { %v2058_v55 = vpop.f32.mrf.mxu0 }
 0x263   : >> { %v2285_v10 = vpop.f32.mrf.mxu1  ;;  %v2059_v18 = vadd.f32 %v6857_v21, %v2058_v55 }
 0x264   : >> { %v2060_v5 = vpop.f32.mrf.mxu0 }
 0x265   : >> { %v7019_v55 = vadd.f32 %v2283_v42, %v2059_v18  ;;  %v7023_v5 = vld [vmem:[%s2599_s26] ss:$0 sm:$0xff] }
 0x269   : >> { %v2288_v62 = vpop.f32.mrf.mxu1 }
 0x26a   : >> { %v2063_v20 = vpop.f32.mrf.mxu0 }
 0x26b   : >> { %v2290_v17 = vpop.f32.mrf.mxu1  ;;  %v2064_v48 = vadd.f32 %v6857_v21, %v2063_v20 }
 0x26c   : >> { %v2065_v35 = vpop.f32.mrf.mxu0 }
 0x271   : >> { %v2293_v1 = vpop.f32.mrf.mxu1 }
 0x272   : >> { %v2068_v19 = vpop.f32.mrf.mxu0 }
 0x273   : >> { %v2295_v43 = vpop.f32.mrf.mxu1  ;;  %v2069_v49 = vadd.f32 %v6857_v21, %v2068_v19 }
 0x274   : >> { %v2070_v9 = vpop.f32.mrf.mxu0 }
 0x275   : >> { %v7027_v19 = vadd.f32 %v2293_v1, %v2069_v49 }
 0x279   : >> { %v2298_v56 = vpop.f32.mrf.mxu1 }
 0x27a   : >> { %v2073_v45 = vpop.f32.mrf.mxu0 }
 0x27b   : >> { %v2300_v24 = vpop.f32.mrf.mxu1  ;;  %v2074_v52 = vadd.f32 %v6857_v21, %v2073_v45 }
 0x27c   : >> { %v2075_v32 = vpop.f32.mrf.mxu0 }
 0x27d   : >> { %v5391_v34 = vpop.f32.mrf.mxu1 }
 0x27e   : >> { %v5367_v29 = vpop.f32.mrf.mxu0  ;;  %v2454_v22 = vadd.f32 %v5391_v34, %v6969_v3  ;;  %v7021_v3 = vadd.f32 %v2288_v62, %v2064_v48 }
 0x27f   : >> { %v2374_v63 = vadd.f32 %v5367_v29, %v6869_v38  ;;  %v2448_v4 = vpop.f32.mrf.mxu1 }
 0x280   : >> { %v2368_v54 = vpop.f32.mrf.mxu0  ;;  %v2544_v60 = vmax.f32 %v2454_v22, 0.0  ;;  %v2449_v38 = vadd.f32 %v2448_v4, %v6966_v23  ;;  %v7029_v23 = vadd.f32 %v2298_v56, %v2074_v52 }
 0x281   : >> { %v2528_v25 = vmax.f32 %v2374_v63, 0.0  ;;  %v2369_v16 = vadd.f32 %v2368_v54, %v6862_v8  ;;  %v5394_v10 = vpop.f32.mrf.mxu1 }
 0x282   : >> { %v5370_v21 = vpop.f32.mrf.mxu0  ;;  %v2584_v35 = vmul.f32 %v7011_v46, %v2544_v60  ;;  %v2543_v8 = vmax.f32 %v2449_v38, 0.0  ;;  %v2464_v28 = vadd.f32 %v5394_v10, %v6975_v30 }
 0x283   : >> { %v2568_v20 = vmul.f32 %v7011_v46, %v2528_v25  ;;  %v2527_v17 = vmax.f32 %v2369_v16, 0.0  ;;  %v2384_v61 = vadd.f32 %v5370_v21, %v6883_v14  ;;  %v2458_v62 = vpop.f32.mrf.mxu1 }
 0x284   : >> { %v2378_v42 = vpop.f32.mrf.mxu0  ;;  %v2624_v43 = vadd.f32 %v7023_v5, %v2584_v35  ;;  %v2583_v32 = vmul.f32 %v7011_v46, %v2543_v8  ;;  %v2546_v36 = vmax.f32 %v2464_v28, 0.0  ;;  %v2459_v56 = vadd.f32 %v2458_v62, %v6972_v6 }
 0x285   : >> { %v2608_v9 = vadd.f32 %v7023_v5, %v2568_v20  ;;  %v2567_v45 = vmul.f32 %v7011_v46, %v2527_v17  ;;  %v2530_v24 = vmax.f32 %v2384_v61, 0.0  ;;  %v2379_v1 = vadd.f32 %v2378_v42, %v6876_v41  ;;  %v5397_v14 = vpop.f32.mrf.mxu1 }
 0x286   : >> { %v5373_v15 = vpop.f32.mrf.mxu0  ;;  %2656 = vst.msk [vmem:[#allocation2 + $0x130] sm:$0xff] %vm279_vm0, %v2624_v43  ;;  %v2623_v18 = vadd.f32 %v7023_v5, %v2583_v32  ;;  %v2474_v29 = vadd.f32 %v5397_v14, %v6981_v2  ;;  %v2586_v41 = vmul.f32 %v7011_v46, %v2546_v36  ;;  %v2545_v6 = vmax.f32 %v2459_v56, 0.0 }
 0x287   : >> { %2640 = vst.msk [vmem:[#allocation2 + $0x30] sm:$0xff] %vm279_vm0, %v2608_v9  ;;  %v2607_v30 = vadd.f32 %v7023_v5, %v2567_v45  ;;  %v2394_v48 = vadd.f32 %v5373_v15, %v6897_v7  ;;  %v2570_v34 = vmul.f32 %v7011_v46, %v2530_v24  ;;  %v2529_v63 = vmax.f32 %v2379_v1, 0.0  ;;  %v2468_v49 = vpop.f32.mrf.mxu1 }
 0x288   : >> { %v2388_v22 = vpop.f32.mrf.mxu0  ;;  %2655 = vst.msk [vmem:[#allocation2 + $0x128] sm:$0xff] %vm279_vm0, %v2623_v18  ;;  %v2548_v54 = vmax.f32 %v2474_v29, 0.0  ;;  %v2469_v7 = vadd.f32 %v2468_v49, %v6978_v59  ;;  %v2626_v25 = vadd.f32 %v7023_v5, %v2586_v41  ;;  %v2585_v16 = vmul.f32 %v7011_v46, %v2545_v6 }
 0x289   : >> { %2639 = vst.msk [vmem:[#allocation2 + $0x28] sm:$0xff] %vm279_vm0, %v2607_v30  ;;  %v2532_v52 = vmax.f32 %v2394_v48, 0.0  ;;  %v2389_v4 = vadd.f32 %v2388_v22, %v6890_v33  ;;  %v2610_v2 = vadd.f32 %v7023_v5, %v2570_v34  ;;  %v2569_v60 = vmul.f32 %v7011_v46, %v2529_v63  ;;  %v5400_v21 = vpop.f32.mrf.mxu1 }
 0x28a   : >> { %v5376_v38 = vpop.f32.mrf.mxu0  ;;  %v2588_v20 = vmul.f32 %v7011_v46, %v2548_v54  ;;  %v2547_v17 = vmax.f32 %v2469_v7, 0.0  ;;  %2658 = vst.msk [vmem:[#allocation2 + $0x150] sm:$0xff] %vm279_vm0, %v2626_v25  ;;  %v2625_v59 = vadd.f32 %v7023_v5, %v2585_v16  ;;  %v2484_v61 = vadd.f32 %v5400_v21, %v6987_v12 }
 0x28b   : >> { %v2572_v10 = vmul.f32 %v7011_v46, %v2532_v52  ;;  %v2531_v35 = vmax.f32 %v2389_v4, 0.0  ;;  %2642 = vst.msk [vmem:[#allocation2 + $0x50] sm:$0xff] %vm279_vm0, %v2610_v2  ;;  %v2609_v33 = vadd.f32 %v7023_v5, %v2569_v60  ;;  %v2404_v8 = vadd.f32 %v5376_v38, %v6909_v37  ;;  %v2478_v42 = vpop.f32.mrf.mxu1 }
 0x28c   : >> { %v2398_v28 = vpop.f32.mrf.mxu0  ;;  %v2628_v9 = vadd.f32 %v7023_v5, %v2588_v20  ;;  %v2587_v45 = vmul.f32 %v7011_v46, %v2547_v17  ;;  %2657 = vst.msk [vmem:[#allocation2 + $0x148] sm:$0xff] %vm279_vm0, %v2625_v59  ;;  %v2550_v24 = vmax.f32 %v2484_v61, 0.0  ;;  %v2479_v12 = vadd.f32 %v2478_v42, %v6984_v39 }
 0x28d   : >> { %v2612_v62 = vadd.f32 %v7023_v5, %v2572_v10  ;;  %v2571_v43 = vmul.f32 %v7011_v46, %v2531_v35  ;;  %2641 = vst.msk [vmem:[#allocation2 + $0x48] sm:$0xff] %vm279_vm0, %v2609_v33  ;;  %v2534_v32 = vmax.f32 %v2404_v8, 0.0  ;;  %v2399_v37 = vadd.f32 %v2398_v28, %v6904_v51  ;;  %v5403_v1 = vpop.f32.mrf.mxu1 }
 0x28e   : >> { %v5379_v36 = vpop.f32.mrf.mxu0  ;;  %2660 = vst.msk [vmem:[#allocation2 + $0x170] sm:$0xff] %vm279_vm0, %v2628_v9  ;;  %v2627_v15 = vadd.f32 %v7023_v5, %v2587_v45  ;;  %v2494_v30 = vadd.f32 %v5403_v1, %v6993_v47  ;;  %v2590_v51 = vmul.f32 %v7011_v46, %v2550_v24  ;;  %v2549_v39 = vmax.f32 %v2479_v12, 0.0 }
 0x28f   : >> { %2644 = vst.msk [vmem:[#allocation2 + $0x70] sm:$0xff] %vm279_vm0, %v2612_v62  ;;  %v2611_v56 = vadd.f32 %v7023_v5, %v2571_v43  ;;  %v2414_v14 = vadd.f32 %v5379_v36, %v6931_v44  ;;  %v2574_v18 = vmul.f32 %v7011_v46, %v2534_v32  ;;  %v2533_v48 = vmax.f32 %v2399_v37, 0.0  ;;  %v2488_v34 = vpop.f32.mrf.mxu1 }
 0x290   : >> { %v2408_v29 = vpop.f32.mrf.mxu0  ;;  %2659 = vst.msk [vmem:[#allocation2 + $0x168] sm:$0xff] %vm279_vm0, %v2627_v15  ;;  %v2552_v63 = vmax.f32 %v2494_v30, 0.0  ;;  %v2489_v44 = vadd.f32 %v2488_v34, %v6990_v31  ;;  %v2630_v22 = vadd.f32 %v7023_v5, %v2590_v51  ;;  %v2589_v52 = vmul.f32 %v7011_v46, %v2549_v39 }
 0x291   : >> { %2643 = vst.msk [vmem:[#allocation2 + $0x68] sm:$0xff] %vm279_vm0, %v2611_v56  ;;  %v2536_v41 = vmax.f32 %v2414_v14, 0.0  ;;  %v2409_v6 = vadd.f32 %v2408_v29, %v6920_v53  ;;  %v2614_v47 = vadd.f32 %v7023_v5, %v2574_v18  ;;  %v2573_v49 = vmul.f32 %v7011_v46, %v2533_v48  ;;  %v5406_v4 = vpop.f32.mrf.mxu1 }
 0x292   : >> { %v5382_v54 = vpop.f32.mrf.mxu0  ;;  %v2592_v2 = vmul.f32 %v7011_v46, %v2552_v63  ;;  %v2551_v60 = vmax.f32 %v2489_v44, 0.0  ;;  %2662 = vst.msk [vmem:[#allocation2 + $0x190] sm:$0xff] %vm279_vm0, %v2630_v22  ;;  %v2629_v31 = vadd.f32 %v7023_v5, %v2589_v52  ;;  %v2504_v38 = vadd.f32 %v5406_v4, %v7017_v58 }
 0x293   : >> { %v2576_v7 = vmul.f32 %v7011_v46, %v2536_v41  ;;  %v2535_v25 = vmax.f32 %v2409_v6, 0.0  ;;  %2646 = vst.msk [vmem:[#allocation2 + $0x90] sm:$0xff] %vm279_vm0, %v2614_v47  ;;  %v2613_v53 = vadd.f32 %v7023_v5, %v2573_v49  ;;  %v2424_v16 = vadd.f32 %v5382_v54, %v6951_v11  ;;  %v2498_v10 = vpop.f32.mrf.mxu1 }
 0x294   : >> { %v2418_v21 = vpop.f32.mrf.mxu0  ;;  %v2632_v35 = vadd.f32 %v7023_v5, %v2592_v2  ;;  %v2591_v33 = vmul.f32 %v7011_v46, %v2551_v60  ;;  %2661 = vst.msk [vmem:[#allocation2 + $0x188] sm:$0xff] %vm279_vm0, %v2629_v31  ;;  %v2554_v8 = vmax.f32 %v2504_v38, 0.0  ;;  %v2499_v58 = vadd.f32 %v2498_v10, %v7015_v26  ;;  %v2992_v10 = vld [vmem:[#allocation2 + $0x27] sm:$0xff] (%p420_p4) }
 0x295   : >> { %v2616_v20 = vadd.f32 %v7023_v5, %v2576_v7  ;;  %v2575_v17 = vmul.f32 %v7011_v46, %v2535_v25  ;;  %2645 = vst.msk [vmem:[#allocation2 + $0x88] sm:$0xff] %vm279_vm0, %v2613_v53  ;;  %v2538_v59 = vmax.f32 %v2424_v16, 0.0  ;;  %v2419_v11 = vadd.f32 %v2418_v21, %v6942_v40  ;;  %v5409_v28 = vpop.f32.mrf.mxu1  ;;  %3056 = vrot.lane.b32.xlu0 (%p420_p4), %v2992_v10, %s5677_s27 }
 0x296   : >> { %v5385_v61 = vpop.f32.mrf.mxu0  ;;  %2664 = vst.msk [vmem:[#allocation2 + $0x1b0] sm:$0xff] %vm279_vm0, %v2632_v35  ;;  %v2631_v62 = vadd.f32 %v7023_v5, %v2591_v33  ;;  %v2514_v43 = vadd.f32 %v5409_v28, %v7021_v3  ;;  %v2594_v40 = vmul.f32 %v7011_v46, %v2554_v8  ;;  %v2553_v26 = vmax.f32 %v2499_v58, 0.0  ;;  %v2993_v35 = vld [vmem:[#allocation2 + $0x2f] sm:$0xff] (%p420_p4)  ;;  %2705 = vst.msk [vmem:[#allocation3 + $0x50] sm:$0xff] (%p420_p4), %vm279_vm0, %v2992_v10 }
 0x297   : >> { %2648 = vst.msk [vmem:[#allocation2 + $0xb0] sm:$0xff] %vm279_vm0, %v2616_v20  ;;  %v2615_v42 = vadd.f32 %v7023_v5, %v2575_v17  ;;  %v2434_v9 = vadd.f32 %v5385_v61, %v6957_v57  ;;  %v2578_v45 = vmul.f32 %v7011_v46, %v2538_v59  ;;  %v2537_v32 = vmax.f32 %v2419_v11, 0.0  ;;  %v2508_v37 = vpop.f32.mrf.mxu1  ;;  %v7156_v20 = vld [vmem:[#allocation2 + $0x48] sm:$0xff] (%p420_p4)  ;;  %v7162_v17 = vld [vmem:[#allocation2 + $0x50] sm:$0xff] (%p420_p4)  ;;  %2706 = vst.msk [vmem:[#allocation3 + $0x78] sm:$0xff] (%p420_p4), %vm279_vm0, %v2993_v35 }
 0x298   : >> { %v2428_v24 = vpop.f32.mrf.mxu0  ;;  %2663 = vst.msk [vmem:[#allocation2 + $0x1a8] sm:$0xff] %vm279_vm0, %v2631_v62  ;;  %v2556_v36 = vmax.f32 %v2514_v43, 0.0  ;;  %v2509_v57 = vadd.f32 %v2508_v37, %v7019_v55  ;;  %v2634_v56 = vadd.f32 %v7023_v5, %v2594_v40  ;;  %v2593_v14 = vmul.f32 %v7011_v46, %v2553_v26  ;;  %3218 = vst.msk [vmem:[#allocation3 + $0x60] sm:$0xff] (%p420_p4), %vm279_vm0, %v7156_v20  ;;  %v3249_v33 = vld [vmem:[#allocation2 + $0x31] sm:$0xff] (%p420_p4)  ;;  %v7167_v59 = vld [vmem:[#allocation2 + $0x47] sm:$0xff] (%p420_p4) }
 0x299   : >> { %2647 = vst.msk [vmem:[#allocation2 + $0xa8] sm:$0xff] %vm279_vm0, %v2615_v42  ;;  %v2540_v12 = vmax.f32 %v2434_v9, 0.0  ;;  %v2429_v1 = vadd.f32 %v2428_v24, %v6954_v50  ;;  %v2618_v3 = vadd.f32 %v7023_v5, %v2578_v45  ;;  %v2577_v15 = vmul.f32 %v7011_v46, %v2537_v32  ;;  %v5412_v18 = vpop.f32.mrf.mxu1  ;;  %3219 = vst.msk [vmem:[#allocation3 + $0x88] sm:$0xff] (%p420_p4), %vm279_vm0, %v7162_v17  ;;  %v7173_v8 = vld [vmem:[#allocation2 + $0x68] sm:$0xff] (%p420_p4)  ;;  %v7186_v28 = vld [vmem:[#allocation2 + $0x70] sm:$0xff] (%p420_p4) }
 0x29a   : >> { %v5388_v30 = vpop.f32.mrf.mxu0  ;;  %v2596_v48 = vmul.f32 %v7011_v46, %v2556_v36  ;;  %v2555_v29 = vmax.f32 %v2509_v57, 0.0  ;;  %2666 = vst.msk [vmem:[#allocation2 + $0x1d0] sm:$0xff] %vm279_vm0, %v2634_v56  ;;  %v2633_v55 = vadd.f32 %v7023_v5, %v2593_v14  ;;  %v2524_v41 = vadd.f32 %v5412_v18, %v7029_v23  ;;  %v7175_v11 = vld [vmem:[#allocation2 + $0x28] sm:$0xff] (%p420_p4)  ;;  %3473 = vst.msk [vmem:[#allocation3 + $0x18] sm:$0xff] (%p420_p4), %vm279_vm0, %v7167_v59  ;;  %v7188_v42 = vld [vmem:[#allocation2 + $0x30] sm:$0xff] (%p420_p4) }
 0x29b   : >> { %v2580_v51 = vmul.f32 %v7011_v46, %v2540_v12  ;;  %v2539_v39 = vmax.f32 %v2429_v1, 0.0  ;;  %2650 = vst.msk [vmem:[#allocation2 + $0xd0] sm:$0xff] %vm279_vm0, %v2618_v3  ;;  %v2617_v50 = vadd.f32 %v7023_v5, %v2577_v15  ;;  %v2444_v34 = vadd.f32 %v5388_v30, %v6963_v27  ;;  %v2518_v6 = vpop.f32.mrf.mxu1  ;;  %v7177_v58 = vld [vmem:[#allocation2 + $0x49] sm:$0xff] (%p420_p4)  ;;  %2963 = vst.msk [vmem:[#allocation3 + $0x80] sm:$0xff] (%p420_p4), %vm279_vm0, %v3249_v33  ;;  %v7199_v62 = vld [vmem:[#allocation2 + $0x51] sm:$0xff] (%p420_p4) }
 0x29c   : >> { %v2438_v63 = vpop.f32.mrf.mxu0  ;;  %v2636_v47 = vadd.f32 %v7023_v5, %v2596_v48  ;;  %v2595_v49 = vmul.f32 %v7011_v46, %v2555_v29  ;;  %2665 = vst.msk [vmem:[#allocation2 + $0x1c8] sm:$0xff] %vm279_vm0, %v2633_v55  ;;  %v2558_v54 = vmax.f32 %v2524_v41, 0.0  ;;  %v2519_v23 = vadd.f32 %v2518_v6, %v7027_v19  ;;  %2707 = vst.msk [vmem:[#allocation3 + $0xa0] sm:$0xff] (%p420_p4), %vm279_vm0, %v7167_v59  ;;  %v7184_v61 = vld [vmem:[#allocation2 + $0x4f] sm:$0xff] (%p420_p4)  ;;  %v7201_v9 = vld [vmem:[#allocation2 + $0x67] sm:$0xff] (%p420_p4) }
 0x29d   : >> { %v2620_v44 = vadd.f32 %v7023_v5, %v2580_v51  ;;  %v2579_v22 = vmul.f32 %v7011_v46, %v2539_v39  ;;  %2649 = vst.msk [vmem:[#allocation2 + $0xc8] sm:$0xff] %vm279_vm0, %v2617_v50  ;;  %v2542_v52 = vmax.f32 %v2444_v34, 0.0  ;;  %v2439_v27 = vadd.f32 %v2438_v63, %v6960_v13  ;;  %3216 = vst.msk [vmem:[#allocation3 + $0x10] sm:$0xff] (%p420_p4), %vm279_vm0, %v7175_v11  ;;  %v7203_v43 = vld [vmem:[#allocation2 + $0x88] sm:$0xff] (%p420_p4)  ;;  %v7217_v32 = vld [vmem:[#allocation2 + $0x90] sm:$0xff] (%p420_p4) }
 0x29e   : >> { %2668 = vst.msk [vmem:[#allocation2 + $0x1f0] sm:$0xff] %vm279_vm0, %v2636_v47  ;;  %v2635_v7 = vadd.f32 %v7023_v5, %v2595_v49  ;;  %v2598_v25 = vmul.f32 %v7011_v46, %v2558_v54  ;;  %v2557_v53 = vmax.f32 %v2519_v23, 0.0  ;;  %2964 = vst.msk [vmem:[#allocation3 + $0xa8] sm:$0xff] (%p420_p4), %vm279_vm0, %v7177_v58  ;;  %3569 = vrot.lane.b32.xlu0 (%p420_p4), %v7156_v20, %s5677_s27  ;;  %v7213_v45 = vld [vmem:[#allocation2 + $0x69] sm:$0xff] (%p420_p4)  ;;  %v7227_v26 = vld [vmem:[#allocation2 + $0x71] sm:$0xff] (%p420_p4) }
 0x29f   : >> { %2652 = vst.msk [vmem:[#allocation2 + $0xf0] sm:$0xff] %vm279_vm0, %v2620_v44  ;;  %v2619_v4 = vadd.f32 %v7023_v5, %v2579_v22  ;;  %v2582_v2 = vmul.f32 %v7011_v46, %v2542_v52  ;;  %v2541_v60 = vmax.f32 %v2439_v27, 0.0  ;;  %3220 = vst.msk [vmem:[#allocation3 + $0xb0] sm:$0xff] (%p420_p4), %vm279_vm0, %v7173_v8  ;;  %v7215_v40 = vld [vmem:[#allocation2 + $0x6f] sm:$0xff] (%p420_p4)  ;;  %v7229_v24 = vld [vmem:[#allocation2 + $0x87] sm:$0xff] (%p420_p4) }
 0x2a0   : >> { %2667 = vst.msk [vmem:[#allocation2 + $0x1e8] sm:$0xff] %vm279_vm0, %v2635_v7  ;;  %v2638_v19 = vadd.f32 %v7023_v5, %v2598_v25  ;;  %v2597_v16 = vmul.f32 %v7011_v46, %v2557_v53  ;;  %3474 = vst.msk [vmem:[#allocation3 + $0x40] sm:$0xff] (%p420_p4), %vm279_vm0, %v7184_v61  ;;  %v7239_v37 = vld [vmem:[#allocation2 + $0x89] sm:$0xff] (%p420_p4)  ;;  %v3936_v36 = vld [vmem:[%s8541_s5 + $0x78] sm:$0xff] (%p420_p4) }
 0x2a1   : >> { %2651 = vst.msk [vmem:[#allocation2 + $0xe8] sm:$0xff] %vm279_vm0, %v2619_v4  ;;  %v2622_v13 = vadd.f32 %v7023_v5, %v2582_v2  ;;  %v2581_v31 = vmul.f32 %v7011_v46, %v2541_v60  ;;  %422 = sbr.rel (!%p420_p4) target bundleno = 64 (0x40), region = 92  ;;  %v2735_v46 = vld [vmem:[#allocation2 + $0x8] sm:$0xff] (%p420_p4)  ;;  %3217 = vst.msk [vmem:[#allocation3 + $0x38] sm:$0xff] (%p420_p4), %vm279_vm0, %v7188_v42  ;;  %v3935_v1 = vld [vmem:[%s8541_s5 + $0x70] sm:$0xff] (%p420_p4)  ;;  %4097 = vmatpush1.msra.mxu0 (%p420_p4), %v3936_v36 }
 0x2a2   : >> { %2670 = vst.msk [vmem:[#allocation2 + $0x210] sm:$0xff] %vm279_vm0, %v2638_v19  ;;  %v2637_v21 = vadd.f32 %v7023_v5, %v2597_v16  ;;  %2799 = vrot.lane.b32.xlu1 (%p420_p4), %v2735_v46, %s5677_s27  ;;  %2708 = vst.msk [vmem:[#allocation3 + $0xc8] sm:$0xff] (%p420_p4), %vm279_vm0, %v7184_v61  ;;  %v7241_v12 = vld [vmem:[#allocation2 + $0x8f] sm:$0xff] (%p420_p4)  ;;  %3058 = vrot.lane.b32.xlu0 (%p420_p4), %v2993_v35, %s5677_s27  ;;  %v7260_v3 = vld [vmem:[#allocation2 + $0xa7] sm:$0xff] (%p420_p4) }
 0x2a3   : >> { %2654 = vst.msk [vmem:[#allocation2 + $0x110] sm:$0xff] %vm279_vm0, %v2622_v13  ;;  %v2621_v38 = vadd.f32 %v7023_v5, %v2581_v31  ;;  %v3248_v5 = vld [vmem:[#allocation2 + $0x29] sm:$0xff] (%p420_p4)  ;;  %3221 = vst.msk [vmem:[#allocation3 + $0xd8] sm:$0xff] (%p420_p4), %vm279_vm0, %v7186_v28  ;;  %4098 = vmatprep.subr.mxu0 (%p420_p4), %v5674_v0  ;;  %v3968_v56 = vld [vmem:[%s8541_s5 + $0x178] sm:$0xff] (%p420_p4) }
 0x2a4   : >> { %2669 = vst.msk [vmem:[#allocation2 + $0x208] sm:$0xff] %vm279_vm0, %v2637_v21  ;;  %2962 = vst.msk [vmem:[#allocation3 + $0x58] sm:$0xff] (%p420_p4), %vm279_vm0, %v3248_v5  ;;  %v2736_v57 = vld [vmem:[#allocation2 + $0x10] sm:$0xff] (%p420_p4)  ;;  %4099 = vmatpush1.msra.mxu0 (%p420_p4), %v3935_v1  ;;  %v3934_v15 = vld [vmem:[%s8541_s5 + $0x68] sm:$0xff] (%p420_p4)  ;;  %4322 = vmatpush1.msra.mxu1 (%p420_p4), %v3968_v56 }
 0x2a5   : >> { %2653 = vst.msk [vmem:[#allocation2 + $0x108] sm:$0xff] %vm279_vm0, %v2621_v38  ;;  %3475 = vst.msk [vmem:[#allocation3 + $0x68] sm:$0xff] (%p420_p4), %vm279_vm0, %v7201_v9  ;;  %v3967_v14 = vld [vmem:[%s8541_s5 + $0x170] sm:$0xff] (%p420_p4)  ;;  %4100 = vmatprep.subr.mxu0 (%p420_p4), %v5674_v0  ;;  %4323 = vmatprep.subr.mxu1 (%p420_p4), %v5674_v0  ;;  %v3933_v18 = vld [vmem:[%s8541_s5 + $0x60] sm:$0xff] (%p420_p4) }
 0x2a6   : > { %3312 = vrot.lane.b32.xlu1 %v3248_v5, %s5677_s27  ;;  %2965 = vst.msk [vmem:[#allocation3 + $0xd0] sm:$0xff] %vm279_vm0, %v7199_v62  ;;  %2709 = vst.msk [vmem:[#allocation3 + $0xf0] sm:$0xff] %vm279_vm0, %v7201_v9  ;;  %2801 = vrot.lane.b32.xlu0 %v2736_v57, %s5677_s27  ;;  %v7276_v30 = vld [vmem:[#allocation2 + $0xaf] sm:$0xff]  ;;  %v3932_v48 = vld [vmem:[%s8541_s5 + $0x58] sm:$0xff] }
 0x2a7   : > { %3222 = vst.msk [vmem:[#allocation3 + $0x100] sm:$0xff] %vm279_vm0, %v7203_v43  ;;  %3476 = vst.msk [vmem:[#allocation3 + $0x90] sm:$0xff] %vm279_vm0, %v7215_v40  ;;  %4101 = vmatpush1.msra.mxu0 %v3934_v15  ;;  %4324 = vmatpush1.msra.mxu1 %v3967_v14  ;;  %v3966_v51 = vld [vmem:[%s8541_s5 + $0x168] sm:$0xff]  ;;  %v3965_v39 = vld [vmem:[%s8541_s5 + $0x160] sm:$0xff] }
 0x2a8   : > { %2966 = vst.msk [vmem:[#allocation3 + $0xf8] sm:$0xff] %vm279_vm0, %v7213_v45  ;;  %2710 = vst.msk [vmem:[#allocation3 + $0x118] sm:$0xff] %vm279_vm0, %v7215_v40  ;;  %4102 = vmatprep.subr.mxu0 %v5674_v0  ;;  %4325 = vmatprep.subr.mxu1 %v5674_v0  ;;  %v7300_v29 = vld [vmem:[#allocation2 + $0xc7] sm:$0xff]  ;;  %v3931_v50 = vld [vmem:[%s8541_s5 + $0x50] sm:$0xff] }
 0x2a9   : > { %3223 = vst.msk [vmem:[#allocation3 + $0x128] sm:$0xff] %vm279_vm0, %v7217_v32  ;;  %3477 = vst.msk [vmem:[#allocation3 + $0xb8] sm:$0xff] %vm279_vm0, %v7229_v24  ;;  %4103 = vmatpush1.msra.mxu0 %v3933_v18  ;;  %4326 = vmatpush1.msra.mxu1 %v3966_v51  ;;  %v3964_v55 = vld [vmem:[%s8541_s5 + $0x158] sm:$0xff]  ;;  %v7316_v34 = vld [vmem:[#allocation2 + $0xcf] sm:$0xff] }
 0x2aa   : > { %2967 = vst.msk [vmem:[#allocation3 + $0x120] sm:$0xff] %vm279_vm0, %v7227_v26  ;;  %3571 = vrot.lane.b32.xlu1 %v7162_v17, %s5677_s27  ;;  %3478 = vst.msk [vmem:[#allocation3 + $0xe0] sm:$0xff] %vm279_vm0, %v7241_v12  ;;  %3060 = vrot.lane.b32.xlu0 %v7167_v59, %s5677_s27  ;;  %v3930_v41 = vld [vmem:[%s8541_s5 + $0x48] sm:$0xff]  ;;  %v3963_v63 = vld [vmem:[%s8541_s5 + $0x150] sm:$0xff] }
 0x2ab   : > { %2968 = vst.msk [vmem:[#allocation3 + $0x148] sm:$0xff] %vm279_vm0, %v7239_v37  ;;  %3479 = vst.msk [vmem:[#allocation3 + $0x108] sm:$0xff] %vm279_vm0, %v7260_v3  ;;  %4104 = vmatprep.subr.mxu0 %v5674_v0  ;;  %4327 = vmatprep.subr.mxu1 %v5674_v0  ;;  %v7330_v6 = vld [vmem:[#allocation2 + $0xe7] sm:$0xff]  ;;  %v3928_v22 = vld [vmem:[%s8541_s5 + $0x38] sm:$0xff] }
 0x2ac   : > { %3480 = vst.msk [vmem:[#allocation3 + $0x130] sm:$0xff] %vm279_vm0, %v7276_v30  ;;  %3481 = vst.msk [vmem:[#allocation3 + $0x158] sm:$0xff] %vm279_vm0, %v7300_v29  ;;  %4105 = vmatpush1.msra.mxu0 %v3932_v48  ;;  %4328 = vmatpush1.msra.mxu1 %v3965_v39  ;;  %v3929_v44 = vld [vmem:[%s8541_s5 + $0x40] sm:$0xff]  ;;  %v3962_v47 = vld [vmem:[%s8541_s5 + $0x148] sm:$0xff] }
 0x2ad   : > { %4106 = vmatprep.subr.mxu0 %v5674_v0  ;;  %4329 = vmatprep.subr.mxu1 %v5674_v0  ;;  %3482 = vst.msk [vmem:[#allocation3 + $0x180] sm:$0xff] %vm279_vm0, %v7316_v34  ;;  %3483 = vst.msk [vmem:[#allocation3 + $0x1a8] sm:$0xff] %vm279_vm0, %v7330_v6  ;;  %v3961_v49 = vld [vmem:[%s8541_s5 + $0x140] sm:$0xff]  ;;  %v7352_v52 = vld [vmem:[#allocation2 + $0xef] sm:$0xff] }
 0x2ae   : > { %3314 = vrot.lane.b32.xlu1 %v3249_v33, %s5677_s27  ;;  %2803 = vrot.lane.b32.xlu0 %v7175_v11, %s5677_s27  ;;  %3484 = vst.msk [vmem:[#allocation3 + $0x1d0] sm:$0xff] %vm279_vm0, %v7352_v52  ;;  %v3927_v54 = vld [vmem:[%s8541_s5 + $0x30] sm:$0xff]  ;;  %v3960_v27 = vld [vmem:[%s8541_s5 + $0x138] sm:$0xff]  ;;  %v7373_v4 = vld [vmem:[#allocation2 + $0x107] sm:$0xff] }
 0x2af   : > { %4107 = vmatpush1.msra.mxu0 %v3931_v50  ;;  %4330 = vmatpush1.msra.mxu1 %v3964_v55  ;;  %v3926_v23 = vld [vmem:[%s8541_s5 + $0x28] sm:$0xff]  ;;  %v3959_v7 = vld [vmem:[%s8541_s5 + $0x130] sm:$0xff]  ;;  %3485 = vst.msk [vmem:[#allocation3 + $0x1f8] sm:$0xff] %vm279_vm0, %v7373_v4  ;;  %v3925_v60 = vld [vmem:[%s8541_s5 + $0x20] sm:$0xff] }
 0x2b0   : > { %4108 = vmatprep.subr.mxu0 %v5674_v0  ;;  %4331 = vmatprep.subr.mxu1 %v5674_v0  ;;  %v2928_v2 = vld [vmem:[#allocation2 + $0x9] sm:$0xff]  ;;  %v2929_v19 = vld [vmem:[#allocation2 + $0x11] sm:$0xff]  ;;  %v3957_v38 = vld [vmem:[%s8541_s5 + $0x120] sm:$0xff] }
 0x2b1   : > { %4109 = vmatpush1.msra.mxu0 %v3930_v41  ;;  %4332 = vmatpush1.msra.mxu1 %v3963_v63  ;;  %v2671_v25 = vld [vmem:[#allocation2 + $0x7] sm:$0xff]  ;;  %2960 = vst.msk [vmem:[#allocation3 + $0x8] sm:$0xff] %vm279_vm0, %v2928_v2  ;;  %v7394_v13 = vld [vmem:[#allocation2 + $0x10f] sm:$0xff]  ;;  %2961 = vst.msk [vmem:[#allocation3 + $0x30] sm:$0xff] %vm279_vm0, %v2929_v19 }
 0x2b2   : > { %3573 = vrot.lane.b32.xlu1 %v7173_v8, %s5677_s27  ;;  %3062 = vrot.lane.b32.xlu0 %v7184_v61, %s5677_s27  ;;  %2703 = vst.msk [vmem:[#allocation3] sm:$0xff] %vm279_vm0, %v2671_v25  ;;  %v3958_v53 = vld [vmem:[%s8541_s5 + $0x128] sm:$0xff]  ;;  %3486 = vst.msk [vmem:[#allocation3 + $0x220] sm:$0xff] %vm279_vm0, %v7394_v13  ;;  %v7405_v31 = vld [vmem:[#allocation2 + $0x111] sm:$0xff] }
 0x2b3   : > { %4110 = vmatprep.subr.mxu0 %v5674_v0  ;;  %4333 = vmatprep.subr.mxu1 %v5674_v0  ;;  %v3924_v16 = vld [vmem:[%s8541_s5 + $0x18] sm:$0xff]  ;;  %v2672_v21 = vld [vmem:[#allocation2 + $0xf] sm:$0xff]  ;;  %2977 = vst.msk [vmem:[#allocation3 + $0x2b0] sm:$0xff] %vm279_vm0, %v7405_v31  ;;  %v7421_v46 = vld [vmem:[#allocation2 + $0x127] sm:$0xff] }
 0x2b4   : > { %4111 = vmatpush1.msra.mxu0 %v3929_v44  ;;  %4334 = vmatpush1.msra.mxu1 %v3962_v47  ;;  %v3923_v10 = vld [vmem:[%s8541_s5 + $0x10] sm:$0xff]  ;;  %2704 = vst.msk [vmem:[#allocation3 + $0x28] sm:$0xff] %vm279_vm0, %v2672_v21  ;;  %v3956_v5 = vld [vmem:[%s8541_s5 + $0x118] sm:$0xff]  ;;  %3487 = vst.msk [vmem:[#allocation3 + $0x248] sm:$0xff] %vm279_vm0, %v7421_v46 }
 0x2b5   : > { %4112 = vmatprep.subr.mxu0 %v5674_v0  ;;  %4335 = vmatprep.subr.mxu1 %v5674_v0  ;;  %v7432_v35 = vld [vmem:[#allocation2 + $0x12f] sm:$0xff]  ;;  %v7443_v11 = vld [vmem:[#allocation2 + $0x147] sm:$0xff]  ;;  %v3952_v14 = vld [vmem:[%s8541_s5 + $0xf8] sm:$0xff] }
 0x2b6   : > { %3316 = vrot.lane.b32.xlu1 %v7177_v58, %s5677_s27  ;;  %2805 = vrot.lane.b32.xlu0 %v7188_v42, %s5677_s27  ;;  %v7434_v33 = vld [vmem:[#allocation2 + $0x131] sm:$0xff]  ;;  %v3922_v59 = vld [vmem:[%s8541_s5 + $0x8] sm:$0xff]  ;;  %3488 = vst.msk [vmem:[#allocation3 + $0x270] sm:$0xff] %vm279_vm0, %v7432_v35  ;;  %3489 = vst.msk [vmem:[#allocation3 + $0x298] sm:$0xff] %vm279_vm0, %v7443_v11 }
 0x2b7   : > { %4113 = vmatpush1.msra.mxu0 %v3928_v22  ;;  %4336 = vmatpush1.msra.mxu1 %v3961_v49  ;;  %v7445_v58 = vld [vmem:[#allocation2 + $0x149] sm:$0xff]  ;;  %2979 = vst.msk [vmem:[#allocation3 + $0x300] sm:$0xff] %vm279_vm0, %v7434_v33  ;;  %v7482_v57 = vld [vmem:[#allocation2 + $0x171] sm:$0xff]  ;;  %v3953_v18 = vld [vmem:[%s8541_s5 + $0x100] sm:$0xff] }
 0x2b8   : > { %4114 = vmatprep.subr.mxu0 %v5674_v0  ;;  %4337 = vmatprep.subr.mxu1 %v5674_v0  ;;  %v3955_v61 = vld [vmem:[%s8541_s5 + $0x110] sm:$0xff]  ;;  %2980 = vst.msk [vmem:[#allocation3 + $0x328] sm:$0xff] %vm279_vm0, %v7445_v58  ;;  %2983 = vst.msk [vmem:[#allocation3 + $0x3a0] sm:$0xff] %vm279_vm0, %v7482_v57  ;;  %v3954_v56 = vld [vmem:[%s8541_s5 + $0x108] sm:$0xff] }
 0x2b9   : > { %4115 = vmatpush1.msra.mxu0 %v3927_v54  ;;  %4338 = vmatpush1.msra.mxu1 %v3960_v27  ;;  %v7456_v42 = vld [vmem:[#allocation2 + $0x14f] sm:$0xff]  ;;  %v7512_v15 = vld [vmem:[#allocation2 + $0x187] sm:$0xff]  ;;  %v3984_v48 = vld [vmem:[%s8541_s5 + $0x1f8] sm:$0xff] }
 0x2ba   : > { %3575 = vrot.lane.b32.xlu1 %v7186_v28, %s5677_s27  ;;  %3064 = vrot.lane.b32.xlu0 %v7201_v9, %s5677_s27  ;;  %v7464_v9 = vld [vmem:[#allocation2 + $0x167] sm:$0xff]  ;;  %3490 = vst.msk [vmem:[#allocation3 + $0x2c0] sm:$0xff] %vm279_vm0, %v7456_v42  ;;  %v7478_v36 = vld [vmem:[#allocation2 + $0x16f] sm:$0xff]  ;;  %3493 = vst.msk [vmem:[#allocation3 + $0x338] sm:$0xff] %vm279_vm0, %v7512_v15 }
 0x2bb   : > { %4116 = vmatprep.subr.mxu0 %v5674_v0  ;;  %4339 = vmatprep.subr.mxu1 %v5674_v0  ;;  %v7480_v1 = vld [vmem:[#allocation2 + $0x190] sm:$0xff]  ;;  %3491 = vst.msk [vmem:[#allocation3 + $0x2e8] sm:$0xff] %vm279_vm0, %v7464_v9  ;;  %2725 = vst.msk [vmem:[#allocation3 + $0x370] sm:$0xff] %vm279_vm0, %v7464_v9  ;;  %v7524_v51 = vld [vmem:[#allocation2 + $0x1a8] sm:$0xff] }
 0x2bc   : > { %4117 = vmatpush1.msra.mxu0 %v3926_v23  ;;  %4340 = vmatpush1.msra.mxu1 %v3959_v7  ;;  %3492 = vst.msk [vmem:[#allocation3 + $0x310] sm:$0xff] %vm279_vm0, %v7478_v36  ;;  %2726 = vst.msk [vmem:[#allocation3 + $0x398] sm:$0xff] %vm279_vm0, %v7478_v36  ;;  %v7544_v39 = vld [vmem:[#allocation2 + $0x189] sm:$0xff]  ;;  %v3949_v63 = vld [vmem:[%s8541_s5 + $0xe0] sm:$0xff] }
 0x2bd   : > { %4118 = vmatprep.subr.mxu0 %v5674_v0  ;;  %4341 = vmatprep.subr.mxu1 %v5674_v0  ;;  %3239 = vst.msk [vmem:[#allocation3 + $0x3a8] sm:$0xff] %vm279_vm0, %v7480_v1  ;;  %2727 = vst.msk [vmem:[#allocation3 + $0x3c0] sm:$0xff] %vm279_vm0, %v7512_v15  ;;  %v7546_v50 = vld [vmem:[#allocation2 + $0xb0] sm:$0xff]  ;;  %v3950_v55 = vld [vmem:[%s8541_s5 + $0xe8] sm:$0xff] }
 0x2be   : > { %3318 = vrot.lane.b32.xlu1 %v7199_v62, %s5677_s27  ;;  %2807 = vrot.lane.b32.xlu0 %v7156_v20, %s5677_s27  ;;  %v7423_v20 = vld [vmem:[#allocation2 + $0x129] sm:$0xff]  ;;  %v7458_v62 = vld [vmem:[#allocation2 + $0x151] sm:$0xff]  ;;  %3240 = vst.msk [vmem:[#allocation3 + $0x3d0] sm:$0xff] %vm279_vm0, %v7524_v51  ;;  %2984 = vst.msk [vmem:[#allocation3 + $0x3c8] sm:$0xff] %vm279_vm0, %v7544_v39 }
 0x2bf   : > { %4119 = vmatpush1.msra.mxu0 %v3925_v60  ;;  %4342 = vmatpush1.msra.mxu1 %v3958_v53  ;;  %2978 = vst.msk [vmem:[#allocation3 + $0x2d8] sm:$0xff] %vm279_vm0, %v7423_v20  ;;  %2981 = vst.msk [vmem:[#allocation3 + $0x350] sm:$0xff] %vm279_vm0, %v7458_v62  ;;  %v3192_v41 = vld [vmem:[#allocation2 + $0xa8] sm:$0xff]  ;;  %v7574_v22 = vld [vmem:[#allocation2 + $0x1b0] sm:$0xff] }
 0x2c0   : > { %4120 = vmatprep.subr.mxu0 %v5674_v0  ;;  %4343 = vmatprep.subr.mxu1 %v5674_v0  ;;  %3224 = vst.msk [vmem:[#allocation3 + $0x150] sm:$0xff] %vm279_vm0, %v3192_v41  ;;  %v7565_v44 = vld [vmem:[#allocation2 + $0x18f] sm:$0xff]  ;;  %3241 = vst.msk [vmem:[#allocation3 + $0x3f8] sm:$0xff] %vm279_vm0, %v7574_v22  ;;  %v3981_v27 = vld [vmem:[%s8541_s5 + $0x1e0] sm:$0xff] }
 0x2c1   : > { %4121 = vmatpush1.msra.mxu0 %v3924_v16  ;;  %4344 = vmatpush1.msra.mxu1 %v3957_v38  ;;  %v3982_v47 = vld [vmem:[%s8541_s5 + $0x1e8] sm:$0xff]  ;;  %v2937_v49 = vld [vmem:[#allocation2 + $0x91] sm:$0xff]  ;;  %3494 = vst.msk [vmem:[#allocation3 + $0x360] sm:$0xff] %vm279_vm0, %v7565_v44  ;;  %2728 = vst.msk [vmem:[#allocation3 + $0x3e8] sm:$0xff] %vm279_vm0, %v7565_v44 }
 0x2c2   : > { %3577 = vrot.lane.b32.xlu1 %v7203_v43, %s5677_s27  ;;  %3066 = vrot.lane.b32.xlu0 %v7215_v40, %s5677_s27  ;;  %v7468_v40 = vld [vmem:[#allocation2 + $0x169] sm:$0xff]  ;;  %v3255_v54 = vld [vmem:[#allocation2 + $0x91] sm:$0xff]  ;;  %2969 = vst.msk [vmem:[#allocation3 + $0x170] sm:$0xff] %vm279_vm0, %v2937_v49  ;;  %v3941_v49 = vld [vmem:[%s8541_s5 + $0xa0] sm:$0xff] }
 0x2c3   : > { %4122 = vmatprep.subr.mxu0 %v5674_v0  ;;  %4345 = vmatprep.subr.mxu1 %v5674_v0  ;;  %2982 = vst.msk [vmem:[#allocation3 + $0x378] sm:$0xff] %vm279_vm0, %v7468_v40  ;;  %v7594_v23 = vld [vmem:[#allocation2 + $0x191] sm:$0xff]  ;;  %v7596_v7 = vld [vmem:[#allocation2 + $0xc8] sm:$0xff] }
 0x2c4   : > { %4123 = vmatpush1.msra.mxu0 %v3923_v10  ;;  %4346 = vmatpush1.msra.mxu1 %v3956_v5  ;;  %v3947_v2 = vld [vmem:[%s8541_s5 + $0xd0] sm:$0xff]  ;;  %2985 = vst.msk [vmem:[#allocation3 + $0x3f0] sm:$0xff] %vm279_vm0, %v7594_v23  ;;  %v3946_v53 = vld [vmem:[%s8541_s5 + $0xc8] sm:$0xff] }
 0x2c5   : > { %4124 = vmatprep.subr.mxu0 %v5674_v0  ;;  %4347 = vmatprep.subr.mxu1 %v5674_v0  ;;  %v2680_v25 = vld [vmem:[#allocation2 + $0x8f] sm:$0xff]  ;;  %v7615_v19 = vld [vmem:[#allocation2 + $0x1a7] sm:$0xff] }
 0x2c6   : > { %3320 = vrot.lane.b32.xlu1 %v7213_v45, %s5677_s27  ;;  %v7466_v45 = vld [vmem:[#allocation2 + $0x188] sm:$0xff]  ;;  %2809 = vrot.lane.b32.xlu0 %v7162_v17, %s5677_s27  ;;  %v3193_v60 = vld [vmem:[#allocation2 + $0xb0] sm:$0xff]  ;;  %2712 = vst.msk [vmem:[#allocation3 + $0x168] sm:$0xff] %vm279_vm0, %v2680_v25  ;;  %3495 = vst.msk [vmem:[#allocation3 + $0x388] sm:$0xff] %vm279_vm0, %v7615_v19 }
 0x2c7   : > { %3238 = vst.msk [vmem:[#allocation3 + $0x380] sm:$0xff] %vm279_vm0, %v7466_v45  ;;  %v7492_v17 = vld [vmem:[#allocation2 + $0xa8] sm:$0xff]  ;;  %4125 = vmatpush1.msra.mxu0 %v3922_v59  ;;  %4348 = vmatpush1.msra.mxu1 %v3955_v61  ;;  %3225 = vst.msk [vmem:[#allocation3 + $0x178] sm:$0xff] %vm279_vm0, %v3193_v60  ;;  %v3979_v16 = vld [vmem:[%s8541_s5 + $0x1d0] sm:$0xff] }
 0x2c8   : > { %4126 = vmatprep.subr.mxu0 %v5674_v0  ;;  %4349 = vmatprep.subr.mxu1 %v5674_v0  ;;  %v7624_v38 = vld [vmem:[#allocation2 + $0x1c8] sm:$0xff]  ;;  %2729 = vst.msk [vmem:[#allocation3 + $0x410] sm:$0xff] %vm279_vm0, %v7615_v19  ;;  %v7646_v61 = vld [vmem:[#allocation2 + $0xd0] sm:$0xff] }
 0x2c9   : > { %4350 = vmatpush1.msra.mxu1 %v3954_v56  ;;  %v2938_v21 = vld [vmem:[#allocation2 + $0xa9] sm:$0xff]  ;;  %3242 = vst.msk [vmem:[#allocation3 + $0x420] sm:$0xff] %vm279_vm0, %v7624_v38 }
 0x2ca   : > { %3579 = vrot.lane.b32.xlu1 %v7217_v32, %s5677_s27  ;;  %3068 = vrot.lane.b32.xlu0 %v7229_v24, %s5677_s27  ;;  %v3951_v24 = vld [vmem:[%s8541_s5 + $0xf0] sm:$0xff]  ;;  %2970 = vst.msk [vmem:[#allocation3 + $0x198] sm:$0xff] %vm279_vm0, %v2938_v21  ;;  %v3978_v5 = vld [vmem:[%s8541_s5 + $0x1c8] sm:$0xff] }
 0x2cb   : > { %4351 = vmatprep.subr.mxu1 %v5674_v0  ;;  %v3256_v10 = vld [vmem:[#allocation2 + $0xa9] sm:$0xff] }
 0x2cc   : > { %4352 = vmatpush1.msra.mxu1 %v3953_v18  ;;  %v7644_v59 = vld [vmem:[#allocation2 + $0x1a9] sm:$0xff] }
 0x2cd   : > { %4353 = vmatprep.subr.mxu1 %v5674_v0  ;;  %2986 = vst.msk [vmem:[#allocation3 + $0x418] sm:$0xff] %vm279_vm0, %v7644_v59  ;;  %v2681_v56 = vld [vmem:[#allocation2 + $0xa7] sm:$0xff]  ;;  %v3943_v18 = vld [vmem:[%s8541_s5 + $0xb0] sm:$0xff] }
 0x2ce   : > { %3322 = vrot.lane.b32.xlu1 %v7227_v26, %s5677_s27  ;;  %v3921_v26 = vld [vmem:[%s8541_s5] sm:$0xff]  ;;  %2811 = vrot.lane.b32.xlu0 %v7173_v8, %s5677_s27  ;;  %v3983_v8 = vld [vmem:[%s8541_s5 + $0x1f0] sm:$0xff]  ;;  %2713 = vst.msk [vmem:[#allocation3 + $0x190] sm:$0xff] %vm279_vm0, %v2681_v56  ;;  %v7724_v25 = vld [vmem:[#allocation2 + $0x1e8] sm:$0xff] }
 0x2cf   : > { %4127 = vmatpush1.msra.mxu0 %v3921_v26  ;;  %4354 = vmatpush2.msra.mxu1 %v3984_v48  ;;  %v3944_v26 = vld [vmem:[%s8541_s5 + $0xb8] sm:$0xff]  ;;  %v3975_v41 = vld [vmem:[%s8541_s5 + $0x1b0] sm:$0xff]  ;;  %3244 = vst.msk [vmem:[#allocation3 + $0x470] sm:$0xff] %vm279_vm0, %v7724_v25 }
 0x2d0   : > { %4128 = vmatprep.subr.mxu0 %v5674_v0  ;;  %4355 = vmatprep.subr.mxu1 %v5674_v0  ;;  %v3976_v48 = vld [vmem:[%s8541_s5 + $0x1b8] sm:$0xff]  ;;  %v2940_v60 = vld [vmem:[#allocation2 + $0xc9] sm:$0xff] }
 0x2d1   : > { %4129 = vmatpush2.msra.mxu0 %v3952_v14  ;;  %4356 = vmatpush2.msra.mxu1 %v3983_v8  ;;  %v3194_v14 = vld [vmem:[#allocation2 + $0xc8] sm:$0xff]  ;;  %v2939_v8 = vld [vmem:[#allocation2 + $0xb1] sm:$0xff]  ;;  %2972 = vst.msk [vmem:[#allocation3 + $0x1e8] sm:$0xff] %vm279_vm0, %v2940_v60 }
 0x2d2   : > { %3581 = vrot.lane.b32.xlu1 %v7492_v17, %s5677_s27  ;;  %4130 = vmatprep.subr.mxu0 %v5674_v0  ;;  %3226 = vst.msk [vmem:[#allocation3 + $0x1a0] sm:$0xff] %vm279_vm0, %v3194_v14  ;;  %2971 = vst.msk [vmem:[#allocation3 + $0x1c0] sm:$0xff] %vm279_vm0, %v2939_v8  ;;  %v7744_v21 = vld [vmem:[#allocation2 + $0x1c9] sm:$0xff]  ;;  %v3259_v8 = vld [vmem:[#allocation2 + $0xd1] sm:$0xff] }
 0x2d3   : > { %4131 = vmatpush2.msra.mxu0 %v3951_v24  ;;  %3070 = vrot.lane.b32.xlu0 %v7241_v12, %s5677_s27  ;;  %v3948_v12 = vld [vmem:[%s8541_s5 + $0xd8] sm:$0xff]  ;;  %v7665_v24 = vld [vmem:[#allocation2 + $0x1af] sm:$0xff]  ;;  %2988 = vst.msk [vmem:[#allocation3 + $0x468] sm:$0xff] %vm279_vm0, %v7744_v21 }
 0x2d4   : > { %4132 = vmatprep.subr.mxu0 %v5674_v0  ;;  %4357 = vmatprep.subr.mxu1 %v5674_v0  ;;  %3496 = vst.msk [vmem:[#allocation3 + $0x3b0] sm:$0xff] %vm279_vm0, %v7665_v24  ;;  %2730 = vst.msk [vmem:[#allocation3 + $0x438] sm:$0xff] %vm279_vm0, %v7665_v24  ;;  %v7765_v56 = vld [vmem:[#allocation2 + $0x1cf] sm:$0xff] }
 0x2d5   : > { %4133 = vmatpush2.msra.mxu0 %v3950_v55  ;;  %4358 = vmatpush2.msra.mxu1 %v3982_v47  ;;  %v7674_v55 = vld [vmem:[#allocation2 + $0x1d0] sm:$0xff]  ;;  %v7696_v47 = vld [vmem:[#allocation2 + $0xe8] sm:$0xff]  ;;  %3498 = vst.msk [vmem:[#allocation3 + $0x400] sm:$0xff] %vm279_vm0, %v7765_v56  ;;  %2732 = vst.msk [vmem:[#allocation3 + $0x488] sm:$0xff] %vm279_vm0, %v7765_v56 }
 0x2d6   : > { %3324 = vrot.lane.b32.xlu1 %v7239_v37, %s5677_s27  ;;  %v2679_v37 = vld [vmem:[#allocation2 + $0x87] sm:$0xff]  ;;  %4134 = vmatprep.subr.mxu0 %v5674_v0  ;;  %3243 = vst.msk [vmem:[#allocation3 + $0x448] sm:$0xff] %vm279_vm0, %v7674_v55  ;;  %v7826_v60 = vld [vmem:[#allocation2 + $0x1ef] sm:$0xff] }
 0x2d7   : > { %2711 = vst.msk [vmem:[#allocation3 + $0x140] sm:$0xff] %vm279_vm0, %v2679_v37  ;;  %4135 = vmatpush2.msra.mxu0 %v3949_v63  ;;  %2813 = vrot.lane.b32.xlu0 %v7186_v28, %s5677_s27  ;;  %v3980_v28 = vld [vmem:[%s8541_s5 + $0x1d8] sm:$0xff]  ;;  %v3970_v14 = vld [vmem:[%s8541_s5 + $0x188] sm:$0xff]  ;;  %3500 = vst.msk [vmem:[#allocation3 + $0x450] sm:$0xff] %vm279_vm0, %v7826_v60 }
 0x2d8   : > { %4136 = vmatprep.subr.mxu0 %v5674_v0  ;;  %4359 = vmatprep.subr.mxu1 %v5674_v0  ;;  %v3257_v37 = vld [vmem:[#allocation2 + $0xb1] sm:$0xff]  ;;  %2734 = vst.msk [vmem:[#allocation3 + $0x4d8] sm:$0xff] %vm279_vm0, %v7826_v60 }
 0x2d9   : > { %4137 = vmatpush2.msra.mxu0 %v3948_v12  ;;  %4360 = vmatpush2.msra.mxu1 %v3981_v27  ;;  %v7694_v63 = vld [vmem:[#allocation2 + $0x1b1] sm:$0xff] }
 0x2da   : > { %3583 = vrot.lane.b32.xlu1 %v7546_v50, %s5677_s27  ;;  %4138 = vmatprep.subr.mxu0 %v5674_v0  ;;  %2987 = vst.msk [vmem:[#allocation3 + $0x440] sm:$0xff] %vm279_vm0, %v7694_v63  ;;  %v3195_v12 = vld [vmem:[#allocation2 + $0xd0] sm:$0xff]  ;;  %v3940_v27 = vld [vmem:[%s8541_s5 + $0x98] sm:$0xff] }
 0x2db   : > { %4361 = vmatprep.subr.mxu1 %v5674_v0  ;;  %3072 = vrot.lane.b32.xlu0 %v7260_v3, %s5677_s27  ;;  %v3945_v3 = vld [vmem:[%s8541_s5 + $0xc0] sm:$0xff]  ;;  %3227 = vst.msk [vmem:[#allocation3 + $0x1c8] sm:$0xff] %vm279_vm0, %v3195_v12  ;;  %v7820_v12 = vld [vmem:[#allocation2 + $0x110] sm:$0xff] }
 0x2dc   : > { %4139 = vmatpush2.msra.mxu0 %v3947_v2  ;;  %4362 = vmatpush2.msra.mxu1 %v3980_v28  ;;  %v7715_v2 = vld [vmem:[#allocation2 + $0x1c7] sm:$0xff] }
 0x2dd   : > { %4140 = vmatprep.subr.mxu0 %v5674_v0  ;;  %4363 = vmatprep.subr.mxu1 %v5674_v0  ;;  %v3973_v28 = vld [vmem:[%s8541_s5 + $0x1a0] sm:$0xff]  ;;  %3497 = vst.msk [vmem:[#allocation3 + $0x3d8] sm:$0xff] %vm279_vm0, %v7715_v2  ;;  %2731 = vst.msk [vmem:[#allocation3 + $0x460] sm:$0xff] %vm279_vm0, %v7715_v2 }
 0x2de   : > { %3326 = vrot.lane.b32.xlu1 %v3255_v54, %s5677_s27  ;;  %4141 = vmatpush2.msra.mxu0 %v3946_v53  ;;  %v2682_v54 = vld [vmem:[#allocation2 + $0xaf] sm:$0xff] }
 0x2df   : > { %4364 = vmatpush2.msra.mxu1 %v3979_v16  ;;  %2815 = vrot.lane.b32.xlu0 %v7203_v43, %s5677_s27  ;;  %v3977_v43 = vld [vmem:[%s8541_s5 + $0x1c0] sm:$0xff]  ;;  %2714 = vst.msk [vmem:[#allocation3 + $0x1b8] sm:$0xff] %vm279_vm0, %v2682_v54  ;;  %v3258_v53 = vld [vmem:[#allocation2 + $0xc9] sm:$0xff]  ;;  %v3972_v16 = vld [vmem:[%s8541_s5 + $0x198] sm:$0xff] }
 0x2e0   : > { %4142 = vmatprep.subr.mxu0 %v5674_v0  ;;  %4365 = vmatprep.subr.mxu1 %v5674_v0  ;;  %v3260_v54 = vld [vmem:[#allocation2 + $0xe9] sm:$0xff] }
 0x2e1   : > { %4143 = vmatpush2.msra.mxu0 %v3945_v3  ;;  %4366 = vmatpush2.msra.mxu1 %v3978_v5  ;;  %v3938_v3 = vld [vmem:[%s8541_s5 + $0x88] sm:$0xff] }
 0x2e2   : > { %3585 = vrot.lane.b32.xlu1 %v7596_v7, %s5677_s27  ;;  %4144 = vmatprep.subr.mxu0 %v5674_v0  ;;  %v2683_v5 = vld [vmem:[#allocation2 + $0xc7] sm:$0xff] }
 0x2e3   : > { %4367 = vmatprep.subr.mxu1 %v5674_v0  ;;  %3074 = vrot.lane.b32.xlu0 %v7276_v30, %s5677_s27  ;;  %v3942_v30 = vld [vmem:[%s8541_s5 + $0xa8] sm:$0xff]  ;;  %2715 = vst.msk [vmem:[#allocation3 + $0x1e0] sm:$0xff] %vm279_vm0, %v2683_v5 }
 0x2e4   : > { %4145 = vmatpush2.msra.mxu0 %v3944_v26  ;;  %4368 = vmatpush2.msra.mxu1 %v3977_v43  ;;  %v3196_v26 = vld [vmem:[#allocation2 + $0xe8] sm:$0xff]  ;;  %v3937_v43 = vld [vmem:[%s8541_s5 + $0x80] sm:$0xff] }
 0x2e5   : > { %4146 = vmatprep.subr.mxu0 %v5674_v0  ;;  %4369 = vmatprep.subr.mxu1 %v5674_v0  ;;  %3228 = vst.msk [vmem:[#allocation3 + $0x1f0] sm:$0xff] %vm279_vm0, %v3196_v26  ;;  %v7852_v5 = vld [vmem:[#allocation2 + $0x207] sm:$0xff] }
 0x2e6   : > { %3328 = vrot.lane.b32.xlu1 %v3256_v10, %s5677_s27  ;;  %4147 = vmatpush2.msra.mxu0 %v3943_v18  ;;  %v7746_v10 = vld [vmem:[#allocation2 + $0xf0] sm:$0xff]  ;;  %3501 = vst.msk [vmem:[#allocation3 + $0x478] sm:$0xff] %vm279_vm0, %v7852_v5 }
 0x2e7   : > { %4370 = vmatpush2.msra.mxu1 %v3976_v48  ;;  %2817 = vrot.lane.b32.xlu0 %v7217_v32, %s5677_s27  ;;  %v3974_v32 = vld [vmem:[%s8541_s5 + $0x1a8] sm:$0xff]  ;;  %v7774_v18 = vld [vmem:[#allocation2 + $0x1f0] sm:$0xff] }
 0x2e8   : > { %4148 = vmatprep.subr.mxu0 %v5674_v0  ;;  %4371 = vmatprep.subr.mxu1 %v5674_v0  ;;  %v2941_v48 = vld [vmem:[#allocation2 + $0xd1] sm:$0xff]  ;;  %3245 = vst.msk [vmem:[#allocation3 + $0x498] sm:$0xff] %vm279_vm0, %v7774_v18  ;;  %v3262_v26 = vld [vmem:[#allocation2 + $0x109] sm:$0xff] }
 0x2e9   : > { %4149 = vmatpush2.msra.mxu0 %v3942_v30  ;;  %4372 = vmatpush2.msra.mxu1 %v3975_v41  ;;  %2973 = vst.msk [vmem:[#allocation3 + $0x210] sm:$0xff] %vm279_vm0, %v2941_v48  ;;  %v7793_v30 = vld [vmem:[#allocation2 + $0x108] sm:$0xff] }
 0x2ea   : > { %3587 = vrot.lane.b32.xlu1 %v7646_v61, %s5677_s27  ;;  %4150 = vmatprep.subr.mxu0 %v5674_v0  ;;  %v2684_v41 = vld [vmem:[#allocation2 + $0xcf] sm:$0xff] }
 0x2eb   : > { %4373 = vmatprep.subr.mxu1 %v5674_v0  ;;  %3076 = vrot.lane.b32.xlu0 %v7300_v29, %s5677_s27  ;;  %v3939_v29 = vld [vmem:[%s8541_s5 + $0x90] sm:$0xff]  ;;  %2716 = vst.msk [vmem:[#allocation3 + $0x208] sm:$0xff] %vm279_vm0, %v2684_v41  ;;  %v3200_v41 = vld [vmem:[#allocation2 + $0x128] sm:$0xff] }
 0x2ec   : > { %4151 = vmatpush2.msra.mxu0 %v3941_v49  ;;  %4374 = vmatpush2.msra.mxu1 %v3974_v32  ;;  %v3197_v49 = vld [vmem:[#allocation2 + $0xf0] sm:$0xff]  ;;  %v7800_v32 = vld [vmem:[#allocation2 + $0x1e7] sm:$0xff]  ;;  %3232 = vst.msk [vmem:[#allocation3 + $0x290] sm:$0xff] %vm279_vm0, %v3200_v41 }
 0x2ed   : > { %4152 = vmatprep.subr.mxu0 %v5674_v0  ;;  %4375 = vmatprep.subr.mxu1 %v5674_v0  ;;  %3229 = vst.msk [vmem:[#allocation3 + $0x218] sm:$0xff] %vm279_vm0, %v3197_v49  ;;  %3499 = vst.msk [vmem:[#allocation3 + $0x428] sm:$0xff] %vm279_vm0, %v7800_v32  ;;  %v7872_v49 = vld [vmem:[#allocation2 + $0x20f] sm:$0xff] }
 0x2ee   : > { %3330 = vrot.lane.b32.xlu1 %v3257_v37, %s5677_s27  ;;  %4153 = vmatpush2.msra.mxu0 %v3940_v27  ;;  %v7791_v37 = vld [vmem:[#allocation2 + $0x1d1] sm:$0xff]  ;;  %2733 = vst.msk [vmem:[#allocation3 + $0x4b0] sm:$0xff] %vm279_vm0, %v7800_v32  ;;  %v2685_v27 = vld [vmem:[#allocation2 + $0xe7] sm:$0xff]  ;;  %3502 = vst.msk [vmem:[#allocation3 + $0x4a0] sm:$0xff] %vm279_vm0, %v7872_v49 }
 0x2ef   : > { %4376 = vmatpush2.msra.mxu1 %v3973_v28  ;;  %2819 = vrot.lane.b32.xlu0 %v7492_v17, %s5677_s27  ;;  %v3971_v17 = vld [vmem:[%s8541_s5 + $0x190] sm:$0xff]  ;;  %2989 = vst.msk [vmem:[#allocation3 + $0x490] sm:$0xff] %vm279_vm0, %v7791_v37  ;;  %v3198_v28 = vld [vmem:[#allocation2 + $0x108] sm:$0xff]  ;;  %2717 = vst.msk [vmem:[#allocation3 + $0x230] sm:$0xff] %vm279_vm0, %v2685_v27 }
 0x2f0   : > { %4154 = vmatprep.subr.mxu0 %v5674_v0  ;;  %4377 = vmatprep.subr.mxu1 %v5674_v0  ;;  %3230 = vst.msk [vmem:[#allocation3 + $0x240] sm:$0xff] %vm279_vm0, %v3198_v28 }
 0x2f1   : > { %4155 = vmatpush2.msra.mxu0 %v3939_v29  ;;  %4378 = vmatpush2.msra.mxu1 %v3972_v16  ;;  %v3261_v29 = vld [vmem:[#allocation2 + $0xf1] sm:$0xff]  ;;  %v7846_v16 = vld [vmem:[#allocation2 + $0x128] sm:$0xff] }
 0x2f2   : > { %3589 = vrot.lane.b32.xlu1 %v7696_v47, %s5677_s27  ;;  %4156 = vmatprep.subr.mxu0 %v5674_v0 }
 0x2f3   : > { %4379 = vmatprep.subr.mxu1 %v5674_v0  ;;  %3078 = vrot.lane.b32.xlu0 %v7316_v34, %s5677_s27  ;;  %v3969_v34 = vld [vmem:[%s8541_s5 + $0x180] sm:$0xff] }
 0x2f4   : > { %4157 = vmatpush2.msra.mxu0 %v3938_v3  ;;  %4380 = vmatpush2.msra.mxu1 %v3971_v17  ;;  %v2686_v3 = vld [vmem:[#allocation2 + $0xef] sm:$0xff] }
 0x2f5   : > { %4158 = vmatprep.subr.mxu0 %v5674_v0  ;;  %4381 = vmatprep.subr.mxu1 %v5674_v0  ;;  %v3199_v17 = vld [vmem:[#allocation2 + $0x110] sm:$0xff]  ;;  %2718 = vst.msk [vmem:[#allocation3 + $0x258] sm:$0xff] %vm279_vm0, %v2686_v3 }
 0x2f6   : > { %3332 = vrot.lane.b32.xlu1 %v3258_v53, %s5677_s27  ;;  %4159 = vmatpush2.msra.mxu0 %v3937_v43  ;;  %v2943_v53 = vld [vmem:[#allocation2 + $0xf1] sm:$0xff]  ;;  %3231 = vst.msk [vmem:[#allocation3 + $0x268] sm:$0xff] %vm279_vm0, %v3199_v17 }
 0x2f7   : > { %4382 = vmatpush2.msra.mxu1 %v3970_v14  ;;  %2821 = vrot.lane.b32.xlu0 %v7546_v50, %s5677_s27  ;;  %v7806_v50 = vld [vmem:[#allocation2 + $0x208] sm:$0xff]  ;;  %2975 = vst.msk [vmem:[#allocation3 + $0x260] sm:$0xff] %vm279_vm0, %v2943_v53 }
 0x2f8   : > { %4383 = vmatprep.subr.mxu1 %v5674_v0  ;;  %v2942_v0 = vld [vmem:[#allocation2 + $0xe9] sm:$0xff]  ;;  %3246 = vst.msk [vmem:[#allocation3 + $0x4c0] sm:$0xff] %vm279_vm0, %v7806_v50 }
 0x2f9   : > { %4384 = vmatpush2.msra.mxu1 %v3969_v34  ;;  %2974 = vst.msk [vmem:[#allocation3 + $0x238] sm:$0xff] %vm279_vm0, %v2942_v0  ;;  %v2687_v34 = vld [vmem:[#allocation2 + $0x107] sm:$0xff] }
 0x2fa   : > { %3591 = vrot.lane.b32.xlu1 %v7746_v10, %s5677_s27  ;;  %2719 = vst.msk [vmem:[#allocation3 + $0x280] sm:$0xff] %vm279_vm0, %v2687_v34 }
 0x2fb   : > { %3080 = vrot.lane.b32.xlu0 %v7330_v6, %s5677_s27  ;;  %v7818_v6 = vld [vmem:[#allocation2 + $0x1e9] sm:$0xff] }
 0x2fc   : > { %2990 = vst.msk [vmem:[#allocation3 + $0x4b8] sm:$0xff] %vm279_vm0, %v7818_v6 }
 0x2fe   : > { %3334 = vrot.lane.b32.xlu1 %v3259_v8, %s5677_s27 }
 0x2ff   : > { %2823 = vrot.lane.b32.xlu0 %v7596_v7, %s5677_s27  ;;  %v7832_v7 = vld [vmem:[#allocation2 + $0x210] sm:$0xff] }
 0x300   : > { %3247 = vst.msk [vmem:[#allocation3 + $0x4e8] sm:$0xff] %vm279_vm0, %v7832_v7 }
 0x302   : > { %3593 = vrot.lane.b32.xlu1 %v7793_v30, %s5677_s27 }
 0x303   : > { %3082 = vrot.lane.b32.xlu0 %v7352_v52, %s5677_s27  ;;  %v7844_v52 = vld [vmem:[#allocation2 + $0x1f1] sm:$0xff] }
 0x304   : > { %2991 = vst.msk [vmem:[#allocation3 + $0x4e0] sm:$0xff] %vm279_vm0, %v7844_v52 }
 0x306   : > { %3336 = vrot.lane.b32.xlu1 %v3260_v54, %s5677_s27 }
 0x307   : > { %2825 = vrot.lane.b32.xlu0 %v7646_v61, %s5677_s27  ;;  %v2944_v61 = vld [vmem:[#allocation2 + $0x109] sm:$0xff]  ;;  %v3057_v43 = vpop.permute.xlu0 %3056 }
 0x308   : > { %2976 = vst.msk [vmem:[#allocation3 + $0x288] sm:$0xff] %vm279_vm0, %v2944_v61  ;;  %v2688_v61 = vld [vmem:[#allocation2 + $0x10f] sm:$0xff] }
 0x309   : > { %3152 = vst.msk [vmem:[#allocation3 + $0x8] sm:$0xff] %vm648_vm2, %v3057_v43 }
 0x30a   : > { %3595 = vrot.lane.b32.xlu1 %v7820_v12, %s5677_s27  ;;  %2720 = vst.msk [vmem:[#allocation3 + $0x2a8] sm:$0xff] %vm279_vm0, %v2688_v61  ;;  %v2690_v61 = vld [vmem:[#allocation2 + $0x12f] sm:$0xff] }
 0x30b   : > { %3084 = vrot.lane.b32.xlu0 %v7373_v4, %s5677_s27  ;;  %v7866_v4 = vld [vmem:[#allocation2 + $0x130] sm:$0xff]  ;;  %2722 = vst.msk [vmem:[#allocation3 + $0x2f8] sm:$0xff] %vm279_vm0, %v2690_v61 }
 0x30e   : > { %3338 = vrot.lane.b32.xlu1 %v3261_v29, %s5677_s27 }
 0x30f   : > { %2827 = vrot.lane.b32.xlu0 %v7696_v47, %s5677_s27  ;;  %v3992_v47 = vld [vmem:[%s8541_s5 + $0x238] sm:$0xff] }
 0x310   : > { %v3570_v48 = vpop.permute.xlu0 %3569  ;;  %5413 = vmatprep.subr.mxu0 %v3992_v47  ;;  %5493 = vmatprep.subr.mxu1 %v3992_v47  ;;  %v3762_v27 = vld [vmem:[#allocation3 + $0x8] sm:$0xff] }
 0x311   : > { %3665 = vst.msk [vmem:[#allocation3 + $0x18] sm:$0xff] %vm648_vm2, %v3570_v48  ;;  %4160 = vmatprep.mubr.f32.mxu0 %v3762_v27 }
 0x312   : > { %3597 = vrot.lane.b32.xlu1 %v7846_v16, %s5677_s27 }
 0x313   : > { %3086 = vrot.lane.b32.xlu0 %v7394_v13, %s5677_s27  ;;  %v7889_v13 = vld [vmem:[#allocation2 + $0x148] sm:$0xff] }
 0x314   : > { %v2800_v14 = vpop.permute.xlu1 %2799  ;;  %v3059_v0 = vpop.permute.xlu0 %3058 }
 0x315   : > { %2896 = vst.msk [vmem:[#allocation3] sm:$0xff] %vm648_vm2, %v2800_v14  ;;  %3153 = vst.msk [vmem:[#allocation3 + $0x30] sm:$0xff] %vm648_vm2, %v3059_v0  ;;  %v2689_v0 = vld [vmem:[#allocation2 + $0x127] sm:$0xff] }
 0x316   : > { %3340 = vrot.lane.b32.xlu1 %v3262_v26, %s5677_s27  ;;  %2721 = vst.msk [vmem:[#allocation3 + $0x2d0] sm:$0xff] %vm279_vm0, %v2689_v0 }
 0x317   : > { %2829 = vrot.lane.b32.xlu0 %v7746_v10, %s5677_s27  ;;  %v3201_v10 = vld [vmem:[#allocation2 + $0x130] sm:$0xff] }
 0x318   : > { %v3313_v8 = vpop.permute.xlu1 %3312  ;;  %v2802_v53 = vpop.permute.xlu0 %2801  ;;  %v3764_v3 = vld [vmem:[#allocation3 + $0x18] sm:$0xff]  ;;  %3233 = vst.msk [vmem:[#allocation3 + $0x2b8] sm:$0xff] %vm279_vm0, %v3201_v10 }
 0x319   : > { %3408 = vst.msk [vmem:[#allocation3 + $0x10] sm:$0xff] %vm648_vm2, %v3313_v8  ;;  %2897 = vst.msk [vmem:[#allocation3 + $0x28] sm:$0xff] %vm648_vm2, %v2802_v53  ;;  %4385 = vmatprep.mubr.f32.mxu1 %v3764_v3 }
 0x31a   : > { %3599 = vrot.lane.b32.xlu1 %v7866_v4, %s5677_s27 }
 0x31b   : > { %3088 = vrot.lane.b32.xlu0 %v7421_v46, %s5677_s27  ;;  %v7905_v46 = vld [vmem:[#allocation2 + $0x150] sm:$0xff] }
 0x31c   : > { %v3572_v54 = vpop.permute.xlu1 %3571  ;;  %v3761_v28 = vld [vmem:[#allocation3] sm:$0xff]  ;;  %v3767_v43 = vld [vmem:[#allocation3 + $0x30] sm:$0xff] }
 0x31d   : > { %3666 = vst.msk [vmem:[#allocation3 + $0x40] sm:$0xff] %vm648_vm2, %v3572_v54  ;;  %4161 = vmatmul.mubr.f32.vlgmr.msra.gmra.mxu0 %v3761_v28  ;;  %v3991_v28 = vld [vmem:[%s8541_s5 + $0x230] sm:$0xff] }
 0x31e   : > { %3342 = vrot.lane.b32.xlu1 %v7405_v31, %s5677_s27  ;;  %5414 = vmatpush3.msra.mxu0 %v3992_v47  ;;  %v3061_v31 = vpop.permute.xlu0 %3060 }
 0x31f   : > { %3154 = vst.msk [vmem:[#allocation3 + $0x58] sm:$0xff] %vm648_vm2, %v3061_v31  ;;  %4165 = vmatprep.mubr.f32.mxu0 %v3767_v43  ;;  %2831 = vrot.lane.b32.xlu0 %v7793_v30, %s5677_s27 }
 0x320   : > { %v3315_v29 = vpop.permute.xlu1 %3314  ;;  %v3763_v17 = vld [vmem:[#allocation3 + $0x10] sm:$0xff]  ;;  %v3766_v34 = vld [vmem:[#allocation3 + $0x28] sm:$0xff]  ;;  %5415 = vmatprep.subr.mxu0 %v3991_v28 }
 0x321   : > { %3409 = vst.msk [vmem:[#allocation3 + $0x38] sm:$0xff] %vm648_vm2, %v3315_v29  ;;  %4386 = vmatmul.mubr.f32.vlgmr.msra.gmra.mxu1 %v3763_v17  ;;  %4166 = vmatmul.mubr.f32.gmra.mxu0 %v3766_v34  ;;  %v2691_v34 = vld [vmem:[#allocation2 + $0x147] sm:$0xff] }
 0x322   : > { %3601 = vrot.lane.b32.xlu1 %v7889_v13, %s5677_s27  ;;  %5501 = vmatpush3.msra.mxu1 %v3992_v47  ;;  %v2804_v48 = vpop.permute.xlu0 %2803  ;;  %v3202_v47 = vld [vmem:[#allocation2 + $0x148] sm:$0xff]  ;;  %2723 = vst.msk [vmem:[#allocation3 + $0x320] sm:$0xff] %vm279_vm0, %v2691_v34 }
 0x323   : > { %2898 = vst.msk [vmem:[#allocation3 + $0x50] sm:$0xff] %vm648_vm2, %v2804_v48  ;;  %3090 = vrot.lane.b32.xlu0 %v7432_v35, %s5677_s27  ;;  %v7924_v35 = vld [vmem:[#allocation2 + $0x168] sm:$0xff]  ;;  %5494 = vmatprep.subr.mxu1 %v3991_v28 }
 0x324   : > { %v3574_v26 = vpop.permute.xlu1 %3573  ;;  %v3769_v14 = vld [vmem:[#allocation3 + $0x40] sm:$0xff]  ;;  %3234 = vst.msk [vmem:[#allocation3 + $0x2e0] sm:$0xff] %vm279_vm0, %v3202_v47  ;;  %5416 = vmatpush3.msra.mxu0 %v3991_v28  ;;  %5502 = vmatpush3.msra.mxu1 %v3991_v28  ;;  %v2692_v28 = vld [vmem:[#allocation2 + $0x14f] sm:$0xff] }
 0x325   : > { %3667 = vst.msk [vmem:[#allocation3 + $0x68] sm:$0xff] %vm648_vm2, %v3574_v26  ;;  %4390 = vmatprep.mubr.f32.mxu1 %v3769_v14 }
 0x326   : > { %3344 = vrot.lane.b32.xlu1 %v7423_v20, %s5677_s27  ;;  %v3063_v20 = vpop.permute.xlu0 %3062  ;;  %v3772_v54 = vld [vmem:[#allocation3 + $0x58] sm:$0xff]  ;;  %2724 = vst.msk [vmem:[#allocation3 + $0x348] sm:$0xff] %vm279_vm0, %v2692_v28 }
 0x327   : > { %3155 = vst.msk [vmem:[#allocation3 + $0x80] sm:$0xff] %vm648_vm2, %v3063_v20  ;;  %4170 = vmatprep.mubr.f32.mxu0 %v3772_v54  ;;  %2833 = vrot.lane.b32.xlu0 %v7820_v12, %s5677_s27  ;;  %v3990_v20 = vld [vmem:[%s8541_s5 + $0x228] sm:$0xff] }
 0x328   : > { %v3317_v8 = vpop.permute.xlu1 %3316  ;;  %v3768_v41 = vld [vmem:[#allocation3 + $0x38] sm:$0xff]  ;;  %5495 = vmatprep.subr.mxu1 %v3990_v20  ;;  %5417 = vmatprep.subr.mxu0 %v3990_v20 }
 0x329   : > { %3410 = vst.msk [vmem:[#allocation3 + $0x60] sm:$0xff] %vm648_vm2, %v3317_v8  ;;  %4391 = vmatmul.mubr.f32.gmra.mxu1 %v3768_v41  ;;  %v3204_v41 = vld [vmem:[#allocation2 + $0x168] sm:$0xff]  ;;  %5418 = vmatpush3.msra.mxu0 %v3990_v20 }
 0x32a   : > { %3603 = vrot.lane.b32.xlu1 %v7905_v46, %s5677_s27  ;;  %v2806_v53 = vpop.permute.xlu0 %2805  ;;  %v3771_v3 = vld [vmem:[#allocation3 + $0x50] sm:$0xff]  ;;  %3236 = vst.msk [vmem:[#allocation3 + $0x330] sm:$0xff] %vm279_vm0, %v3204_v41  ;;  %5503 = vmatpush3.msra.mxu1 %v3990_v20 }
 0x32b   : > { %2899 = vst.msk [vmem:[#allocation3 + $0x78] sm:$0xff] %vm648_vm2, %v2806_v53  ;;  %4171 = vmatmul.mubr.f32.gmra.mxu0 %v3771_v3  ;;  %3092 = vrot.lane.b32.xlu0 %v7443_v11, %s5677_s27  ;;  %v7940_v11 = vld [vmem:[#allocation2 + $0x170] sm:$0xff] }
 0x32c   : > { %v3576_v30 = vpop.permute.xlu1 %3575  ;;  %v3774_v27 = vld [vmem:[#allocation3 + $0x68] sm:$0xff] }
 0x32d   : > { %3668 = vst.msk [vmem:[#allocation3 + $0x90] sm:$0xff] %vm648_vm2, %v3576_v30  ;;  %4395 = vmatprep.mubr.f32.mxu1 %v3774_v27 }
 0x32e   : > { %3346 = vrot.lane.b32.xlu1 %v7434_v33, %s5677_s27  ;;  %v3203_v33 = vld [vmem:[#allocation2 + $0x150] sm:$0xff]  ;;  %v3065_v12 = vpop.permute.xlu0 %3064  ;;  %v3777_v31 = vld [vmem:[#allocation3 + $0x80] sm:$0xff] }
 0x32f   : > { %3235 = vst.msk [vmem:[#allocation3 + $0x308] sm:$0xff] %vm279_vm0, %v3203_v33  ;;  %4175 = vmatprep.mubr.f32.mxu0 %v3777_v31  ;;  %2835 = vrot.lane.b32.xlu0 %v7846_v16, %s5677_s27  ;;  %v3989_v31 = vld [vmem:[%s8541_s5 + $0x220] sm:$0xff] }
 0x330   : > { %v3319_v29 = vpop.permute.xlu1 %3318  ;;  %v3773_v17 = vld [vmem:[#allocation3 + $0x60] sm:$0xff]  ;;  %3156 = vst.msk [vmem:[#allocation3 + $0xa8] sm:$0xff] %vm648_vm2, %v3065_v12  ;;  %5496 = vmatprep.subr.mxu1 %v3989_v31  ;;  %5419 = vmatprep.subr.mxu0 %v3989_v31 }
 0x331   : > { %3411 = vst.msk [vmem:[#allocation3 + $0x88] sm:$0xff] %vm648_vm2, %v3319_v29  ;;  %4396 = vmatmul.mubr.f32.gmra.mxu1 %v3773_v17  ;;  %5420 = vmatpush3.msra.mxu0 %v3989_v31 }
 0x332   : > { %3605 = vrot.lane.b32.xlu1 %v7924_v35, %s5677_s27  ;;  %v2808_v43 = vpop.permute.xlu0 %2807  ;;  %v3776_v48 = vld [vmem:[#allocation3 + $0x78] sm:$0xff]  ;;  %5504 = vmatpush3.msra.mxu1 %v3989_v31 }
 0x333   : > { %2900 = vst.msk [vmem:[#allocation3 + $0xa0] sm:$0xff] %vm648_vm2, %v2808_v43  ;;  %4176 = vmatmul.mubr.f32.gmra.mxu0 %v3776_v48  ;;  %3094 = vrot.lane.b32.xlu0 %v7456_v42, %s5677_s27 }
 0x334   : > { %v3578_v10 = vpop.permute.xlu1 %3577  ;;  %v3779_v26 = vld [vmem:[#allocation3 + $0x90] sm:$0xff] }
 0x335   : > { %3669 = vst.msk [vmem:[#allocation3 + $0xb8] sm:$0xff] %vm648_vm2, %v3578_v10  ;;  %4400 = vmatprep.mubr.f32.mxu1 %v3779_v26 }
 0x336   : > { %3348 = vrot.lane.b32.xlu1 %v7445_v58, %s5677_s27  ;;  %v3067_v58 = vpop.permute.xlu0 %3066 }
 0x337   : > { %v3782_v0 = vld [vmem:[#allocation3 + $0xa8] sm:$0xff]  ;;  %3157 = vst.msk [vmem:[#allocation3 + $0xd0] sm:$0xff] %vm648_vm2, %v3067_v58  ;;  %2837 = vrot.lane.b32.xlu0 %v7866_v4, %s5677_s27  ;;  %v3205_v4 = vld [vmem:[#allocation2 + $0x170] sm:$0xff] }
 0x338   : > { %v3321_v14 = vpop.permute.xlu1 %3320  ;;  %v3778_v8 = vld [vmem:[#allocation3 + $0x88] sm:$0xff]  ;;  %4180 = vmatprep.mubr.f32.mxu0 %v3782_v0  ;;  %3237 = vst.msk [vmem:[#allocation3 + $0x358] sm:$0xff] %vm279_vm0, %v3205_v4 }
 0x339   : > { %3412 = vst.msk [vmem:[#allocation3 + $0xb0] sm:$0xff] %vm648_vm2, %v3321_v14  ;;  %4401 = vmatmul.mubr.f32.gmra.mxu1 %v3778_v8 }
 0x33a   : > { %3607 = vrot.lane.b32.xlu1 %v7940_v11, %s5677_s27  ;;  %v2810_v42 = vpop.permute.xlu0 %2809  ;;  %v3781_v54 = vld [vmem:[#allocation3 + $0xa0] sm:$0xff] }
 0x33b   : > { %2901 = vst.msk [vmem:[#allocation3 + $0xc8] sm:$0xff] %vm648_vm2, %v2810_v42  ;;  %4181 = vmatmul.mubr.f32.gmra.mxu0 %v3781_v54  ;;  %3096 = vrot.lane.b32.xlu0 %v7464_v9, %s5677_s27 }
 0x33c   : > { %v3580_v16 = vpop.permute.xlu1 %3579  ;;  %v3784_v47 = vld [vmem:[#allocation3 + $0xb8] sm:$0xff] }
 0x33d   : > { %3670 = vst.msk [vmem:[#allocation3 + $0xe0] sm:$0xff] %vm648_vm2, %v3580_v16  ;;  %4405 = vmatprep.mubr.f32.mxu1 %v3784_v47  ;;  %v3988_v47 = vld [vmem:[%s8541_s5 + $0x218] sm:$0xff] }
 0x33e   : > { %3350 = vrot.lane.b32.xlu1 %v7458_v62, %s5677_s27  ;;  %v3069_v62 = vpop.permute.xlu0 %3068  ;;  %v3787_v29 = vld [vmem:[#allocation3 + $0xd0] sm:$0xff]  ;;  %5497 = vmatprep.subr.mxu1 %v3988_v47 }
 0x33f   : > { %3158 = vst.msk [vmem:[#allocation3 + $0xf8] sm:$0xff] %vm648_vm2, %v3069_v62  ;;  %4185 = vmatprep.mubr.f32.mxu0 %v3787_v29  ;;  %2839 = vrot.lane.b32.xlu0 %v7889_v13, %s5677_s27 }
 0x340   : > { %v3323_v30 = vpop.permute.xlu1 %3322  ;;  %v3783_v27 = vld [vmem:[#allocation3 + $0xb0] sm:$0xff]  ;;  %5421 = vmatprep.subr.mxu0 %v3988_v47  ;;  %5505 = vmatpush3.msra.mxu1 %v3988_v47 }
 0x341   : > { %3413 = vst.msk [vmem:[#allocation3 + $0xd8] sm:$0xff] %vm648_vm2, %v3323_v30  ;;  %4406 = vmatmul.mubr.f32.gmra.mxu1 %v3783_v27  ;;  %5422 = vmatpush3.msra.mxu0 %v3988_v47 }
 0x342   : > { %3609 = vrot.lane.b32.xlu1 %v7466_v45, %s5677_s27  ;;  %v2812_v9 = vpop.permute.xlu0 %2811  ;;  %v3786_v61 = vld [vmem:[#allocation3 + $0xc8] sm:$0xff] }
 0x343   : > { %2902 = vst.msk [vmem:[#allocation3 + $0xf0] sm:$0xff] %vm648_vm2, %v2812_v9  ;;  %4186 = vmatmul.mubr.f32.gmra.mxu0 %v3786_v61  ;;  %3098 = vrot.lane.b32.xlu0 %v7478_v36, %s5677_s27 }
 0x344   : > { %v3582_v53 = vpop.permute.xlu1 %3581  ;;  %v3789_v3 = vld [vmem:[#allocation3 + $0xe0] sm:$0xff] }
 0x345   : > { %3671 = vst.msk [vmem:[#allocation3 + $0x108] sm:$0xff] %vm648_vm2, %v3582_v53  ;;  %4410 = vmatprep.mubr.f32.mxu1 %v3789_v3  ;;  %v3987_v3 = vld [vmem:[%s8541_s5 + $0x210] sm:$0xff] }
 0x346   : > { %3352 = vrot.lane.b32.xlu1 %v7468_v40, %s5677_s27  ;;  %v3071_v13 = vpop.permute.xlu0 %3070  ;;  %v3792_v10 = vld [vmem:[#allocation3 + $0xf8] sm:$0xff]  ;;  %5498 = vmatprep.subr.mxu1 %v3987_v3 }
 0x347   : > { %3159 = vst.msk [vmem:[#allocation3 + $0x120] sm:$0xff] %vm648_vm2, %v3071_v13  ;;  %4190 = vmatprep.mubr.f32.mxu0 %v3792_v10  ;;  %2841 = vrot.lane.b32.xlu0 %v7905_v46, %s5677_s27 }
 0x348   : > { %v3325_v17 = vpop.permute.xlu1 %3324  ;;  %v3788_v33 = vld [vmem:[#allocation3 + $0xd8] sm:$0xff]  ;;  %5423 = vmatprep.subr.mxu0 %v3987_v3  ;;  %5506 = vmatpush3.msra.mxu1 %v3987_v3 }
 0x349   : > { %3414 = vst.msk [vmem:[#allocation3 + $0x100] sm:$0xff] %vm648_vm2, %v3325_v17  ;;  %4411 = vmatmul.mubr.f32.gmra.mxu1 %v3788_v33  ;;  %5424 = vmatpush3.msra.mxu0 %v3987_v3 }
 0x34a   : > { %3611 = vrot.lane.b32.xlu1 %v7480_v1, %s5677_s27  ;;  %v2814_v36 = vpop.permute.xlu0 %2813  ;;  %v3791_v43 = vld [vmem:[#allocation3 + $0xf0] sm:$0xff] }
 0x34b   : > { %2903 = vst.msk [vmem:[#allocation3 + $0x118] sm:$0xff] %vm648_vm2, %v2814_v36  ;;  %4191 = vmatmul.mubr.f32.gmra.mxu0 %v3791_v43  ;;  %3100 = vrot.lane.b32.xlu0 %v7512_v15, %s5677_s27 }
 0x34c   : > { %v3584_v12 = vpop.permute.xlu1 %3583  ;;  %v3794_v40 = vld [vmem:[#allocation3 + $0x108] sm:$0xff] }
 0x34d   : > { %3672 = vst.msk [vmem:[#allocation3 + $0x130] sm:$0xff] %vm648_vm2, %v3584_v12  ;;  %4415 = vmatprep.mubr.f32.mxu1 %v3794_v40 }
 0x34e   : > { %3354 = vrot.lane.b32.xlu1 %v7482_v57, %s5677_s27  ;;  %v3073_v57 = vpop.permute.xlu0 %3072  ;;  %v3797_v48 = vld [vmem:[#allocation3 + $0x120] sm:$0xff] }
 0x34f   : > { %3160 = vst.msk [vmem:[#allocation3 + $0x148] sm:$0xff] %vm648_vm2, %v3073_v57  ;;  %4195 = vmatprep.mubr.f32.mxu0 %v3797_v48  ;;  %2843 = vrot.lane.b32.xlu0 %v7924_v35, %s5677_s27 }
 0x350   : > { %v3327_v26 = vpop.permute.xlu1 %3326  ;;  %v3793_v14 = vld [vmem:[#allocation3 + $0x100] sm:$0xff] }
 0x351   : > { %3415 = vst.msk [vmem:[#allocation3 + $0x128] sm:$0xff] %vm648_vm2, %v3327_v26  ;;  %4416 = vmatmul.mubr.f32.gmra.mxu1 %v3793_v14  ;;  %v3986_v26 = vld [vmem:[%s8541_s5 + $0x208] sm:$0xff] }
 0x352   : > { %3613 = vrot.lane.b32.xlu1 %v7524_v51, %s5677_s27  ;;  %v2816_v15 = vpop.permute.xlu0 %2815  ;;  %v3796_v41 = vld [vmem:[#allocation3 + $0x118] sm:$0xff]  ;;  %5499 = vmatprep.subr.mxu1 %v3986_v26 }
 0x353   : > { %2904 = vst.msk [vmem:[#allocation3 + $0x140] sm:$0xff] %vm648_vm2, %v2816_v15  ;;  %4196 = vmatmul.mubr.f32.gmra.mxu0 %v3796_v41  ;;  %3102 = vrot.lane.b32.xlu0 %v7565_v44, %s5677_s27 }
 0x354   : > { %v3586_v46 = vpop.permute.xlu1 %3585  ;;  %v3799_v8 = vld [vmem:[#allocation3 + $0x130] sm:$0xff]  ;;  %5425 = vmatprep.subr.mxu0 %v3986_v26  ;;  %5507 = vmatpush3.msra.mxu1 %v3986_v26 }
 0x355   : > { %3673 = vst.msk [vmem:[#allocation3 + $0x158] sm:$0xff] %vm648_vm2, %v3586_v46  ;;  %4420 = vmatprep.mubr.f32.mxu1 %v3799_v8  ;;  %5426 = vmatpush3.msra.mxu0 %v3986_v26  ;;  %v3471_v8 = vld [vmem:[#allocation2 + $0x227] sm:$0xff] }
 0x356   : > { %3356 = vrot.lane.b32.xlu1 %v7544_v39, %s5677_s27  ;;  %v3075_v35 = vpop.permute.xlu0 %3074  ;;  %v3802_v0 = vld [vmem:[#allocation3 + $0x148] sm:$0xff]  ;;  %3503 = vst.msk [vmem:[#allocation3 + $0x4c8] sm:$0xff] %vm279_vm0, %v3471_v8 }
 0x357   : > { %3161 = vst.msk [vmem:[#allocation3 + $0x170] sm:$0xff] %vm648_vm2, %v3075_v35  ;;  %4200 = vmatprep.mubr.f32.mxu0 %v3802_v0  ;;  %2845 = vrot.lane.b32.xlu0 %v7940_v11, %s5677_s27  ;;  %v3472_v35 = vld [vmem:[#allocation2 + $0x22f] sm:$0xff] }
 0x358   : > { %v3329_v34 = vpop.permute.xlu1 %3328  ;;  %v3798_v58 = vld [vmem:[#allocation3 + $0x128] sm:$0xff]  ;;  %3504 = vst.msk [vmem:[#allocation3 + $0x4f0] sm:$0xff] %vm279_vm0, %v3472_v35  ;;  %v3710_v35 = vld [vmem:[#allocation2 + $0x111] sm:$0xff] }
 0x359   : > { %3416 = vst.msk [vmem:[#allocation3 + $0x150] sm:$0xff] %vm648_vm2, %v3329_v34  ;;  %4421 = vmatmul.mubr.f32.gmra.mxu1 %v3798_v58  ;;  %v3705_v26 = vld [vmem:[#allocation2 + $0xc9] sm:$0xff] }
 0x35a   : > { %3615 = vrot.lane.b32.xlu1 %v7574_v22, %s5677_s27  ;;  %v2818_v44 = vpop.permute.xlu0 %2817  ;;  %v3801_v42 = vld [vmem:[#allocation3 + $0x140] sm:$0xff]  ;;  %3737 = vst.msk [vmem:[#allocation3 + $0x160] sm:$0xff] %vm279_vm0, %v3705_v26  ;;  %v3723_v8 = vld [vmem:[#allocation2 + $0x1e9] sm:$0xff]  ;;  %3742 = vst.msk [vmem:[#allocation3 + $0x228] sm:$0xff] %vm279_vm0, %v3710_v35 }
 0x35b   : > { %2905 = vst.msk [vmem:[#allocation3 + $0x168] sm:$0xff] %vm648_vm2, %v2818_v44  ;;  %4201 = vmatmul.mubr.f32.gmra.mxu0 %v3801_v42  ;;  %3104 = vrot.lane.b32.xlu0 %v7615_v19, %s5677_s27 }
 0x35c   : > { %v3588_v16 = vpop.permute.xlu1 %3587  ;;  %v3804_v39 = vld [vmem:[#allocation3 + $0x158] sm:$0xff]  ;;  %3755 = vst.msk [vmem:[#allocation3 + $0x430] sm:$0xff] %vm279_vm0, %v3723_v8 }
 0x35d   : > { %3674 = vst.msk [vmem:[#allocation3 + $0x180] sm:$0xff] %vm648_vm2, %v3588_v16  ;;  %4425 = vmatprep.mubr.f32.mxu1 %v3804_v39  ;;  %v3985_v16 = vld [vmem:[%s8541_s5 + $0x200] sm:$0xff] }
 0x35e   : > { %3358 = vrot.lane.b32.xlu1 %v7594_v23, %s5677_s27  ;;  %v3077_v23 = vpop.permute.xlu0 %3076  ;;  %v3807_v54 = vld [vmem:[#allocation3 + $0x170] sm:$0xff]  ;;  %5500 = vmatprep.subr.mxu1 %v3985_v16 }
 0x35f   : > { %3162 = vst.msk [vmem:[#allocation3 + $0x198] sm:$0xff] %vm648_vm2, %v3077_v23  ;;  %4205 = vmatprep.mubr.f32.mxu0 %v3807_v54  ;;  %2847 = vrot.lane.b32.xlu0 %v7466_v45, %s5677_s27  ;;  %v3713_v23 = vld [vmem:[#allocation2 + $0x149] sm:$0xff]  ;;  %v3714_v54 = vld [vmem:[#allocation2 + $0x151] sm:$0xff] }
 0x360   : > { %v3331_v20 = vpop.permute.xlu1 %3330  ;;  %v3803_v30 = vld [vmem:[#allocation3 + $0x150] sm:$0xff]  ;;  %5427 = vmatprep.subr.mxu0 %v3985_v16  ;;  %5508 = vmatpush3.msra.mxu1 %v3985_v16  ;;  %3745 = vst.msk [vmem:[#allocation3 + $0x2a0] sm:$0xff] %vm279_vm0, %v3713_v23  ;;  %3746 = vst.msk [vmem:[#allocation3 + $0x2c8] sm:$0xff] %vm279_vm0, %v3714_v54 }
 0x361   : > { %3417 = vst.msk [vmem:[#allocation3 + $0x178] sm:$0xff] %vm648_vm2, %v3331_v20  ;;  %4426 = vmatmul.mubr.f32.gmra.mxu1 %v3803_v30  ;;  %5428 = vmatpush3.msra.mxu0 %v3985_v16  ;;  %v3697_v30 = vld [vmem:[#allocation2 + $0x49] sm:$0xff]  ;;  %v3726_v16 = vld [vmem:[#allocation2 + $0x211] sm:$0xff] }
 0x362   : > { %3617 = vrot.lane.b32.xlu1 %v7624_v38, %s5677_s27  ;;  %v2820_v19 = vpop.permute.xlu0 %2819  ;;  %v3806_v4 = vld [vmem:[#allocation3 + $0x168] sm:$0xff]  ;;  %3729 = vst.msk [vmem:[#allocation3 + $0x20] sm:$0xff] %vm279_vm0, %v3697_v30  ;;  %3758 = vst.msk [vmem:[#allocation3 + $0x4a8] sm:$0xff] %vm279_vm0, %v3726_v16 }
 0x363   : > { %2906 = vst.msk [vmem:[#allocation3 + $0x190] sm:$0xff] %vm648_vm2, %v2820_v19  ;;  %4206 = vmatmul.mubr.f32.gmra.mxu0 %v3806_v4  ;;  %3106 = vrot.lane.b32.xlu0 %v7665_v24, %s5677_s27 }
 0x364   : > { %v3590_v11 = vpop.permute.xlu1 %3589  ;;  %v3809_v27 = vld [vmem:[#allocation3 + $0x180] sm:$0xff] }
 0x365   : > { %3675 = vst.msk [vmem:[#allocation3 + $0x1a8] sm:$0xff] %vm648_vm2, %v3590_v11  ;;  %4430 = vmatprep.mubr.f32.mxu1 %v3809_v27  ;;  %v3698_v11 = vld [vmem:[#allocation2 + $0x51] sm:$0xff] }
 0x366   : > { %3360 = vrot.lane.b32.xlu1 %v7644_v59, %s5677_s27  ;;  %v3079_v45 = vpop.permute.xlu0 %3078  ;;  %v3812_v29 = vld [vmem:[#allocation3 + $0x198] sm:$0xff]  ;;  %3730 = vst.msk [vmem:[#allocation3 + $0x48] sm:$0xff] %vm279_vm0, %v3698_v11 }
 0x367   : > { %3163 = vst.msk [vmem:[#allocation3 + $0x1c0] sm:$0xff] %vm648_vm2, %v3079_v45  ;;  %4210 = vmatprep.mubr.f32.mxu0 %v3812_v29  ;;  %2849 = vrot.lane.b32.xlu0 %v7480_v1, %s5677_s27  ;;  %v3700_v45 = vld [vmem:[#allocation2 + $0x71] sm:$0xff] }
 0x368   : > { %v3333_v28 = vpop.permute.xlu1 %3332  ;;  %v3808_v62 = vld [vmem:[#allocation3 + $0x178] sm:$0xff]  ;;  %3732 = vst.msk [vmem:[#allocation3 + $0x98] sm:$0xff] %vm279_vm0, %v3700_v45 }
 0x369   : > { %3418 = vst.msk [vmem:[#allocation3 + $0x1a0] sm:$0xff] %vm648_vm2, %v3333_v28  ;;  %4431 = vmatmul.mubr.f32.gmra.mxu1 %v3808_v62  ;;  %v3699_v62 = vld [vmem:[#allocation2 + $0x69] sm:$0xff]  ;;  %v3279_v29 = vld [vmem:[#allocation2 + $0x211] sm:$0xff] }
 0x36a   : > { %3619 = vrot.lane.b32.xlu1 %v7674_v55, %s5677_s27  ;;  %v2822_v24 = vpop.permute.xlu0 %2821  ;;  %v3811_v17 = vld [vmem:[#allocation3 + $0x190] sm:$0xff]  ;;  %3731 = vst.msk [vmem:[#allocation3 + $0x70] sm:$0xff] %vm279_vm0, %v3699_v62 }
 0x36b   : > { %2907 = vst.msk [vmem:[#allocation3 + $0x1b8] sm:$0xff] %vm648_vm2, %v2822_v24  ;;  %4211 = vmatmul.mubr.f32.gmra.mxu0 %v3811_v17  ;;  %3108 = vrot.lane.b32.xlu0 %v7715_v2, %s5677_s27  ;;  %v3717_v17 = vld [vmem:[#allocation2 + $0x189] sm:$0xff] }
 0x36c   : > { %v3592_v53 = vpop.permute.xlu1 %3591  ;;  %v3814_v59 = vld [vmem:[#allocation3 + $0x1a8] sm:$0xff]  ;;  %3749 = vst.msk [vmem:[#allocation3 + $0x340] sm:$0xff] %vm279_vm0, %v3717_v17 }
 0x36d   : > { %3676 = vst.msk [vmem:[#allocation3 + $0x1d0] sm:$0xff] %vm648_vm2, %v3592_v53  ;;  %4435 = vmatprep.mubr.f32.mxu1 %v3814_v59  ;;  %v3716_v53 = vld [vmem:[#allocation2 + $0x171] sm:$0xff] }
 0x36e   : > { %3362 = vrot.lane.b32.xlu1 %v7694_v63, %s5677_s27  ;;  %v3081_v1 = vpop.permute.xlu0 %3080  ;;  %v3817_v33 = vld [vmem:[#allocation3 + $0x1c0] sm:$0xff]  ;;  %3748 = vst.msk [vmem:[#allocation3 + $0x318] sm:$0xff] %vm279_vm0, %v3716_v53 }
 0x36f   : > { %3164 = vst.msk [vmem:[#allocation3 + $0x1e8] sm:$0xff] %vm648_vm2, %v3081_v1  ;;  %4215 = vmatprep.mubr.f32.mxu0 %v3817_v33  ;;  %2851 = vrot.lane.b32.xlu0 %v7524_v51, %s5677_s27  ;;  %v3718_v1 = vld [vmem:[#allocation2 + $0x191] sm:$0xff] }
 0x370   : > { %v3335_v9 = vpop.permute.xlu1 %3334  ;;  %v3813_v61 = vld [vmem:[#allocation3 + $0x1a0] sm:$0xff]  ;;  %3750 = vst.msk [vmem:[#allocation3 + $0x368] sm:$0xff] %vm279_vm0, %v3718_v1 }
 0x371   : > { %3419 = vst.msk [vmem:[#allocation3 + $0x1c8] sm:$0xff] %vm648_vm2, %v3335_v9  ;;  %4436 = vmatmul.mubr.f32.gmra.mxu1 %v3813_v61  ;;  %v3702_v61 = vld [vmem:[#allocation2 + $0x91] sm:$0xff] }
 0x372   : > { %3621 = vrot.lane.b32.xlu1 %v7724_v25, %s5677_s27  ;;  %v2824_v2 = vpop.permute.xlu0 %2823  ;;  %v3816_v10 = vld [vmem:[#allocation3 + $0x1b8] sm:$0xff]  ;;  %3734 = vst.msk [vmem:[#allocation3 + $0xe8] sm:$0xff] %vm279_vm0, %v3702_v61 }
 0x373   : > { %2908 = vst.msk [vmem:[#allocation3 + $0x1e0] sm:$0xff] %vm648_vm2, %v2824_v2  ;;  %4216 = vmatmul.mubr.f32.gmra.mxu0 %v3816_v10  ;;  %3110 = vrot.lane.b32.xlu0 %v7765_v56, %s5677_s27  ;;  %v3704_v10 = vld [vmem:[#allocation2 + $0xb1] sm:$0xff] }
 0x374   : > { %v3594_v63 = vpop.permute.xlu1 %3593  ;;  %v3819_v13 = vld [vmem:[#allocation3 + $0x1d0] sm:$0xff]  ;;  %3736 = vst.msk [vmem:[#allocation3 + $0x138] sm:$0xff] %vm279_vm0, %v3704_v10 }
 0x375   : > { %3677 = vst.msk [vmem:[#allocation3 + $0x1f8] sm:$0xff] %vm648_vm2, %v3594_v63  ;;  %4440 = vmatprep.mubr.f32.mxu1 %v3819_v13 }
 0x376   : > { %3364 = vrot.lane.b32.xlu1 %v7744_v21, %s5677_s27  ;;  %v3083_v51 = vpop.permute.xlu0 %3082  ;;  %v3822_v36 = vld [vmem:[#allocation3 + $0x1e8] sm:$0xff] }
 0x377   : > { %3165 = vst.msk [vmem:[#allocation3 + $0x210] sm:$0xff] %vm648_vm2, %v3083_v51  ;;  %4220 = vmatprep.mubr.f32.mxu0 %v3822_v36  ;;  %2853 = vrot.lane.b32.xlu0 %v7574_v22, %s5677_s27 }
 0x378   : > { %v3337_v12 = vpop.permute.xlu1 %3336  ;;  %v3818_v40 = vld [vmem:[#allocation3 + $0x1c8] sm:$0xff] }
 0x379   : > { %3420 = vst.msk [vmem:[#allocation3 + $0x1f0] sm:$0xff] %vm648_vm2, %v3337_v12  ;;  %4441 = vmatmul.mubr.f32.gmra.mxu1 %v3818_v40  ;;  %v3719_v12 = vld [vmem:[#allocation2 + $0x1a9] sm:$0xff]  ;;  %v3720_v40 = vld [vmem:[#allocation2 + $0x1b1] sm:$0xff] }
 0x37a   : > { %3623 = vrot.lane.b32.xlu1 %v7774_v18, %s5677_s27  ;;  %v2826_v56 = vpop.permute.xlu0 %2825  ;;  %v3821_v14 = vld [vmem:[#allocation3 + $0x1e0] sm:$0xff]  ;;  %3751 = vst.msk [vmem:[#allocation3 + $0x390] sm:$0xff] %vm279_vm0, %v3719_v12  ;;  %3752 = vst.msk [vmem:[#allocation3 + $0x3b8] sm:$0xff] %vm279_vm0, %v3720_v40 }
 0x37b   : > { %2909 = vst.msk [vmem:[#allocation3 + $0x208] sm:$0xff] %vm648_vm2, %v2826_v56  ;;  %4221 = vmatmul.mubr.f32.gmra.mxu0 %v3821_v14  ;;  %3112 = vrot.lane.b32.xlu0 %v7800_v32, %s5677_s27  ;;  %v3721_v56 = vld [vmem:[#allocation2 + $0x1c9] sm:$0xff]  ;;  %v3722_v14 = vld [vmem:[#allocation2 + $0x1d1] sm:$0xff] }
 0x37c   : > { %v3596_v31 = vpop.permute.xlu1 %3595  ;;  %v3824_v21 = vld [vmem:[#allocation3 + $0x1f8] sm:$0xff]  ;;  %3753 = vst.msk [vmem:[#allocation3 + $0x3e0] sm:$0xff] %vm279_vm0, %v3721_v56  ;;  %3754 = vst.msk [vmem:[#allocation3 + $0x408] sm:$0xff] %vm279_vm0, %v3722_v14 }
 0x37d   : > { %3678 = vst.msk [vmem:[#allocation3 + $0x220] sm:$0xff] %vm648_vm2, %v3596_v31  ;;  %4445 = vmatprep.mubr.f32.mxu1 %v3824_v21 }
 0x37e   : > { %3366 = vrot.lane.b32.xlu1 %v7791_v37, %s5677_s27  ;;  %v3085_v22 = vpop.permute.xlu0 %3084  ;;  %v3827_v46 = vld [vmem:[#allocation3 + $0x210] sm:$0xff] }
 0x37f   : > { %3166 = vst.msk [vmem:[#allocation3 + $0x238] sm:$0xff] %vm648_vm2, %v3085_v22  ;;  %4225 = vmatprep.mubr.f32.mxu0 %v3827_v46  ;;  %2855 = vrot.lane.b32.xlu0 %v7624_v38, %s5677_s27 }
 0x380   : > { %v3339_v43 = vpop.permute.xlu1 %3338  ;;  %v3823_v57 = vld [vmem:[#allocation3 + $0x1f0] sm:$0xff] }
 0x381   : > { %3421 = vst.msk [vmem:[#allocation3 + $0x218] sm:$0xff] %vm648_vm2, %v3339_v43  ;;  %4446 = vmatmul.mubr.f32.gmra.mxu1 %v3823_v57  ;;  %v3706_v43 = vld [vmem:[#allocation2 + $0xd1] sm:$0xff] }
 0x382   : > { %3625 = vrot.lane.b32.xlu1 %v7806_v50, %s5677_s27  ;;  %v2828_v32 = vpop.permute.xlu0 %2827  ;;  %v3826_v15 = vld [vmem:[#allocation3 + $0x208] sm:$0xff]  ;;  %3738 = vst.msk [vmem:[#allocation3 + $0x188] sm:$0xff] %vm279_vm0, %v3706_v43 }
 0x383   : > { %2910 = vst.msk [vmem:[#allocation3 + $0x230] sm:$0xff] %vm648_vm2, %v2828_v32  ;;  %4226 = vmatmul.mubr.f32.gmra.mxu0 %v3826_v15  ;;  %3114 = vrot.lane.b32.xlu0 %v7826_v60, %s5677_s27  ;;  %v3535_v60 = vld [vmem:[#allocation2 + $0x228] sm:$0xff]  ;;  %v3708_v32 = vld [vmem:[#allocation2 + $0xf1] sm:$0xff] }
 0x384   : > { %v3598_v37 = vpop.permute.xlu1 %3597  ;;  %v3829_v48 = vld [vmem:[#allocation3 + $0x220] sm:$0xff]  ;;  %3740 = vst.msk [vmem:[#allocation3 + $0x1d8] sm:$0xff] %vm279_vm0, %v3708_v32 }
 0x385   : > { %3679 = vst.msk [vmem:[#allocation3 + $0x248] sm:$0xff] %vm648_vm2, %v3598_v37  ;;  %4450 = vmatprep.mubr.f32.mxu1 %v3829_v48  ;;  %v3707_v48 = vld [vmem:[#allocation2 + $0xe9] sm:$0xff] }
 0x386   : > { %3368 = vrot.lane.b32.xlu1 %v7818_v6, %s5677_s27  ;;  %v3087_v38 = vpop.permute.xlu0 %3086  ;;  %v3832_v58 = vld [vmem:[#allocation3 + $0x238] sm:$0xff]  ;;  %3739 = vst.msk [vmem:[#allocation3 + $0x1b0] sm:$0xff] %vm279_vm0, %v3707_v48  ;;  %v8185_v48 = vld [vmem:[%s8542_s6] ss:$0 sm:$0xff] }
 0x387   : > { %3167 = vst.msk [vmem:[#allocation3 + $0x260] sm:$0xff] %vm648_vm2, %v3087_v38  ;;  %4230 = vmatprep.mubr.f32.mxu0 %v3832_v58  ;;  %2857 = vrot.lane.b32.xlu0 %v7674_v55, %s5677_s27  ;;  %v3278_v55 = vld [vmem:[#allocation2 + $0x209] sm:$0xff] }
 0x388   : > { %v3341_v50 = vpop.permute.xlu1 %3340  ;;  %v3828_v34 = vld [vmem:[#allocation3 + $0x218] sm:$0xff]  ;;  %v3709_v58 = vld [vmem:[#allocation2 + $0x109] sm:$0xff] }
 0x389   : > { %3422 = vst.msk [vmem:[#allocation3 + $0x240] sm:$0xff] %vm648_vm2, %v3341_v50  ;;  %4451 = vmatmul.mubr.f32.gmra.mxu1 %v3828_v34  ;;  %v3724_v50 = vld [vmem:[#allocation2 + $0x1f1] sm:$0xff] }
 0x38a   : > { %3627 = vrot.lane.b32.xlu1 %v7832_v7, %s5677_s27  ;;  %v2830_v7 = vpop.permute.xlu0 %2829  ;;  %v3831_v39 = vld [vmem:[#allocation3 + $0x230] sm:$0xff]  ;;  %3756 = vst.msk [vmem:[#allocation3 + $0x458] sm:$0xff] %vm279_vm0, %v3724_v50  ;;  %3741 = vst.msk [vmem:[#allocation3 + $0x200] sm:$0xff] %vm279_vm0, %v3709_v58 }
 0x38b   : > { %2911 = vst.msk [vmem:[#allocation3 + $0x258] sm:$0xff] %vm648_vm2, %v2830_v7  ;;  %4231 = vmatmul.mubr.f32.gmra.mxu0 %v3831_v39  ;;  %3116 = vrot.lane.b32.xlu0 %v7852_v5, %s5677_s27  ;;  %v3536_v5 = vld [vmem:[#allocation2 + $0x230] sm:$0xff] }
 0x38c   : > { %v3600_v41 = vpop.permute.xlu1 %3599  ;;  %v3834_v6 = vld [vmem:[#allocation3 + $0x248] sm:$0xff] }
 0x38d   : > { %3680 = vst.msk [vmem:[#allocation3 + $0x270] sm:$0xff] %vm648_vm2, %v3600_v41  ;;  %4455 = vmatprep.mubr.f32.mxu1 %v3834_v6  ;;  %v3725_v6 = vld [vmem:[#allocation2 + $0x209] sm:$0xff] }
 0x38e   : > { %3370 = vrot.lane.b32.xlu1 %v7844_v52, %s5677_s27  ;;  %v3089_v52 = vpop.permute.xlu0 %3088  ;;  %v3837_v20 = vld [vmem:[#allocation3 + $0x260] sm:$0xff]  ;;  %3757 = vst.msk [vmem:[#allocation3 + $0x480] sm:$0xff] %vm279_vm0, %v3725_v6 }
 0x38f   : > { %3168 = vst.msk [vmem:[#allocation3 + $0x288] sm:$0xff] %vm648_vm2, %v3089_v52  ;;  %4235 = vmatprep.mubr.f32.mxu0 %v3837_v20  ;;  %2859 = vrot.lane.b32.xlu0 %v7724_v25, %s5677_s27  ;;  %v3715_v25 = vld [vmem:[#allocation2 + $0x169] sm:$0xff]  ;;  %v3712_v52 = vld [vmem:[#allocation2 + $0x131] sm:$0xff] }
 0x390   : > { %v3343_v0 = vpop.permute.xlu1 %3342  ;;  %v3833_v47 = vld [vmem:[#allocation3 + $0x240] sm:$0xff]  ;;  %3747 = vst.msk [vmem:[#allocation3 + $0x2f0] sm:$0xff] %vm279_vm0, %v3715_v25  ;;  %3744 = vst.msk [vmem:[#allocation3 + $0x278] sm:$0xff] %vm279_vm0, %v3712_v52 }
 0x391   : > { %3423 = vst.msk [vmem:[#allocation3 + $0x268] sm:$0xff] %vm648_vm2, %v3343_v0  ;;  %4456 = vmatmul.mubr.f32.gmra.mxu1 %v3833_v47  ;;  %v3711_v47 = vld [vmem:[#allocation2 + $0x129] sm:$0xff] }
 0x392   : > { %3629 = vrot.lane.b32.xlu1 %v3535_v60, %s5677_s27  ;;  %v2832_v27 = vpop.permute.xlu0 %2831  ;;  %v3836_v28 = vld [vmem:[#allocation3 + $0x258] sm:$0xff]  ;;  %3743 = vst.msk [vmem:[#allocation3 + $0x250] sm:$0xff] %vm279_vm0, %v3711_v47 }
 0x393   : > { %2912 = vst.msk [vmem:[#allocation3 + $0x280] sm:$0xff] %vm648_vm2, %v2832_v27  ;;  %4236 = vmatmul.mubr.f32.gmra.mxu0 %v3836_v28  ;;  %3118 = vrot.lane.b32.xlu0 %v7872_v49, %s5677_s27  ;;  %v3701_v49 = vld [vmem:[#allocation2 + $0x89] sm:$0xff] }
 0x394   : > { %v3602_v44 = vpop.permute.xlu1 %3601  ;;  %v3839_v42 = vld [vmem:[#allocation3 + $0x270] sm:$0xff]  ;;  %3733 = vst.msk [vmem:[#allocation3 + $0xc0] sm:$0xff] %vm279_vm0, %v3701_v49 }
 0x395   : > { %3681 = vst.msk [vmem:[#allocation3 + $0x298] sm:$0xff] %vm648_vm2, %v3602_v44  ;;  %4460 = vmatprep.mubr.f32.mxu1 %v3839_v42  ;;  %v3728_v44 = vld [vmem:[#allocation2 + $0x231] sm:$0xff] }
 0x396   : > { %3372 = vrot.lane.b32.xlu1 %v3278_v55, %s5677_s27  ;;  %v3091_v59 = vpop.permute.xlu0 %3090  ;;  %v3842_v24 = vld [vmem:[#allocation3 + $0x288] sm:$0xff]  ;;  %3760 = vst.msk [vmem:[#allocation3 + $0x4f8] sm:$0xff] %vm279_vm0, %v3728_v44 }
 0x397   : > { %3169 = vst.msk [vmem:[#allocation3 + $0x2b0] sm:$0xff] %vm648_vm2, %v3091_v59  ;;  %4240 = vmatprep.mubr.f32.mxu0 %v3842_v24  ;;  %2861 = vrot.lane.b32.xlu0 %v7774_v18, %s5677_s27  ;;  %v3703_v18 = vld [vmem:[#allocation2 + $0xa9] sm:$0xff] }
 0x398   : > { %v3345_v19 = vpop.permute.xlu1 %3344  ;;  %v3838_v4 = vld [vmem:[#allocation3 + $0x268] sm:$0xff]  ;;  %3735 = vst.msk [vmem:[#allocation3 + $0x110] sm:$0xff] %vm279_vm0, %v3703_v18 }
 0x399   : > { %3424 = vst.msk [vmem:[#allocation3 + $0x290] sm:$0xff] %vm648_vm2, %v3345_v19  ;;  %4461 = vmatmul.mubr.f32.gmra.mxu1 %v3838_v4  ;;  %v3727_v55 = vld [vmem:[#allocation2 + $0x229] sm:$0xff] }
 0x39a   : > { %3631 = vrot.lane.b32.xlu1 %v3536_v5, %s5677_s27  ;;  %v2834_v63 = vpop.permute.xlu0 %2833  ;;  %v3841_v13 = vld [vmem:[#allocation3 + $0x280] sm:$0xff]  ;;  %3759 = vst.msk [vmem:[#allocation3 + $0x4d0] sm:$0xff] %vm279_vm0, %v3727_v55 }
 0x39b   : > { %2913 = vst.msk [vmem:[#allocation3 + $0x2a8] sm:$0xff] %vm648_vm2, %v2834_v63  ;;  %4241 = vmatmul.mubr.f32.gmra.mxu0 %v3841_v13 }
 0x39c   : > { %v3604_v3 = vpop.permute.xlu1 %3603  ;;  %v3844_v9 = vld [vmem:[#allocation3 + $0x298] sm:$0xff] }
 0x39d   : > { %3682 = vst.msk [vmem:[#allocation3 + $0x2c0] sm:$0xff] %vm648_vm2, %v3604_v3  ;;  %4465 = vmatprep.mubr.f32.mxu1 %v3844_v9 }
 0x39e   : > { %3374 = vrot.lane.b32.xlu1 %v3279_v29, %s5677_s27  ;;  %v3093_v51 = vpop.permute.xlu0 %3092  ;;  %v3847_v36 = vld [vmem:[#allocation3 + $0x2b0] sm:$0xff] }
 0x39f   : > { %3170 = vst.msk [vmem:[#allocation3 + $0x2d8] sm:$0xff] %vm648_vm2, %v3093_v51  ;;  %4245 = vmatprep.mubr.f32.mxu0 %v3847_v36 }
 0x3a0   : > { %v3347_v33 = vpop.permute.xlu1 %3346  ;;  %v3843_v2 = vld [vmem:[#allocation3 + $0x290] sm:$0xff] }
 0x3a1   : > { %3425 = vst.msk [vmem:[#allocation3 + $0x2b8] sm:$0xff] %vm648_vm2, %v3347_v33  ;;  %4466 = vmatmul.mubr.f32.gmra.mxu1 %v3843_v2 }
 0x3a2   : > { %v2836_v57 = vpop.permute.xlu0 %2835  ;;  %v3846_v37 = vld [vmem:[#allocation3 + $0x2a8] sm:$0xff] }
 0x3a3   : > { %2914 = vst.msk [vmem:[#allocation3 + $0x2d0] sm:$0xff] %vm648_vm2, %v2836_v57  ;;  %4246 = vmatmul.mubr.f32.gmra.mxu0 %v3846_v37 }
 0x3a4   : > { %v3606_v31 = vpop.permute.xlu1 %3605  ;;  %v3849_v21 = vld [vmem:[#allocation3 + $0x2c0] sm:$0xff] }
 0x3a5   : > { %3683 = vst.msk [vmem:[#allocation3 + $0x2e8] sm:$0xff] %vm648_vm2, %v3606_v31  ;;  %4470 = vmatprep.mubr.f32.mxu1 %v3849_v21 }
 0x3a6   : > { %v3095_v15 = vpop.permute.xlu0 %3094  ;;  %v3852_v38 = vld [vmem:[#allocation3 + $0x2d8] sm:$0xff] }
 0x3a7   : > { %3171 = vst.msk [vmem:[#allocation3 + $0x300] sm:$0xff] %vm648_vm2, %v3095_v15  ;;  %4250 = vmatprep.mubr.f32.mxu0 %v3852_v38 }
 0x3a8   : > { %v3349_v22 = vpop.permute.xlu1 %3348  ;;  %v3848_v46 = vld [vmem:[#allocation3 + $0x2b8] sm:$0xff] }
 0x3a9   : > { %3426 = vst.msk [vmem:[#allocation3 + $0x2e0] sm:$0xff] %vm648_vm2, %v3349_v22  ;;  %4471 = vmatmul.mubr.f32.gmra.mxu1 %v3848_v46 }
 0x3aa   : > { %v2838_v60 = vpop.permute.xlu0 %2837  ;;  %v3851_v0 = vld [vmem:[#allocation3 + $0x2d0] sm:$0xff] }
 0x3ab   : > { %2915 = vst.msk [vmem:[#allocation3 + $0x2f8] sm:$0xff] %vm648_vm2, %v2838_v60  ;;  %4251 = vmatmul.mubr.f32.gmra.mxu0 %v3851_v0 }
 0x3ac   : > { %v3608_v34 = vpop.permute.xlu1 %3607  ;;  %v3854_v41 = vld [vmem:[#allocation3 + $0x2e8] sm:$0xff] }
 0x3ad   : > { %3684 = vst.msk [vmem:[#allocation3 + $0x310] sm:$0xff] %vm648_vm2, %v3608_v34  ;;  %4475 = vmatprep.mubr.f32.mxu1 %v3854_v41 }
 0x3ae   : > { %v3097_v20 = vpop.permute.xlu0 %3096  ;;  %v3857_v30 = vld [vmem:[#allocation3 + $0x300] sm:$0xff] }
 0x3af   : > { %3172 = vst.msk [vmem:[#allocation3 + $0x328] sm:$0xff] %vm648_vm2, %v3097_v20  ;;  %4255 = vmatprep.mubr.f32.mxu0 %v3857_v30 }
 0x3b0   : > { %v3351_v7 = vpop.permute.xlu1 %3350  ;;  %v3853_v39 = vld [vmem:[#allocation3 + $0x2e0] sm:$0xff] }
 0x3b1   : > { %3427 = vst.msk [vmem:[#allocation3 + $0x308] sm:$0xff] %vm648_vm2, %v3351_v7  ;;  %4476 = vmatmul.mubr.f32.gmra.mxu1 %v3853_v39 }
 0x3b2   : > { %v2840_v11 = vpop.permute.xlu0 %2839  ;;  %v3856_v5 = vld [vmem:[#allocation3 + $0x2f8] sm:$0xff] }
 0x3b3   : > { %2916 = vst.msk [vmem:[#allocation3 + $0x320] sm:$0xff] %vm648_vm2, %v2840_v11  ;;  %4256 = vmatmul.mubr.f32.gmra.mxu0 %v3856_v5 }
 0x3b4   : > { %v3610_v42 = vpop.permute.xlu1 %3609  ;;  %v3859_v23 = vld [vmem:[#allocation3 + $0x310] sm:$0xff] }
 0x3b5   : > { %3685 = vst.msk [vmem:[#allocation3 + $0x338] sm:$0xff] %vm648_vm2, %v3610_v42  ;;  %4480 = vmatprep.mubr.f32.mxu1 %v3859_v23 }
 0x3b6   : > { %v3099_v19 = vpop.permute.xlu0 %3098  ;;  %v3862_v4 = vld [vmem:[#allocation3 + $0x328] sm:$0xff] }
 0x3b7   : > { %3173 = vst.msk [vmem:[#allocation3 + $0x350] sm:$0xff] %vm648_vm2, %v3099_v19  ;;  %4260 = vmatprep.mubr.f32.mxu0 %v3862_v4 }
 0x3b8   : > { %v3353_v54 = vpop.permute.xlu1 %3352  ;;  %v3858_v27 = vld [vmem:[#allocation3 + $0x308] sm:$0xff] }
 0x3b9   : > { %3428 = vst.msk [vmem:[#allocation3 + $0x330] sm:$0xff] %vm648_vm2, %v3353_v54  ;;  %4481 = vmatmul.mubr.f32.gmra.mxu1 %v3858_v27 }
 0x3ba   : > { %v2842_v25 = vpop.permute.xlu0 %2841  ;;  %v3861_v53 = vld [vmem:[#allocation3 + $0x320] sm:$0xff] }
 0x3bb   : > { %2917 = vst.msk [vmem:[#allocation3 + $0x348] sm:$0xff] %vm648_vm2, %v2842_v25  ;;  %4261 = vmatmul.mubr.f32.gmra.mxu0 %v3861_v53 }
 0x3bc   : > { %v3612_v28 = vpop.permute.xlu1 %3611  ;;  %v3864_v62 = vld [vmem:[#allocation3 + $0x338] sm:$0xff] }
 0x3bd   : > { %3686 = vst.msk [vmem:[#allocation3 + $0x360] sm:$0xff] %vm648_vm2, %v3612_v28  ;;  %4485 = vmatprep.mubr.f32.mxu1 %v3864_v62 }
 0x3be   : > { %v3101_v59 = vpop.permute.xlu0 %3100  ;;  %v3867_v24 = vld [vmem:[#allocation3 + $0x350] sm:$0xff] }
 0x3bf   : > { %3174 = vst.msk [vmem:[#allocation3 + $0x378] sm:$0xff] %vm648_vm2, %v3101_v59  ;;  %4265 = vmatprep.mubr.f32.mxu0 %v3867_v24 }
 0x3c0   : > { %v3355_v45 = vpop.permute.xlu1 %3354  ;;  %v3863_v29 = vld [vmem:[#allocation3 + $0x330] sm:$0xff] }
 0x3c1   : > { %3429 = vst.msk [vmem:[#allocation3 + $0x358] sm:$0xff] %vm648_vm2, %v3355_v45  ;;  %4486 = vmatmul.mubr.f32.gmra.mxu1 %v3863_v29 }
 0x3c2   : > { %v2844_v49 = vpop.permute.xlu0 %2843  ;;  %v3866_v61 = vld [vmem:[#allocation3 + $0x348] sm:$0xff] }
 0x3c3   : > { %2918 = vst.msk [vmem:[#allocation3 + $0x370] sm:$0xff] %vm648_vm2, %v2844_v49  ;;  %4266 = vmatmul.mubr.f32.gmra.mxu0 %v3866_v61 }
 0x3c4   : > { %v3614_v3 = vpop.permute.xlu1 %3613  ;;  %v3869_v9 = vld [vmem:[#allocation3 + $0x360] sm:$0xff] }
 0x3c5   : > { %3687 = vst.msk [vmem:[#allocation3 + $0x388] sm:$0xff] %vm648_vm2, %v3614_v3  ;;  %4490 = vmatprep.mubr.f32.mxu1 %v3869_v9 }
 0x3c6   : > { %v3103_v63 = vpop.permute.xlu0 %3102  ;;  %v3872_v13 = vld [vmem:[#allocation3 + $0x378] sm:$0xff] }
 0x3c7   : > { %3175 = vst.msk [vmem:[#allocation3 + $0x3a0] sm:$0xff] %vm648_vm2, %v3103_v63  ;;  %4270 = vmatprep.mubr.f32.mxu0 %v3872_v13 }
 0x3c8   : > { %v3357_v17 = vpop.permute.xlu1 %3356  ;;  %v3868_v1 = vld [vmem:[#allocation3 + $0x358] sm:$0xff] }
 0x3c9   : > { %3430 = vst.msk [vmem:[#allocation3 + $0x380] sm:$0xff] %vm648_vm2, %v3357_v17  ;;  %4491 = vmatmul.mubr.f32.gmra.mxu1 %v3868_v1 }
 0x3ca   : > { %v2846_v18 = vpop.permute.xlu0 %2845  ;;  %v3871_v10 = vld [vmem:[#allocation3 + $0x370] sm:$0xff] }
 0x3cb   : > { %2919 = vst.msk [vmem:[#allocation3 + $0x398] sm:$0xff] %vm648_vm2, %v2846_v18  ;;  %4271 = vmatmul.mubr.f32.gmra.mxu0 %v3871_v10 }
 0x3cc   : > { %v3616_v33 = vpop.permute.xlu1 %3615  ;;  %v3874_v2 = vld [vmem:[#allocation3 + $0x388] sm:$0xff] }
 0x3cd   : > { %3688 = vst.msk [vmem:[#allocation3 + $0x3b0] sm:$0xff] %vm648_vm2, %v3616_v33  ;;  %4495 = vmatprep.mubr.f32.mxu1 %v3874_v2 }
 0x3ce   : > { %v3105_v51 = vpop.permute.xlu0 %3104  ;;  %v3877_v36 = vld [vmem:[#allocation3 + $0x3a0] sm:$0xff] }
 0x3cf   : > { %3176 = vst.msk [vmem:[#allocation3 + $0x3c8] sm:$0xff] %vm648_vm2, %v3105_v51  ;;  %4275 = vmatprep.mubr.f32.mxu0 %v3877_v36 }
 0x3d0   : > { %v3359_v12 = vpop.permute.xlu1 %3358  ;;  %v3873_v40 = vld [vmem:[#allocation3 + $0x380] sm:$0xff] }
 0x3d1   : > { %3431 = vst.msk [vmem:[#allocation3 + $0x3a8] sm:$0xff] %vm648_vm2, %v3359_v12  ;;  %4496 = vmatmul.mubr.f32.gmra.mxu1 %v3873_v40 }
 0x3d2   : > { %v2848_v26 = vpop.permute.xlu0 %2847  ;;  %v3876_v43 = vld [vmem:[#allocation3 + $0x398] sm:$0xff] }
 0x3d3   : > { %2920 = vst.msk [vmem:[#allocation3 + $0x3c0] sm:$0xff] %vm648_vm2, %v2848_v26  ;;  %4276 = vmatmul.mubr.f32.gmra.mxu0 %v3876_v43 }
 0x3d4   : > { %v3618_v31 = vpop.permute.xlu1 %3617  ;;  %v3879_v21 = vld [vmem:[#allocation3 + $0x3b0] sm:$0xff] }
 0x3d5   : > { %3689 = vst.msk [vmem:[#allocation3 + $0x3d8] sm:$0xff] %vm648_vm2, %v3618_v31  ;;  %4500 = vmatprep.mubr.f32.mxu1 %v3879_v21 }
 0x3d6   : > { %v3107_v57 = vpop.permute.xlu0 %3106  ;;  %v3882_v37 = vld [vmem:[#allocation3 + $0x3c8] sm:$0xff] }
 0x3d7   : > { %3177 = vst.msk [vmem:[#allocation3 + $0x3f0] sm:$0xff] %vm648_vm2, %v3107_v57  ;;  %4280 = vmatprep.mubr.f32.mxu0 %v3882_v37 }
 0x3d8   : > { %v3361_v56 = vpop.permute.xlu1 %3360  ;;  %v3878_v14 = vld [vmem:[#allocation3 + $0x3a8] sm:$0xff] }
 0x3d9   : > { %3432 = vst.msk [vmem:[#allocation3 + $0x3d0] sm:$0xff] %vm648_vm2, %v3361_v56  ;;  %4501 = vmatmul.mubr.f32.gmra.mxu1 %v3878_v14 }
 0x3da   : > { %v2850_v32 = vpop.permute.xlu0 %2849  ;;  %v3881_v15 = vld [vmem:[#allocation3 + $0x3c0] sm:$0xff] }
 0x3db   : > { %2921 = vst.msk [vmem:[#allocation3 + $0x3e8] sm:$0xff] %vm648_vm2, %v2850_v32  ;;  %4281 = vmatmul.mubr.f32.gmra.mxu0 %v3881_v15 }
 0x3dc   : > { %v3620_v22 = vpop.permute.xlu1 %3619  ;;  %v3884_v46 = vld [vmem:[#allocation3 + $0x3d8] sm:$0xff] }
 0x3dd   : > { %3690 = vst.msk [vmem:[#allocation3 + $0x400] sm:$0xff] %vm648_vm2, %v3620_v22  ;;  %4505 = vmatprep.mubr.f32.mxu1 %v3884_v46  ;;  %v4162_v8 = vpop.f32.mrf.mxu0 }
 0x3de   : > { %v4163_v41 = vadd.f32 %v8185_v48, %v4162_v8  ;;  %v3109_v35 = vpop.permute.xlu0 %3108  ;;  %v3887_v60 = vld [vmem:[#allocation3 + $0x3f0] sm:$0xff] }
 0x3df   : > { %v4164_v38 = vpop.f32.mrf.mxu0  ;;  %3178 = vst.msk [vmem:[#allocation3 + $0x418] sm:$0xff] %vm648_vm2, %v3109_v35  ;;  %4285 = vmatprep.mubr.f32.mxu0 %v3887_v60 }
 0x3e0   : > { %v3363_v50 = vpop.permute.xlu1 %3362  ;;  %v3883_v34 = vld [vmem:[#allocation3 + $0x3d0] sm:$0xff] }
 0x3e1   : > { %3433 = vst.msk [vmem:[#allocation3 + $0x3f8] sm:$0xff] %vm648_vm2, %v3363_v50  ;;  %4506 = vmatmul.mubr.f32.gmra.mxu1 %v3883_v34  ;;  %v4387_v58 = vpop.f32.mrf.mxu1  ;;  %v4167_v44 = vpop.f32.mrf.mxu0 }
 0x3e2   : > { %v8190_v6 = vadd.f32 %v4387_v58, %v4163_v41  ;;  %v2852_v39 = vpop.permute.xlu0 %2851  ;;  %v3886_v55 = vld [vmem:[#allocation3 + $0x3e8] sm:$0xff]  ;;  %v4168_v42 = vadd.f32 %v8185_v48, %v4167_v44 }
 0x3e3   : > { %v4389_v0 = vpop.f32.mrf.mxu1  ;;  %2922 = vst.msk [vmem:[#allocation3 + $0x410] sm:$0xff] %vm648_vm2, %v2852_v39  ;;  %4286 = vmatmul.mubr.f32.gmra.mxu0 %v3886_v55  ;;  %v4169_v30 = vpop.f32.mrf.mxu0 }
 0x3e4   : > { %v3622_v16 = vpop.permute.xlu1 %3621  ;;  %v3889_v7 = vld [vmem:[#allocation3 + $0x400] sm:$0xff] }
 0x3e5   : > { %3691 = vst.msk [vmem:[#allocation3 + $0x428] sm:$0xff] %vm648_vm2, %v3622_v16  ;;  %4510 = vmatprep.mubr.f32.mxu1 %v3889_v7 }
 0x3e6   : > { %v3111_v54 = vpop.permute.xlu0 %3110  ;;  %v3892_v27 = vld [vmem:[#allocation3 + $0x418] sm:$0xff] }
 0x3e7   : > { %3179 = vst.msk [vmem:[#allocation3 + $0x440] sm:$0xff] %vm648_vm2, %v3111_v54  ;;  %4290 = vmatprep.mubr.f32.mxu0 %v3892_v27 }
 0x3e8   : > { %v3365_v47 = vpop.permute.xlu1 %3364  ;;  %v3888_v52 = vld [vmem:[#allocation3 + $0x3f8] sm:$0xff] }
 0x3e9   : > { %3434 = vst.msk [vmem:[#allocation3 + $0x420] sm:$0xff] %vm648_vm2, %v3365_v47  ;;  %v4392_v20 = vpop.f32.mrf.mxu1  ;;  %4511 = vmatmul.mubr.f32.gmra.mxu1 %v3888_v52 }
 0x3ea   : > { %v8197_v11 = vadd.f32 %v4392_v20, %v4168_v42  ;;  %v2854_v28 = vpop.permute.xlu0 %2853  ;;  %v3891_v62 = vld [vmem:[#allocation3 + $0x410] sm:$0xff] }
 0x3eb   : > { %v4394_v23 = vpop.f32.mrf.mxu1  ;;  %2923 = vst.msk [vmem:[#allocation3 + $0x438] sm:$0xff] %vm648_vm2, %v2854_v28  ;;  %v4172_v45 = vpop.f32.mrf.mxu0  ;;  %4291 = vmatmul.mubr.f32.gmra.mxu0 %v3891_v62 }
 0x3ec   : > { %v3624_v5 = vpop.permute.xlu1 %3623  ;;  %v3894_v19 = vld [vmem:[#allocation3 + $0x428] sm:$0xff]  ;;  %v4173_v29 = vadd.f32 %v8185_v48, %v4172_v45 }
 0x3ed   : > { %3692 = vst.msk [vmem:[#allocation3 + $0x450] sm:$0xff] %vm648_vm2, %v3624_v5  ;;  %4515 = vmatprep.mubr.f32.mxu1 %v3894_v19  ;;  %v4174_v59 = vpop.f32.mrf.mxu0 }
 0x3ee   : > { %v3113_v9 = vpop.permute.xlu0 %3112  ;;  %v3897_v17 = vld [vmem:[#allocation3 + $0x440] sm:$0xff] }
 0x3ef   : > { %3180 = vst.msk [vmem:[#allocation3 + $0x468] sm:$0xff] %vm648_vm2, %v3113_v9  ;;  %4295 = vmatprep.mubr.f32.mxu0 %v3897_v17  ;;  %v3765_v59 = vld [vmem:[#allocation3 + $0x20] sm:$0xff] }
 0x3f0   : > { %v3367_v4 = vpop.permute.xlu1 %3366  ;;  %v3893_v25 = vld [vmem:[#allocation3 + $0x420] sm:$0xff] }
 0x3f1   : > { %3435 = vst.msk [vmem:[#allocation3 + $0x448] sm:$0xff] %vm648_vm2, %v3367_v4  ;;  %v4397_v53 = vpop.f32.mrf.mxu1  ;;  %4516 = vmatmul.mubr.f32.gmra.mxu1 %v3893_v25 }
 0x3f2   : > { %v8204_v24 = vadd.f32 %v4397_v53, %v4173_v29  ;;  %v2856_v1 = vpop.permute.xlu0 %2855  ;;  %v3896_v33 = vld [vmem:[#allocation3 + $0x438] sm:$0xff] }
 0x3f3   : > { %v4399_v3 = vpop.f32.mrf.mxu1  ;;  %2924 = vst.msk [vmem:[#allocation3 + $0x460] sm:$0xff] %vm648_vm2, %v2856_v1  ;;  %v4177_v2 = vpop.f32.mrf.mxu0  ;;  %4296 = vmatmul.mubr.f32.gmra.mxu0 %v3896_v33  ;;  %v3850_v33 = vld [vmem:[#allocation3 + $0x2c8] sm:$0xff] }
 0x3f4   : > { %v3626_v49 = vpop.permute.xlu1 %3625  ;;  %v3899_v61 = vld [vmem:[#allocation3 + $0x450] sm:$0xff]  ;;  %v4178_v12 = vadd.f32 %v8185_v48, %v4177_v2  ;;  %v3845_v3 = vld [vmem:[#allocation3 + $0x2a0] sm:$0xff] }
 0x3f5   : > { %3693 = vst.msk [vmem:[#allocation3 + $0x478] sm:$0xff] %vm648_vm2, %v3626_v49  ;;  %4520 = vmatprep.mubr.f32.mxu1 %v3899_v61  ;;  %v4179_v10 = vpop.f32.mrf.mxu0 }
 0x3f6   : > { %v3115_v31 = vpop.permute.xlu0 %3114  ;;  %v3902_v21 = vld [vmem:[#allocation3 + $0x468] sm:$0xff] }
 0x3f7   : > { %3181 = vst.msk [vmem:[#allocation3 + $0x490] sm:$0xff] %vm648_vm2, %v3115_v31  ;;  %4300 = vmatprep.mubr.f32.mxu0 %v3902_v21  ;;  %v3860_v31 = vld [vmem:[#allocation3 + $0x318] sm:$0xff]  ;;  %v3865_v21 = vld [vmem:[#allocation3 + $0x340] sm:$0xff] }
 0x3f8   : > { %v3369_v63 = vpop.permute.xlu1 %3368  ;;  %v3898_v13 = vld [vmem:[#allocation3 + $0x448] sm:$0xff] }
 0x3f9   : > { %3436 = vst.msk [vmem:[#allocation3 + $0x470] sm:$0xff] %vm648_vm2, %v3369_v63  ;;  %v4402_v18 = vpop.f32.mrf.mxu1  ;;  %4521 = vmatmul.mubr.f32.gmra.mxu1 %v3898_v13  ;;  %v3770_v63 = vld [vmem:[#allocation3 + $0x48] sm:$0xff] }
 0x3fa   : > { %v8211_v51 = vadd.f32 %v4402_v18, %v4178_v12  ;;  %v2858_v56 = vpop.permute.xlu0 %2857  ;;  %v3901_v14 = vld [vmem:[#allocation3 + $0x460] sm:$0xff]  ;;  %v3775_v18 = vld [vmem:[#allocation3 + $0x70] sm:$0xff] }
 0x3fb   : > { %v4404_v40 = vpop.f32.mrf.mxu1  ;;  %2925 = vst.msk [vmem:[#allocation3 + $0x488] sm:$0xff] %vm648_vm2, %v2858_v56  ;;  %v4182_v22 = vpop.f32.mrf.mxu0  ;;  %4301 = vmatmul.mubr.f32.gmra.mxu0 %v3901_v14  ;;  %v3855_v12 = vld [vmem:[#allocation3 + $0x2f0] sm:$0xff]  ;;  %v3790_v14 = vld [vmem:[#allocation3 + $0xe8] sm:$0xff] }
 0x3fc   : > { %v3628_v36 = vpop.permute.xlu1 %3627  ;;  %v3904_v26 = vld [vmem:[#allocation3 + $0x478] sm:$0xff]  ;;  %v4183_v46 = vadd.f32 %v8185_v48, %v4182_v22 }
 0x3fd   : > { %3694 = vst.msk [vmem:[#allocation3 + $0x4a0] sm:$0xff] %vm648_vm2, %v3628_v36  ;;  %4525 = vmatprep.mubr.f32.mxu1 %v3904_v26  ;;  %v4184_v8 = vpop.f32.mrf.mxu0  ;;  %v3780_v40 = vld [vmem:[#allocation3 + $0x98] sm:$0xff]  ;;  %v3785_v36 = vld [vmem:[#allocation3 + $0xc0] sm:$0xff] }
 0x3fe   : > { %v3117_v15 = vpop.permute.xlu0 %3116  ;;  %v3907_v38 = vld [vmem:[#allocation3 + $0x490] sm:$0xff] }
 0x3ff   : > { %3182 = vst.msk [vmem:[#allocation3 + $0x4b8] sm:$0xff] %vm648_vm2, %v3117_v15  ;;  %4305 = vmatprep.mubr.f32.mxu0 %v3907_v38  ;;  %v3875_v8 = vld [vmem:[#allocation3 + $0x390] sm:$0xff]  ;;  %v3800_v15 = vld [vmem:[#allocation3 + $0x138] sm:$0xff]  ;;  %v3805_v38 = vld [vmem:[#allocation3 + $0x160] sm:$0xff] }
 0x400   : > { %v3371_v43 = vpop.permute.xlu1 %3370  ;;  %v3903_v57 = vld [vmem:[#allocation3 + $0x470] sm:$0xff] }
 0x401   : > { %3437 = vst.msk [vmem:[#allocation3 + $0x498] sm:$0xff] %vm648_vm2, %v3371_v43  ;;  %v4407_v37 = vpop.f32.mrf.mxu1  ;;  %4526 = vmatmul.mubr.f32.gmra.mxu1 %v3903_v57  ;;  %v3870_v57 = vld [vmem:[#allocation3 + $0x368] sm:$0xff] }
 0x402   : > { %v8218_v50 = vadd.f32 %v4407_v37, %v4183_v46  ;;  %v2860_v58 = vpop.permute.xlu0 %2859  ;;  %v3906_v16 = vld [vmem:[#allocation3 + $0x488] sm:$0xff]  ;;  %v3795_v46 = vld [vmem:[#allocation3 + $0x110] sm:$0xff] }
 0x403   : > { %v4409_v32 = vpop.f32.mrf.mxu1  ;;  %2926 = vst.msk [vmem:[#allocation3 + $0x4b0] sm:$0xff] %vm648_vm2, %v2860_v58  ;;  %v4187_v7 = vpop.f32.mrf.mxu0  ;;  %4306 = vmatmul.mubr.f32.gmra.mxu0 %v3906_v16 }
 0x404   : > { %v3630_v34 = vpop.permute.xlu1 %3629  ;;  %v3909_v41 = vld [vmem:[#allocation3 + $0x4a0] sm:$0xff]  ;;  %v4188_v39 = vadd.f32 %v8185_v48, %v4187_v7  ;;  %v3890_v7 = vld [vmem:[#allocation3 + $0x408] sm:$0xff] }
 0x405   : > { %3695 = vst.msk [vmem:[#allocation3 + $0x4c8] sm:$0xff] %vm648_vm2, %v3630_v34  ;;  %4530 = vmatprep.mubr.f32.mxu1 %v3909_v41  ;;  %v4189_v47 = vpop.f32.mrf.mxu0  ;;  %v3880_v34 = vld [vmem:[#allocation3 + $0x3b8] sm:$0xff]  ;;  %v3885_v41 = vld [vmem:[#allocation3 + $0x3e0] sm:$0xff] }
 0x406   : > { %v3119_v44 = vpop.permute.xlu0 %3118  ;;  %v3912_v42 = vld [vmem:[#allocation3 + $0x4b8] sm:$0xff]  ;;  %v3815_v47 = vld [vmem:[#allocation3 + $0x1b0] sm:$0xff] }
 0x407   : > { %3183 = vst.msk [vmem:[#allocation3 + $0x4e0] sm:$0xff] %vm648_vm2, %v3119_v44  ;;  %4310 = vmatprep.mubr.f32.mxu0 %v3912_v42  ;;  %v3900_v42 = vld [vmem:[#allocation3 + $0x458] sm:$0xff] }
 0x408   : > { %v3373_v35 = vpop.permute.xlu1 %3372  ;;  %v3908_v60 = vld [vmem:[#allocation3 + $0x498] sm:$0xff] }
 0x409   : > { %3438 = vst.msk [vmem:[#allocation3 + $0x4c0] sm:$0xff] %vm648_vm2, %v3373_v35  ;;  %v4412_v0 = vpop.f32.mrf.mxu1  ;;  %4531 = vmatmul.mubr.f32.gmra.mxu1 %v3908_v60  ;;  %v3810_v60 = vld [vmem:[#allocation3 + $0x188] sm:$0xff] }
 0x40a   : > { %v8225_v52 = vadd.f32 %v4412_v0, %v4188_v39  ;;  %v2862_v23 = vpop.permute.xlu0 %2861  ;;  %v3911_v5 = vld [vmem:[#allocation3 + $0x4b0] sm:$0xff] }
 0x40b   : > { %v4414_v55 = vpop.f32.mrf.mxu1  ;;  %2927 = vst.msk [vmem:[#allocation3 + $0x4d8] sm:$0xff] %vm648_vm2, %v2862_v23  ;;  %v4192_v19 = vpop.f32.mrf.mxu0  ;;  %4311 = vmatmul.mubr.f32.gmra.mxu0 %v3911_v5  ;;  %v3905_v23 = vld [vmem:[#allocation3 + $0x480] sm:$0xff] }
 0x40c   : > { %v3632_v20 = vpop.permute.xlu1 %3631  ;;  %v3914_v30 = vld [vmem:[#allocation3 + $0x4c8] sm:$0xff]  ;;  %v4193_v4 = vadd.f32 %v8185_v48, %v4192_v19  ;;  %v3895_v55 = vld [vmem:[#allocation3 + $0x430] sm:$0xff] }
 0x40d   : > { %3696 = vst.msk [vmem:[#allocation3 + $0x4f0] sm:$0xff] %vm648_vm2, %v3632_v20  ;;  %4535 = vmatprep.mubr.f32.mxu1 %v3914_v30  ;;  %v4194_v62 = vpop.f32.mrf.mxu0  ;;  %v3820_v20 = vld [vmem:[#allocation3 + $0x1d8] sm:$0xff]  ;;  %v3825_v30 = vld [vmem:[#allocation3 + $0x200] sm:$0xff]  ;;  %v3830_v19 = vld [vmem:[#allocation3 + $0x228] sm:$0xff] }
 0x40e   : > { %v3917_v53 = vld [vmem:[#allocation3 + $0x4e0] sm:$0xff] }
 0x40f   : > { %4315 = vmatprep.mubr.f32.mxu0 %v3917_v53  ;;  %v3915_v53 = vld [vmem:[#allocation3 + $0x4d0] sm:$0xff] }
 0x410   : > { %v3375_v54 = vpop.permute.xlu1 %3374  ;;  %v3913_v27 = vld [vmem:[#allocation3 + $0x4c0] sm:$0xff] }
 0x411   : > { %3439 = vst.msk [vmem:[#allocation3 + $0x4e8] sm:$0xff] %vm648_vm2, %v3375_v54  ;;  %v4417_v28 = vpop.f32.mrf.mxu1  ;;  %4536 = vmatmul.mubr.f32.gmra.mxu1 %v3913_v27 }
 0x412   : > { %v8232_v45 = vadd.f32 %v4417_v28, %v4193_v4  ;;  %v3916_v9 = vld [vmem:[#allocation3 + $0x4d8] sm:$0xff]  ;;  %v3910_v28 = vld [vmem:[#allocation3 + $0x4a8] sm:$0xff] }
 0x413   : > { %v4419_v25 = vpop.f32.mrf.mxu1  ;;  %v4197_v17 = vpop.f32.mrf.mxu0  ;;  %4316 = vmatmul.mubr.f32.gmra.mxu0 %v3916_v9 }
 0x414   : > { %v3919_v29 = vld [vmem:[#allocation3 + $0x4f0] sm:$0xff]  ;;  %v4198_v1 = vadd.f32 %v8185_v48, %v4197_v17  ;;  %5429 = vmatprep.mubr.msk.f32.mxu0 %vm279_vm0, %v3765_v59  ;;  %v3840_v59 = vld [vmem:[#allocation3 + $0x278] sm:$0xff] }
 0x415   : > { %4540 = vmatprep.mubr.f32.mxu1 %v3919_v29  ;;  %v4199_v13 = vpop.f32.mrf.mxu0  ;;  %v3835_v25 = vld [vmem:[#allocation3 + $0x250] sm:$0xff] }
 0x417   : > { %5430 = vmatmul.mubr.msk.f32.vlgmr.msra.gmra.mxu0 %vm279_vm0, %v3770_v63 }
 0x418   : > { %v3918_v49 = vld [vmem:[#allocation3 + $0x4e8] sm:$0xff]  ;;  %5432 = vmatprep.mubr.msk.f32.mxu0 %vm279_vm0, %v3775_v18 }
 0x419   : > { %v4422_v61 = vpop.f32.mrf.mxu1  ;;  %4541 = vmatmul.mubr.f32.gmra.mxu1 %v3918_v49 }
 0x41a   : > { %5453 = vmatprep.mubr.msk.f32.mxu1 %vm279_vm0, %v3845_v3  ;;  %v8237_v10 = vadd.f32 %v4422_v61, %v4198_v1  ;;  %v3920_v3 = vld [vmem:[#allocation3 + $0x4f8] sm:$0xff] }
 0x41b   : > { %v4424_v2 = vpop.f32.mrf.mxu1  ;;  %v4202_v26 = vpop.f32.mrf.mxu0  ;;  %5433 = vmatmul.mubr.msk.f32.gmra.mxu0 %vm279_vm0, %v3780_v40 }
 0x41c   : > { %v4203_v43 = vadd.f32 %v8185_v48, %v4202_v26  ;;  %5435 = vmatprep.mubr.msk.f32.mxu0 %vm279_vm0, %v3785_v36 }
 0x41d   : > { %5454 = vmatmul.mubr.msk.f32.vlgmr.msra.gmra.mxu1 %vm279_vm0, %v3850_v33  ;;  %v4204_v22 = vpop.f32.mrf.mxu0 }
 0x41e   : > { %5456 = vmatprep.mubr.msk.f32.mxu1 %vm279_vm0, %v3855_v12 }
 0x41f   : > { %5436 = vmatmul.mubr.msk.f32.gmra.mxu0 %vm279_vm0, %v3790_v14 }
 0x420   : > { %5438 = vmatprep.mubr.msk.f32.mxu0 %vm279_vm0, %v3795_v46 }
 0x421   : > { %v4427_v56 = vpop.f32.mrf.mxu1  ;;  %5457 = vmatmul.mubr.msk.f32.gmra.mxu1 %vm279_vm0, %v3860_v31 }
 0x422   : > { %5459 = vmatprep.mubr.msk.f32.mxu1 %vm279_vm0, %v3865_v21  ;;  %v8248_v32 = vadd.f32 %v4427_v56, %v4203_v43 }
 0x423   : > { %v4429_v37 = vpop.f32.mrf.mxu1  ;;  %v4207_v58 = vpop.f32.mrf.mxu0  ;;  %5439 = vmatmul.mubr.msk.f32.gmra.mxu0 %vm279_vm0, %v3800_v15 }
 0x424   : > { %v4208_v16 = vadd.f32 %v8185_v48, %v4207_v58  ;;  %5441 = vmatprep.mubr.msk.f32.mxu0 %vm279_vm0, %v3805_v38 }
 0x425   : > { %5460 = vmatmul.mubr.msk.f32.gmra.mxu1 %vm279_vm0, %v3870_v57  ;;  %v4209_v0 = vpop.f32.mrf.mxu0 }
 0x426   : > { %5462 = vmatprep.mubr.msk.f32.mxu1 %vm279_vm0, %v3875_v8 }
 0x427   : > { %5442 = vmatmul.mubr.msk.f32.gmra.mxu0 %vm279_vm0, %v3810_v60 }
 0x428   : > { %5444 = vmatprep.mubr.msk.f32.mxu0 %vm279_vm0, %v3815_v47 }
 0x429   : > { %v4432_v35 = vpop.f32.mrf.mxu1  ;;  %5463 = vmatmul.mubr.msk.f32.gmra.mxu1 %vm279_vm0, %v3880_v34 }
 0x42a   : > { %5465 = vmatprep.mubr.msk.f32.mxu1 %vm279_vm0, %v3885_v41  ;;  %v8259_v44 = vadd.f32 %v4432_v35, %v4208_v16 }
 0x42b   : > { %v4434_v39 = vpop.f32.mrf.mxu1  ;;  %v4212_v54 = vpop.f32.mrf.mxu0  ;;  %5445 = vmatmul.mubr.msk.f32.gmra.mxu0 %vm279_vm0, %v3820_v20 }
 0x42c   : > { %v4213_v27 = vadd.f32 %v8185_v48, %v4212_v54  ;;  %5447 = vmatprep.mubr.msk.f32.mxu0 %vm279_vm0, %v3825_v30 }
 0x42d   : > { %5466 = vmatmul.mubr.msk.f32.gmra.mxu1 %vm279_vm0, %v3890_v7  ;;  %v4214_v4 = vpop.f32.mrf.mxu0 }
 0x42e   : > { %5468 = vmatprep.mubr.msk.f32.mxu1 %vm279_vm0, %v3895_v55 }
 0x42f   : > { %5448 = vmatmul.mubr.msk.f32.gmra.mxu0 %vm279_vm0, %v3830_v19 }
 0x430   : > { %5450 = vmatprep.mubr.msk.f32.mxu0 %vm279_vm0, %v3835_v25 }
 0x431   : > { %v4437_v5 = vpop.f32.mrf.mxu1  ;;  %5469 = vmatmul.mubr.msk.f32.gmra.mxu1 %vm279_vm0, %v3900_v42 }
 0x432   : > { %5471 = vmatprep.mubr.msk.f32.mxu1 %vm279_vm0, %v3905_v23  ;;  %v8270_v29 = vadd.f32 %v4437_v5, %v4213_v27 }
 0x433   : > { %v4439_v62 = vpop.f32.mrf.mxu1  ;;  %v4217_v9 = vpop.f32.mrf.mxu0  ;;  %5451 = vmatmul.mubr.msk.f32.gmra.mxu0 %vm279_vm0, %v3840_v59 }
 0x434   : > { %v4218_v17 = vadd.f32 %v8185_v48, %v4217_v9 }
 0x435   : > { %5472 = vmatmul.mubr.msk.f32.gmra.mxu1 %vm279_vm0, %v3910_v28  ;;  %v4219_v61 = vpop.f32.mrf.mxu0 }
 0x436   : > { %5474 = vmatprep.mubr.msk.f32.mxu1 %vm279_vm0, %v3915_v53 }
 0x439   : > { %v4442_v49 = vpop.f32.mrf.mxu1  ;;  %5475 = vmatmul.mubr.msk.f32.gmra.mxu1 %vm279_vm0, %v3920_v3 }
 0x43a   : > { %v8279_v63 = vadd.f32 %v4442_v49, %v4218_v17 }
 0x43b   : > { %v4444_v1 = vpop.f32.mrf.mxu1  ;;  %v4222_v33 = vpop.f32.mrf.mxu0 }
 0x43c   : > { %v4223_v2 = vadd.f32 %v8185_v48, %v4222_v33 }
 0x43d   : > { %v4224_v18 = vpop.f32.mrf.mxu0 }
 0x441   : > { %v4447_v13 = vpop.f32.mrf.mxu1 }
 0x442   : > { %v8282_v40 = vadd.f32 %v4447_v13, %v4223_v2 }
 0x443   : > { %v4449_v12 = vpop.f32.mrf.mxu1  ;;  %v4227_v31 = vpop.f32.mrf.mxu0 }
 0x444   : > { %v4228_v21 = vadd.f32 %v8185_v48, %v4227_v31 }
 0x445   : > { %v4229_v26 = vpop.f32.mrf.mxu0 }
 0x449   : > { %v4452_v36 = vpop.f32.mrf.mxu1 }
 0x44a   : > { %v8285_v43 = vadd.f32 %v4452_v36, %v4228_v21 }
 0x44b   : > { %v4454_v56 = vpop.f32.mrf.mxu1  ;;  %v4232_v14 = vpop.f32.mrf.mxu0 }
 0x44c   : > { %v4233_v22 = vadd.f32 %v8185_v48, %v4232_v14 }
 0x44d   : > { %v4234_v37 = vpop.f32.mrf.mxu0 }
 0x451   : > { %v4457_v57 = vpop.f32.mrf.mxu1 }
 0x452   : > { %v8288_v8 = vadd.f32 %v4457_v57, %v4233_v22 }
 0x453   : > { %v4459_v46 = vpop.f32.mrf.mxu1  ;;  %v4237_v15 = vpop.f32.mrf.mxu0 }
 0x454   : > { %v4238_v38 = vadd.f32 %v8185_v48, %v4237_v15 }
 0x455   : > { %v4239_v41 = vpop.f32.mrf.mxu0 }
 0x459   : > { %v4462_v34 = vpop.f32.mrf.mxu1 }
 0x45a   : > { %v8291_v35 = vadd.f32 %v4462_v34, %v4238_v38 }
 0x45b   : > { %v4464_v58 = vpop.f32.mrf.mxu1  ;;  %v4242_v16 = vpop.f32.mrf.mxu0 }
 0x45c   : > { %v4243_v7 = vadd.f32 %v8185_v48, %v4242_v16 }
 0x45d   : > { %v4244_v0 = vpop.f32.mrf.mxu0 }
 0x461   : > { %v4467_v60 = vpop.f32.mrf.mxu1 }
 0x462   : > { %v8294_v47 = vadd.f32 %v4467_v60, %v4243_v7 }
 0x463   : > { %v4469_v39 = vpop.f32.mrf.mxu1  ;;  %v4247_v55 = vpop.f32.mrf.mxu0 }
 0x464   : > { %v4248_v42 = vadd.f32 %v8185_v48, %v4247_v55 }
 0x465   : > { %v4249_v30 = vpop.f32.mrf.mxu0 }
 0x469   : > { %v4472_v20 = vpop.f32.mrf.mxu1 }
 0x46a   : > { %v8297_v54 = vadd.f32 %v4472_v20, %v4248_v42 }
 0x46b   : > { %v4474_v23 = vpop.f32.mrf.mxu1  ;;  %v4252_v5 = vpop.f32.mrf.mxu0 }
 0x46c   : > { %v4253_v19 = vadd.f32 %v8185_v48, %v4252_v5 }
 0x46d   : > { %v4254_v28 = vpop.f32.mrf.mxu0 }
 0x471   : > { %v4477_v27 = vpop.f32.mrf.mxu1 }
 0x472   : > { %v8300_v62 = vadd.f32 %v4477_v27, %v4253_v19 }
 0x473   : > { %v4479_v4 = vpop.f32.mrf.mxu1  ;;  %v4257_v25 = vpop.f32.mrf.mxu0 }
 0x474   : > { %v4258_v59 = vadd.f32 %v8185_v48, %v4257_v25 }
 0x475   : > { %v4259_v3 = vpop.f32.mrf.mxu0 }
 0x479   : > { %v4482_v53 = vpop.f32.mrf.mxu1 }
 0x47a   : > { %v8303_v49 = vadd.f32 %v4482_v53, %v4258_v59 }
 0x47b   : > { %v4484_v9 = vpop.f32.mrf.mxu1  ;;  %v4262_v17 = vpop.f32.mrf.mxu0 }
 0x47c   : > { %v4263_v1 = vadd.f32 %v8185_v48, %v4262_v17 }
 0x47d   : > { %v4264_v33 = vpop.f32.mrf.mxu0 }
 0x481   : > { %v4487_v61 = vpop.f32.mrf.mxu1 }
 0x482   : > { %v8306_v2 = vadd.f32 %v4487_v61, %v4263_v1 }
 0x483   : > { %v4489_v13 = vpop.f32.mrf.mxu1  ;;  %v4267_v18 = vpop.f32.mrf.mxu0 }
 0x484   : > { %v4268_v31 = vadd.f32 %v8185_v48, %v4267_v18 }
 0x485   : > { %v4269_v36 = vpop.f32.mrf.mxu0 }
 0x489   : > { %v4492_v12 = vpop.f32.mrf.mxu1 }
 0x48a   : > { %v8309_v26 = vadd.f32 %v4492_v12, %v4268_v31 }
 0x48b   : > { %v4494_v21 = vpop.f32.mrf.mxu1  ;;  %v4272_v56 = vpop.f32.mrf.mxu0 }
 0x48c   : > { %v4273_v57 = vadd.f32 %v8185_v48, %v4272_v56 }
 0x48d   : > { %v4274_v22 = vpop.f32.mrf.mxu0 }
 0x491   : > { %v4497_v14 = vpop.f32.mrf.mxu1 }
 0x492   : > { %v8312_v46 = vadd.f32 %v4497_v14, %v4273_v57 }
 0x493   : > { %v4499_v37 = vpop.f32.mrf.mxu1  ;;  %v4277_v15 = vpop.f32.mrf.mxu0 }
 0x494   : > { %v4278_v38 = vadd.f32 %v8185_v48, %v4277_v15 }
 0x495   : > { %v4279_v41 = vpop.f32.mrf.mxu0 }
 0x499   : > { %v4502_v34 = vpop.f32.mrf.mxu1 }
 0x49a   : > { %v8315_v16 = vadd.f32 %v4502_v34, %v4278_v38 }
 0x49b   : > { %v4504_v58 = vpop.f32.mrf.mxu1  ;;  %v4282_v60 = vpop.f32.mrf.mxu0 }
 0x49c   : > { %v4283_v0 = vadd.f32 %v8185_v48, %v4282_v60 }
 0x49d   : > { %v4284_v39 = vpop.f32.mrf.mxu0 }
 0x49e   : > { %v4771_v39 = vld [vmem:[%s5883_s30] sm:$0xff] }
 0x4a1   : > { %v4507_v7 = vpop.f32.mrf.mxu1 }
 0x4a2   : > { %v8318_v20 = vadd.f32 %v4507_v7, %v4283_v0  ;;  %v4772_v7 = vld [vmem:[%s5883_s30 + $0x8] sm:$0xff] }
 0x4a3   : > { %v4509_v55 = vpop.f32.mrf.mxu1  ;;  %v4287_v42 = vpop.f32.mrf.mxu0  ;;  %v4788_v0 = vld [vmem:[%s5883_s30 + $0x88] sm:$0xff] }
 0x4a4   : > { %v4288_v23 = vadd.f32 %v8185_v48, %v4287_v42 }
 0x4a5   : > { %v4289_v5 = vpop.f32.mrf.mxu0 }
 0x4a6   : > { %v4790_v5 = vld [vmem:[%s5883_s30 + $0x98] sm:$0xff] }
 0x4a9   : > { %v4512_v30 = vpop.f32.mrf.mxu1 }
 0x4aa   : > { %v8321_v19 = vadd.f32 %v4512_v30, %v4288_v23  ;;  %v4787_v30 = vld [vmem:[%s5883_s30 + $0x80] sm:$0xff]  ;;  %v4774_v23 = vld [vmem:[%s5883_s30 + $0x18] sm:$0xff] }
 0x4ab   : > { %v4514_v27 = vpop.f32.mrf.mxu1  ;;  %v4292_v28 = vpop.f32.mrf.mxu0 }
 0x4ac   : > { %v4293_v25 = vadd.f32 %v8185_v48, %v4292_v28  ;;  %v4773_v27 = vld [vmem:[%s5883_s30 + $0x10] sm:$0xff] }
 0x4ad   : > { %v4294_v53 = vpop.f32.mrf.mxu0  ;;  %v4789_v28 = vld [vmem:[%s5883_s30 + $0x90] sm:$0xff] }
 0x4ae   : > { %v4804_v53 = vsel %vm279_vm0, %v4772_v7, 0.0  ;;  %v4821_v7 = vsel %vm279_vm0, %v4789_v28, 0.0 }
 0x4b1   : > { %v4517_v4 = vpop.f32.mrf.mxu1 }
 0x4b2   : > { %v8324_v3 = vadd.f32 %v4517_v4, %v4293_v25  ;;  %v4776_v4 = vld [vmem:[%s5883_s30 + $0x28] sm:$0xff] }
 0x4b3   : > { %v4519_v59 = vpop.f32.mrf.mxu1  ;;  %v4297_v9 = vpop.f32.mrf.mxu0 }
 0x4b4   : > { %v4298_v61 = vadd.f32 %v8185_v48, %v4297_v9  ;;  %v4820_v9 = vsel %vm279_vm0, %v4788_v0, 0.0 }
 0x4b5   : > { %v4299_v1 = vpop.f32.mrf.mxu0 }
 0x4b9   : > { %v4522_v17 = vpop.f32.mrf.mxu1 }
 0x4ba   : > { %v8327_v13 = vadd.f32 %v4522_v17, %v4298_v61  ;;  %v4803_v17 = vsel %vm279_vm0, %v4771_v39, 0.0  ;;  %v4792_v61 = vld [vmem:[%s5883_s30 + $0xa8] sm:$0xff] }
 0x4bb   : > { %v4524_v33 = vpop.f32.mrf.mxu1  ;;  %v4302_v18 = vpop.f32.mrf.mxu0 }
 0x4bc   : > { %v4303_v31 = vadd.f32 %v8185_v48, %v4302_v18  ;;  %v4819_v18 = vsel %vm279_vm0, %v4787_v30, 0.0  ;;  %v4777_v30 = vld [vmem:[%s5883_s30 + $0x30] sm:$0xff] }
 0x4bd   : > { %v4304_v36 = vpop.f32.mrf.mxu0 }
 0x4be   : > { %v4791_v36 = vld [vmem:[%s5883_s30 + $0xa0] sm:$0xff] }
 0x4c1   : > { %v4527_v12 = vpop.f32.mrf.mxu1 }
 0x4c2   : > { %v8330_v56 = vadd.f32 %v4527_v12, %v4303_v31  ;;  %v4806_v12 = vsel %vm279_vm0, %v4774_v23, 0.0  ;;  %v4775_v31 = vld [vmem:[%s5883_s30 + $0x20] sm:$0xff] }
 0x4c3   : > { %v4529_v21 = vpop.f32.mrf.mxu1  ;;  %v8332_v14 = vpop.f32.mrf.mxu0 }
 0x4c4   : > { %v4778_v21 = vld [vmem:[%s5883_s30 + $0x38] sm:$0xff] }
 0x4c5   : > { %v4309_v22 = vpop.f32.mrf.mxu0  ;;  %v4810_v28 = vsel %vm279_vm0, %v4778_v21, 0.0 }
 0x4c9   : > { %v8334_v57 = vpop.f32.mrf.mxu1 }
 0x4cb   : > { %v4534_v37 = vpop.f32.mrf.mxu1  ;;  %v8336_v15 = vpop.f32.mrf.mxu0 }
 0x4cd   : > { %v4314_v38 = vpop.f32.mrf.mxu0 }
 0x4ce   : > { %v4822_v38 = vsel %vm279_vm0, %v4790_v5, 0.0  ;;  %v4807_v5 = vsel %vm279_vm0, %v4775_v31, 0.0 }
 0x4d1   : > { %v8338_v34 = vpop.f32.mrf.mxu1 }
 0x4d2   : > { %8545 = vst [vmem:[#allocation4_spill] sm:$0xff] %v8338_v34 }
 0x4d3   : > { %v4539_v41 = vpop.f32.mrf.mxu1  ;;  %v8340_v58 = vpop.f32.mrf.mxu0 }
 0x4d4   : > { %v4805_v41 = vsel %vm279_vm0, %v4773_v27, 0.0  ;;  %v4823_v27 = vsel %vm279_vm0, %v4791_v36, 0.0 }
 0x4d5   : > { %v4319_v55 = vpop.f32.mrf.mxu0 }
 0x4d7   : > { %v5431_v25 = vpop.f32.mrf.mxu0 }
 0x4d8   : > { %v4618_v1 = vadd.f32 %v5431_v25, %v8197_v11  ;;  %v4808_v11 = vsel %vm279_vm0, %v4776_v4, 0.0 }
 0x4d9   : > { %v8342_v60 = vpop.f32.mrf.mxu1  ;;  %v4612_v22 = vpop.f32.mrf.mxu0 }
 0x4da   : > { %v4613_v39 = vadd.f32 %v4612_v22, %v8190_v6 }
 0x4db   : > { %v4544_v42 = vpop.f32.mrf.mxu1  ;;  %v5434_v23 = vpop.f32.mrf.mxu0 }
 0x4dc   : > { %v4794_v42 = vld [vmem:[%s5883_s30 + $0xb8] sm:$0xff]  ;;  %v4628_v6 = vadd.f32 %v5434_v23, %v8211_v51 }
 0x4dd   : > { %v5455_v59 = vpop.f32.mrf.mxu1  ;;  %v4826_v22 = vsel %vm279_vm0, %v4794_v42, 0.0 }
 0x4de   : > { %v4698_v33 = vadd.f32 %v5455_v59, %v8297_v54  ;;  %v4836_v54 = vadd.f32 %v4804_v53, %v4618_v1  ;;  %v4824_v59 = vsel %vm279_vm0, %v4792_v61, 0.0  ;;  %v4835_v53 = vadd.f32 %v4803_v17, %v4613_v39  ;;  %v4622_v1 = vpop.f32.mrf.mxu0 }
 0x4df   : > { %v4692_v37 = vpop.f32.mrf.mxu1  ;;  %v4809_v61 = vsel %vm279_vm0, %v4777_v30, 0.0  ;;  %v4623_v21 = vadd.f32 %v4622_v1, %v8204_v24 }
 0x4e0   : > { %v4852_v0 = vadd.f32 %v4820_v9, %v4698_v33  ;;  %v4693_v55 = vadd.f32 %v4692_v37, %v8294_v47  ;;  %v5234_v34 = vmul.f32 -1.442695, %v4836_v54  ;;  %v5233_v31 = vmul.f32 -1.442695, %v4835_v53  ;;  %v5437_v51 = vpop.f32.mrf.mxu0 }
 0x4e1   : > { %v5458_v25 = vpop.f32.mrf.mxu1  ;;  %v4838_v37 = vadd.f32 %v4806_v12, %v4628_v6 }
 0x4e2   : > { %v5250_v4 = vmul.f32 -1.442695, %v4852_v0  ;;  %v4851_v9 = vadd.f32 %v4819_v18, %v4693_v55  ;;  %v4708_v47 = vadd.f32 %v5458_v25, %v8303_v49  ;;  %5529 = vpow2.f32 %v5234_v34  ;;  %v4793_v55 = vld [vmem:[%s5883_s30 + $0xb0] sm:$0xff]  ;;  %v4632_v23 = vpop.f32.mrf.mxu0 }
 0x4e3   : > { %v4702_v33 = vpop.f32.mrf.mxu1  ;;  %v4837_v49 = vadd.f32 %v4805_v41, %v4623_v21  ;;  %v4638_v0 = vadd.f32 %v5437_v51, %v8225_v52  ;;  %v5236_v34 = vmul.f32 -1.442695, %v4838_v37  ;;  %v4780_v37 = vld [vmem:[%s5883_s30 + $0x48] sm:$0xff] }
 0x4e4   : > { %v5249_v36 = vmul.f32 -1.442695, %v4851_v9  ;;  %5531 = vpow2.f32 %v5250_v4  ;;  %v4854_v17 = vadd.f32 %v4822_v38, %v4708_v47  ;;  %v4703_v18 = vadd.f32 %v4702_v33, %v8300_v62  ;;  %v5440_v53 = vpop.f32.mrf.mxu0 }
 0x4e5   : > { %v5461_v54 = vpop.f32.mrf.mxu1  ;;  %5533 = vpow2.f32 %v5233_v31  ;;  %v5235_v25 = vmul.f32 -1.442695, %v4837_v49  ;;  %v4840_v12 = vadd.f32 %v4808_v11, %v4638_v0  ;;  %v4633_v62 = vadd.f32 %v4632_v23, %v8218_v50  ;;  %v4795_v49 = vld [vmem:[%s5883_s30 + $0xc0] sm:$0xff] }
 0x4e6   : > { %v4718_v39 = vadd.f32 %v5461_v54, %v8309_v26  ;;  %5535 = vpow2.f32 %v5249_v36  ;;  %v5252_v42 = vmul.f32 -1.442695, %v4854_v17  ;;  %v4853_v30 = vadd.f32 %v4821_v7, %v4703_v18  ;;  %v4642_v50 = vpop.f32.mrf.mxu0  ;;  %v4796_v17 = vld [vmem:[%s5883_s30 + $0xc8] sm:$0xff]  ;;  %v4779_v18 = vld [vmem:[%s5883_s30 + $0x40] sm:$0xff] }
 0x4e7   : > { %v4712_v24 = vpop.f32.mrf.mxu1  ;;  %5537 = vpow2.f32 %v5236_v34  ;;  %v4825_v26 = vsel %vm279_vm0, %v4793_v55, 0.0  ;;  %v5238_v9 = vmul.f32 -1.442695, %v4840_v12  ;;  %v4839_v47 = vadd.f32 %v4807_v5, %v4633_v62  ;;  %v4781_v55 = vld [vmem:[%s5883_s30 + $0x50] sm:$0xff] }
 0x4e8   : > { %v4856_v38 = vadd.f32 %v4824_v59, %v4718_v39  ;;  %v5251_v4 = vmul.f32 -1.442695, %v4853_v30  ;;  %v4713_v41 = vadd.f32 %v4712_v24, %v8306_v2  ;;  %5539 = vpow2.f32 %v5252_v42  ;;  %v4798_v39 = vld [vmem:[%s5883_s30 + $0xd8] sm:$0xff]  ;;  %v4797_v24 = vld [vmem:[%s5883_s30 + $0xd0] sm:$0xff] }
 0x4e9   : > { %v5464_v52 = vpop.f32.mrf.mxu1  ;;  %5541 = vpow2.f32 %v5235_v25  ;;  %v4648_v1 = vadd.f32 %v5440_v53, %v8237_v10  ;;  %v5237_v2 = vmul.f32 -1.442695, %v4839_v47  ;;  %v4643_v33 = vadd.f32 %v4642_v50, %v8232_v45  ;;  %v5443_v10 = vpop.f32.mrf.mxu0 }
 0x4ea   : > { %v5254_v6 = vmul.f32 -1.442695, %v4856_v38  ;;  %v4855_v7 = vadd.f32 %v4823_v27, %v4713_v41  ;;  %v4728_v11 = vadd.f32 %v5464_v52, %v8315_v16  ;;  %5543 = vpow2.f32 %v5251_v4 }
 0x4eb   : > { %v4722_v59 = vpop.f32.mrf.mxu1  ;;  %5545 = vpow2.f32 %v5238_v9  ;;  %v4842_v27 = vadd.f32 %v4810_v28, %v4648_v1  ;;  %v4841_v16 = vadd.f32 %v4809_v61, %v4643_v33  ;;  %v4782_v28 = vld [vmem:[%s5883_s30 + $0x58] sm:$0xff]  ;;  %v4812_v61 = vsel %vm279_vm0, %v4780_v37, 0.0  ;;  %v4784_v9 = vld [vmem:[%s5883_s30 + $0x68] sm:$0xff] }
 0x4ec   : > { %v4723_v31 = vadd.f32 %v4722_v59, %v8312_v46  ;;  %v5253_v5 = vmul.f32 -1.442695, %v4855_v7  ;;  %v4858_v36 = vadd.f32 %v4826_v22, %v4728_v11  ;;  %5547 = vpow2.f32 %v5254_v6  ;;  %v8395_v46 = vpop.f32.mrf.mxu0  ;;  %v4800_v6 = vld [vmem:[%s5883_s30 + $0xe8] sm:$0xff]  ;;  %v4783_v59 = vld [vmem:[%s5883_s30 + $0x60] sm:$0xff] }
 0x4ed   : > { %v5467_v21 = vpop.f32.mrf.mxu1  ;;  %5549 = vpow2.f32 %v5237_v2  ;;  %v5240_v51 = vmul.f32 -1.442695, %v4842_v27  ;;  %v5239_v22 = vmul.f32 -1.442695, %v4841_v16  ;;  %v4828_v42 = vsel %vm279_vm0, %v4796_v17, 0.0  ;;  %v4799_v2 = vld [vmem:[%s5883_s30 + $0xe0] sm:$0xff] }
 0x4ee   : > { %v5256_v45 = vmul.f32 -1.442695, %v4858_v36  ;;  %5551 = vpow2.f32 %v5253_v5  ;;  %v4857_v0 = vadd.f32 %v4825_v26, %v4723_v31  ;;  %v8406_v30 = vsel %vm279_vm0, %v4779_v18, 0.0  ;;  %v8408_v23 = vpop.f32.mrf.mxu0  ;;  %v4786_v27 = vld [vmem:[%s5883_s30 + $0x78] sm:$0xff] }
 0x4ef   : > { %v8397_v54 = vpop.f32.mrf.mxu1  ;;  %v5530_v34 = vpop.eup %5529  ;;  %5553 = vpow2.f32 %v5240_v51  ;;  %v8412_v38 = vsel %vm279_vm0, %v4795_v49, 0.0  ;;  %v8415_v62 = vsel %vm279_vm0, %v4782_v28, 0.0  ;;  %v8420_v52 = vsel %vm279_vm0, %v4798_v39, 0.0  ;;  %v4802_v36 = vld [vmem:[%s5883_s30 + $0xf8] sm:$0xff] }
 0x4f0   : > { %v4964_v12 = vadd.f32 1.0, %v5530_v34  ;;  %5555 = vpow2.f32 %v5256_v45  ;;  %v8423_v26 = vsel %vm279_vm0, %v4781_v55, 0.0  ;;  %v5255_v1 = vmul.f32 -1.442695, %v4857_v0  ;;  %v8427_v11 = vpop.f32.mrf.mxu0 }
 0x4f1   : > { %v5532_v25 = vpop.eup %5531  ;;  %5557 = vpow2.f32 %v5239_v22  ;;  %v8417_v53 = vpop.f32.mrf.mxu1  ;;  %v8430_v50 = vsel %vm279_vm0, %v4797_v24, 0.0  ;;  %v4308_v33 = vadd.f32 %v8185_v48, %v8332_v14  ;;  %v4658_v5 = vadd.f32 %v5443_v10, %v8259_v44 }
 0x4f2   : > { %v5534_v4 = vpop.eup %5533  ;;  %v4980_v41 = vadd.f32 1.0, %v5532_v25  ;;  %5559 = vrcp.f32 %v4964_v12  ;;  %v4738_v37 = vadd.f32 %v5467_v21, %v8321_v19  ;;  %v8441_v17 = vsel %vm279_vm0, %v4784_v9, 0.0  ;;  %v5449_v19 = vpop.f32.mrf.mxu0 }
 0x4f3   : > { %v5536_v47 = vpop.eup %5535  ;;  %v4963_v7 = vadd.f32 1.0, %v5534_v4  ;;  %v8444_v18 = vsel %vm279_vm0, %v4800_v6, 0.0  ;;  %v4742_v48 = vpop.f32.mrf.mxu1  ;;  %v8447_v14 = vsel %vm279_vm0, %v4783_v59, 0.0  ;;  %v8450_v44 = vsel %vm279_vm0, %v4799_v2, 0.0 }
 0x4f4   : > { %5561 = vrcp.f32 %v4980_v41  ;;  %v4979_v31 = vadd.f32 1.0, %v5536_v47  ;;  %v5538_v16 = vpop.eup %5537  ;;  %v8453_v21 = vsel %vm279_vm0, %v4786_v27, 0.0  ;;  %v8456_v28 = vsel %vm279_vm0, %v4802_v36, 0.0  ;;  %v5657_v41 = vld [vmem:[%s8542_s6] ss:$0 sm:$0xff] }
 0x4f5   : > { %5563 = vrcp.f32 %v4963_v7  ;;  %v5540_v51 = vpop.eup %5539  ;;  %v4966_v45 = vadd.f32 1.0, %v5538_v16  ;;  %v4533_v0 = vadd.f32 %v8334_v57, %v4308_v33  ;;  %v4844_v55 = vadd.f32 %v4812_v61, %v4658_v5  ;;  %v5473_v6 = vpop.f32.mrf.mxu1 }
 0x4f6   : > { %5565 = vrcp.f32 %v4979_v31  ;;  %v5542_v10 = vpop.eup %5541  ;;  %v4982_v49 = vadd.f32 1.0, %v5540_v51  ;;  %v4860_v25 = vadd.f32 %v4828_v42, %v4738_v37  ;;  %v4653_v12 = vadd.f32 %v8395_v46, %v8248_v32  ;;  %v4672_v46 = vpop.f32.mrf.mxu0 }
 0x4f7   : > { %5567 = vpow2.f32 %v5255_v1  ;;  %v5544_v22 = vpop.eup %5543  ;;  %v4965_v39 = vadd.f32 1.0, %v5542_v10  ;;  %v8465_v9 = vadd.f32 %v5657_v41, %v8336_v15  ;;  %v4733_v61 = vadd.f32 %v8397_v54, %v8318_v20 }
 0x4f8   : > { %5569 = vrcp.f32 %v4966_v45  ;;  %v5546_v34 = vpop.eup %5545  ;;  %v4981_v24 = vadd.f32 1.0, %v5544_v22  ;;  %v4318_v42 = vadd.f32 %v5657_v41, %v8340_v58  ;;  %v4668_v32 = vadd.f32 %v8408_v23, %v8279_v63  ;;  %v4752_v23 = vpop.f32.mrf.mxu1 }
 0x4f9   : > { %5571 = vrcp.f32 %v4982_v49  ;;  %v5548_v4 = vpop.eup %5547  ;;  %v4968_v57 = vadd.f32 1.0, %v5546_v34  ;;  %v5242_v15 = vmul.f32 -1.442695, %v4844_v55  ;;  %v4748_v2 = vadd.f32 %v8417_v53, %v8327_v13  ;;  %v5452_v37 = vpop.f32.mrf.mxu0 }
 0x4fa   : > { %5573 = vrcp.f32 %v4965_v39  ;;  %v5550_v47 = vpop.eup %5549  ;;  %v4984_v7 = vadd.f32 1.0, %v5548_v4  ;;  %v5258_v54 = vmul.f32 -1.442695, %v4860_v25  ;;  %v4843_v31 = vadd.f32 %v8406_v30, %v4653_v12  ;;  %v5476_v22 = vpop.f32.mrf.mxu1 }
 0x4fb   : > { %5575 = vrcp.f32 %v4981_v24  ;;  %v5552_v1 = vpop.eup %5551  ;;  %v4967_v59 = vadd.f32 1.0, %v5550_v47  ;;  %v4859_v27 = vadd.f32 %v8412_v38, %v4733_v61  ;;  %v4663_v63 = vadd.f32 %v8427_v11, %v8270_v29  ;;  %v4785_v24 = vld [vmem:[%s5883_s30 + $0x70] sm:$0xff] }
 0x4fc   : > { %5577 = vrcp.f32 %v4968_v57  ;;  %v5554_v33 = vpop.eup %5553  ;;  %v4983_v20 = vadd.f32 1.0, %v5552_v1  ;;  %v4846_v13 = vadd.f32 %v8415_v62, %v4668_v32  ;;  %v4743_v53 = vadd.f32 %v4742_v48, %v8324_v3 }
 0x4fd   : > { %5579 = vrcp.f32 %v4984_v7  ;;  %v5556_v58 = vpop.eup %5555  ;;  %v4970_v5 = vadd.f32 1.0, %v5554_v33  ;;  %v4862_v45 = vadd.f32 %v8420_v52, %v4748_v2  ;;  %v4678_v38 = vadd.f32 %v5449_v19, %v8285_v43  ;;  %v4762_v7 = vpop.f32.mrf.mxu1 }
 0x4fe   : > { %5581 = vrcp.f32 %v4967_v59  ;;  %v5558_v36 = vpop.eup %5557  ;;  %v4986_v16 = vadd.f32 1.0, %v5556_v58  ;;  %v4543_v29 = vadd.f32 %v8342_v60, %v4318_v42  ;;  %v5241_v11 = vmul.f32 -1.442695, %v4843_v31  ;;  %v4801_v59 = vld [vmem:[%s5883_s30 + $0xf0] sm:$0xff] }
 0x4ff   : > { %5583 = vrcp.f32 %v4983_v20  ;;  %v5560_v30 = vpop.eup %5559  ;;  %v4969_v51 = vadd.f32 1.0, %v5558_v36  ;;  %v4758_v49 = vadd.f32 %v5473_v6, %v4533_v0  ;;  %v5257_v3 = vmul.f32 -1.442695, %v4859_v27  ;;  %v4682_v0 = vpop.f32.mrf.mxu0 }
 0x500   : > { %5585 = vrcp.f32 %v4970_v5  ;;  %5060 = vst [vmem:[%s5888_s10 + $0x8] sm:$0xff] %v5560_v30  ;;  %v4845_v48 = vadd.f32 %v8423_v26, %v4663_v63  ;;  %v4673_v52 = vadd.f32 %v4672_v46, %v8282_v40  ;;  %v5244_v43 = vmul.f32 -1.442695, %v4846_v13 }
 0x501   : > { %v5562_v10 = vpop.eup %5561  ;;  %5587 = vrcp.f32 %v4986_v16  ;;  %v4861_v60 = vadd.f32 %v8430_v50, %v4743_v53  ;;  %v4753_v19 = vadd.f32 %v4752_v23, %v8330_v56  ;;  %v5260_v34 = vmul.f32 -1.442695, %v4862_v45 }
 0x502   : > { %v5564_v62 = vpop.eup %5563  ;;  %5076 = vst [vmem:[%s5888_s10 + $0x88] sm:$0xff] %v5562_v10  ;;  %5589 = vrcp.f32 %v4969_v51  ;;  %v4848_v26 = vadd.f32 %v8441_v17, %v4678_v38  ;;  %v4688_v40 = vadd.f32 %v5452_v37, %v8291_v35  ;;  %v4864_v50 = vadd.f32 %v8444_v18, %v4758_v49 }
 0x503   : > { %v5566_v39 = vpop.eup %5565  ;;  %5059 = vst [vmem:[%s5888_s10] sm:$0xff] %v5564_v62  ;;  %5591 = vpow2.f32 %v5242_v15  ;;  %v4768_v4 = vadd.f32 %v5476_v22, %v4543_v29  ;;  %v5243_v56 = vmul.f32 -1.442695, %v4845_v48  ;;  %v4847_v57 = vadd.f32 %v8447_v14, %v4673_v52 }
 0x504   : > { %v5568_v55 = vpop.eup %5567  ;;  %5075 = vst [vmem:[%s5888_s10 + $0x80] sm:$0xff] %v5566_v39  ;;  %5593 = vpow2.f32 %v5258_v54  ;;  %v4683_v61 = vadd.f32 %v4682_v0, %v8288_v8  ;;  %v5259_v35 = vmul.f32 -1.442695, %v4861_v60  ;;  %v4863_v6 = vadd.f32 %v8450_v44, %v4753_v19  ;;  %v8546_v8 = vld [vmem:[#allocation4_spill] sm:$0xff] }
 0x505   : > { %v5570_v25 = vpop.eup %5569  ;;  %v4985_v12 = vadd.f32 1.0, %v5568_v55  ;;  %5595 = vpow2.f32 %v5241_v11  ;;  %v4817_v18 = vsel %vm279_vm0, %v4785_v24, 0.0  ;;  %v5246_v42 = vmul.f32 -1.442695, %v4848_v26 }
 0x506   : > { %v5572_v41 = vpop.eup %5571  ;;  %5062 = vst [vmem:[%s5888_s10 + $0x18] sm:$0xff] %v5570_v25  ;;  %5597 = vpow2.f32 %v5257_v3  ;;  %v4850_v14 = vadd.f32 %v8453_v21, %v4688_v40  ;;  %v4538_v46 = vadd.f32 %v8546_v8, %v8465_v9  ;;  %v5262_v1 = vmul.f32 -1.442695, %v4864_v50 }
 0x507   : > { %v5574_v17 = vpop.eup %5573  ;;  %5078 = vst [vmem:[%s5888_s10 + $0x98] sm:$0xff] %v5572_v41  ;;  %5599 = vrcp.f32 %v4985_v12  ;;  %v4866_v44 = vadd.f32 %v8456_v28, %v4768_v4  ;;  %v5245_v2 = vmul.f32 -1.442695, %v4847_v57  ;;  %v4849_v33 = vadd.f32 %v4817_v18, %v4683_v61 }
 0x508   : > { %v5576_v47 = vpop.eup %5575  ;;  %5061 = vst [vmem:[%s5888_s10 + $0x10] sm:$0xff] %v5574_v17  ;;  %5601 = vpow2.f32 %v5244_v43  ;;  %v5261_v20 = vmul.f32 -1.442695, %v4863_v6  ;;  %v4763_v9 = vadd.f32 %v4762_v7, %v4538_v46  ;;  %v5248_v31 = vmul.f32 -1.442695, %v4850_v14 }
 0x509   : > { %v5578_v32 = vpop.eup %5577  ;;  %5077 = vst [vmem:[%s5888_s10 + $0x90] sm:$0xff] %v5576_v47  ;;  %5603 = vpow2.f32 %v5260_v34  ;;  %v4833_v28 = vsel %vm279_vm0, %v4801_v59, 0.0  ;;  %v5264_v5 = vmul.f32 -1.442695, %v4866_v44  ;;  %v5247_v63 = vmul.f32 -1.442695, %v4849_v33 }
 0x50a   : > { %v5580_v15 = vpop.eup %5579  ;;  %5064 = vst [vmem:[%s5888_s10 + $0x28] sm:$0xff] %v5578_v32  ;;  %5605 = vpow2.f32 %v5243_v56  ;;  %v4865_v36 = vadd.f32 %v4833_v28, %v4763_v9 }
 0x50b   : > { %v5582_v21 = vpop.eup %5581  ;;  %5080 = vst [vmem:[%s5888_s10 + $0xa8] sm:$0xff] %v5580_v15  ;;  %5607 = vpow2.f32 %v5259_v35 }
 0x50c   : > { %v5584_v54 = vpop.eup %5583  ;;  %5063 = vst [vmem:[%s5888_s10 + $0x20] sm:$0xff] %v5582_v21  ;;  %5609 = vpow2.f32 %v5246_v42  ;;  %v5263_v38 = vmul.f32 -1.442695, %v4865_v36 }
 0x50d   : > { %v5586_v58 = vpop.eup %5585  ;;  %5079 = vst [vmem:[%s5888_s10 + $0xa0] sm:$0xff] %v5584_v54  ;;  %5611 = vpow2.f32 %v5262_v1 }
 0x50e   : > { %v5588_v27 = vpop.eup %5587  ;;  %5066 = vst [vmem:[%s5888_s10 + $0x38] sm:$0xff] %v5586_v58  ;;  %5613 = vpow2.f32 %v5245_v2 }
 0x50f   : > { %v5590_v23 = vpop.eup %5589  ;;  %5082 = vst [vmem:[%s5888_s10 + $0xb8] sm:$0xff] %v5588_v27  ;;  %5615 = vpow2.f32 %v5261_v20 }
 0x510   : > { %v5592_v16 = vpop.eup %5591  ;;  %5065 = vst [vmem:[%s5888_s10 + $0x30] sm:$0xff] %v5590_v23  ;;  %5617 = vpow2.f32 %v5248_v31 }
 0x511   : > { %v5594_v13 = vpop.eup %5593  ;;  %v4972_v53 = vadd.f32 1.0, %v5592_v16  ;;  %5619 = vpow2.f32 %v5264_v5 }
 0x512   : > { %v5596_v37 = vpop.eup %5595  ;;  %v4988_v30 = vadd.f32 1.0, %v5594_v13  ;;  %5621 = vpow2.f32 %v5247_v63 }
 0x513   : > { %v5598_v51 = vpop.eup %5597  ;;  %5623 = vrcp.f32 %v4972_v53  ;;  %v4971_v45 = vadd.f32 1.0, %v5596_v37 }
 0x514   : > { %v5600_v10 = vpop.eup %5599  ;;  %5625 = vrcp.f32 %v4988_v30  ;;  %v4987_v29 = vadd.f32 1.0, %v5598_v51 }
 0x515   : > { %v5602_v11 = vpop.eup %5601  ;;  %5081 = vst [vmem:[%s5888_s10 + $0xb0] sm:$0xff] %v5600_v10  ;;  %5627 = vrcp.f32 %v4971_v45 }
 0x516   : > { %v5604_v49 = vpop.eup %5603  ;;  %5629 = vrcp.f32 %v4987_v29  ;;  %v4974_v62 = vadd.f32 1.0, %v5602_v11 }
 0x517   : > { %v5606_v3 = vpop.eup %5605  ;;  %v4990_v48 = vadd.f32 1.0, %v5604_v49  ;;  %5631 = vpow2.f32 %v5263_v38 }
 0x518   : > { %v5608_v52 = vpop.eup %5607  ;;  %5633 = vrcp.f32 %v4974_v62  ;;  %v4973_v22 = vadd.f32 1.0, %v5606_v3 }
 0x519   : > { %v5610_v39 = vpop.eup %5609  ;;  %5635 = vrcp.f32 %v4990_v48  ;;  %v4989_v43 = vadd.f32 1.0, %v5608_v52 }
 0x51a   : > { %v5612_v60 = vpop.eup %5611  ;;  %5637 = vrcp.f32 %v4973_v22  ;;  %v4976_v19 = vadd.f32 1.0, %v5610_v39 }
 0x51b   : > { %v5614_v0 = vpop.eup %5613  ;;  %5639 = vrcp.f32 %v4989_v43  ;;  %v4992_v55 = vadd.f32 1.0, %v5612_v60 }
 0x51c   : > { %v5616_v34 = vpop.eup %5615  ;;  %5641 = vrcp.f32 %v4976_v19  ;;  %v4975_v26 = vadd.f32 1.0, %v5614_v0 }
 0x51d   : > { %v5618_v40 = vpop.eup %5617  ;;  %5643 = vrcp.f32 %v4992_v55  ;;  %v4991_v24 = vadd.f32 1.0, %v5616_v34 }
 0x51e   : > { %v5620_v25 = vpop.eup %5619  ;;  %5645 = vrcp.f32 %v4975_v26  ;;  %v4978_v12 = vadd.f32 1.0, %v5618_v40 }
 0x51f   : > { %v5622_v50 = vpop.eup %5621  ;;  %5647 = vrcp.f32 %v4991_v24  ;;  %v4994_v4 = vadd.f32 1.0, %v5620_v25 }
 0x520   : > { %v5624_v41 = vpop.eup %5623  ;;  %5649 = vrcp.f32 %v4978_v12  ;;  %v4977_v56 = vadd.f32 1.0, %v5622_v50 }
 0x521   : > { %v5626_v57 = vpop.eup %5625  ;;  %5068 = vst [vmem:[%s5888_s10 + $0x48] sm:$0xff] %v5624_v41  ;;  %5651 = vrcp.f32 %v4994_v4 }
 0x522   : > { %v5628_v61 = vpop.eup %5627  ;;  %5084 = vst [vmem:[%s5888_s10 + $0xc8] sm:$0xff] %v5626_v57  ;;  %5653 = vrcp.f32 %v4977_v56 }
 0x523   : > { %v5630_v17 = vpop.eup %5629  ;;  %5067 = vst [vmem:[%s5888_s10 + $0x40] sm:$0xff] %v5628_v61 }
 0x524   : > { %v5632_v35 = vpop.eup %5631  ;;  %5083 = vst [vmem:[%s5888_s10 + $0xc0] sm:$0xff] %v5630_v17 }
 0x525   : > { %v5634_v6 = vpop.eup %5633  ;;  %v4993_v18 = vadd.f32 1.0, %v5632_v35 }
 0x526   : > { %v5636_v47 = vpop.eup %5635  ;;  %5070 = vst [vmem:[%s5888_s10 + $0x58] sm:$0xff] %v5634_v6 }
 0x527   : > { %v5638_v42 = vpop.eup %5637  ;;  %5086 = vst [vmem:[%s5888_s10 + $0xd8] sm:$0xff] %v5636_v47  ;;  %5655 = vrcp.f32 %v4993_v18 }
 0x528   : > { %v5640_v14 = vpop.eup %5639  ;;  %5069 = vst [vmem:[%s5888_s10 + $0x50] sm:$0xff] %v5638_v42 }
 0x529   : > { %v5642_v7 = vpop.eup %5641  ;;  %5085 = vst [vmem:[%s5888_s10 + $0xd0] sm:$0xff] %v5640_v14 }
 0x52a   : > { %v5644_v32 = vpop.eup %5643  ;;  %5072 = vst [vmem:[%s5888_s10 + $0x68] sm:$0xff] %v5642_v7 }
 0x52b   : > { %v5646_v8 = vpop.eup %5645  ;;  %5088 = vst [vmem:[%s5888_s10 + $0xe8] sm:$0xff] %v5644_v32 }
 0x52c   : > { %v5648_v46 = vpop.eup %5647  ;;  %5071 = vst [vmem:[%s5888_s10 + $0x60] sm:$0xff] %v5646_v8 }
 0x52d   : > { %v5650_v1 = vpop.eup %5649  ;;  %5087 = vst [vmem:[%s5888_s10 + $0xe0] sm:$0xff] %v5648_v46 }
 0x52e   : > { %v5652_v44 = vpop.eup %5651  ;;  %5074 = vst [vmem:[%s5888_s10 + $0x78] sm:$0xff] %v5650_v1 }
 0x52f   : > { %v5654_v59 = vpop.eup %5653  ;;  %5090 = vst [vmem:[%s5888_s10 + $0xf8] sm:$0xff] %v5652_v44 }
 0x530   : > { %5073 = vst [vmem:[%s5888_s10 + $0x70] sm:$0xff] %v5654_v59 }
 0x534   : > { %v5656_v15 = vpop.eup %5655 }
 0x535   : > { %5089 = vst [vmem:[%s5888_s10 + $0xf0] sm:$0xff] %v5656_v15 }
 0x536 PF: > { %s17_s24 = sadd.s32 1, %s5668_s24  }
 0x537   : > { %p14_p5 = scmp.ge.s32.totalorder %s17_s24, 4  }
 0x539   :  { %16 = sbr.rel (!%p14_p5) target bundleno = 1 (0x1), region = 103 }

</bundles_post_ra>
